<compile_context>
chip_gen: v5e
topology: v5e:2x2
jax: 0.10.0
libtpu: 0.0.40
codegen_flags: <defaults>
</compile_context>

<pallas_src>
import jax
import jax.numpy as jnp
from jax import lax
from jax.experimental import pallas as pl
from jax.experimental.pallas import tpu as pltpu

# ---------------------------------------------------------------------------
# Shapes / packing constants (LeNet on 32x32x3 inputs).
# ---------------------------------------------------------------------------
K = 5                        # conv kernel size
H0 = W0 = 32                 # input spatial size
C0, CP0 = 3, 8               # conv1 in-channels  (padded to 8 lanes / pixel)
C1, CP1 = 6, 8               # conv1 out-channels (padded to 8)
H1 = W1 = H0 - K + 1         # 28
HP1 = WP1 = H1 // 2          # 14
P1_COLS = 128                # pooled-1 packed width (14*8 = 112 -> 128, zero pad)
C2, CP2 = 16, 16             # conv2 out-channels
H2 = W2 = HP1 - K + 1        # 10
HP2 = WP2 = H2 // 2          # 5
P2_COLS = 128                # pooled-2 packed width (5*16 = 80 -> 128, zero pad)
FCP = 128                    # fc lane padding (120 / 84 / 10 -> 128)

X_COLS = W0 * CP0            # 256
Y1_COLS = W1 * CP1           # 224
Y2_COLS = W2 * CP2           # 160

B_BLK = 2                    # images per grid step (Python-unrolled in kernel)


# ---------------------------------------------------------------------------
# The fused Pallas kernel (one grid step == B_BLK images).
# ---------------------------------------------------------------------------
def _lenet_kernel(x_ref,
                  cw1_ref, cb1_ref, sw1_ref, sh1_ref,
                  cw2_ref, cb2_ref, sw2_ref, sh2_ref,
                  fw1_ref, fb1_ref, fw2_ref, fb2_ref, fw3_ref, fb3_ref,
                  out_ref, p1_ref, p2_ref):
    f32 = jnp.float32

    def dot(a, b):
        return jnp.dot(a, b, preferred_element_type=f32)

    # Unrolled loop over the images of this block: the per-image chains are
    # independent, so the scheduler interleaves their tiny MXU ops.
    for b in range(B_BLK):
        xb = x_ref.at[b]            # (32, 256) view
        p1 = p1_ref.at[b]           # (14, 128) scratch view
        p2 = p2_ref.at[b]           # (5, 128)  scratch view
        ob = out_ref.at[b]          # (1, 128)  output view

        # ---- conv1 + bias + ReLU : packed output (28, 28*8) ----
        acc = dot(xb[pl.ds(0, H1), :], cw1_ref[0])
        for kh in range(1, K):
            acc = acc + dot(xb[pl.ds(kh, H1), :], cw1_ref[kh])
        y1 = jnp.maximum(acc + cb1_ref[...], 0.0)                      # (28, 224)

        # ---- 2x2 max pool -> (14, 128) [cols >= 112 are zero padding] ----
        zw = jnp.maximum(dot(y1, sw1_ref[0]), dot(y1, sw1_ref[1]))     # (28, 128)
        p1[...] = jnp.maximum(dot(sh1_ref[0], zw), dot(sh1_ref[1], zw))

        # ---- conv2 + bias + ReLU : packed output (10, 10*16) ----
        acc2 = dot(p1[pl.ds(0, H2), :], cw2_ref[0])
        for kh in range(1, K):
            acc2 = acc2 + dot(p1[pl.ds(kh, H2), :], cw2_ref[kh])
        y2 = jnp.maximum(acc2 + cb2_ref[...], 0.0)                     # (10, 160)

        # ---- 2x2 max pool -> (5, 128) [cols >= 80 are zero padding] ----
        zw2 = jnp.maximum(dot(y2, sw2_ref[0]), dot(y2, sw2_ref[1]))    # (10, 128)
        p2[...] = jnp.maximum(dot(sh2_ref[0], zw2), dot(sh2_ref[1], zw2))

        # ---- fc1 (+ReLU) -> fc2 (+ReLU) -> fc3, all lane-padded to 128 ----
        h = fb1_ref[...]                                               # (1, 128)
        for r in range(HP2):
            h = h + dot(p2[pl.ds(r, 1), :], fw1_ref[r])
        h = jnp.maximum(h, 0.0)
        h = jnp.maximum(dot(h, fw2_ref[...]) + fb2_ref[...], 0.0)
        ob[...] = dot(h, fw3_ref[...]) + fb3_ref[...]


# ---------------------------------------------------------------------------
# One-time parameter packing (plain JAX, outside the kernel / jit).
# ---------------------------------------------------------------------------
def _band_matrices(w, cin, cp_in, cout, cp_out, win):
    """w: (cout, cin, K, K) -> (K, win*cp_in, (win-K+1)*cp_out) banded weights."""
    wout = win - K + 1
    rows = jnp.arange(win * cp_in)
    cols = jnp.arange(wout * cp_out)
    rw, rc = rows // cp_in, rows % cp_in          # input column w, in-channel c
    cw, cc = cols // cp_out, cols % cp_out        # output column ow, out-channel oc
    kw = rw[:, None] - cw[None, :]
    valid = (kw >= 0) & (kw < K) & (rc[:, None] < cin) & (cc[None, :] < cout)
    kw_c = jnp.clip(kw, 0, K - 1)
    rc_c = jnp.clip(rc, 0, cin - 1)
    cc_c = jnp.clip(cc, 0, cout - 1)
    mats = []
    for kh in range(K):
        vals = w[cc_c[None, :], rc_c[:, None], kh, kw_c]              # (rows, cols)
        mats.append(jnp.where(valid, vals, 0.0))
    return jnp.stack(mats, 0).astype(jnp.float32)


def _bias_row(b, cout, cp_out, wout):
    v = jnp.zeros((cp_out,), jnp.float32).at[:cout].set(b)
    return jnp.tile(v, wout)[None, :]


def _pool_col_selectors(win, cp, out_cols):
    wout = win // 2
    r = jnp.arange(win * cp)
    c = jnp.arange(wout * cp)
    rw, rc = r // cp, r % cp
    cw, cc = c // cp, c % cp
    same_ch = rc[:, None] == cc[None, :]
    a = (same_ch & (rw[:, None] == 2 * cw[None, :])).astype(jnp.float32)
    b = (same_ch & (rw[:, None] == 2 * cw[None, :] + 1)).astype(jnp.float32)
    sel = jnp.stack([a, b], 0)
    return jnp.pad(sel, ((0, 0), (0, 0), (0, out_cols - wout * cp)))


def _pool_row_selectors(hin):
    hout = hin // 2
    i = jnp.arange(hout)[:, None]
    h = jnp.arange(hin)[None, :]
    return jnp.stack([(h == 2 * i).astype(jnp.float32),
                      (h == 2 * i + 1).astype(jnp.float32)], 0)


def pack_params(params):
    f32 = jnp.float32
    # conv1: banded weights (5, 256, 224), bias (1, 224)
    cw1 = _band_matrices(params["conv1_w"], C0, CP0, C1, CP1, W0)
    cb1 = _bias_row(params["conv1_b"], C1, CP1, W1)
    # pool1 selectors
    sw1 = _pool_col_selectors(W1, CP1, P1_COLS)          # (2, 224, 128)
    sh1 = _pool_row_selectors(H1)                        # (2, 14, 28)
    # conv2: banded weights (5, 112 -> 128, 160), bias (1, 160)
    cw2 = _band_matrices(params["conv2_w"], C1, CP1, C2, CP2, WP1)
    cw2 = jnp.pad(cw2, ((0, 0), (0, P1_COLS - WP1 * CP1), (0, 0)))
    cb2 = _bias_row(params["conv2_b"], C2, CP2, W2)
    # pool2 selectors
    sw2 = _pool_col_selectors(W2, CP2, P2_COLS)          # (2, 160, 128)
    sh2 = _pool_row_selectors(H2)                        # (2, 5, 10)
    # fc1: rows reordered to the packed (h ; w*16+c) layout, padded to (5,128,128).
    # PyTorch's x.view(-1, 400) flattens pooled2 in (c, h, w) order.
    r = jnp.arange(WP2 * CP2)                            # 80
    wr, cr = r // CP2, r % CP2
    blocks = []
    for h in range(HP2):
        idx = cr * (HP2 * WP2) + h * WP2 + wr
        blk = params["fc1_w"][idx, :]                    # (80, 120)
        blk = jnp.pad(blk, ((0, P2_COLS - blk.shape[0]), (0, FCP - blk.shape[1])))
        blocks.append(blk)
    fw1 = jnp.stack(blocks, 0).astype(f32)               # (5, 128, 128)
    fb1 = jnp.pad(params["fc1_b"], (0, FCP - 120))[None, :]
    fw2 = jnp.zeros((FCP, FCP), f32).at[:120, :84].set(params["fc2_w"])
    fb2 = jnp.pad(params["fc2_b"], (0, FCP - 84))[None, :]
    fw3 = jnp.zeros((FCP, FCP), f32).at[:84, :10].set(params["fc3_w"])
    fb3 = jnp.pad(params["fc3_b"], (0, FCP - 10))[None, :]
    return dict(cw1=cw1, cb1=cb1, sw1=sw1, sh1=sh1,
                cw2=cw2, cb2=cb2, sw2=sw2, sh2=sh2,
                fw1=fw1, fb1=fb1, fw2=fw2, fb2=fb2, fw3=fw3, fb3=fb3)


# ---------------------------------------------------------------------------
# Forward pass wrapper.
# ---------------------------------------------------------------------------
def _pack_input(x_nchw):
    n = x_nchw.shape[0]
    xt = jnp.transpose(x_nchw, (0, 2, 3, 1)).astype(jnp.float32)   # (N, 32, 32, 3)
    xt = jnp.pad(xt, ((0, 0), (0, 0), (0, 0), (0, CP0 - C0)))      # pad channels to 8
    return xt.reshape(n, H0, X_COLS)                               # (N, 32, 256)


def net_forward(x_nchw, pk):
    n = x_nchw.shape[0]
    n_pad = ((n + B_BLK - 1) // B_BLK) * B_BLK
    x2 = _pack_input(x_nchw)
    if n_pad != n:
        x2 = jnp.pad(x2, ((0, n_pad - n), (0, 0), (0, 0)))

    order = ("cw1", "cb1", "sw1", "sh1", "cw2", "cb2", "sw2", "sh2",
             "fw1", "fb1", "fw2", "fb2", "fw3", "fb3")
    consts = [pk[k] for k in order]

    def const_spec(a):
        nd = a.ndim
        return pl.BlockSpec(a.shape, lambda i: (0,) * nd)

    flops = 2 * n_pad * (K * H1 * X_COLS * Y1_COLS
                         + 2 * H1 * Y1_COLS * P1_COLS + 2 * HP1 * H1 * P1_COLS
                         + K * H2 * P1_COLS * Y2_COLS
                         + 2 * H2 * Y2_COLS * P2_COLS + 2 * HP2 * H2 * P2_COLS
                         + (HP2 + 2) * FCP * FCP)
    bytes_accessed = 4 * (int(x2.size) + sum(int(c.size) for c in consts)
                          + n_pad * FCP)

    out = pl.pallas_call(
        _lenet_kernel,
        out_shape=jax.ShapeDtypeStruct((n_pad, 1, FCP), jnp.float32),
        grid=(n_pad // B_BLK,),
        in_specs=[pl.BlockSpec((B_BLK, H0, X_COLS), lambda i: (i, 0, 0))]
                 + [const_spec(c) for c in consts],
        out_specs=pl.BlockSpec((B_BLK, 1, FCP), lambda i: (i, 0, 0)),
        scratch_shapes=[pltpu.VMEM((B_BLK, HP1, P1_COLS), jnp.float32),
                        pltpu.VMEM((B_BLK, HP2, P2_COLS), jnp.float32)],
        compiler_params=pltpu.CompilerParams(dimension_semantics=("parallel",)),
        cost_estimate=pl.CostEstimate(flops=flops, transcendentals=0,
                                      bytes_accessed=bytes_accessed),
    )(x2, *consts)
    return out[:n, 0, :10]


# ---------------------------------------------------------------------------
# Parameters + plain-JAX reference (for a numerical self-check).
# ---------------------------------------------------------------------------
def init_params():
    key = jax.random.PRNGKey(42)
    ks = jax.random.split(key, 10)
    f32 = jnp.float32
    return dict(
        conv1_w=jax.random.normal(ks[0], (6, 3, 5, 5), f32) * 0.15,
        conv1_b=jax.random.normal(ks[1], (6,), f32) * 0.1,
        conv2_w=jax.random.normal(ks[2], (16, 6, 5, 5), f32) * 0.15,
        conv2_b=jax.random.normal(ks[3], (16,), f32) * 0.1,
        # Linear weights stored already transposed: (in_features, out_features)
        fc1_w=jax.random.normal(ks[4], (16 * 5 * 5, 120), f32) * 0.1,
        fc1_b=jax.random.normal(ks[5], (120,), f32) * 0.1,
        fc2_w=jax.random.normal(ks[6], (120, 84), f32) * 0.1,
        fc2_b=jax.random.normal(ks[7], (84,), f32) * 0.1,
        fc3_w=jax.random.normal(ks[8], (84, 10), f32) * 0.1,
        fc3_b=jax.random.normal(ks[9], (10,), f32) * 0.1,
    )


def net_reference(x, params):
    dn = ("NCHW", "OIHW", "NCHW")

    def pool(h):
        n, c, hh, ww = h.shape
        return h.reshape(n, c, hh // 2, 2, ww // 2, 2).max(axis=(3, 5))

    h = lax.conv_general_dilated(x, params["conv1_w"], (1, 1), "VALID",
                                 dimension_numbers=dn)
    h = pool(jax.nn.relu(h + params["conv1_b"][None, :, None, None]))
    h = lax.conv_general_dilated(h, params["conv2_w"], (1, 1), "VALID",
                                 dimension_numbers=dn)
    h = pool(jax.nn.relu(h + params["conv2_b"][None, :, None, None]))
    h = h.reshape(h.shape[0], -1)
    h = jax.nn.relu(h @ params["fc1_w"] + params["fc1_b"])
    h = jax.nn.relu(h @ params["fc2_w"] + params["fc2_b"])
    return h @ params["fc3_w"] + params["fc3_b"]


if __name__ == "__main__":
    params = init_params()
    packed = pack_params(params)
    x = jax.random.normal(jax.random.PRNGKey(0), (2, 3, 32, 32), jnp.float32)

    fwd = jax.jit(net_forward)
    out = jax.block_until_ready(fwd(x, packed))
    assert out.shape == (2, 10) and out.dtype == jnp.float32

    ref = jax.block_until_ready(net_reference(x, params))
    err = float(jnp.max(jnp.abs(out - ref)))
    tol = 7.5e-2 * float(jnp.max(jnp.abs(ref))) + 1e-2
    assert err < tol, f"kernel/reference mismatch: max|diff|={err} tol={tol}"
    print("KERNEL_OK")
</pallas_src>

<mosaic_0001>
module attributes {stable_mosaic.version = 11 : i64} {
  func.func @_lenet_kernel(%arg0: i32, %arg1: memref<2x32x256xf32, #tpu.memory_space<vmem>>, %arg2: memref<5x256x224xf32, #tpu.memory_space<vmem>>, %arg3: memref<1x224xf32, #tpu.memory_space<vmem>>, %arg4: memref<2x224x128xf32, #tpu.memory_space<vmem>>, %arg5: memref<2x14x28xf32, #tpu.memory_space<vmem>>, %arg6: memref<5x128x160xf32, #tpu.memory_space<vmem>>, %arg7: memref<1x160xf32, #tpu.memory_space<vmem>>, %arg8: memref<2x160x128xf32, #tpu.memory_space<vmem>>, %arg9: memref<2x5x10xf32, #tpu.memory_space<vmem>>, %arg10: memref<5x128x128xf32, #tpu.memory_space<vmem>>, %arg11: memref<1x128xf32, #tpu.memory_space<vmem>>, %arg12: memref<128x128xf32, #tpu.memory_space<vmem>>, %arg13: memref<1x128xf32, #tpu.memory_space<vmem>>, %arg14: memref<128x128xf32, #tpu.memory_space<vmem>>, %arg15: memref<1x128xf32, #tpu.memory_space<vmem>>, %arg16: memref<2x1x128xf32, #tpu.memory_space<vmem>>, %arg17: memref<2x14x128xf32, #tpu.memory_space<vmem>>, %arg18: memref<2x5x128xf32, #tpu.memory_space<vmem>>) attributes {dimension_semantics = [#tpu.dimension_semantics<parallel>], iteration_bounds = array<i64: 1>, scalar_prefetch = 0 : i64, scratch_operands = 2 : i64, tpu.core_type = #tpu.core_type<tc>, window_params = [{transform_indices = @transform_0, window_bounds = array<i64: 2, 32, 256>}, {pipeline_mode = #tpu.pipeline_mode<synchronous>, transform_indices = @transform_1, window_bounds = array<i64: 5, 256, 224>}, {pipeline_mode = #tpu.pipeline_mode<synchronous>, transform_indices = @transform_2, window_bounds = array<i64: 1, 224>}, {pipeline_mode = #tpu.pipeline_mode<synchronous>, transform_indices = @transform_3, window_bounds = array<i64: 2, 224, 128>}, {pipeline_mode = #tpu.pipeline_mode<synchronous>, transform_indices = @transform_4, window_bounds = array<i64: 2, 14, 28>}, {pipeline_mode = #tpu.pipeline_mode<synchronous>, transform_indices = @transform_5, window_bounds = array<i64: 5, 128, 160>}, {pipeline_mode = #tpu.pipeline_mode<synchronous>, transform_indices = @transform_6, window_bounds = array<i64: 1, 160>}, {pipeline_mode = #tpu.pipeline_mode<synchronous>, transform_indices = @transform_7, window_bounds = array<i64: 2, 160, 128>}, {pipeline_mode = #tpu.pipeline_mode<synchronous>, transform_indices = @transform_8, window_bounds = array<i64: 2, 5, 10>}, {pipeline_mode = #tpu.pipeline_mode<synchronous>, transform_indices = @transform_9, window_bounds = array<i64: 5, 128, 128>}, {pipeline_mode = #tpu.pipeline_mode<synchronous>, transform_indices = @transform_10, window_bounds = array<i64: 1, 128>}, {pipeline_mode = #tpu.pipeline_mode<synchronous>, transform_indices = @transform_11, window_bounds = array<i64: 128, 128>}, {pipeline_mode = #tpu.pipeline_mode<synchronous>, transform_indices = @transform_12, window_bounds = array<i64: 1, 128>}, {pipeline_mode = #tpu.pipeline_mode<synchronous>, transform_indices = @transform_13, window_bounds = array<i64: 128, 128>}, {pipeline_mode = #tpu.pipeline_mode<synchronous>, transform_indices = @transform_14, window_bounds = array<i64: 1, 128>}, {transform_indices = @transform_15, window_bounds = array<i64: 2, 1, 128>}]} {
    %c0_i32 = arith.constant 0 : i32
    %c0_i32_0 = arith.constant 0 : i32
    %c0_i32_1 = arith.constant 0 : i32
    %0 = tpu.memref_slice %arg1[%c0_i32, %c0_i32_0, %c0_i32_1] : memref<2x32x256xf32, #tpu.memory_space<vmem>> -> memref<1x32x256xf32, #tpu.memory_space<vmem>>
    %1 = tpu.memref_squeeze %0 : memref<1x32x256xf32, #tpu.memory_space<vmem>> -> memref<32x256xf32, #tpu.memory_space<vmem>>
    %c0 = arith.constant 0 : index
    %c0_2 = arith.constant 0 : index
    %2 = vector.load %1[%c0, %c0_2] : memref<32x256xf32, #tpu.memory_space<vmem>>, vector<28x256xf32>
    %c0_3 = arith.constant 0 : index
    %c0_4 = arith.constant 0 : index
    %c0_5 = arith.constant 0 : index
    %3 = vector.load %arg2[%c0_3, %c0_4, %c0_5] : memref<5x256x224xf32, #tpu.memory_space<vmem>>, vector<1x256x224xf32>
    %4 = vector.shape_cast %3 : vector<1x256x224xf32> to vector<256x224xf32>
    %cst = arith.constant dense<0.000000e+00> : vector<28x224xf32>
    %5 = tpu.matmul %2, %4, %cst {dimension_numbers = #tpu.dot_dimension_numbers<[1], [0], [0], [1], [0, 0, 1, 1], [], []>} : vector<28x256xf32>, vector<256x224xf32>, vector<28x224xf32> -> vector<28x224xf32>
    %c0_i32_6 = arith.constant 0 : i32
    %c0_i32_7 = arith.constant 0 : i32
    %c0_i32_8 = arith.constant 0 : i32
    %6 = tpu.memref_slice %arg1[%c0_i32_6, %c0_i32_7, %c0_i32_8] : memref<2x32x256xf32, #tpu.memory_space<vmem>> -> memref<1x32x256xf32, #tpu.memory_space<vmem>>
    %7 = tpu.memref_squeeze %6 : memref<1x32x256xf32, #tpu.memory_space<vmem>> -> memref<32x256xf32, #tpu.memory_space<vmem>>
    %c1 = arith.constant 1 : index
    %c0_9 = arith.constant 0 : index
    %8 = vector.load %7[%c1, %c0_9] : memref<32x256xf32, #tpu.memory_space<vmem>>, vector<28x256xf32>
    %c1_10 = arith.constant 1 : index
    %c0_11 = arith.constant 0 : index
    %c0_12 = arith.constant 0 : index
    %9 = vector.load %arg2[%c1_10, %c0_11, %c0_12] : memref<5x256x224xf32, #tpu.memory_space<vmem>>, vector<1x256x224xf32>
    %10 = vector.shape_cast %9 : vector<1x256x224xf32> to vector<256x224xf32>
    %cst_13 = arith.constant dense<0.000000e+00> : vector<28x224xf32>
    %11 = tpu.matmul %8, %10, %cst_13 {dimension_numbers = #tpu.dot_dimension_numbers<[1], [0], [0], [1], [0, 0, 1, 1], [], []>} : vector<28x256xf32>, vector<256x224xf32>, vector<28x224xf32> -> vector<28x224xf32>
    %12 = arith.addf %5, %11 : vector<28x224xf32>
    %c0_i32_14 = arith.constant 0 : i32
    %c0_i32_15 = arith.constant 0 : i32
    %c0_i32_16 = arith.constant 0 : i32
    %13 = tpu.memref_slice %arg1[%c0_i32_14, %c0_i32_15, %c0_i32_16] : memref<2x32x256xf32, #tpu.memory_space<vmem>> -> memref<1x32x256xf32, #tpu.memory_space<vmem>>
    %14 = tpu.memref_squeeze %13 : memref<1x32x256xf32, #tpu.memory_space<vmem>> -> memref<32x256xf32, #tpu.memory_space<vmem>>
    %c2 = arith.constant 2 : index
    %c0_17 = arith.constant 0 : index
    %15 = vector.load %14[%c2, %c0_17] : memref<32x256xf32, #tpu.memory_space<vmem>>, vector<28x256xf32>
    %c2_18 = arith.constant 2 : index
    %c0_19 = arith.constant 0 : index
    %c0_20 = arith.constant 0 : index
    %16 = vector.load %arg2[%c2_18, %c0_19, %c0_20] : memref<5x256x224xf32, #tpu.memory_space<vmem>>, vector<1x256x224xf32>
    %17 = vector.shape_cast %16 : vector<1x256x224xf32> to vector<256x224xf32>
    %cst_21 = arith.constant dense<0.000000e+00> : vector<28x224xf32>
    %18 = tpu.matmul %15, %17, %cst_21 {dimension_numbers = #tpu.dot_dimension_numbers<[1], [0], [0], [1], [0, 0, 1, 1], [], []>} : vector<28x256xf32>, vector<256x224xf32>, vector<28x224xf32> -> vector<28x224xf32>
    %19 = arith.addf %12, %18 : vector<28x224xf32>
    %c0_i32_22 = arith.constant 0 : i32
    %c0_i32_23 = arith.constant 0 : i32
    %c0_i32_24 = arith.constant 0 : i32
    %20 = tpu.memref_slice %arg1[%c0_i32_22, %c0_i32_23, %c0_i32_24] : memref<2x32x256xf32, #tpu.memory_space<vmem>> -> memref<1x32x256xf32, #tpu.memory_space<vmem>>
    %21 = tpu.memref_squeeze %20 : memref<1x32x256xf32, #tpu.memory_space<vmem>> -> memref<32x256xf32, #tpu.memory_space<vmem>>
    %c3 = arith.constant 3 : index
    %c0_25 = arith.constant 0 : index
    %22 = vector.load %21[%c3, %c0_25] : memref<32x256xf32, #tpu.memory_space<vmem>>, vector<28x256xf32>
    %c3_26 = arith.constant 3 : index
    %c0_27 = arith.constant 0 : index
    %c0_28 = arith.constant 0 : index
    %23 = vector.load %arg2[%c3_26, %c0_27, %c0_28] : memref<5x256x224xf32, #tpu.memory_space<vmem>>, vector<1x256x224xf32>
    %24 = vector.shape_cast %23 : vector<1x256x224xf32> to vector<256x224xf32>
    %cst_29 = arith.constant dense<0.000000e+00> : vector<28x224xf32>
    %25 = tpu.matmul %22, %24, %cst_29 {dimension_numbers = #tpu.dot_dimension_numbers<[1], [0], [0], [1], [0, 0, 1, 1], [], []>} : vector<28x256xf32>, vector<256x224xf32>, vector<28x224xf32> -> vector<28x224xf32>
    %26 = arith.addf %19, %25 : vector<28x224xf32>
    %c0_i32_30 = arith.constant 0 : i32
    %c0_i32_31 = arith.constant 0 : i32
    %c0_i32_32 = arith.constant 0 : i32
    %27 = tpu.memref_slice %arg1[%c0_i32_30, %c0_i32_31, %c0_i32_32] : memref<2x32x256xf32, #tpu.memory_space<vmem>> -> memref<1x32x256xf32, #tpu.memory_space<vmem>>
    %28 = tpu.memref_squeeze %27 : memref<1x32x256xf32, #tpu.memory_space<vmem>> -> memref<32x256xf32, #tpu.memory_space<vmem>>
    %c4 = arith.constant 4 : index
    %c0_33 = arith.constant 0 : index
    %29 = vector.load %28[%c4, %c0_33] : memref<32x256xf32, #tpu.memory_space<vmem>>, vector<28x256xf32>
    %c4_34 = arith.constant 4 : index
    %c0_35 = arith.constant 0 : index
    %c0_36 = arith.constant 0 : index
    %30 = vector.load %arg2[%c4_34, %c0_35, %c0_36] : memref<5x256x224xf32, #tpu.memory_space<vmem>>, vector<1x256x224xf32>
    %31 = vector.shape_cast %30 : vector<1x256x224xf32> to vector<256x224xf32>
    %cst_37 = arith.constant dense<0.000000e+00> : vector<28x224xf32>
    %32 = tpu.matmul %29, %31, %cst_37 {dimension_numbers = #tpu.dot_dimension_numbers<[1], [0], [0], [1], [0, 0, 1, 1], [], []>} : vector<28x256xf32>, vector<256x224xf32>, vector<28x224xf32> -> vector<28x224xf32>
    %33 = arith.addf %26, %32 : vector<28x224xf32>
    %c0_38 = arith.constant 0 : index
    %c0_39 = arith.constant 0 : index
    %34 = vector.load %arg3[%c0_38, %c0_39] : memref<1x224xf32, #tpu.memory_space<vmem>>, vector<1x224xf32>
    %35 = vector.broadcast %34 : vector<1x224xf32> to vector<28x224xf32>
    %36 = arith.addf %33, %35 : vector<28x224xf32>
    %cst_40 = arith.constant 0.000000e+00 : f32
    %37 = vector.broadcast %cst_40 : f32 to vector<28x224xf32>
    %38 = arith.maximumf %36, %37 : vector<28x224xf32>
    %c0_41 = arith.constant 0 : index
    %c0_42 = arith.constant 0 : index
    %c0_43 = arith.constant 0 : index
    %39 = vector.load %arg4[%c0_41, %c0_42, %c0_43] : memref<2x224x128xf32, #tpu.memory_space<vmem>>, vector<1x224x128xf32>
    %40 = vector.shape_cast %39 : vector<1x224x128xf32> to vector<224x128xf32>
    %cst_44 = arith.constant dense<0.000000e+00> : vector<28x128xf32>
    %41 = tpu.matmul %38, %40, %cst_44 {dimension_numbers = #tpu.dot_dimension_numbers<[1], [0], [0], [1], [0, 0, 1, 1], [], []>} : vector<28x224xf32>, vector<224x128xf32>, vector<28x128xf32> -> vector<28x128xf32>
    %c1_45 = arith.constant 1 : index
    %c0_46 = arith.constant 0 : index
    %c0_47 = arith.constant 0 : index
    %42 = vector.load %arg4[%c1_45, %c0_46, %c0_47] : memref<2x224x128xf32, #tpu.memory_space<vmem>>, vector<1x224x128xf32>
    %43 = vector.shape_cast %42 : vector<1x224x128xf32> to vector<224x128xf32>
    %cst_48 = arith.constant dense<0.000000e+00> : vector<28x128xf32>
    %44 = tpu.matmul %38, %43, %cst_48 {dimension_numbers = #tpu.dot_dimension_numbers<[1], [0], [0], [1], [0, 0, 1, 1], [], []>} : vector<28x224xf32>, vector<224x128xf32>, vector<28x128xf32> -> vector<28x128xf32>
    %45 = arith.maximumf %41, %44 : vector<28x128xf32>
    %c0_49 = arith.constant 0 : index
    %c0_50 = arith.constant 0 : index
    %c0_51 = arith.constant 0 : index
    %46 = vector.load %arg5[%c0_49, %c0_50, %c0_51] : memref<2x14x28xf32, #tpu.memory_space<vmem>>, vector<1x14x28xf32>
    %47 = vector.shape_cast %46 : vector<1x14x28xf32> to vector<14x28xf32>
    %cst_52 = arith.constant dense<0.000000e+00> : vector<14x128xf32>
    %48 = tpu.matmul %47, %45, %cst_52 {dimension_numbers = #tpu.dot_dimension_numbers<[1], [0], [0], [1], [0, 0, 1, 1], [], []>} : vector<14x28xf32>, vector<28x128xf32>, vector<14x128xf32> -> vector<14x128xf32>
    %c1_53 = arith.constant 1 : index
    %c0_54 = arith.constant 0 : index
    %c0_55 = arith.constant 0 : index
    %49 = vector.load %arg5[%c1_53, %c0_54, %c0_55] : memref<2x14x28xf32, #tpu.memory_space<vmem>>, vector<1x14x28xf32>
    %50 = vector.shape_cast %49 : vector<1x14x28xf32> to vector<14x28xf32>
    %cst_56 = arith.constant dense<0.000000e+00> : vector<14x128xf32>
    %51 = tpu.matmul %50, %45, %cst_56 {dimension_numbers = #tpu.dot_dimension_numbers<[1], [0], [0], [1], [0, 0, 1, 1], [], []>} : vector<14x28xf32>, vector<28x128xf32>, vector<14x128xf32> -> vector<14x128xf32>
    %52 = arith.maximumf %48, %51 : vector<14x128xf32>
    %c0_57 = arith.constant 0 : index
    %c0_58 = arith.constant 0 : index
    %c0_59 = arith.constant 0 : index
    %53 = vector.load %arg17[%c0_57, %c0_58, %c0_59] : memref<2x14x128xf32, #tpu.memory_space<vmem>>, vector<1x14x128xf32>
    %54 = vector.shape_cast %53 : vector<1x14x128xf32> to vector<14x128xf32>
    %55 = vector.shape_cast %52 : vector<14x128xf32> to vector<1x14x128xf32>
    tpu.vector_store %arg17[%c0_57, %c0_58, %c0_59], %55 {strides = array<i32>} : memref<2x14x128xf32, #tpu.memory_space<vmem>>, vector<1x14x128xf32>,
    %c0_i32_60 = arith.constant 0 : i32
    %c0_i32_61 = arith.constant 0 : i32
    %c0_i32_62 = arith.constant 0 : i32
    %56 = tpu.memref_slice %arg17[%c0_i32_60, %c0_i32_61, %c0_i32_62] : memref<2x14x128xf32, #tpu.memory_space<vmem>> -> memref<1x14x128xf32, #tpu.memory_space<vmem>>
    %57 = tpu.memref_squeeze %56 : memref<1x14x128xf32, #tpu.memory_space<vmem>> -> memref<14x128xf32, #tpu.memory_space<vmem>>
    %c0_63 = arith.constant 0 : index
    %c0_64 = arith.constant 0 : index
    %58 = vector.load %57[%c0_63, %c0_64] : memref<14x128xf32, #tpu.memory_space<vmem>>, vector<10x128xf32>
    %c0_65 = arith.constant 0 : index
    %c0_66 = arith.constant 0 : index
    %c0_67 = arith.constant 0 : index
    %59 = vector.load %arg6[%c0_65, %c0_66, %c0_67] : memref<5x128x160xf32, #tpu.memory_space<vmem>>, vector<1x128x160xf32>
    %60 = vector.shape_cast %59 : vector<1x128x160xf32> to vector<128x160xf32>
    %cst_68 = arith.constant dense<0.000000e+00> : vector<10x160xf32>
    %61 = tpu.matmul %58, %60, %cst_68 {dimension_numbers = #tpu.dot_dimension_numbers<[1], [0], [0], [1], [0, 0, 1, 1], [], []>} : vector<10x128xf32>, vector<128x160xf32>, vector<10x160xf32> -> vector<10x160xf32>
    %c0_i32_69 = arith.constant 0 : i32
    %c0_i32_70 = arith.constant 0 : i32
    %c0_i32_71 = arith.constant 0 : i32
    %62 = tpu.memref_slice %arg17[%c0_i32_69, %c0_i32_70, %c0_i32_71] : memref<2x14x128xf32, #tpu.memory_space<vmem>> -> memref<1x14x128xf32, #tpu.memory_space<vmem>>
    %63 = tpu.memref_squeeze %62 : memref<1x14x128xf32, #tpu.memory_space<vmem>> -> memref<14x128xf32, #tpu.memory_space<vmem>>
    %c1_72 = arith.constant 1 : index
    %c0_73 = arith.constant 0 : index
    %64 = vector.load %63[%c1_72, %c0_73] : memref<14x128xf32, #tpu.memory_space<vmem>>, vector<10x128xf32>
    %c1_74 = arith.constant 1 : index
    %c0_75 = arith.constant 0 : index
    %c0_76 = arith.constant 0 : index
    %65 = vector.load %arg6[%c1_74, %c0_75, %c0_76] : memref<5x128x160xf32, #tpu.memory_space<vmem>>, vector<1x128x160xf32>
    %66 = vector.shape_cast %65 : vector<1x128x160xf32> to vector<128x160xf32>
    %cst_77 = arith.constant dense<0.000000e+00> : vector<10x160xf32>
    %67 = tpu.matmul %64, %66, %cst_77 {dimension_numbers = #tpu.dot_dimension_numbers<[1], [0], [0], [1], [0, 0, 1, 1], [], []>} : vector<10x128xf32>, vector<128x160xf32>, vector<10x160xf32> -> vector<10x160xf32>
    %68 = arith.addf %61, %67 : vector<10x160xf32>
    %c0_i32_78 = arith.constant 0 : i32
    %c0_i32_79 = arith.constant 0 : i32
    %c0_i32_80 = arith.constant 0 : i32
    %69 = tpu.memref_slice %arg17[%c0_i32_78, %c0_i32_79, %c0_i32_80] : memref<2x14x128xf32, #tpu.memory_space<vmem>> -> memref<1x14x128xf32, #tpu.memory_space<vmem>>
    %70 = tpu.memref_squeeze %69 : memref<1x14x128xf32, #tpu.memory_space<vmem>> -> memref<14x128xf32, #tpu.memory_space<vmem>>
    %c2_81 = arith.constant 2 : index
    %c0_82 = arith.constant 0 : index
    %71 = vector.load %70[%c2_81, %c0_82] : memref<14x128xf32, #tpu.memory_space<vmem>>, vector<10x128xf32>
    %c2_83 = arith.constant 2 : index
    %c0_84 = arith.constant 0 : index
    %c0_85 = arith.constant 0 : index
    %72 = vector.load %arg6[%c2_83, %c0_84, %c0_85] : memref<5x128x160xf32, #tpu.memory_space<vmem>>, vector<1x128x160xf32>
    %73 = vector.shape_cast %72 : vector<1x128x160xf32> to vector<128x160xf32>
    %cst_86 = arith.constant dense<0.000000e+00> : vector<10x160xf32>
    %74 = tpu.matmul %71, %73, %cst_86 {dimension_numbers = #tpu.dot_dimension_numbers<[1], [0], [0], [1], [0, 0, 1, 1], [], []>} : vector<10x128xf32>, vector<128x160xf32>, vector<10x160xf32> -> vector<10x160xf32>
    %75 = arith.addf %68, %74 : vector<10x160xf32>
    %c0_i32_87 = arith.constant 0 : i32
    %c0_i32_88 = arith.constant 0 : i32
    %c0_i32_89 = arith.constant 0 : i32
    %76 = tpu.memref_slice %arg17[%c0_i32_87, %c0_i32_88, %c0_i32_89] : memref<2x14x128xf32, #tpu.memory_space<vmem>> -> memref<1x14x128xf32, #tpu.memory_space<vmem>>
    %77 = tpu.memref_squeeze %76 : memref<1x14x128xf32, #tpu.memory_space<vmem>> -> memref<14x128xf32, #tpu.memory_space<vmem>>
    %c3_90 = arith.constant 3 : index
    %c0_91 = arith.constant 0 : index
    %78 = vector.load %77[%c3_90, %c0_91] : memref<14x128xf32, #tpu.memory_space<vmem>>, vector<10x128xf32>
    %c3_92 = arith.constant 3 : index
    %c0_93 = arith.constant 0 : index
    %c0_94 = arith.constant 0 : index
    %79 = vector.load %arg6[%c3_92, %c0_93, %c0_94] : memref<5x128x160xf32, #tpu.memory_space<vmem>>, vector<1x128x160xf32>
    %80 = vector.shape_cast %79 : vector<1x128x160xf32> to vector<128x160xf32>
    %cst_95 = arith.constant dense<0.000000e+00> : vector<10x160xf32>
    %81 = tpu.matmul %78, %80, %cst_95 {dimension_numbers = #tpu.dot_dimension_numbers<[1], [0], [0], [1], [0, 0, 1, 1], [], []>} : vector<10x128xf32>, vector<128x160xf32>, vector<10x160xf32> -> vector<10x160xf32>
    %82 = arith.addf %75, %81 : vector<10x160xf32>
    %c0_i32_96 = arith.constant 0 : i32
    %c0_i32_97 = arith.constant 0 : i32
    %c0_i32_98 = arith.constant 0 : i32
    %83 = tpu.memref_slice %arg17[%c0_i32_96, %c0_i32_97, %c0_i32_98] : memref<2x14x128xf32, #tpu.memory_space<vmem>> -> memref<1x14x128xf32, #tpu.memory_space<vmem>>
    %84 = tpu.memref_squeeze %83 : memref<1x14x128xf32, #tpu.memory_space<vmem>> -> memref<14x128xf32, #tpu.memory_space<vmem>>
    %c4_99 = arith.constant 4 : index
    %c0_100 = arith.constant 0 : index
    %85 = vector.load %84[%c4_99, %c0_100] : memref<14x128xf32, #tpu.memory_space<vmem>>, vector<10x128xf32>
    %c4_101 = arith.constant 4 : index
    %c0_102 = arith.constant 0 : index
    %c0_103 = arith.constant 0 : index
    %86 = vector.load %arg6[%c4_101, %c0_102, %c0_103] : memref<5x128x160xf32, #tpu.memory_space<vmem>>, vector<1x128x160xf32>
    %87 = vector.shape_cast %86 : vector<1x128x160xf32> to vector<128x160xf32>
    %cst_104 = arith.constant dense<0.000000e+00> : vector<10x160xf32>
    %88 = tpu.matmul %85, %87, %cst_104 {dimension_numbers = #tpu.dot_dimension_numbers<[1], [0], [0], [1], [0, 0, 1, 1], [], []>} : vector<10x128xf32>, vector<128x160xf32>, vector<10x160xf32> -> vector<10x160xf32>
    %89 = arith.addf %82, %88 : vector<10x160xf32>
    %c0_105 = arith.constant 0 : index
    %c0_106 = arith.constant 0 : index
    %90 = vector.load %arg7[%c0_105, %c0_106] : memref<1x160xf32, #tpu.memory_space<vmem>>, vector<1x160xf32>
    %91 = vector.broadcast %90 : vector<1x160xf32> to vector<10x160xf32>
    %92 = arith.addf %89, %91 : vector<10x160xf32>
    %cst_107 = arith.constant 0.000000e+00 : f32
    %93 = vector.broadcast %cst_107 : f32 to vector<10x160xf32>
    %94 = arith.maximumf %92, %93 : vector<10x160xf32>
    %c0_108 = arith.constant 0 : index
    %c0_109 = arith.constant 0 : index
    %c0_110 = arith.constant 0 : index
    %95 = vector.load %arg8[%c0_108, %c0_109, %c0_110] : memref<2x160x128xf32, #tpu.memory_space<vmem>>, vector<1x160x128xf32>
    %96 = vector.shape_cast %95 : vector<1x160x128xf32> to vector<160x128xf32>
    %cst_111 = arith.constant dense<0.000000e+00> : vector<10x128xf32>
    %97 = tpu.matmul %94, %96, %cst_111 {dimension_numbers = #tpu.dot_dimension_numbers<[1], [0], [0], [1], [0, 0, 1, 1], [], []>} : vector<10x160xf32>, vector<160x128xf32>, vector<10x128xf32> -> vector<10x128xf32>
    %c1_112 = arith.constant 1 : index
    %c0_113 = arith.constant 0 : index
    %c0_114 = arith.constant 0 : index
    %98 = vector.load %arg8[%c1_112, %c0_113, %c0_114] : memref<2x160x128xf32, #tpu.memory_space<vmem>>, vector<1x160x128xf32>
    %99 = vector.shape_cast %98 : vector<1x160x128xf32> to vector<160x128xf32>
    %cst_115 = arith.constant dense<0.000000e+00> : vector<10x128xf32>
    %100 = tpu.matmul %94, %99, %cst_115 {dimension_numbers = #tpu.dot_dimension_numbers<[1], [0], [0], [1], [0, 0, 1, 1], [], []>} : vector<10x160xf32>, vector<160x128xf32>, vector<10x128xf32> -> vector<10x128xf32>
    %101 = arith.maximumf %97, %100 : vector<10x128xf32>
    %c0_116 = arith.constant 0 : index
    %c0_117 = arith.constant 0 : index
    %c0_118 = arith.constant 0 : index
    %102 = vector.load %arg9[%c0_116, %c0_117, %c0_118] : memref<2x5x10xf32, #tpu.memory_space<vmem>>, vector<1x5x10xf32>
    %103 = vector.shape_cast %102 : vector<1x5x10xf32> to vector<5x10xf32>
    %cst_119 = arith.constant dense<0.000000e+00> : vector<5x128xf32>
    %104 = tpu.matmul %103, %101, %cst_119 {dimension_numbers = #tpu.dot_dimension_numbers<[1], [0], [0], [1], [0, 0, 1, 1], [], []>} : vector<5x10xf32>, vector<10x128xf32>, vector<5x128xf32> -> vector<5x128xf32>
    %c1_120 = arith.constant 1 : index
    %c0_121 = arith.constant 0 : index
    %c0_122 = arith.constant 0 : index
    %105 = vector.load %arg9[%c1_120, %c0_121, %c0_122] : memref<2x5x10xf32, #tpu.memory_space<vmem>>, vector<1x5x10xf32>
    %106 = vector.shape_cast %105 : vector<1x5x10xf32> to vector<5x10xf32>
    %cst_123 = arith.constant dense<0.000000e+00> : vector<5x128xf32>
    %107 = tpu.matmul %106, %101, %cst_123 {dimension_numbers = #tpu.dot_dimension_numbers<[1], [0], [0], [1], [0, 0, 1, 1], [], []>} : vector<5x10xf32>, vector<10x128xf32>, vector<5x128xf32> -> vector<5x128xf32>
    %108 = arith.maximumf %104, %107 : vector<5x128xf32>
    %c0_124 = arith.constant 0 : index
    %c0_125 = arith.constant 0 : index
    %c0_126 = arith.constant 0 : index
    %109 = vector.load %arg18[%c0_124, %c0_125, %c0_126] : memref<2x5x128xf32, #tpu.memory_space<vmem>>, vector<1x5x128xf32>
    %110 = vector.shape_cast %109 : vector<1x5x128xf32> to vector<5x128xf32>
    %111 = vector.shape_cast %108 : vector<5x128xf32> to vector<1x5x128xf32>
    tpu.vector_store %arg18[%c0_124, %c0_125, %c0_126], %111 {strides = array<i32>} : memref<2x5x128xf32, #tpu.memory_space<vmem>>, vector<1x5x128xf32>,
    %c0_127 = arith.constant 0 : index
    %c0_128 = arith.constant 0 : index
    %112 = vector.load %arg11[%c0_127, %c0_128] : memref<1x128xf32, #tpu.memory_space<vmem>>, vector<1x128xf32>
    %c0_i32_129 = arith.constant 0 : i32
    %c0_i32_130 = arith.constant 0 : i32
    %c0_i32_131 = arith.constant 0 : i32
    %113 = tpu.memref_slice %arg18[%c0_i32_129, %c0_i32_130, %c0_i32_131] : memref<2x5x128xf32, #tpu.memory_space<vmem>> -> memref<1x5x128xf32, #tpu.memory_space<vmem>>
    %114 = tpu.memref_squeeze %113 : memref<1x5x128xf32, #tpu.memory_space<vmem>> -> memref<5x128xf32, #tpu.memory_space<vmem>>
    %c0_132 = arith.constant 0 : index
    %c0_133 = arith.constant 0 : index
    %115 = vector.load %114[%c0_132, %c0_133] : memref<5x128xf32, #tpu.memory_space<vmem>>, vector<1x128xf32>
    %c0_134 = arith.constant 0 : index
    %c0_135 = arith.constant 0 : index
    %c0_136 = arith.constant 0 : index
    %116 = vector.load %arg10[%c0_134, %c0_135, %c0_136] : memref<5x128x128xf32, #tpu.memory_space<vmem>>, vector<1x128x128xf32>
    %117 = vector.shape_cast %116 : vector<1x128x128xf32> to vector<128x128xf32>
    %cst_137 = arith.constant dense<0.000000e+00> : vector<1x128xf32>
    %118 = tpu.matmul %115, %117, %cst_137 {dimension_numbers = #tpu.dot_dimension_numbers<[1], [0], [0], [1], [0, 0, 1, 1], [], []>} : vector<1x128xf32>, vector<128x128xf32>, vector<1x128xf32> -> vector<1x128xf32>
    %119 = arith.addf %112, %118 : vector<1x128xf32>
    %c0_i32_138 = arith.constant 0 : i32
    %c0_i32_139 = arith.constant 0 : i32
    %c0_i32_140 = arith.constant 0 : i32
    %120 = tpu.memref_slice %arg18[%c0_i32_138, %c0_i32_139, %c0_i32_140] : memref<2x5x128xf32, #tpu.memory_space<vmem>> -> memref<1x5x128xf32, #tpu.memory_space<vmem>>
    %121 = tpu.memref_squeeze %120 : memref<1x5x128xf32, #tpu.memory_space<vmem>> -> memref<5x128xf32, #tpu.memory_space<vmem>>
    %c1_141 = arith.constant 1 : index
    %c0_142 = arith.constant 0 : index
    %122 = vector.load %121[%c1_141, %c0_142] : memref<5x128xf32, #tpu.memory_space<vmem>>, vector<1x128xf32>
    %c1_143 = arith.constant 1 : index
    %c0_144 = arith.constant 0 : index
    %c0_145 = arith.constant 0 : index
    %123 = vector.load %arg10[%c1_143, %c0_144, %c0_145] : memref<5x128x128xf32, #tpu.memory_space<vmem>>, vector<1x128x128xf32>
    %124 = vector.shape_cast %123 : vector<1x128x128xf32> to vector<128x128xf32>
    %cst_146 = arith.constant dense<0.000000e+00> : vector<1x128xf32>
    %125 = tpu.matmul %122, %124, %cst_146 {dimension_numbers = #tpu.dot_dimension_numbers<[1], [0], [0], [1], [0, 0, 1, 1], [], []>} : vector<1x128xf32>, vector<128x128xf32>, vector<1x128xf32> -> vector<1x128xf32>
    %126 = arith.addf %119, %125 : vector<1x128xf32>
    %c0_i32_147 = arith.constant 0 : i32
    %c0_i32_148 = arith.constant 0 : i32
    %c0_i32_149 = arith.constant 0 : i32
    %127 = tpu.memref_slice %arg18[%c0_i32_147, %c0_i32_148, %c0_i32_149] : memref<2x5x128xf32, #tpu.memory_space<vmem>> -> memref<1x5x128xf32, #tpu.memory_space<vmem>>
    %128 = tpu.memref_squeeze %127 : memref<1x5x128xf32, #tpu.memory_space<vmem>> -> memref<5x128xf32, #tpu.memory_space<vmem>>
    %c2_150 = arith.constant 2 : index
    %c0_151 = arith.constant 0 : index
    %129 = vector.load %128[%c2_150, %c0_151] : memref<5x128xf32, #tpu.memory_space<vmem>>, vector<1x128xf32>
    %c2_152 = arith.constant 2 : index
    %c0_153 = arith.constant 0 : index
    %c0_154 = arith.constant 0 : index
    %130 = vector.load %arg10[%c2_152, %c0_153, %c0_154] : memref<5x128x128xf32, #tpu.memory_space<vmem>>, vector<1x128x128xf32>
    %131 = vector.shape_cast %130 : vector<1x128x128xf32> to vector<128x128xf32>
    %cst_155 = arith.constant dense<0.000000e+00> : vector<1x128xf32>
    %132 = tpu.matmul %129, %131, %cst_155 {dimension_numbers = #tpu.dot_dimension_numbers<[1], [0], [0], [1], [0, 0, 1, 1], [], []>} : vector<1x128xf32>, vector<128x128xf32>, vector<1x128xf32> -> vector<1x128xf32>
    %133 = arith.addf %126, %132 : vector<1x128xf32>
    %c0_i32_156 = arith.constant 0 : i32
    %c0_i32_157 = arith.constant 0 : i32
    %c0_i32_158 = arith.constant 0 : i32
    %134 = tpu.memref_slice %arg18[%c0_i32_156, %c0_i32_157, %c0_i32_158] : memref<2x5x128xf32, #tpu.memory_space<vmem>> -> memref<1x5x128xf32, #tpu.memory_space<vmem>>
    %135 = tpu.memref_squeeze %134 : memref<1x5x128xf32, #tpu.memory_space<vmem>> -> memref<5x128xf32, #tpu.memory_space<vmem>>
    %c3_159 = arith.constant 3 : index
    %c0_160 = arith.constant 0 : index
    %136 = vector.load %135[%c3_159, %c0_160] : memref<5x128xf32, #tpu.memory_space<vmem>>, vector<1x128xf32>
    %c3_161 = arith.constant 3 : index
    %c0_162 = arith.constant 0 : index
    %c0_163 = arith.constant 0 : index
    %137 = vector.load %arg10[%c3_161, %c0_162, %c0_163] : memref<5x128x128xf32, #tpu.memory_space<vmem>>, vector<1x128x128xf32>
    %138 = vector.shape_cast %137 : vector<1x128x128xf32> to vector<128x128xf32>
    %cst_164 = arith.constant dense<0.000000e+00> : vector<1x128xf32>
    %139 = tpu.matmul %136, %138, %cst_164 {dimension_numbers = #tpu.dot_dimension_numbers<[1], [0], [0], [1], [0, 0, 1, 1], [], []>} : vector<1x128xf32>, vector<128x128xf32>, vector<1x128xf32> -> vector<1x128xf32>
    %140 = arith.addf %133, %139 : vector<1x128xf32>
    %c0_i32_165 = arith.constant 0 : i32
    %c0_i32_166 = arith.constant 0 : i32
    %c0_i32_167 = arith.constant 0 : i32
    %141 = tpu.memref_slice %arg18[%c0_i32_165, %c0_i32_166, %c0_i32_167] : memref<2x5x128xf32, #tpu.memory_space<vmem>> -> memref<1x5x128xf32, #tpu.memory_space<vmem>>
    %142 = tpu.memref_squeeze %141 : memref<1x5x128xf32, #tpu.memory_space<vmem>> -> memref<5x128xf32, #tpu.memory_space<vmem>>
    %c4_168 = arith.constant 4 : index
    %c0_169 = arith.constant 0 : index
    %143 = vector.load %142[%c4_168, %c0_169] : memref<5x128xf32, #tpu.memory_space<vmem>>, vector<1x128xf32>
    %c4_170 = arith.constant 4 : index
    %c0_171 = arith.constant 0 : index
    %c0_172 = arith.constant 0 : index
    %144 = vector.load %arg10[%c4_170, %c0_171, %c0_172] : memref<5x128x128xf32, #tpu.memory_space<vmem>>, vector<1x128x128xf32>
    %145 = vector.shape_cast %144 : vector<1x128x128xf32> to vector<128x128xf32>
    %cst_173 = arith.constant dense<0.000000e+00> : vector<1x128xf32>
    %146 = tpu.matmul %143, %145, %cst_173 {dimension_numbers = #tpu.dot_dimension_numbers<[1], [0], [0], [1], [0, 0, 1, 1], [], []>} : vector<1x128xf32>, vector<128x128xf32>, vector<1x128xf32> -> vector<1x128xf32>
    %147 = arith.addf %140, %146 : vector<1x128xf32>
    %cst_174 = arith.constant 0.000000e+00 : f32
    %148 = vector.broadcast %cst_174 : f32 to vector<1x128xf32>
    %149 = arith.maximumf %147, %148 : vector<1x128xf32>
    %c0_175 = arith.constant 0 : index
    %c0_176 = arith.constant 0 : index
    %150 = vector.load %arg12[%c0_175, %c0_176] : memref<128x128xf32, #tpu.memory_space<vmem>>, vector<128x128xf32>
    %cst_177 = arith.constant dense<0.000000e+00> : vector<1x128xf32>
    %151 = tpu.matmul %149, %150, %cst_177 {dimension_numbers = #tpu.dot_dimension_numbers<[1], [0], [0], [1], [0, 0, 1, 1], [], []>} : vector<1x128xf32>, vector<128x128xf32>, vector<1x128xf32> -> vector<1x128xf32>
    %c0_178 = arith.constant 0 : index
    %c0_179 = arith.constant 0 : index
    %152 = vector.load %arg13[%c0_178, %c0_179] : memref<1x128xf32, #tpu.memory_space<vmem>>, vector<1x128xf32>
    %153 = arith.addf %151, %152 : vector<1x128xf32>
    %cst_180 = arith.constant 0.000000e+00 : f32
    %154 = vector.broadcast %cst_180 : f32 to vector<1x128xf32>
    %155 = arith.maximumf %153, %154 : vector<1x128xf32>
    %c0_181 = arith.constant 0 : index
    %c0_182 = arith.constant 0 : index
    %156 = vector.load %arg14[%c0_181, %c0_182] : memref<128x128xf32, #tpu.memory_space<vmem>>, vector<128x128xf32>
    %cst_183 = arith.constant dense<0.000000e+00> : vector<1x128xf32>
    %157 = tpu.matmul %155, %156, %cst_183 {dimension_numbers = #tpu.dot_dimension_numbers<[1], [0], [0], [1], [0, 0, 1, 1], [], []>} : vector<1x128xf32>, vector<128x128xf32>, vector<1x128xf32> -> vector<1x128xf32>
    %c0_184 = arith.constant 0 : index
    %c0_185 = arith.constant 0 : index
    %158 = vector.load %arg15[%c0_184, %c0_185] : memref<1x128xf32, #tpu.memory_space<vmem>>, vector<1x128xf32>
    %159 = arith.addf %157, %158 : vector<1x128xf32>
    %c0_186 = arith.constant 0 : index
    %c0_187 = arith.constant 0 : index
    %c0_188 = arith.constant 0 : index
    %160 = vector.load %arg16[%c0_186, %c0_187, %c0_188] : memref<2x1x128xf32, #tpu.memory_space<vmem>>, vector<1x1x128xf32>
    %161 = vector.shape_cast %160 : vector<1x1x128xf32> to vector<1x128xf32>
    %162 = vector.shape_cast %159 : vector<1x128xf32> to vector<1x1x128xf32>
    tpu.vector_store %arg16[%c0_186, %c0_187, %c0_188], %162 {strides = array<i32>} : memref<2x1x128xf32, #tpu.memory_space<vmem>>, vector<1x1x128xf32>,
    %c1_i32 = arith.constant 1 : i32
    %c0_i32_189 = arith.constant 0 : i32
    %c0_i32_190 = arith.constant 0 : i32
    %163 = tpu.memref_slice %arg1[%c1_i32, %c0_i32_189, %c0_i32_190] : memref<2x32x256xf32, #tpu.memory_space<vmem>> -> memref<1x32x256xf32, #tpu.memory_space<vmem>>
    %164 = tpu.memref_squeeze %163 : memref<1x32x256xf32, #tpu.memory_space<vmem>> -> memref<32x256xf32, #tpu.memory_space<vmem>>
    %c0_191 = arith.constant 0 : index
    %c0_192 = arith.constant 0 : index
    %165 = vector.load %164[%c0_191, %c0_192] : memref<32x256xf32, #tpu.memory_space<vmem>>, vector<28x256xf32>
    %c0_193 = arith.constant 0 : index
    %c0_194 = arith.constant 0 : index
    %c0_195 = arith.constant 0 : index
    %166 = vector.load %arg2[%c0_193, %c0_194, %c0_195] : memref<5x256x224xf32, #tpu.memory_space<vmem>>, vector<1x256x224xf32>
    %167 = vector.shape_cast %166 : vector<1x256x224xf32> to vector<256x224xf32>
    %cst_196 = arith.constant dense<0.000000e+00> : vector<28x224xf32>
    %168 = tpu.matmul %165, %167, %cst_196 {dimension_numbers = #tpu.dot_dimension_numbers<[1], [0], [0], [1], [0, 0, 1, 1], [], []>} : vector<28x256xf32>, vector<256x224xf32>, vector<28x224xf32> -> vector<28x224xf32>
    %c1_i32_197 = arith.constant 1 : i32
    %c0_i32_198 = arith.constant 0 : i32
    %c0_i32_199 = arith.constant 0 : i32
    %169 = tpu.memref_slice %arg1[%c1_i32_197, %c0_i32_198, %c0_i32_199] : memref<2x32x256xf32, #tpu.memory_space<vmem>> -> memref<1x32x256xf32, #tpu.memory_space<vmem>>
    %170 = tpu.memref_squeeze %169 : memref<1x32x256xf32, #tpu.memory_space<vmem>> -> memref<32x256xf32, #tpu.memory_space<vmem>>
    %c1_200 = arith.constant 1 : index
    %c0_201 = arith.constant 0 : index
    %171 = vector.load %170[%c1_200, %c0_201] : memref<32x256xf32, #tpu.memory_space<vmem>>, vector<28x256xf32>
    %c1_202 = arith.constant 1 : index
    %c0_203 = arith.constant 0 : index
    %c0_204 = arith.constant 0 : index
    %172 = vector.load %arg2[%c1_202, %c0_203, %c0_204] : memref<5x256x224xf32, #tpu.memory_space<vmem>>, vector<1x256x224xf32>
    %173 = vector.shape_cast %172 : vector<1x256x224xf32> to vector<256x224xf32>
    %cst_205 = arith.constant dense<0.000000e+00> : vector<28x224xf32>
    %174 = tpu.matmul %171, %173, %cst_205 {dimension_numbers = #tpu.dot_dimension_numbers<[1], [0], [0], [1], [0, 0, 1, 1], [], []>} : vector<28x256xf32>, vector<256x224xf32>, vector<28x224xf32> -> vector<28x224xf32>
    %175 = arith.addf %168, %174 : vector<28x224xf32>
    %c1_i32_206 = arith.constant 1 : i32
    %c0_i32_207 = arith.constant 0 : i32
    %c0_i32_208 = arith.constant 0 : i32
    %176 = tpu.memref_slice %arg1[%c1_i32_206, %c0_i32_207, %c0_i32_208] : memref<2x32x256xf32, #tpu.memory_space<vmem>> -> memref<1x32x256xf32, #tpu.memory_space<vmem>>
    %177 = tpu.memref_squeeze %176 : memref<1x32x256xf32, #tpu.memory_space<vmem>> -> memref<32x256xf32, #tpu.memory_space<vmem>>
    %c2_209 = arith.constant 2 : index
    %c0_210 = arith.constant 0 : index
    %178 = vector.load %177[%c2_209, %c0_210] : memref<32x256xf32, #tpu.memory_space<vmem>>, vector<28x256xf32>
    %c2_211 = arith.constant 2 : index
    %c0_212 = arith.constant 0 : index
    %c0_213 = arith.constant 0 : index
    %179 = vector.load %arg2[%c2_211, %c0_212, %c0_213] : memref<5x256x224xf32, #tpu.memory_space<vmem>>, vector<1x256x224xf32>
    %180 = vector.shape_cast %179 : vector<1x256x224xf32> to vector<256x224xf32>
    %cst_214 = arith.constant dense<0.000000e+00> : vector<28x224xf32>
    %181 = tpu.matmul %178, %180, %cst_214 {dimension_numbers = #tpu.dot_dimension_numbers<[1], [0], [0], [1], [0, 0, 1, 1], [], []>} : vector<28x256xf32>, vector<256x224xf32>, vector<28x224xf32> -> vector<28x224xf32>
    %182 = arith.addf %175, %181 : vector<28x224xf32>
    %c1_i32_215 = arith.constant 1 : i32
    %c0_i32_216 = arith.constant 0 : i32
    %c0_i32_217 = arith.constant 0 : i32
    %183 = tpu.memref_slice %arg1[%c1_i32_215, %c0_i32_216, %c0_i32_217] : memref<2x32x256xf32, #tpu.memory_space<vmem>> -> memref<1x32x256xf32, #tpu.memory_space<vmem>>
    %184 = tpu.memref_squeeze %183 : memref<1x32x256xf32, #tpu.memory_space<vmem>> -> memref<32x256xf32, #tpu.memory_space<vmem>>
    %c3_218 = arith.constant 3 : index
    %c0_219 = arith.constant 0 : index
    %185 = vector.load %184[%c3_218, %c0_219] : memref<32x256xf32, #tpu.memory_space<vmem>>, vector<28x256xf32>
    %c3_220 = arith.constant 3 : index
    %c0_221 = arith.constant 0 : index
    %c0_222 = arith.constant 0 : index
    %186 = vector.load %arg2[%c3_220, %c0_221, %c0_222] : memref<5x256x224xf32, #tpu.memory_space<vmem>>, vector<1x256x224xf32>
    %187 = vector.shape_cast %186 : vector<1x256x224xf32> to vector<256x224xf32>
    %cst_223 = arith.constant dense<0.000000e+00> : vector<28x224xf32>
    %188 = tpu.matmul %185, %187, %cst_223 {dimension_numbers = #tpu.dot_dimension_numbers<[1], [0], [0], [1], [0, 0, 1, 1], [], []>} : vector<28x256xf32>, vector<256x224xf32>, vector<28x224xf32> -> vector<28x224xf32>
    %189 = arith.addf %182, %188 : vector<28x224xf32>
    %c1_i32_224 = arith.constant 1 : i32
    %c0_i32_225 = arith.constant 0 : i32
    %c0_i32_226 = arith.constant 0 : i32
    %190 = tpu.memref_slice %arg1[%c1_i32_224, %c0_i32_225, %c0_i32_226] : memref<2x32x256xf32, #tpu.memory_space<vmem>> -> memref<1x32x256xf32, #tpu.memory_space<vmem>>
    %191 = tpu.memref_squeeze %190 : memref<1x32x256xf32, #tpu.memory_space<vmem>> -> memref<32x256xf32, #tpu.memory_space<vmem>>
    %c4_227 = arith.constant 4 : index
    %c0_228 = arith.constant 0 : index
    %192 = vector.load %191[%c4_227, %c0_228] : memref<32x256xf32, #tpu.memory_space<vmem>>, vector<28x256xf32>
    %c4_229 = arith.constant 4 : index
    %c0_230 = arith.constant 0 : index
    %c0_231 = arith.constant 0 : index
    %193 = vector.load %arg2[%c4_229, %c0_230, %c0_231] : memref<5x256x224xf32, #tpu.memory_space<vmem>>, vector<1x256x224xf32>
    %194 = vector.shape_cast %193 : vector<1x256x224xf32> to vector<256x224xf32>
    %cst_232 = arith.constant dense<0.000000e+00> : vector<28x224xf32>
    %195 = tpu.matmul %192, %194, %cst_232 {dimension_numbers = #tpu.dot_dimension_numbers<[1], [0], [0], [1], [0, 0, 1, 1], [], []>} : vector<28x256xf32>, vector<256x224xf32>, vector<28x224xf32> -> vector<28x224xf32>
    %196 = arith.addf %189, %195 : vector<28x224xf32>
    %c0_233 = arith.constant 0 : index
    %c0_234 = arith.constant 0 : index
    %197 = vector.load %arg3[%c0_233, %c0_234] : memref<1x224xf32, #tpu.memory_space<vmem>>, vector<1x224xf32>
    %198 = vector.broadcast %197 : vector<1x224xf32> to vector<28x224xf32>
    %199 = arith.addf %196, %198 : vector<28x224xf32>
    %cst_235 = arith.constant 0.000000e+00 : f32
    %200 = vector.broadcast %cst_235 : f32 to vector<28x224xf32>
    %201 = arith.maximumf %199, %200 : vector<28x224xf32>
    %c0_236 = arith.constant 0 : index
    %c0_237 = arith.constant 0 : index
    %c0_238 = arith.constant 0 : index
    %202 = vector.load %arg4[%c0_236, %c0_237, %c0_238] : memref<2x224x128xf32, #tpu.memory_space<vmem>>, vector<1x224x128xf32>
    %203 = vector.shape_cast %202 : vector<1x224x128xf32> to vector<224x128xf32>
    %cst_239 = arith.constant dense<0.000000e+00> : vector<28x128xf32>
    %204 = tpu.matmul %201, %203, %cst_239 {dimension_numbers = #tpu.dot_dimension_numbers<[1], [0], [0], [1], [0, 0, 1, 1], [], []>} : vector<28x224xf32>, vector<224x128xf32>, vector<28x128xf32> -> vector<28x128xf32>
    %c1_240 = arith.constant 1 : index
    %c0_241 = arith.constant 0 : index
    %c0_242 = arith.constant 0 : index
    %205 = vector.load %arg4[%c1_240, %c0_241, %c0_242] : memref<2x224x128xf32, #tpu.memory_space<vmem>>, vector<1x224x128xf32>
    %206 = vector.shape_cast %205 : vector<1x224x128xf32> to vector<224x128xf32>
    %cst_243 = arith.constant dense<0.000000e+00> : vector<28x128xf32>
    %207 = tpu.matmul %201, %206, %cst_243 {dimension_numbers = #tpu.dot_dimension_numbers<[1], [0], [0], [1], [0, 0, 1, 1], [], []>} : vector<28x224xf32>, vector<224x128xf32>, vector<28x128xf32> -> vector<28x128xf32>
    %208 = arith.maximumf %204, %207 : vector<28x128xf32>
    %c0_244 = arith.constant 0 : index
    %c0_245 = arith.constant 0 : index
    %c0_246 = arith.constant 0 : index
    %209 = vector.load %arg5[%c0_244, %c0_245, %c0_246] : memref<2x14x28xf32, #tpu.memory_space<vmem>>, vector<1x14x28xf32>
    %210 = vector.shape_cast %209 : vector<1x14x28xf32> to vector<14x28xf32>
    %cst_247 = arith.constant dense<0.000000e+00> : vector<14x128xf32>
    %211 = tpu.matmul %210, %208, %cst_247 {dimension_numbers = #tpu.dot_dimension_numbers<[1], [0], [0], [1], [0, 0, 1, 1], [], []>} : vector<14x28xf32>, vector<28x128xf32>, vector<14x128xf32> -> vector<14x128xf32>
    %c1_248 = arith.constant 1 : index
    %c0_249 = arith.constant 0 : index
    %c0_250 = arith.constant 0 : index
    %212 = vector.load %arg5[%c1_248, %c0_249, %c0_250] : memref<2x14x28xf32, #tpu.memory_space<vmem>>, vector<1x14x28xf32>
    %213 = vector.shape_cast %212 : vector<1x14x28xf32> to vector<14x28xf32>
    %cst_251 = arith.constant dense<0.000000e+00> : vector<14x128xf32>
    %214 = tpu.matmul %213, %208, %cst_251 {dimension_numbers = #tpu.dot_dimension_numbers<[1], [0], [0], [1], [0, 0, 1, 1], [], []>} : vector<14x28xf32>, vector<28x128xf32>, vector<14x128xf32> -> vector<14x128xf32>
    %215 = arith.maximumf %211, %214 : vector<14x128xf32>
    %c1_252 = arith.constant 1 : index
    %c0_253 = arith.constant 0 : index
    %c0_254 = arith.constant 0 : index
    %216 = vector.load %arg17[%c1_252, %c0_253, %c0_254] : memref<2x14x128xf32, #tpu.memory_space<vmem>>, vector<1x14x128xf32>
    %217 = vector.shape_cast %216 : vector<1x14x128xf32> to vector<14x128xf32>
    %218 = vector.shape_cast %215 : vector<14x128xf32> to vector<1x14x128xf32>
    tpu.vector_store %arg17[%c1_252, %c0_253, %c0_254], %218 {strides = array<i32>} : memref<2x14x128xf32, #tpu.memory_space<vmem>>, vector<1x14x128xf32>,
    %c1_i32_255 = arith.constant 1 : i32
    %c0_i32_256 = arith.constant 0 : i32
    %c0_i32_257 = arith.constant 0 : i32
    %219 = tpu.memref_slice %arg17[%c1_i32_255, %c0_i32_256, %c0_i32_257] : memref<2x14x128xf32, #tpu.memory_space<vmem>> -> memref<1x14x128xf32, #tpu.memory_space<vmem>>
    %220 = tpu.memref_squeeze %219 : memref<1x14x128xf32, #tpu.memory_space<vmem>> -> memref<14x128xf32, #tpu.memory_space<vmem>>
    %c0_258 = arith.constant 0 : index
    %c0_259 = arith.constant 0 : index
    %221 = vector.load %220[%c0_258, %c0_259] : memref<14x128xf32, #tpu.memory_space<vmem>>, vector<10x128xf32>
    %c0_260 = arith.constant 0 : index
    %c0_261 = arith.constant 0 : index
    %c0_262 = arith.constant 0 : index
    %222 = vector.load %arg6[%c0_260, %c0_261, %c0_262] : memref<5x128x160xf32, #tpu.memory_space<vmem>>, vector<1x128x160xf32>
    %223 = vector.shape_cast %222 : vector<1x128x160xf32> to vector<128x160xf32>
    %cst_263 = arith.constant dense<0.000000e+00> : vector<10x160xf32>
    %224 = tpu.matmul %221, %223, %cst_263 {dimension_numbers = #tpu.dot_dimension_numbers<[1], [0], [0], [1], [0, 0, 1, 1], [], []>} : vector<10x128xf32>, vector<128x160xf32>, vector<10x160xf32> -> vector<10x160xf32>
    %c1_i32_264 = arith.constant 1 : i32
    %c0_i32_265 = arith.constant 0 : i32
    %c0_i32_266 = arith.constant 0 : i32
    %225 = tpu.memref_slice %arg17[%c1_i32_264, %c0_i32_265, %c0_i32_266] : memref<2x14x128xf32, #tpu.memory_space<vmem>> -> memref<1x14x128xf32, #tpu.memory_space<vmem>>
    %226 = tpu.memref_squeeze %225 : memref<1x14x128xf32, #tpu.memory_space<vmem>> -> memref<14x128xf32, #tpu.memory_space<vmem>>
    %c1_267 = arith.constant 1 : index
    %c0_268 = arith.constant 0 : index
    %227 = vector.load %226[%c1_267, %c0_268] : memref<14x128xf32, #tpu.memory_space<vmem>>, vector<10x128xf32>
    %c1_269 = arith.constant 1 : index
    %c0_270 = arith.constant 0 : index
    %c0_271 = arith.constant 0 : index
    %228 = vector.load %arg6[%c1_269, %c0_270, %c0_271] : memref<5x128x160xf32, #tpu.memory_space<vmem>>, vector<1x128x160xf32>
    %229 = vector.shape_cast %228 : vector<1x128x160xf32> to vector<128x160xf32>
    %cst_272 = arith.constant dense<0.000000e+00> : vector<10x160xf32>
    %230 = tpu.matmul %227, %229, %cst_272 {dimension_numbers = #tpu.dot_dimension_numbers<[1], [0], [0], [1], [0, 0, 1, 1], [], []>} : vector<10x128xf32>, vector<128x160xf32>, vector<10x160xf32> -> vector<10x160xf32>
    %231 = arith.addf %224, %230 : vector<10x160xf32>
    %c1_i32_273 = arith.constant 1 : i32
    %c0_i32_274 = arith.constant 0 : i32
    %c0_i32_275 = arith.constant 0 : i32
    %232 = tpu.memref_slice %arg17[%c1_i32_273, %c0_i32_274, %c0_i32_275] : memref<2x14x128xf32, #tpu.memory_space<vmem>> -> memref<1x14x128xf32, #tpu.memory_space<vmem>>
    %233 = tpu.memref_squeeze %232 : memref<1x14x128xf32, #tpu.memory_space<vmem>> -> memref<14x128xf32, #tpu.memory_space<vmem>>
    %c2_276 = arith.constant 2 : index
    %c0_277 = arith.constant 0 : index
    %234 = vector.load %233[%c2_276, %c0_277] : memref<14x128xf32, #tpu.memory_space<vmem>>, vector<10x128xf32>
    %c2_278 = arith.constant 2 : index
    %c0_279 = arith.constant 0 : index
    %c0_280 = arith.constant 0 : index
    %235 = vector.load %arg6[%c2_278, %c0_279, %c0_280] : memref<5x128x160xf32, #tpu.memory_space<vmem>>, vector<1x128x160xf32>
    %236 = vector.shape_cast %235 : vector<1x128x160xf32> to vector<128x160xf32>
    %cst_281 = arith.constant dense<0.000000e+00> : vector<10x160xf32>
    %237 = tpu.matmul %234, %236, %cst_281 {dimension_numbers = #tpu.dot_dimension_numbers<[1], [0], [0], [1], [0, 0, 1, 1], [], []>} : vector<10x128xf32>, vector<128x160xf32>, vector<10x160xf32> -> vector<10x160xf32>
    %238 = arith.addf %231, %237 : vector<10x160xf32>
    %c1_i32_282 = arith.constant 1 : i32
    %c0_i32_283 = arith.constant 0 : i32
    %c0_i32_284 = arith.constant 0 : i32
    %239 = tpu.memref_slice %arg17[%c1_i32_282, %c0_i32_283, %c0_i32_284] : memref<2x14x128xf32, #tpu.memory_space<vmem>> -> memref<1x14x128xf32, #tpu.memory_space<vmem>>
    %240 = tpu.memref_squeeze %239 : memref<1x14x128xf32, #tpu.memory_space<vmem>> -> memref<14x128xf32, #tpu.memory_space<vmem>>
    %c3_285 = arith.constant 3 : index
    %c0_286 = arith.constant 0 : index
    %241 = vector.load %240[%c3_285, %c0_286] : memref<14x128xf32, #tpu.memory_space<vmem>>, vector<10x128xf32>
    %c3_287 = arith.constant 3 : index
    %c0_288 = arith.constant 0 : index
    %c0_289 = arith.constant 0 : index
    %242 = vector.load %arg6[%c3_287, %c0_288, %c0_289] : memref<5x128x160xf32, #tpu.memory_space<vmem>>, vector<1x128x160xf32>
    %243 = vector.shape_cast %242 : vector<1x128x160xf32> to vector<128x160xf32>
    %cst_290 = arith.constant dense<0.000000e+00> : vector<10x160xf32>
    %244 = tpu.matmul %241, %243, %cst_290 {dimension_numbers = #tpu.dot_dimension_numbers<[1], [0], [0], [1], [0, 0, 1, 1], [], []>} : vector<10x128xf32>, vector<128x160xf32>, vector<10x160xf32> -> vector<10x160xf32>
    %245 = arith.addf %238, %244 : vector<10x160xf32>
    %c1_i32_291 = arith.constant 1 : i32
    %c0_i32_292 = arith.constant 0 : i32
    %c0_i32_293 = arith.constant 0 : i32
    %246 = tpu.memref_slice %arg17[%c1_i32_291, %c0_i32_292, %c0_i32_293] : memref<2x14x128xf32, #tpu.memory_space<vmem>> -> memref<1x14x128xf32, #tpu.memory_space<vmem>>
    %247 = tpu.memref_squeeze %246 : memref<1x14x128xf32, #tpu.memory_space<vmem>> -> memref<14x128xf32, #tpu.memory_space<vmem>>
    %c4_294 = arith.constant 4 : index
    %c0_295 = arith.constant 0 : index
    %248 = vector.load %247[%c4_294, %c0_295] : memref<14x128xf32, #tpu.memory_space<vmem>>, vector<10x128xf32>
    %c4_296 = arith.constant 4 : index
    %c0_297 = arith.constant 0 : index
    %c0_298 = arith.constant 0 : index
    %249 = vector.load %arg6[%c4_296, %c0_297, %c0_298] : memref<5x128x160xf32, #tpu.memory_space<vmem>>, vector<1x128x160xf32>
    %250 = vector.shape_cast %249 : vector<1x128x160xf32> to vector<128x160xf32>
    %cst_299 = arith.constant dense<0.000000e+00> : vector<10x160xf32>
    %251 = tpu.matmul %248, %250, %cst_299 {dimension_numbers = #tpu.dot_dimension_numbers<[1], [0], [0], [1], [0, 0, 1, 1], [], []>} : vector<10x128xf32>, vector<128x160xf32>, vector<10x160xf32> -> vector<10x160xf32>
    %252 = arith.addf %245, %251 : vector<10x160xf32>
    %c0_300 = arith.constant 0 : index
    %c0_301 = arith.constant 0 : index
    %253 = vector.load %arg7[%c0_300, %c0_301] : memref<1x160xf32, #tpu.memory_space<vmem>>, vector<1x160xf32>
    %254 = vector.broadcast %253 : vector<1x160xf32> to vector<10x160xf32>
    %255 = arith.addf %252, %254 : vector<10x160xf32>
    %cst_302 = arith.constant 0.000000e+00 : f32
    %256 = vector.broadcast %cst_302 : f32 to vector<10x160xf32>
    %257 = arith.maximumf %255, %256 : vector<10x160xf32>
    %c0_303 = arith.constant 0 : index
    %c0_304 = arith.constant 0 : index
    %c0_305 = arith.constant 0 : index
    %258 = vector.load %arg8[%c0_303, %c0_304, %c0_305] : memref<2x160x128xf32, #tpu.memory_space<vmem>>, vector<1x160x128xf32>
    %259 = vector.shape_cast %258 : vector<1x160x128xf32> to vector<160x128xf32>
    %cst_306 = arith.constant dense<0.000000e+00> : vector<10x128xf32>
    %260 = tpu.matmul %257, %259, %cst_306 {dimension_numbers = #tpu.dot_dimension_numbers<[1], [0], [0], [1], [0, 0, 1, 1], [], []>} : vector<10x160xf32>, vector<160x128xf32>, vector<10x128xf32> -> vector<10x128xf32>
    %c1_307 = arith.constant 1 : index
    %c0_308 = arith.constant 0 : index
    %c0_309 = arith.constant 0 : index
    %261 = vector.load %arg8[%c1_307, %c0_308, %c0_309] : memref<2x160x128xf32, #tpu.memory_space<vmem>>, vector<1x160x128xf32>
    %262 = vector.shape_cast %261 : vector<1x160x128xf32> to vector<160x128xf32>
    %cst_310 = arith.constant dense<0.000000e+00> : vector<10x128xf32>
    %263 = tpu.matmul %257, %262, %cst_310 {dimension_numbers = #tpu.dot_dimension_numbers<[1], [0], [0], [1], [0, 0, 1, 1], [], []>} : vector<10x160xf32>, vector<160x128xf32>, vector<10x128xf32> -> vector<10x128xf32>
    %264 = arith.maximumf %260, %263 : vector<10x128xf32>
    %c0_311 = arith.constant 0 : index
    %c0_312 = arith.constant 0 : index
    %c0_313 = arith.constant 0 : index
    %265 = vector.load %arg9[%c0_311, %c0_312, %c0_313] : memref<2x5x10xf32, #tpu.memory_space<vmem>>, vector<1x5x10xf32>
    %266 = vector.shape_cast %265 : vector<1x5x10xf32> to vector<5x10xf32>
    %cst_314 = arith.constant dense<0.000000e+00> : vector<5x128xf32>
    %267 = tpu.matmul %266, %264, %cst_314 {dimension_numbers = #tpu.dot_dimension_numbers<[1], [0], [0], [1], [0, 0, 1, 1], [], []>} : vector<5x10xf32>, vector<10x128xf32>, vector<5x128xf32> -> vector<5x128xf32>
    %c1_315 = arith.constant 1 : index
    %c0_316 = arith.constant 0 : index
    %c0_317 = arith.constant 0 : index
    %268 = vector.load %arg9[%c1_315, %c0_316, %c0_317] : memref<2x5x10xf32, #tpu.memory_space<vmem>>, vector<1x5x10xf32>
    %269 = vector.shape_cast %268 : vector<1x5x10xf32> to vector<5x10xf32>
    %cst_318 = arith.constant dense<0.000000e+00> : vector<5x128xf32>
    %270 = tpu.matmul %269, %264, %cst_318 {dimension_numbers = #tpu.dot_dimension_numbers<[1], [0], [0], [1], [0, 0, 1, 1], [], []>} : vector<5x10xf32>, vector<10x128xf32>, vector<5x128xf32> -> vector<5x128xf32>
    %271 = arith.maximumf %267, %270 : vector<5x128xf32>
    %c1_319 = arith.constant 1 : index
    %c0_320 = arith.constant 0 : index
    %c0_321 = arith.constant 0 : index
    %272 = vector.load %arg18[%c1_319, %c0_320, %c0_321] : memref<2x5x128xf32, #tpu.memory_space<vmem>>, vector<1x5x128xf32>
    %273 = vector.shape_cast %272 : vector<1x5x128xf32> to vector<5x128xf32>
    %274 = vector.shape_cast %271 : vector<5x128xf32> to vector<1x5x128xf32>
    tpu.vector_store %arg18[%c1_319, %c0_320, %c0_321], %274 {strides = array<i32>} : memref<2x5x128xf32, #tpu.memory_space<vmem>>, vector<1x5x128xf32>,
    %c0_322 = arith.constant 0 : index
    %c0_323 = arith.constant 0 : index
    %275 = vector.load %arg11[%c0_322, %c0_323] : memref<1x128xf32, #tpu.memory_space<vmem>>, vector<1x128xf32>
    %c1_i32_324 = arith.constant 1 : i32
    %c0_i32_325 = arith.constant 0 : i32
    %c0_i32_326 = arith.constant 0 : i32
    %276 = tpu.memref_slice %arg18[%c1_i32_324, %c0_i32_325, %c0_i32_326] : memref<2x5x128xf32, #tpu.memory_space<vmem>> -> memref<1x5x128xf32, #tpu.memory_space<vmem>>
    %277 = tpu.memref_squeeze %276 : memref<1x5x128xf32, #tpu.memory_space<vmem>> -> memref<5x128xf32, #tpu.memory_space<vmem>>
    %c0_327 = arith.constant 0 : index
    %c0_328 = arith.constant 0 : index
    %278 = vector.load %277[%c0_327, %c0_328] : memref<5x128xf32, #tpu.memory_space<vmem>>, vector<1x128xf32>
    %c0_329 = arith.constant 0 : index
    %c0_330 = arith.constant 0 : index
    %c0_331 = arith.constant 0 : index
    %279 = vector.load %arg10[%c0_329, %c0_330, %c0_331] : memref<5x128x128xf32, #tpu.memory_space<vmem>>, vector<1x128x128xf32>
    %280 = vector.shape_cast %279 : vector<1x128x128xf32> to vector<128x128xf32>
    %cst_332 = arith.constant dense<0.000000e+00> : vector<1x128xf32>
    %281 = tpu.matmul %278, %280, %cst_332 {dimension_numbers = #tpu.dot_dimension_numbers<[1], [0], [0], [1], [0, 0, 1, 1], [], []>} : vector<1x128xf32>, vector<128x128xf32>, vector<1x128xf32> -> vector<1x128xf32>
    %282 = arith.addf %275, %281 : vector<1x128xf32>
    %c1_i32_333 = arith.constant 1 : i32
    %c0_i32_334 = arith.constant 0 : i32
    %c0_i32_335 = arith.constant 0 : i32
    %283 = tpu.memref_slice %arg18[%c1_i32_333, %c0_i32_334, %c0_i32_335] : memref<2x5x128xf32, #tpu.memory_space<vmem>> -> memref<1x5x128xf32, #tpu.memory_space<vmem>>
    %284 = tpu.memref_squeeze %283 : memref<1x5x128xf32, #tpu.memory_space<vmem>> -> memref<5x128xf32, #tpu.memory_space<vmem>>
    %c1_336 = arith.constant 1 : index
    %c0_337 = arith.constant 0 : index
    %285 = vector.load %284[%c1_336, %c0_337] : memref<5x128xf32, #tpu.memory_space<vmem>>, vector<1x128xf32>
    %c1_338 = arith.constant 1 : index
    %c0_339 = arith.constant 0 : index
    %c0_340 = arith.constant 0 : index
    %286 = vector.load %arg10[%c1_338, %c0_339, %c0_340] : memref<5x128x128xf32, #tpu.memory_space<vmem>>, vector<1x128x128xf32>
    %287 = vector.shape_cast %286 : vector<1x128x128xf32> to vector<128x128xf32>
    %cst_341 = arith.constant dense<0.000000e+00> : vector<1x128xf32>
    %288 = tpu.matmul %285, %287, %cst_341 {dimension_numbers = #tpu.dot_dimension_numbers<[1], [0], [0], [1], [0, 0, 1, 1], [], []>} : vector<1x128xf32>, vector<128x128xf32>, vector<1x128xf32> -> vector<1x128xf32>
    %289 = arith.addf %282, %288 : vector<1x128xf32>
    %c1_i32_342 = arith.constant 1 : i32
    %c0_i32_343 = arith.constant 0 : i32
    %c0_i32_344 = arith.constant 0 : i32
    %290 = tpu.memref_slice %arg18[%c1_i32_342, %c0_i32_343, %c0_i32_344] : memref<2x5x128xf32, #tpu.memory_space<vmem>> -> memref<1x5x128xf32, #tpu.memory_space<vmem>>
    %291 = tpu.memref_squeeze %290 : memref<1x5x128xf32, #tpu.memory_space<vmem>> -> memref<5x128xf32, #tpu.memory_space<vmem>>
    %c2_345 = arith.constant 2 : index
    %c0_346 = arith.constant 0 : index
    %292 = vector.load %291[%c2_345, %c0_346] : memref<5x128xf32, #tpu.memory_space<vmem>>, vector<1x128xf32>
    %c2_347 = arith.constant 2 : index
    %c0_348 = arith.constant 0 : index
    %c0_349 = arith.constant 0 : index
    %293 = vector.load %arg10[%c2_347, %c0_348, %c0_349] : memref<5x128x128xf32, #tpu.memory_space<vmem>>, vector<1x128x128xf32>
    %294 = vector.shape_cast %293 : vector<1x128x128xf32> to vector<128x128xf32>
    %cst_350 = arith.constant dense<0.000000e+00> : vector<1x128xf32>
    %295 = tpu.matmul %292, %294, %cst_350 {dimension_numbers = #tpu.dot_dimension_numbers<[1], [0], [0], [1], [0, 0, 1, 1], [], []>} : vector<1x128xf32>, vector<128x128xf32>, vector<1x128xf32> -> vector<1x128xf32>
    %296 = arith.addf %289, %295 : vector<1x128xf32>
    %c1_i32_351 = arith.constant 1 : i32
    %c0_i32_352 = arith.constant 0 : i32
    %c0_i32_353 = arith.constant 0 : i32
    %297 = tpu.memref_slice %arg18[%c1_i32_351, %c0_i32_352, %c0_i32_353] : memref<2x5x128xf32, #tpu.memory_space<vmem>> -> memref<1x5x128xf32, #tpu.memory_space<vmem>>
    %298 = tpu.memref_squeeze %297 : memref<1x5x128xf32, #tpu.memory_space<vmem>> -> memref<5x128xf32, #tpu.memory_space<vmem>>
    %c3_354 = arith.constant 3 : index
    %c0_355 = arith.constant 0 : index
    %299 = vector.load %298[%c3_354, %c0_355] : memref<5x128xf32, #tpu.memory_space<vmem>>, vector<1x128xf32>
    %c3_356 = arith.constant 3 : index
    %c0_357 = arith.constant 0 : index
    %c0_358 = arith.constant 0 : index
    %300 = vector.load %arg10[%c3_356, %c0_357, %c0_358] : memref<5x128x128xf32, #tpu.memory_space<vmem>>, vector<1x128x128xf32>
    %301 = vector.shape_cast %300 : vector<1x128x128xf32> to vector<128x128xf32>
    %cst_359 = arith.constant dense<0.000000e+00> : vector<1x128xf32>
    %302 = tpu.matmul %299, %301, %cst_359 {dimension_numbers = #tpu.dot_dimension_numbers<[1], [0], [0], [1], [0, 0, 1, 1], [], []>} : vector<1x128xf32>, vector<128x128xf32>, vector<1x128xf32> -> vector<1x128xf32>
    %303 = arith.addf %296, %302 : vector<1x128xf32>
    %c1_i32_360 = arith.constant 1 : i32
    %c0_i32_361 = arith.constant 0 : i32
    %c0_i32_362 = arith.constant 0 : i32
    %304 = tpu.memref_slice %arg18[%c1_i32_360, %c0_i32_361, %c0_i32_362] : memref<2x5x128xf32, #tpu.memory_space<vmem>> -> memref<1x5x128xf32, #tpu.memory_space<vmem>>
    %305 = tpu.memref_squeeze %304 : memref<1x5x128xf32, #tpu.memory_space<vmem>> -> memref<5x128xf32, #tpu.memory_space<vmem>>
    %c4_363 = arith.constant 4 : index
    %c0_364 = arith.constant 0 : index
    %306 = vector.load %305[%c4_363, %c0_364] : memref<5x128xf32, #tpu.memory_space<vmem>>, vector<1x128xf32>
    %c4_365 = arith.constant 4 : index
    %c0_366 = arith.constant 0 : index
    %c0_367 = arith.constant 0 : index
    %307 = vector.load %arg10[%c4_365, %c0_366, %c0_367] : memref<5x128x128xf32, #tpu.memory_space<vmem>>, vector<1x128x128xf32>
    %308 = vector.shape_cast %307 : vector<1x128x128xf32> to vector<128x128xf32>
    %cst_368 = arith.constant dense<0.000000e+00> : vector<1x128xf32>
    %309 = tpu.matmul %306, %308, %cst_368 {dimension_numbers = #tpu.dot_dimension_numbers<[1], [0], [0], [1], [0, 0, 1, 1], [], []>} : vector<1x128xf32>, vector<128x128xf32>, vector<1x128xf32> -> vector<1x128xf32>
    %310 = arith.addf %303, %309 : vector<1x128xf32>
    %cst_369 = arith.constant 0.000000e+00 : f32
    %311 = vector.broadcast %cst_369 : f32 to vector<1x128xf32>
    %312 = arith.maximumf %310, %311 : vector<1x128xf32>
    %c0_370 = arith.constant 0 : index
    %c0_371 = arith.constant 0 : index
    %313 = vector.load %arg12[%c0_370, %c0_371] : memref<128x128xf32, #tpu.memory_space<vmem>>, vector<128x128xf32>
    %cst_372 = arith.constant dense<0.000000e+00> : vector<1x128xf32>
    %314 = tpu.matmul %312, %313, %cst_372 {dimension_numbers = #tpu.dot_dimension_numbers<[1], [0], [0], [1], [0, 0, 1, 1], [], []>} : vector<1x128xf32>, vector<128x128xf32>, vector<1x128xf32> -> vector<1x128xf32>
    %c0_373 = arith.constant 0 : index
    %c0_374 = arith.constant 0 : index
    %315 = vector.load %arg13[%c0_373, %c0_374] : memref<1x128xf32, #tpu.memory_space<vmem>>, vector<1x128xf32>
    %316 = arith.addf %314, %315 : vector<1x128xf32>
    %cst_375 = arith.constant 0.000000e+00 : f32
    %317 = vector.broadcast %cst_375 : f32 to vector<1x128xf32>
    %318 = arith.maximumf %316, %317 : vector<1x128xf32>
    %c0_376 = arith.constant 0 : index
    %c0_377 = arith.constant 0 : index
    %319 = vector.load %arg14[%c0_376, %c0_377] : memref<128x128xf32, #tpu.memory_space<vmem>>, vector<128x128xf32>
    %cst_378 = arith.constant dense<0.000000e+00> : vector<1x128xf32>
    %320 = tpu.matmul %318, %319, %cst_378 {dimension_numbers = #tpu.dot_dimension_numbers<[1], [0], [0], [1], [0, 0, 1, 1], [], []>} : vector<1x128xf32>, vector<128x128xf32>, vector<1x128xf32> -> vector<1x128xf32>
    %c0_379 = arith.constant 0 : index
    %c0_380 = arith.constant 0 : index
    %321 = vector.load %arg15[%c0_379, %c0_380] : memref<1x128xf32, #tpu.memory_space<vmem>>, vector<1x128xf32>
    %322 = arith.addf %320, %321 : vector<1x128xf32>
    %c1_381 = arith.constant 1 : index
    %c0_382 = arith.constant 0 : index
    %c0_383 = arith.constant 0 : index
    %323 = vector.load %arg16[%c1_381, %c0_382, %c0_383] : memref<2x1x128xf32, #tpu.memory_space<vmem>>, vector<1x1x128xf32>
    %324 = vector.shape_cast %323 : vector<1x1x128xf32> to vector<1x128xf32>
    %325 = vector.shape_cast %322 : vector<1x128xf32> to vector<1x1x128xf32>
    tpu.vector_store %arg16[%c1_381, %c0_382, %c0_383], %325 {strides = array<i32>} : memref<2x1x128xf32, #tpu.memory_space<vmem>>, vector<1x1x128xf32>,
    return
  }
  func.func @transform_0(%arg0: i32) -> (i32, i32, i32) {
    %c0_i32 = arith.constant 0 : i32
    %c0_i32_0 = arith.constant 0 : i32
    %c0_i32_1 = arith.constant 0 : i32
    return %arg0, %c0_i32, %c0_i32_0 : i32, i32, i32
  }
  func.func @transform_1(%arg0: i32) -> (i32, i32, i32) {
    %c0_i32 = arith.constant 0 : i32
    %c0_i32_0 = arith.constant 0 : i32
    %c0_i32_1 = arith.constant 0 : i32
    %c0_i32_2 = arith.constant 0 : i32
    return %c0_i32, %c0_i32_0, %c0_i32_1 : i32, i32, i32
  }
  func.func @transform_2(%arg0: i32) -> (i32, i32) {
    %c0_i32 = arith.constant 0 : i32
    %c0_i32_0 = arith.constant 0 : i32
    %c0_i32_1 = arith.constant 0 : i32
    return %c0_i32, %c0_i32_0 : i32, i32
  }
  func.func @transform_3(%arg0: i32) -> (i32, i32, i32) {
    %c0_i32 = arith.constant 0 : i32
    %c0_i32_0 = arith.constant 0 : i32
    %c0_i32_1 = arith.constant 0 : i32
    %c0_i32_2 = arith.constant 0 : i32
    return %c0_i32, %c0_i32_0, %c0_i32_1 : i32, i32, i32
  }
  func.func @transform_4(%arg0: i32) -> (i32, i32, i32) {
    %c0_i32 = arith.constant 0 : i32
    %c0_i32_0 = arith.constant 0 : i32
    %c0_i32_1 = arith.constant 0 : i32
    %c0_i32_2 = arith.constant 0 : i32
    return %c0_i32, %c0_i32_0, %c0_i32_1 : i32, i32, i32
  }
  func.func @transform_5(%arg0: i32) -> (i32, i32, i32) {
    %c0_i32 = arith.constant 0 : i32
    %c0_i32_0 = arith.constant 0 : i32
    %c0_i32_1 = arith.constant 0 : i32
    %c0_i32_2 = arith.constant 0 : i32
    return %c0_i32, %c0_i32_0, %c0_i32_1 : i32, i32, i32
  }
  func.func @transform_6(%arg0: i32) -> (i32, i32) {
    %c0_i32 = arith.constant 0 : i32
    %c0_i32_0 = arith.constant 0 : i32
    %c0_i32_1 = arith.constant 0 : i32
    return %c0_i32, %c0_i32_0 : i32, i32
  }
  func.func @transform_7(%arg0: i32) -> (i32, i32, i32) {
    %c0_i32 = arith.constant 0 : i32
    %c0_i32_0 = arith.constant 0 : i32
    %c0_i32_1 = arith.constant 0 : i32
    %c0_i32_2 = arith.constant 0 : i32
    return %c0_i32, %c0_i32_0, %c0_i32_1 : i32, i32, i32
  }
  func.func @transform_8(%arg0: i32) -> (i32, i32, i32) {
    %c0_i32 = arith.constant 0 : i32
    %c0_i32_0 = arith.constant 0 : i32
    %c0_i32_1 = arith.constant 0 : i32
    %c0_i32_2 = arith.constant 0 : i32
    return %c0_i32, %c0_i32_0, %c0_i32_1 : i32, i32, i32
  }
  func.func @transform_9(%arg0: i32) -> (i32, i32, i32) {
    %c0_i32 = arith.constant 0 : i32
    %c0_i32_0 = arith.constant 0 : i32
    %c0_i32_1 = arith.constant 0 : i32
    %c0_i32_2 = arith.constant 0 : i32
    return %c0_i32, %c0_i32_0, %c0_i32_1 : i32, i32, i32
  }
  func.func @transform_10(%arg0: i32) -> (i32, i32) {
    %c0_i32 = arith.constant 0 : i32
    %c0_i32_0 = arith.constant 0 : i32
    %c0_i32_1 = arith.constant 0 : i32
    return %c0_i32, %c0_i32_0 : i32, i32
  }
  func.func @transform_11(%arg0: i32) -> (i32, i32) {
    %c0_i32 = arith.constant 0 : i32
    %c0_i32_0 = arith.constant 0 : i32
    %c0_i32_1 = arith.constant 0 : i32
    return %c0_i32, %c0_i32_0 : i32, i32
  }
  func.func @transform_12(%arg0: i32) -> (i32, i32) {
    %c0_i32 = arith.constant 0 : i32
    %c0_i32_0 = arith.constant 0 : i32
    %c0_i32_1 = arith.constant 0 : i32
    return %c0_i32, %c0_i32_0 : i32, i32
  }
  func.func @transform_13(%arg0: i32) -> (i32, i32) {
    %c0_i32 = arith.constant 0 : i32
    %c0_i32_0 = arith.constant 0 : i32
    %c0_i32_1 = arith.constant 0 : i32
    return %c0_i32, %c0_i32_0 : i32, i32
  }
  func.func @transform_14(%arg0: i32) -> (i32, i32) {
    %c0_i32 = arith.constant 0 : i32
    %c0_i32_0 = arith.constant 0 : i32
    %c0_i32_1 = arith.constant 0 : i32
    return %c0_i32, %c0_i32_0 : i32, i32
  }
  func.func @transform_15(%arg0: i32) -> (i32, i32, i32) {
    %c0_i32 = arith.constant 0 : i32
    %c0_i32_0 = arith.constant 0 : i32
    %c0_i32_1 = arith.constant 0 : i32
    return %arg0, %c0_i32, %c0_i32_0 : i32, i32, i32
  }
}

</mosaic_0001>

<bundles_post_ra>
// kernel: net_forward.1
= control target key start
LH: loop header
LB: loop body
LE: loop exit
PB: predicated region body
PF: predicated region fallthrough
CT: control target
= control target key end

     0   :  { %vm200_vm0 = vcmask 1046528   ;;  %s10819_s0 = inlined_call_operand.vmem [shape: f32[2,32,256], index: 0, kind: input, shape index: {}]   ;;  %s10820_s1 = inlined_call_operand.vmem [shape: f32[5,256,224], index: 1, kind: input, shape index: {}]   ;;  %s10821_s2 = inlined_call_operand.vmem [shape: f32[1,224], index: 2, kind: input, shape index: {}]   ;;  %s10822_s3 = inlined_call_operand.vmem [shape: f32[2,224,128], index: 3, kind: input, shape index: {}]   ;;  %s10823_s4 = inlined_call_operand.vmem [shape: f32[2,14,28], index: 4, kind: input, shape index: {}]   ;;  %s10824_s5 = inlined_call_operand.vmem [shape: f32[5,128,160], index: 5, kind: input, shape index: {}]   ;;  %s10825_s6 = inlined_call_operand.vmem [shape: f32[1,160], index: 6, kind: input, shape index: {}]   ;;  %s10826_s7 = inlined_call_operand.vmem [shape: f32[2,160,128], index: 7, kind: input, shape index: {}]   ;;  %s10827_s8 = inlined_call_operand.vmem [shape: f32[2,5,10], index: 8, kind: input, shape index: {}]   ;;  %s10828_s9 = inlined_call_operand.vmem [shape: f32[5,128,128], index: 9, kind: input, shape index: {}]   ;;  %s10829_s10 = inlined_call_operand.vmem [shape: f32[1,128], index: 10, kind: input, shape index: {}]   ;;  %s10830_s11 = inlined_call_operand.vmem [shape: f32[128,128], index: 11, kind: input, shape index: {}]   ;;  %s10831_s12 = inlined_call_operand.vmem [shape: f32[1,128], index: 12, kind: input, shape index: {}]   ;;  %s10832_s13 = inlined_call_operand.vmem [shape: f32[128,128], index: 13, kind: input, shape index: {}]   ;;  %s10833_s14 = inlined_call_operand.vmem [shape: f32[1,128], index: 14, kind: input, shape index: {}]   ;;  %s10834_s15 = inlined_call_operand.hbm [shape: f32[2,1,128], index: 15, kind: output, shape index: {}]  }
   0x1   :  { %v4572_v0 = vld [vmem:[%s10820_s1 + $0x2f0] sm:$0xff]  ;;  %v4573_v2 = vld [vmem:[%s10820_s1 + $0x2f8] sm:$0xff]  ;;  %v4570_v4 = vld [vmem:[%s10820_s1 + $0x2e0] sm:$0xff] }
   0x2   :  { %v4604_v1 = vld [vmem:[%s10820_s1 + $0x3f0] sm:$0xff]  ;;  %223 = vmatpush.msra.mxu0 %v4572_v0  ;;  %v4605_v3 = vld [vmem:[%s10820_s1 + $0x3f8] sm:$0xff]  ;;  %v4602_v5 = vld [vmem:[%s10820_s1 + $0x3e0] sm:$0xff]  ;;  %281 = vmatpush.msra.mxu2 %v4573_v2 }
   0x3   :  { %252 = vmatpush.msra.mxu1 %v4604_v1  ;;  %310 = vmatpush.msra.mxu3 %v4605_v3  ;;  %v4571_v6 = vld [vmem:[%s10820_s1 + $0x2e8] sm:$0xff]  ;;  %v4568_v8 = vld [vmem:[%s10820_s1 + $0x2d0] sm:$0xff]  ;;  %v4569_v10 = vld [vmem:[%s10820_s1 + $0x2d8] sm:$0xff] }
   0x4   :  { %v4603_v7 = vld [vmem:[%s10820_s1 + $0x3e8] sm:$0xff]  ;;  %224 = vmatpush.msra.mxu0 %v4570_v4  ;;  %v4600_v9 = vld [vmem:[%s10820_s1 + $0x3d0] sm:$0xff]  ;;  %v4601_v11 = vld [vmem:[%s10820_s1 + $0x3d8] sm:$0xff]  ;;  %282 = vmatpush.msra.mxu2 %v4571_v6 }
   0x5   :  { %253 = vmatpush.msra.mxu1 %v4602_v5  ;;  %311 = vmatpush.msra.mxu3 %v4603_v7  ;;  %v4566_v12 = vld [vmem:[%s10820_s1 + $0x2c0] sm:$0xff]  ;;  %v4567_v14 = vld [vmem:[%s10820_s1 + $0x2c8] sm:$0xff]  ;;  %v4564_v16 = vld [vmem:[%s10820_s1 + $0x2b0] sm:$0xff] }
   0x6   :  { %v4598_v13 = vld [vmem:[%s10820_s1 + $0x3c0] sm:$0xff]  ;;  %225 = vmatpush.msra.mxu0 %v4568_v8  ;;  %v4599_v15 = vld [vmem:[%s10820_s1 + $0x3c8] sm:$0xff]  ;;  %283 = vmatpush.msra.mxu2 %v4569_v10  ;;  %v4596_v17 = vld [vmem:[%s10820_s1 + $0x3b0] sm:$0xff] }
   0x7   :  { %254 = vmatpush.msra.mxu1 %v4600_v9  ;;  %312 = vmatpush.msra.mxu3 %v4601_v11  ;;  %v4565_v18 = vld [vmem:[%s10820_s1 + $0x2b8] sm:$0xff]  ;;  %v4562_v20 = vld [vmem:[%s10820_s1 + $0x2a0] sm:$0xff]  ;;  %v4563_v22 = vld [vmem:[%s10820_s1 + $0x2a8] sm:$0xff] }
   0x8   :  { %226 = vmatpush.msra.mxu0 %v4566_v12  ;;  %v4597_v19 = vld [vmem:[%s10820_s1 + $0x3b8] sm:$0xff]  ;;  %284 = vmatpush.msra.mxu2 %v4567_v14  ;;  %v4594_v21 = vld [vmem:[%s10820_s1 + $0x3a0] sm:$0xff]  ;;  %v4595_v23 = vld [vmem:[%s10820_s1 + $0x3a8] sm:$0xff] }
   0x9   :  { %255 = vmatpush.msra.mxu1 %v4598_v13  ;;  %313 = vmatpush.msra.mxu3 %v4599_v15  ;;  %v4560_v24 = vld [vmem:[%s10820_s1 + $0x290] sm:$0xff]  ;;  %v4561_v26 = vld [vmem:[%s10820_s1 + $0x298] sm:$0xff]  ;;  %v4558_v28 = vld [vmem:[%s10820_s1 + $0x280] sm:$0xff] }
   0xa   :  { %227 = vmatpush.msra.mxu0 %v4564_v16  ;;  %285 = vmatpush.msra.mxu2 %v4565_v18  ;;  %v4592_v25 = vld [vmem:[%s10820_s1 + $0x390] sm:$0xff]  ;;  %v4593_v27 = vld [vmem:[%s10820_s1 + $0x398] sm:$0xff]  ;;  %v4590_v29 = vld [vmem:[%s10820_s1 + $0x380] sm:$0xff] }
   0xb   :  { %256 = vmatpush.msra.mxu1 %v4596_v17  ;;  %314 = vmatpush.msra.mxu3 %v4597_v19  ;;  %v4559_v30 = vld [vmem:[%s10820_s1 + $0x288] sm:$0xff]  ;;  %v4556_v32 = vld [vmem:[%s10820_s1 + $0x270] sm:$0xff]  ;;  %v4557_v34 = vld [vmem:[%s10820_s1 + $0x278] sm:$0xff] }
   0xc   :  { %228 = vmatpush.msra.mxu0 %v4562_v20  ;;  %286 = vmatpush.msra.mxu2 %v4563_v22  ;;  %v4591_v31 = vld [vmem:[%s10820_s1 + $0x388] sm:$0xff]  ;;  %v4588_v33 = vld [vmem:[%s10820_s1 + $0x370] sm:$0xff]  ;;  %v4589_v35 = vld [vmem:[%s10820_s1 + $0x378] sm:$0xff] }
   0xd   :  { %257 = vmatpush.msra.mxu1 %v4594_v21  ;;  %315 = vmatpush.msra.mxu3 %v4595_v23  ;;  %v4554_v36 = vld [vmem:[%s10820_s1 + $0x260] sm:$0xff]  ;;  %v4555_v38 = vld [vmem:[%s10820_s1 + $0x268] sm:$0xff]  ;;  %v4552_v40 = vld [vmem:[%s10820_s1 + $0x250] sm:$0xff] }
   0xe   :  { %229 = vmatpush.msra.mxu0 %v4560_v24  ;;  %287 = vmatpush.msra.mxu2 %v4561_v26  ;;  %v4586_v37 = vld [vmem:[%s10820_s1 + $0x360] sm:$0xff]  ;;  %v4587_v39 = vld [vmem:[%s10820_s1 + $0x368] sm:$0xff]  ;;  %v4584_v41 = vld [vmem:[%s10820_s1 + $0x350] sm:$0xff] }
   0xf   :  { %258 = vmatpush.msra.mxu1 %v4592_v25  ;;  %316 = vmatpush.msra.mxu3 %v4593_v27  ;;  %v4553_v42 = vld [vmem:[%s10820_s1 + $0x258] sm:$0xff]  ;;  %v4550_v44 = vld [vmem:[%s10820_s1 + $0x240] sm:$0xff]  ;;  %v4551_v46 = vld [vmem:[%s10820_s1 + $0x248] sm:$0xff] }
  0x10   :  { %230 = vmatpush.msra.mxu0 %v4558_v28  ;;  %288 = vmatpush.msra.mxu2 %v4559_v30  ;;  %v4585_v43 = vld [vmem:[%s10820_s1 + $0x358] sm:$0xff]  ;;  %v4582_v45 = vld [vmem:[%s10820_s1 + $0x340] sm:$0xff]  ;;  %v4583_v47 = vld [vmem:[%s10820_s1 + $0x348] sm:$0xff] }
  0x11   :  { %259 = vmatpush.msra.mxu1 %v4590_v29  ;;  %317 = vmatpush.msra.mxu3 %v4591_v31  ;;  %v4548_v48 = vld [vmem:[%s10820_s1 + $0x230] sm:$0xff]  ;;  %v4549_v50 = vld [vmem:[%s10820_s1 + $0x238] sm:$0xff]  ;;  %v123_v53 = vld [vmem:[%s10819_s0] sm:$0xfe] }
  0x12   :  { %231 = vmatpush.msra.mxu0 %v4556_v32  ;;  %289 = vmatpush.msra.mxu2 %v4557_v34  ;;  %v4580_v49 = vld [vmem:[%s10820_s1 + $0x330] sm:$0xff]  ;;  %v4581_v51 = vld [vmem:[%s10820_s1 + $0x338] sm:$0xff]  ;;  %v124_v55 = vld [vmem:[%s10819_s0 + $0x8] sm:$0xfe]  ;;  %v201_v62 = vrot.slane %v123_v53, 1 }
  0x13   :  { %260 = vmatpush.msra.mxu1 %v4588_v33  ;;  %318 = vmatpush.msra.mxu3 %v4589_v35  ;;  %v5887_v52 = vld [vmem:[%s10819_s0 + $0x10] sm:$0xff]  ;;  %v5895_v54 = vld [vmem:[%s10819_s0 + $0x18] sm:$0xff]  ;;  %v4546_v56 = vld [vmem:[%s10820_s1 + $0x220] sm:$0xff]  ;;  %v204_v0 = vrot.slane %v124_v55, 1 }
  0x14   :  { %232 = vmatpush.msra.mxu0 %v4554_v36  ;;  %290 = vmatpush.msra.mxu2 %v4555_v38  ;;  %v4578_v57 = vld [vmem:[%s10820_s1 + $0x320] sm:$0xff]  ;;  %v4547_v58 = vld [vmem:[%s10820_s1 + $0x228] sm:$0xff]  ;;  %v4544_v60 = vld [vmem:[%s10820_s1 + $0x210] sm:$0xff]  ;;  %v202_v63 = vrot.slane %v5887_v52, 1  ;;  %v205_v1 = vrot.slane %v5895_v54, 1 }
  0x15   :  { %261 = vmatpush.msra.mxu1 %v4586_v37  ;;  %319 = vmatpush.msra.mxu3 %v4587_v39  ;;  %v4579_v59 = vld [vmem:[%s10820_s1 + $0x328] sm:$0xff]  ;;  %v4576_v61 = vld [vmem:[%s10820_s1 + $0x310] sm:$0xff]  ;;  %v4545_v2 = vld [vmem:[%s10820_s1 + $0x218] sm:$0xff] }
  0x16   :  { %233 = vmatpush.msra.mxu0 %v4552_v40  ;;  %291 = vmatpush.msra.mxu2 %v4553_v42  ;;  %v4577_v3 = vld [vmem:[%s10820_s1 + $0x318] sm:$0xff]  ;;  %v4542_v4 = vld [vmem:[%s10820_s1 + $0x200] sm:$0xff]  ;;  %v4543_v6 = vld [vmem:[%s10820_s1 + $0x208] sm:$0xff]  ;;  %v203_v8 = vsel %vm200_vm0, %v201_v62, %v202_v63  ;;  %v206_v9 = vsel %vm200_vm0, %v204_v0, %v205_v1 }
  0x17   :  { %262 = vmatpush.msra.mxu1 %v4584_v41  ;;  %320 = vmatpush.msra.mxu3 %v4585_v43  ;;  %v4574_v5 = vld [vmem:[%s10820_s1 + $0x300] sm:$0xff]  ;;  %v4575_v7 = vld [vmem:[%s10820_s1 + $0x308] sm:$0xff]  ;;  %v89_v10 = vld [vmem:[%s10820_s1 + $0xf0] sm:$0xff] }
  0x18   :  { %234 = vmatpush.msra.mxu0 %v4550_v44  ;;  %292 = vmatpush.msra.mxu2 %v4551_v46  ;;  %v121_v11 = vld [vmem:[%s10820_s1 + $0x1f0] sm:$0xff]  ;;  %v90_v12 = vld [vmem:[%s10820_s1 + $0xf8] sm:$0xff]  ;;  %v5955_v14 = vld [vmem:[%s10819_s0 + $0x20] sm:$0xff] }
  0x19   :  { %263 = vmatpush.msra.mxu1 %v4582_v45  ;;  %321 = vmatpush.msra.mxu3 %v4583_v47  ;;  %v122_v13 = vld [vmem:[%s10820_s1 + $0x1f8] sm:$0xff]  ;;  %v5960_v15 = vld [vmem:[%s10819_s0 + $0x28] sm:$0xff]  ;;  %v87_v16 = vld [vmem:[%s10820_s1 + $0xe0] sm:$0xff]  ;;  %v207_v22 = vrot.slane %v5955_v14, 1 }
  0x1a   :  { %235 = vmatpush.msra.mxu0 %v4548_v48  ;;  %293 = vmatpush.msra.mxu2 %v4549_v50  ;;  %v119_v17 = vld [vmem:[%s10820_s1 + $0x1e0] sm:$0xff]  ;;  %v88_v18 = vld [vmem:[%s10820_s1 + $0xe8] sm:$0xff]  ;;  %v85_v20 = vld [vmem:[%s10820_s1 + $0xd0] sm:$0xff]  ;;  %v209_v23 = vrot.slane %v5960_v15, 1 }
  0x1b   :  { %264 = vmatpush.msra.mxu1 %v4580_v49  ;;  %322 = vmatpush.msra.mxu3 %v4581_v51  ;;  %v120_v19 = vld [vmem:[%s10820_s1 + $0x1e8] sm:$0xff]  ;;  %v117_v21 = vld [vmem:[%s10820_s1 + $0x1d0] sm:$0xff]  ;;  %v86_v24 = vld [vmem:[%s10820_s1 + $0xd8] sm:$0xff]  ;;  %v208_v30 = vsel %vm200_vm0, %v202_v63, %v207_v22 }
  0x1c   :  { %236 = vmatpush.msra.mxu0 %v4546_v56  ;;  %294 = vmatpush.msra.mxu2 %v4547_v58  ;;  %v118_v25 = vld [vmem:[%s10820_s1 + $0x1d8] sm:$0xff]  ;;  %v83_v26 = vld [vmem:[%s10820_s1 + $0xc0] sm:$0xff]  ;;  %v84_v28 = vld [vmem:[%s10820_s1 + $0xc8] sm:$0xff]  ;;  %v210_v31 = vsel %vm200_vm0, %v205_v1, %v209_v23 }
  0x1d   :  { %265 = vmatpush.msra.mxu1 %v4578_v57  ;;  %323 = vmatpush.msra.mxu3 %v4579_v59  ;;  %v115_v27 = vld [vmem:[%s10820_s1 + $0x1c0] sm:$0xff]  ;;  %v116_v29 = vld [vmem:[%s10820_s1 + $0x1c8] sm:$0xff]  ;;  %v81_v32 = vld [vmem:[%s10820_s1 + $0xb0] sm:$0xff] }
  0x1e   :  { %237 = vmatpush.msra.mxu0 %v4544_v60  ;;  %295 = vmatpush.msra.mxu2 %v4545_v2  ;;  %v113_v33 = vld [vmem:[%s10820_s1 + $0x1b0] sm:$0xff]  ;;  %v82_v34 = vld [vmem:[%s10820_s1 + $0xb8] sm:$0xff]  ;;  %v79_v38 = vld [vmem:[%s10820_s1 + $0xa0] sm:$0xff] }
  0x1f   :  { %266 = vmatpush.msra.mxu1 %v4576_v61  ;;  %324 = vmatpush.msra.mxu3 %v4577_v3  ;;  %v114_v35 = vld [vmem:[%s10820_s1 + $0x1b8] sm:$0xff]  ;;  %v125_v36 = vld [vmem:[%s10819_s0 + $0x30] sm:$0x1f]  ;;  %v111_v39 = vld [vmem:[%s10820_s1 + $0x1a0] sm:$0xff] }
  0x20   :  { %238 = vmatpush.msra.mxu0 %v4542_v4  ;;  %296 = vmatpush.msra.mxu2 %v4543_v6  ;;  %v126_v37 = vld [vmem:[%s10819_s0 + $0x38] sm:$0x1f]  ;;  %v80_v40 = vld [vmem:[%s10820_s1 + $0xa8] sm:$0xff]  ;;  %v77_v42 = vld [vmem:[%s10820_s1 + $0x90] sm:$0xff]  ;;  %v6038_v44 = vrot.slane %v125_v36, 1 }
  0x21   :  { %267 = vmatpush.msra.mxu1 %v4574_v5  ;;  %325 = vmatpush.msra.mxu3 %v4575_v7  ;;  %v112_v41 = vld [vmem:[%s10820_s1 + $0x1a8] sm:$0xff]  ;;  %v109_v43 = vld [vmem:[%s10820_s1 + $0x190] sm:$0xff]  ;;  %v6040_v45 = vrot.slane %v126_v37, 1  ;;  %v78_v46 = vld [vmem:[%s10820_s1 + $0x98] sm:$0xff] }
  0x22   :  { %239 = vmatmul.f32.vlgmr.msra.gmra.mxu0 %v203_v8  ;;  %268 = vmatmul.f32.vlgmr.msra.gmra.mxu1 %v206_v9  ;;  %v110_v47 = vld [vmem:[%s10820_s1 + $0x198] sm:$0xff]  ;;  %v75_v48 = vld [vmem:[%s10820_s1 + $0x80] sm:$0xff]  ;;  %v76_v50 = vld [vmem:[%s10820_s1 + $0x88] sm:$0xff]  ;;  %v212_v53 = vsel %vm200_vm0, %v207_v22, %v6038_v44 }
  0x23   :  { %297 = vmatmul.f32.vlgmr.msra.gmra.mxu2 %v203_v8  ;;  %326 = vmatmul.f32.vlgmr.msra.gmra.mxu3 %v206_v9  ;;  %v107_v49 = vld [vmem:[%s10820_s1 + $0x180] sm:$0xff]  ;;  %v108_v51 = vld [vmem:[%s10820_s1 + $0x188] sm:$0xff]  ;;  %v214_v55 = vsel %vm200_vm0, %v209_v23, %v6040_v45 }
  0x24   :  { %339 = vmatpush.msrb.mxu0 %v89_v10  ;;  %368 = vmatpush.msrb.mxu1 %v121_v11 }
  0x25   :  { %397 = vmatpush.msrb.mxu2 %v90_v12  ;;  %426 = vmatpush.msrb.mxu3 %v122_v13 }
  0x26   :  { %340 = vmatpush.msrb.mxu0 %v87_v16  ;;  %369 = vmatpush.msrb.mxu1 %v119_v17 }
  0x27   :  { %398 = vmatpush.msrb.mxu2 %v88_v18  ;;  %427 = vmatpush.msrb.mxu3 %v120_v19 }
  0x28   :  { %341 = vmatpush.msrb.mxu0 %v85_v20  ;;  %370 = vmatpush.msrb.mxu1 %v117_v21 }
  0x29   :  { %399 = vmatpush.msrb.mxu2 %v86_v24  ;;  %428 = vmatpush.msrb.mxu3 %v118_v25 }
  0x2a   :  { %342 = vmatpush.msrb.mxu0 %v83_v26  ;;  %371 = vmatpush.msrb.mxu1 %v115_v27 }
  0x2b   :  { %400 = vmatpush.msrb.mxu2 %v84_v28  ;;  %429 = vmatpush.msrb.mxu3 %v116_v29 }
  0x2c   :  { %242 = vmatmul.f32.gmra.mxu0 %v208_v30  ;;  %271 = vmatmul.f32.gmra.mxu1 %v210_v31 }
  0x2d   :  { %300 = vmatmul.f32.gmra.mxu2 %v208_v30  ;;  %329 = vmatmul.f32.gmra.mxu3 %v210_v31 }
  0x2e   :  { %343 = vmatpush.msrb.mxu0 %v81_v32  ;;  %372 = vmatpush.msrb.mxu1 %v113_v33 }
  0x2f   :  { %401 = vmatpush.msrb.mxu2 %v82_v34  ;;  %430 = vmatpush.msrb.mxu3 %v114_v35 }
  0x30   :  { %344 = vmatpush.msrb.mxu0 %v79_v38  ;;  %373 = vmatpush.msrb.mxu1 %v111_v39 }
  0x31   :  { %402 = vmatpush.msrb.mxu2 %v80_v40  ;;  %431 = vmatpush.msrb.mxu3 %v112_v41 }
  0x32   :  { %345 = vmatpush.msrb.mxu0 %v77_v42  ;;  %374 = vmatpush.msrb.mxu1 %v109_v43 }
  0x33   :  { %403 = vmatpush.msrb.mxu2 %v78_v46  ;;  %432 = vmatpush.msrb.mxu3 %v110_v47 }
  0x34   :  { %346 = vmatpush.msrb.mxu0 %v75_v48  ;;  %375 = vmatpush.msrb.mxu1 %v107_v49 }
  0x35   :  { %20 = vsyncpa [#allocation5], 0  ;;  %404 = vmatpush.msrb.mxu2 %v76_v50  ;;  %433 = vmatpush.msrb.mxu3 %v108_v51  ;;  %v73_v56 = vld [vmem:[%s10820_s1 + $0x70] sm:$0xff]  ;;  %v74_v58 = vld [vmem:[%s10820_s1 + $0x78] sm:$0xff]  ;;  %vm528_vm1 = vcmask 1045504   ;;  %vm748_vm2 = vcmask 1044480  }
  0x36   :  { %v105_v57 = vld [vmem:[%s10820_s1 + $0x170] sm:$0xff]  ;;  %245 = vmatmul.f32.gmra.mxu0 %v212_v53  ;;  %274 = vmatmul.f32.gmra.mxu1 %v214_v55  ;;  %v106_v59 = vld [vmem:[%s10820_s1 + $0x178] sm:$0xff]  ;;  %v71_v60 = vld [vmem:[%s10820_s1 + $0x60] sm:$0xff]  ;;  %vm968_vm3 = vcmask 1043456   ;;  %vm1165_vm4 = vcmask 785408   ;;  %vm1329_vm5 = vcmask 228352  }
  0x37   :  { %303 = vmatmul.f32.gmra.mxu2 %v212_v53  ;;  %332 = vmatmul.f32.gmra.mxu3 %v214_v55  ;;  %v103_v61 = vld [vmem:[%s10820_s1 + $0x160] sm:$0xff]  ;;  %v72_v62 = vld [vmem:[%s10820_s1 + $0x68] sm:$0xff]  ;;  %v69_v0 = vld [vmem:[%s10820_s1 + $0x50] sm:$0xff]  ;;  %vm1848_vm6 = vcmask 261120   ;;  %vm1975_vm7 = vcmask 1041408   ;;  %vm1971_vm8 = vcmask 80896  }
  0x38   :  { %347 = vmatpush.msrb.mxu0 %v73_v56  ;;  %376 = vmatpush.msrb.mxu1 %v105_v57  ;;  %v104_v63 = vld [vmem:[%s10820_s1 + $0x168] sm:$0xff]  ;;  %v101_v1 = vld [vmem:[%s10820_s1 + $0x150] sm:$0xff]  ;;  %v70_v2 = vld [vmem:[%s10820_s1 + $0x58] sm:$0xff]  ;;  %s5645_s26 = smov [#allocation4]  }
  0x39   :  { %405 = vmatpush.msrb.mxu2 %v74_v58  ;;  %434 = vmatpush.msrb.mxu3 %v106_v59  ;;  %v102_v3 = vld [vmem:[%s10820_s1 + $0x158] sm:$0xff]  ;;  %v67_v4 = vld [vmem:[%s10820_s1 + $0x40] sm:$0xff]  ;;  %v68_v6 = vld [vmem:[%s10820_s1 + $0x48] sm:$0xff] }
  0x3a   :  { %348 = vmatpush.msrb.mxu0 %v71_v60  ;;  %377 = vmatpush.msrb.mxu1 %v103_v61  ;;  %v99_v5 = vld [vmem:[%s10820_s1 + $0x140] sm:$0xff]  ;;  %v100_v7 = vld [vmem:[%s10820_s1 + $0x148] sm:$0xff]  ;;  %v65_v8 = vld [vmem:[%s10820_s1 + $0x30] sm:$0xff] }
  0x3b   :  { %406 = vmatpush.msrb.mxu2 %v72_v62  ;;  %435 = vmatpush.msrb.mxu3 %v104_v63  ;;  %v97_v9 = vld [vmem:[%s10820_s1 + $0x130] sm:$0xff]  ;;  %v66_v10 = vld [vmem:[%s10820_s1 + $0x38] sm:$0xff]  ;;  %v63_v12 = vld [vmem:[%s10820_s1 + $0x20] sm:$0xff] }
  0x3c   :  { %349 = vmatpush.msrb.mxu0 %v69_v0  ;;  %378 = vmatpush.msrb.mxu1 %v101_v1  ;;  %v98_v11 = vld [vmem:[%s10820_s1 + $0x138] sm:$0xff]  ;;  %v95_v13 = vld [vmem:[%s10820_s1 + $0x120] sm:$0xff]  ;;  %v64_v16 = vld [vmem:[%s10820_s1 + $0x28] sm:$0xff] }
  0x3d   :  { %407 = vmatpush.msrb.mxu2 %v70_v2  ;;  %436 = vmatpush.msrb.mxu3 %v102_v3  ;;  %v96_v17 = vld [vmem:[%s10820_s1 + $0x128] sm:$0xff]  ;;  %v61_v18 = vld [vmem:[%s10820_s1 + $0x10] sm:$0xff]  ;;  %v62_v20 = vld [vmem:[%s10820_s1 + $0x18] sm:$0xff] }
  0x3e   :  { %350 = vmatpush.msrb.mxu0 %v67_v4  ;;  %379 = vmatpush.msrb.mxu1 %v99_v5  ;;  %v93_v19 = vld [vmem:[%s10820_s1 + $0x110] sm:$0xff]  ;;  %v94_v21 = vld [vmem:[%s10820_s1 + $0x118] sm:$0xff]  ;;  %v59_v22 = vld [vmem:[%s10820_s1] sm:$0xff] }
  0x3f   :  { %408 = vmatpush.msrb.mxu2 %v68_v6  ;;  %437 = vmatpush.msrb.mxu3 %v100_v7  ;;  %v91_v23 = vld [vmem:[%s10820_s1 + $0x100] sm:$0xff]  ;;  %v60_v24 = vld [vmem:[%s10820_s1 + $0x8] sm:$0xff]  ;;  %v4636_v28 = vld [vmem:[%s10820_s1 + $0x4f0] sm:$0xff] }
  0x40   :  { %248 = vmatmul.f32.gmra.mxu0 %v6038_v44  ;;  %277 = vmatmul.f32.gmra.mxu1 %v6040_v45  ;;  %v92_v25 = vld [vmem:[%s10820_s1 + $0x108] sm:$0xff]  ;;  %v51_v26 = vld [vmem:[%s10819_s0] sm:$0xff]  ;;  %v4668_v29 = vld [vmem:[%s10820_s1 + $0x5f0] sm:$0xff] }
  0x41   :  { %306 = vmatmul.f32.gmra.mxu2 %v6038_v44  ;;  %335 = vmatmul.f32.gmra.mxu3 %v6040_v45  ;;  %v52_v27 = vld [vmem:[%s10819_s0 + $0x8] sm:$0xff]  ;;  %v4637_v30 = vld [vmem:[%s10820_s1 + $0x4f8] sm:$0xff]  ;;  %v4634_v32 = vld [vmem:[%s10820_s1 + $0x4e0] sm:$0xff] }
  0x42   :  { %351 = vmatpush.msrb.mxu0 %v65_v8  ;;  %380 = vmatpush.msrb.mxu1 %v97_v9  ;;  %v4669_v31 = vld [vmem:[%s10820_s1 + $0x5f8] sm:$0xff]  ;;  %v4666_v33 = vld [vmem:[%s10820_s1 + $0x5e0] sm:$0xff]  ;;  %v4635_v34 = vld [vmem:[%s10820_s1 + $0x4e8] sm:$0xff] }
  0x43   :  { %409 = vmatpush.msrb.mxu2 %v66_v10  ;;  %438 = vmatpush.msrb.mxu3 %v98_v11  ;;  %v4667_v35 = vld [vmem:[%s10820_s1 + $0x5e8] sm:$0xff]  ;;  %v4632_v36 = vld [vmem:[%s10820_s1 + $0x4d0] sm:$0xff]  ;;  %v4633_v38 = vld [vmem:[%s10820_s1 + $0x4d8] sm:$0xff] }
  0x44   :  { %352 = vmatpush.msrb.mxu0 %v63_v12  ;;  %381 = vmatpush.msrb.mxu1 %v95_v13  ;;  %v4664_v37 = vld [vmem:[%s10820_s1 + $0x5d0] sm:$0xff]  ;;  %v4665_v39 = vld [vmem:[%s10820_s1 + $0x5d8] sm:$0xff]  ;;  %v4630_v40 = vld [vmem:[%s10820_s1 + $0x4c0] sm:$0xff] }
  0x45   :  { %410 = vmatpush.msrb.mxu2 %v64_v16  ;;  %439 = vmatpush.msrb.mxu3 %v96_v17  ;;  %v4662_v41 = vld [vmem:[%s10820_s1 + $0x5c0] sm:$0xff]  ;;  %v4631_v42 = vld [vmem:[%s10820_s1 + $0x4c8] sm:$0xff]  ;;  %v4628_v44 = vld [vmem:[%s10820_s1 + $0x4b0] sm:$0xff] }
  0x46   :  { %353 = vmatpush.msrb.mxu0 %v61_v18  ;;  %382 = vmatpush.msrb.mxu1 %v93_v19  ;;  %v4663_v43 = vld [vmem:[%s10820_s1 + $0x5c8] sm:$0xff]  ;;  %v4660_v45 = vld [vmem:[%s10820_s1 + $0x5b0] sm:$0xff]  ;;  %v4629_v46 = vld [vmem:[%s10820_s1 + $0x4b8] sm:$0xff] }
  0x47   :  { %411 = vmatpush.msrb.mxu2 %v62_v20  ;;  %440 = vmatpush.msrb.mxu3 %v94_v21  ;;  %v4661_v47 = vld [vmem:[%s10820_s1 + $0x5b8] sm:$0xff]  ;;  %v4626_v48 = vld [vmem:[%s10820_s1 + $0x4a0] sm:$0xff]  ;;  %v4627_v50 = vld [vmem:[%s10820_s1 + $0x4a8] sm:$0xff] }
  0x48   :  { %354 = vmatpush.msrb.mxu0 %v59_v22  ;;  %383 = vmatpush.msrb.mxu1 %v91_v23  ;;  %v4658_v49 = vld [vmem:[%s10820_s1 + $0x5a0] sm:$0xff]  ;;  %v4659_v51 = vld [vmem:[%s10820_s1 + $0x5a8] sm:$0xff]  ;;  %v4624_v53 = vld [vmem:[%s10820_s1 + $0x490] sm:$0xff] }
  0x49   :  { %412 = vmatpush.msrb.mxu2 %v60_v24  ;;  %441 = vmatpush.msrb.mxu3 %v92_v25  ;;  %v4656_v55 = vld [vmem:[%s10820_s1 + $0x590] sm:$0xff]  ;;  %v4625_v56 = vld [vmem:[%s10820_s1 + $0x498] sm:$0xff]  ;;  %v4622_v58 = vld [vmem:[%s10820_s1 + $0x480] sm:$0xff] }
  0x4a   :  { %355 = vmatmul.f32.vlgmr.msrb.gmra.mxu0 %v51_v26  ;;  %384 = vmatmul.f32.vlgmr.msrb.gmra.mxu1 %v52_v27  ;;  %v4657_v57 = vld [vmem:[%s10820_s1 + $0x598] sm:$0xff]  ;;  %v4654_v59 = vld [vmem:[%s10820_s1 + $0x580] sm:$0xff]  ;;  %v4623_v60 = vld [vmem:[%s10820_s1 + $0x488] sm:$0xff] }
  0x4b   :  { %413 = vmatmul.f32.vlgmr.msrb.gmra.mxu2 %v51_v26  ;;  %442 = vmatmul.f32.vlgmr.msrb.gmra.mxu3 %v52_v27  ;;  %v4655_v61 = vld [vmem:[%s10820_s1 + $0x588] sm:$0xff]  ;;  %v4620_v62 = vld [vmem:[%s10820_s1 + $0x470] sm:$0xff]  ;;  %v4621_v0 = vld [vmem:[%s10820_s1 + $0x478] sm:$0xff] }
  0x4c   :  { %551 = vmatpush.msra.mxu0 %v4636_v28  ;;  %580 = vmatpush.msra.mxu1 %v4668_v29  ;;  %v4652_v63 = vld [vmem:[%s10820_s1 + $0x570] sm:$0xff]  ;;  %v4653_v1 = vld [vmem:[%s10820_s1 + $0x578] sm:$0xff]  ;;  %v4618_v2 = vld [vmem:[%s10820_s1 + $0x460] sm:$0xff] }
  0x4d   :  { %609 = vmatpush.msra.mxu2 %v4637_v30  ;;  %638 = vmatpush.msra.mxu3 %v4669_v31  ;;  %v4650_v3 = vld [vmem:[%s10820_s1 + $0x560] sm:$0xff]  ;;  %v4619_v4 = vld [vmem:[%s10820_s1 + $0x468] sm:$0xff]  ;;  %v4616_v6 = vld [vmem:[%s10820_s1 + $0x450] sm:$0xff]  ;;  %v530_v31 = vrot.slane %v5887_v52, 2 }
  0x4e   :  { %552 = vmatpush.msra.mxu0 %v4634_v32  ;;  %581 = vmatpush.msra.mxu1 %v4666_v33  ;;  %v4651_v5 = vld [vmem:[%s10820_s1 + $0x568] sm:$0xff]  ;;  %v4648_v7 = vld [vmem:[%s10820_s1 + $0x550] sm:$0xff]  ;;  %v4617_v8 = vld [vmem:[%s10820_s1 + $0x458] sm:$0xff]  ;;  %v533_v33 = vrot.slane %v5895_v54, 2 }
  0x4f   :  { %610 = vmatpush.msra.mxu2 %v4635_v34  ;;  %639 = vmatpush.msra.mxu3 %v4667_v35  ;;  %v4649_v9 = vld [vmem:[%s10820_s1 + $0x558] sm:$0xff]  ;;  %v4614_v10 = vld [vmem:[%s10820_s1 + $0x440] sm:$0xff]  ;;  %v4615_v12 = vld [vmem:[%s10820_s1 + $0x448] sm:$0xff] }
  0x50   :  { %553 = vmatpush.msra.mxu0 %v4632_v36  ;;  %582 = vmatpush.msra.mxu1 %v4664_v37  ;;  %v4646_v11 = vld [vmem:[%s10820_s1 + $0x540] sm:$0xff]  ;;  %v4647_v13 = vld [vmem:[%s10820_s1 + $0x548] sm:$0xff]  ;;  %v57_v16 = vld [vmem:[%s10819_s0 + $0x30] sm:$0xf] }
  0x51   :  { %611 = vmatpush.msra.mxu2 %v4633_v38  ;;  %640 = vmatpush.msra.mxu3 %v4665_v39  ;;  %v58_v17 = vld [vmem:[%s10819_s0 + $0x38] sm:$0xf]  ;;  %v4612_v18 = vld [vmem:[%s10820_s1 + $0x430] sm:$0xff]  ;;  %v455_v22 = vld [vmem:[%s10819_s0] sm:$0xfc] }
  0x52   :  { %554 = vmatpush.msra.mxu0 %v4630_v40  ;;  %583 = vmatpush.msra.mxu1 %v4662_v41  ;;  %v4644_v19 = vld [vmem:[%s10820_s1 + $0x530] sm:$0xff]  ;;  %v4613_v20 = vld [vmem:[%s10820_s1 + $0x438] sm:$0xff]  ;;  %v456_v23 = vld [vmem:[%s10819_s0 + $0x8] sm:$0xfc]  ;;  %v529_v30 = vrot.slane %v455_v22, 2 }
  0x53   :  { %612 = vmatpush.msra.mxu2 %v4631_v42  ;;  %641 = vmatpush.msra.mxu3 %v4663_v43  ;;  %v4645_v21 = vld [vmem:[%s10820_s1 + $0x538] sm:$0xff]  ;;  %v4610_v24 = vld [vmem:[%s10820_s1 + $0x420] sm:$0xff]  ;;  %v4611_v26 = vld [vmem:[%s10820_s1 + $0x428] sm:$0xff]  ;;  %v532_v32 = vrot.slane %v456_v23, 2 }
  0x54   :  { %358 = vmatmul.f32.gmra.mxu0 %v5887_v52  ;;  %387 = vmatmul.f32.gmra.mxu1 %v5895_v54  ;;  %v4642_v25 = vld [vmem:[%s10820_s1 + $0x520] sm:$0xff]  ;;  %v4643_v27 = vld [vmem:[%s10820_s1 + $0x528] sm:$0xff]  ;;  %v4608_v28 = vld [vmem:[%s10820_s1 + $0x410] sm:$0xff]  ;;  %v531_v40 = vsel %vm528_vm1, %v529_v30, %v530_v31 }
  0x55   :  { %416 = vmatmul.f32.gmra.mxu2 %v5887_v52  ;;  %445 = vmatmul.f32.gmra.mxu3 %v5895_v54  ;;  %v4640_v29 = vld [vmem:[%s10820_s1 + $0x510] sm:$0xff]  ;;  %v4609_v34 = vld [vmem:[%s10820_s1 + $0x418] sm:$0xff]  ;;  %v4606_v36 = vld [vmem:[%s10820_s1 + $0x400] sm:$0xff]  ;;  %v534_v41 = vsel %vm528_vm1, %v532_v32, %v533_v33 }
  0x56   :  { %555 = vmatpush.msra.mxu0 %v4628_v44  ;;  %584 = vmatpush.msra.mxu1 %v4660_v45  ;;  %v4641_v35 = vld [vmem:[%s10820_s1 + $0x518] sm:$0xff]  ;;  %v4638_v37 = vld [vmem:[%s10820_s1 + $0x500] sm:$0xff]  ;;  %v4607_v38 = vld [vmem:[%s10820_s1 + $0x408] sm:$0xff] }
  0x57   :  { %613 = vmatpush.msra.mxu2 %v4629_v46  ;;  %642 = vmatpush.msra.mxu3 %v4661_v47  ;;  %v4639_v39 = vld [vmem:[%s10820_s1 + $0x508] sm:$0xff]  ;;  %v4700_v42 = vld [vmem:[%s10820_s1 + $0x6f0] sm:$0xff]  ;;  %v4701_v44 = vld [vmem:[%s10820_s1 + $0x6f8] sm:$0xff] }
  0x58   :  { %556 = vmatpush.msra.mxu0 %v4626_v48  ;;  %585 = vmatpush.msra.mxu1 %v4658_v49  ;;  %v4732_v43 = vld [vmem:[%s10820_s1 + $0x7f0] sm:$0xff]  ;;  %v4733_v45 = vld [vmem:[%s10820_s1 + $0x7f8] sm:$0xff]  ;;  %v4698_v46 = vld [vmem:[%s10820_s1 + $0x6e0] sm:$0xff] }
  0x59   :  { %614 = vmatpush.msra.mxu2 %v4627_v50  ;;  %643 = vmatpush.msra.mxu3 %v4659_v51  ;;  %v4730_v47 = vld [vmem:[%s10820_s1 + $0x7e0] sm:$0xff]  ;;  %v4699_v48 = vld [vmem:[%s10820_s1 + $0x6e8] sm:$0xff]  ;;  %v4696_v50 = vld [vmem:[%s10820_s1 + $0x6d0] sm:$0xff] }
  0x5a   :  { %557 = vmatpush.msra.mxu0 %v4624_v53  ;;  %586 = vmatpush.msra.mxu1 %v4656_v55  ;;  %v4731_v49 = vld [vmem:[%s10820_s1 + $0x7e8] sm:$0xff]  ;;  %v4728_v51 = vld [vmem:[%s10820_s1 + $0x7d0] sm:$0xff]  ;;  %v535_v53 = vrot.slane %v5955_v14, 2  ;;  %v537_v55 = vrot.slane %v5960_v15, 2 }
  0x5b   :  { %615 = vmatpush.msra.mxu2 %v4625_v56  ;;  %644 = vmatpush.msra.mxu3 %v4657_v57  ;;  %v4697_v56 = vld [vmem:[%s10820_s1 + $0x6d8] sm:$0xff]  ;;  %v4683_v30 = vld [vmem:[%s10820_s1 + $0x668] sm:$0xff]  ;;  %v4680_v32 = vld [vmem:[%s10820_s1 + $0x650] sm:$0xff] }
  0x5c   :  { %558 = vmatpush.msra.mxu0 %v4622_v58  ;;  %587 = vmatpush.msra.mxu1 %v4654_v59  ;;  %v4729_v57 = vld [vmem:[%s10820_s1 + $0x7d8] sm:$0xff]  ;;  %v4694_v58 = vld [vmem:[%s10820_s1 + $0x6c0] sm:$0xff] }
  0x5d   :  { %616 = vmatpush.msra.mxu2 %v4623_v60  ;;  %645 = vmatpush.msra.mxu3 %v4655_v61  ;;  %v4726_v59 = vld [vmem:[%s10820_s1 + $0x7c0] sm:$0xff]  ;;  %v4695_v60 = vld [vmem:[%s10820_s1 + $0x6c8] sm:$0xff] }
  0x5e   :  { %361 = vmatmul.f32.gmra.mxu0 %v5955_v14  ;;  %390 = vmatmul.f32.gmra.mxu1 %v5960_v15  ;;  %v4727_v61 = vld [vmem:[%s10820_s1 + $0x7c8] sm:$0xff] }
  0x5f   :  { %419 = vmatmul.f32.gmra.mxu2 %v5955_v14  ;;  %448 = vmatmul.f32.gmra.mxu3 %v5960_v15 }
  0x60   :  { %559 = vmatpush.msra.mxu0 %v4620_v62  ;;  %588 = vmatpush.msra.mxu1 %v4652_v63  ;;  %v536_v62 = vsel %vm528_vm1, %v530_v31, %v535_v53  ;;  %v538_v63 = vsel %vm528_vm1, %v533_v33, %v537_v55  ;;  %v4715_v31 = vld [vmem:[%s10820_s1 + $0x768] sm:$0xff]  ;;  %v4712_v33 = vld [vmem:[%s10820_s1 + $0x750] sm:$0xff] }
  0x61   :  { %617 = vmatpush.msra.mxu2 %v4621_v0  ;;  %646 = vmatpush.msra.mxu3 %v4653_v1  ;;  %v4692_v0 = vld [vmem:[%s10820_s1 + $0x6b0] sm:$0xff] }
  0x62   :  { %560 = vmatpush.msra.mxu0 %v4618_v2  ;;  %589 = vmatpush.msra.mxu1 %v4650_v3  ;;  %v4724_v1 = vld [vmem:[%s10820_s1 + $0x7b0] sm:$0xff]  ;;  %v4693_v2 = vld [vmem:[%s10820_s1 + $0x6b8] sm:$0xff] }
  0x63   :  { %618 = vmatpush.msra.mxu2 %v4619_v4  ;;  %647 = vmatpush.msra.mxu3 %v4651_v5  ;;  %v4725_v3 = vld [vmem:[%s10820_s1 + $0x7b8] sm:$0xff]  ;;  %v457_v4 = vld [vmem:[%s10819_s0 + $0x30] sm:$0x3f] }
  0x64   :  { %561 = vmatpush.msra.mxu0 %v4616_v6  ;;  %590 = vmatpush.msra.mxu1 %v4648_v7  ;;  %v458_v5 = vld [vmem:[%s10819_s0 + $0x38] sm:$0x3f]  ;;  %v4690_v6 = vld [vmem:[%s10820_s1 + $0x6a0] sm:$0xff] }
  0x65   :  { %619 = vmatpush.msra.mxu2 %v4617_v8  ;;  %648 = vmatpush.msra.mxu3 %v4649_v9  ;;  %v4722_v7 = vld [vmem:[%s10820_s1 + $0x7a0] sm:$0xff]  ;;  %v4691_v8 = vld [vmem:[%s10820_s1 + $0x6a8] sm:$0xff] }
  0x66   :  { %562 = vmatpush.msra.mxu0 %v4614_v10  ;;  %591 = vmatpush.msra.mxu1 %v4646_v11  ;;  %v4723_v9 = vld [vmem:[%s10820_s1 + $0x7a8] sm:$0xff]  ;;  %v4688_v10 = vld [vmem:[%s10820_s1 + $0x690] sm:$0xff] }
  0x67   :  { %620 = vmatpush.msra.mxu2 %v4615_v12  ;;  %649 = vmatpush.msra.mxu3 %v4647_v13  ;;  %v4720_v11 = vld [vmem:[%s10820_s1 + $0x790] sm:$0xff]  ;;  %v6474_v12 = vrot.slane %v457_v4, 2  ;;  %v6476_v13 = vrot.slane %v458_v5, 2  ;;  %v4762_v4 = vld [vmem:[%s10820_s1 + $0x8e0] sm:$0xff] }
  0x68   :  { %364 = vmatmul.f32.gmra.mxu0 %v57_v16  ;;  %393 = vmatmul.f32.gmra.mxu1 %v58_v17  ;;  %v4794_v5 = vld [vmem:[%s10820_s1 + $0x9e0] sm:$0xff] }
  0x69   :  { %422 = vmatmul.f32.gmra.mxu2 %v57_v16  ;;  %451 = vmatmul.f32.gmra.mxu3 %v58_v17  ;;  %v4689_v16 = vld [vmem:[%s10820_s1 + $0x698] sm:$0xff]  ;;  %v540_v22 = vsel %vm528_vm1, %v535_v53, %v6474_v12  ;;  %v542_v23 = vsel %vm528_vm1, %v537_v55, %v6476_v13  ;;  %v750_v55 = vrot.slane %v5887_v52, 3  ;;  %v4670_v52 = vld [vmem:[%s10820_s1 + $0x600] sm:$0xff] }
  0x6a   :  { %563 = vmatpush.msra.mxu0 %v4612_v18  ;;  %592 = vmatpush.msra.mxu1 %v4644_v19  ;;  %v4721_v17 = vld [vmem:[%s10820_s1 + $0x798] sm:$0xff]  ;;  %v4686_v18 = vld [vmem:[%s10820_s1 + $0x680] sm:$0xff] }
  0x6b   :  { %621 = vmatpush.msra.mxu2 %v4613_v20  ;;  %650 = vmatpush.msra.mxu3 %v4645_v21  ;;  %v4718_v19 = vld [vmem:[%s10820_s1 + $0x780] sm:$0xff]  ;;  %v4687_v20 = vld [vmem:[%s10820_s1 + $0x688] sm:$0xff] }
  0x6c   :  { %564 = vmatpush.msra.mxu0 %v4610_v24  ;;  %593 = vmatpush.msra.mxu1 %v4642_v25  ;;  %v4719_v21 = vld [vmem:[%s10820_s1 + $0x788] sm:$0xff]  ;;  %v4684_v24 = vld [vmem:[%s10820_s1 + $0x670] sm:$0xff] }
  0x6d   :  { %622 = vmatpush.msra.mxu2 %v4611_v26  ;;  %651 = vmatpush.msra.mxu3 %v4643_v27  ;;  %v4716_v25 = vld [vmem:[%s10820_s1 + $0x770] sm:$0xff]  ;;  %v4685_v26 = vld [vmem:[%s10820_s1 + $0x678] sm:$0xff] }
  0x6e   :  { %565 = vmatpush.msra.mxu0 %v4608_v28  ;;  %594 = vmatpush.msra.mxu1 %v4640_v29  ;;  %v4717_v27 = vld [vmem:[%s10820_s1 + $0x778] sm:$0xff]  ;;  %v4682_v28 = vld [vmem:[%s10820_s1 + $0x660] sm:$0xff] }
  0x6f   :  { %623 = vmatpush.msra.mxu2 %v4609_v34  ;;  %652 = vmatpush.msra.mxu3 %v4641_v35  ;;  %v4714_v29 = vld [vmem:[%s10820_s1 + $0x760] sm:$0xff]  ;;  %v4681_v34 = vld [vmem:[%s10820_s1 + $0x658] sm:$0xff] }
  0x70   :  { %566 = vmatpush.msra.mxu0 %v4606_v36  ;;  %595 = vmatpush.msra.mxu1 %v4638_v37  ;;  %v4713_v35 = vld [vmem:[%s10820_s1 + $0x758] sm:$0xff]  ;;  %v4678_v36 = vld [vmem:[%s10820_s1 + $0x640] sm:$0xff] }
  0x71   :  { %624 = vmatpush.msra.mxu2 %v4607_v38  ;;  %653 = vmatpush.msra.mxu3 %v4639_v39  ;;  %v4710_v37 = vld [vmem:[%s10820_s1 + $0x740] sm:$0xff]  ;;  %v4679_v38 = vld [vmem:[%s10820_s1 + $0x648] sm:$0xff] }
  0x72   :  { %567 = vmatmul.f32.vlgmr.msra.gmra.mxu0 %v531_v40  ;;  %596 = vmatmul.f32.vlgmr.msra.gmra.mxu1 %v534_v41  ;;  %v4711_v39 = vld [vmem:[%s10820_s1 + $0x748] sm:$0xff] }
  0x73   :  { %625 = vmatmul.f32.vlgmr.msra.gmra.mxu2 %v531_v40  ;;  %654 = vmatmul.f32.vlgmr.msra.gmra.mxu3 %v534_v41  ;;  %v4676_v40 = vld [vmem:[%s10820_s1 + $0x630] sm:$0xff] }
  0x74   :  { %771 = vmatpush.msrb.mxu0 %v4700_v42  ;;  %800 = vmatpush.msrb.mxu1 %v4732_v43  ;;  %v4708_v41 = vld [vmem:[%s10820_s1 + $0x730] sm:$0xff]  ;;  %v4677_v42 = vld [vmem:[%s10820_s1 + $0x638] sm:$0xff] }
  0x75   :  { %829 = vmatpush.msrb.mxu2 %v4701_v44  ;;  %858 = vmatpush.msrb.mxu3 %v4733_v45  ;;  %v4709_v43 = vld [vmem:[%s10820_s1 + $0x738] sm:$0xff]  ;;  %v675_v44 = vld [vmem:[%s10819_s0] sm:$0xf8]  ;;  %v676_v45 = vld [vmem:[%s10819_s0 + $0x8] sm:$0xf8] }
  0x76   :  { %772 = vmatpush.msrb.mxu0 %v4698_v46  ;;  %801 = vmatpush.msrb.mxu1 %v4730_v47  ;;  %v4674_v46 = vld [vmem:[%s10820_s1 + $0x620] sm:$0xff]  ;;  %v749_v53 = vrot.slane %v675_v44, 3 }
  0x77   :  { %830 = vmatpush.msrb.mxu2 %v4699_v48  ;;  %859 = vmatpush.msrb.mxu3 %v4731_v49  ;;  %v4706_v47 = vld [vmem:[%s10820_s1 + $0x720] sm:$0xff]  ;;  %v4675_v48 = vld [vmem:[%s10820_s1 + $0x628] sm:$0xff] }
  0x78   :  { %773 = vmatpush.msrb.mxu0 %v4696_v50  ;;  %802 = vmatpush.msrb.mxu1 %v4728_v51  ;;  %v4707_v49 = vld [vmem:[%s10820_s1 + $0x728] sm:$0xff]  ;;  %v4672_v50 = vld [vmem:[%s10820_s1 + $0x610] sm:$0xff] }
  0x79   :  { %831 = vmatpush.msrb.mxu2 %v4697_v56  ;;  %860 = vmatpush.msrb.mxu3 %v4729_v57  ;;  %v4704_v51 = vld [vmem:[%s10820_s1 + $0x710] sm:$0xff]  ;;  %v752_v56 = vrot.slane %v676_v45, 3  ;;  %v753_v57 = vrot.slane %v5895_v54, 3  ;;  %v4702_v54 = vld [vmem:[%s10820_s1 + $0x700] sm:$0xff] }
  0x7a   :  { %774 = vmatpush.msrb.mxu0 %v4694_v58  ;;  %803 = vmatpush.msrb.mxu1 %v4726_v59  ;;  %v4673_v58 = vld [vmem:[%s10820_s1 + $0x618] sm:$0xff] }
  0x7b   :  { %832 = vmatpush.msrb.mxu2 %v4695_v60  ;;  %861 = vmatpush.msrb.mxu3 %v4727_v61  ;;  %v4705_v59 = vld [vmem:[%s10820_s1 + $0x718] sm:$0xff]  ;;  %v4671_v60 = vld [vmem:[%s10820_s1 + $0x608] sm:$0xff] }
  0x7c   :  { %570 = vmatmul.f32.gmra.mxu0 %v536_v62  ;;  %599 = vmatmul.f32.gmra.mxu1 %v538_v63  ;;  %v4703_v61 = vld [vmem:[%s10820_s1 + $0x708] sm:$0xff] }
  0x7d   :  { %628 = vmatmul.f32.gmra.mxu2 %v536_v62  ;;  %657 = vmatmul.f32.gmra.mxu3 %v538_v63  ;;  %v751_v62 = vsel %vm748_vm2, %v749_v53, %v750_v55  ;;  %v754_v63 = vsel %vm748_vm2, %v752_v56, %v753_v57  ;;  %v4746_v53 = vld [vmem:[%s10820_s1 + $0x860] sm:$0xff]  ;;  %v4747_v56 = vld [vmem:[%s10820_s1 + $0x868] sm:$0xff] }
  0x7e   :  { %775 = vmatpush.msrb.mxu0 %v4692_v0  ;;  %804 = vmatpush.msrb.mxu1 %v4724_v1  ;;  %v4764_v0 = vld [vmem:[%s10820_s1 + $0x8f0] sm:$0xff] }
  0x7f   :  { %833 = vmatpush.msrb.mxu2 %v4693_v2  ;;  %862 = vmatpush.msrb.mxu3 %v4725_v3  ;;  %v4796_v1 = vld [vmem:[%s10820_s1 + $0x9f0] sm:$0xff]  ;;  %v4765_v2 = vld [vmem:[%s10820_s1 + $0x8f8] sm:$0xff] }
  0x80   :  { %776 = vmatpush.msrb.mxu0 %v4690_v6  ;;  %805 = vmatpush.msrb.mxu1 %v4722_v7  ;;  %v4797_v3 = vld [vmem:[%s10820_s1 + $0x9f8] sm:$0xff]  ;;  %v4763_v6 = vld [vmem:[%s10820_s1 + $0x8e8] sm:$0xff] }
  0x81   :  { %834 = vmatpush.msrb.mxu2 %v4691_v8  ;;  %863 = vmatpush.msrb.mxu3 %v4723_v9  ;;  %v4795_v7 = vld [vmem:[%s10820_s1 + $0x9e8] sm:$0xff]  ;;  %v4760_v8 = vld [vmem:[%s10820_s1 + $0x8d0] sm:$0xff] }
  0x82   :  { %777 = vmatpush.msrb.mxu0 %v4688_v10  ;;  %806 = vmatpush.msrb.mxu1 %v4720_v11  ;;  %v4792_v9 = vld [vmem:[%s10820_s1 + $0x9d0] sm:$0xff]  ;;  %v755_v10 = vrot.slane %v5955_v14, 3  ;;  %v757_v11 = vrot.slane %v5960_v15, 3  ;;  %v4749_v14 = vld [vmem:[%s10820_s1 + $0x878] sm:$0xff] }
  0x83   :  { %835 = vmatpush.msrb.mxu2 %v4689_v16  ;;  %864 = vmatpush.msrb.mxu3 %v4721_v17  ;;  %v4758_v16 = vld [vmem:[%s10820_s1 + $0x8c0] sm:$0xff]  ;;  %v4781_v15 = vld [vmem:[%s10820_s1 + $0x978] sm:$0xff] }
  0x84   :  { %778 = vmatpush.msrb.mxu0 %v4686_v18  ;;  %807 = vmatpush.msrb.mxu1 %v4718_v19  ;;  %v4790_v17 = vld [vmem:[%s10820_s1 + $0x9c0] sm:$0xff] }
  0x85   :  { %836 = vmatpush.msrb.mxu2 %v4687_v20  ;;  %865 = vmatpush.msrb.mxu3 %v4719_v21  ;;  %v4759_v20 = vld [vmem:[%s10820_s1 + $0x8c8] sm:$0xff] }
  0x86   :  { %573 = vmatmul.f32.gmra.mxu0 %v540_v22  ;;  %602 = vmatmul.f32.gmra.mxu1 %v542_v23  ;;  %v4791_v21 = vld [vmem:[%s10820_s1 + $0x9c8] sm:$0xff] }
  0x87   :  { %631 = vmatmul.f32.gmra.mxu2 %v540_v22  ;;  %660 = vmatmul.f32.gmra.mxu3 %v542_v23  ;;  %v756_v22 = vsel %vm748_vm2, %v750_v55, %v755_v10  ;;  %v758_v23 = vsel %vm748_vm2, %v753_v57, %v757_v11  ;;  %v4778_v55 = vld [vmem:[%s10820_s1 + $0x960] sm:$0xff]  ;;  %v4779_v57 = vld [vmem:[%s10820_s1 + $0x968] sm:$0xff] }
  0x88   :  { %779 = vmatpush.msrb.mxu0 %v4684_v24  ;;  %808 = vmatpush.msrb.mxu1 %v4716_v25  ;;  %v4756_v24 = vld [vmem:[%s10820_s1 + $0x8b0] sm:$0xff] }
  0x89   :  { %837 = vmatpush.msrb.mxu2 %v4685_v26  ;;  %866 = vmatpush.msrb.mxu3 %v4717_v27  ;;  %v4788_v25 = vld [vmem:[%s10820_s1 + $0x9b0] sm:$0xff]  ;;  %v4757_v26 = vld [vmem:[%s10820_s1 + $0x8b8] sm:$0xff] }
  0x8a   :  { %780 = vmatpush.msrb.mxu0 %v4682_v28  ;;  %809 = vmatpush.msrb.mxu1 %v4714_v29  ;;  %v4789_v27 = vld [vmem:[%s10820_s1 + $0x9b8] sm:$0xff]  ;;  %v677_v28 = vld [vmem:[%s10819_s0 + $0x30] sm:$0x7f] }
  0x8b   :  { %838 = vmatpush.msrb.mxu2 %v4683_v30  ;;  %867 = vmatpush.msrb.mxu3 %v4715_v31  ;;  %v678_v29 = vld [vmem:[%s10819_s0 + $0x38] sm:$0x7f]  ;;  %v4754_v30 = vld [vmem:[%s10820_s1 + $0x8a0] sm:$0xff] }
  0x8c   :  { %781 = vmatpush.msrb.mxu0 %v4680_v32  ;;  %810 = vmatpush.msrb.mxu1 %v4712_v33  ;;  %v4786_v31 = vld [vmem:[%s10820_s1 + $0x9a0] sm:$0xff]  ;;  %v4755_v32 = vld [vmem:[%s10820_s1 + $0x8a8] sm:$0xff] }
  0x8d   :  { %839 = vmatpush.msrb.mxu2 %v4681_v34  ;;  %868 = vmatpush.msrb.mxu3 %v4713_v35  ;;  %v4787_v33 = vld [vmem:[%s10820_s1 + $0x9a8] sm:$0xff] }
  0x8e   :  { %782 = vmatpush.msrb.mxu0 %v4678_v36  ;;  %811 = vmatpush.msrb.mxu1 %v4710_v37  ;;  %v4752_v36 = vld [vmem:[%s10820_s1 + $0x890] sm:$0xff] }
  0x8f   :  { %840 = vmatpush.msrb.mxu2 %v4679_v38  ;;  %869 = vmatpush.msrb.mxu3 %v4711_v39  ;;  %v4784_v37 = vld [vmem:[%s10820_s1 + $0x990] sm:$0xff]  ;;  %v6710_v38 = vrot.slane %v677_v28, 3  ;;  %v6712_v39 = vrot.slane %v678_v29, 3  ;;  %v4737_v28 = vld [vmem:[%s10820_s1 + $0x818] sm:$0xff] }
  0x90   :  { %576 = vmatmul.f32.gmra.mxu0 %v6474_v12  ;;  %605 = vmatmul.f32.gmra.mxu1 %v6476_v13  ;;  %v4769_v29 = vld [vmem:[%s10820_s1 + $0x918] sm:$0xff] }
  0x91   :  { %634 = vmatmul.f32.gmra.mxu2 %v6474_v12  ;;  %663 = vmatmul.f32.gmra.mxu3 %v6476_v13  ;;  %v4761_v12 = vld [vmem:[%s10820_s1 + $0x8d8] sm:$0xff] }
  0x92   :  { %783 = vmatpush.msrb.mxu0 %v4676_v40  ;;  %812 = vmatpush.msrb.mxu1 %v4708_v41  ;;  %v4793_v13 = vld [vmem:[%s10820_s1 + $0x9d8] sm:$0xff] }
  0x93   :  { %841 = vmatpush.msrb.mxu2 %v4677_v42  ;;  %870 = vmatpush.msrb.mxu3 %v4709_v43  ;;  %v4753_v40 = vld [vmem:[%s10820_s1 + $0x898] sm:$0xff]  ;;  %v4750_v42 = vld [vmem:[%s10820_s1 + $0x880] sm:$0xff] }
  0x94   :  { %784 = vmatpush.msrb.mxu0 %v4674_v46  ;;  %813 = vmatpush.msrb.mxu1 %v4706_v47  ;;  %v4785_v41 = vld [vmem:[%s10820_s1 + $0x998] sm:$0xff]  ;;  %v4782_v43 = vld [vmem:[%s10820_s1 + $0x980] sm:$0xff]  ;;  %v4751_v46 = vld [vmem:[%s10820_s1 + $0x888] sm:$0xff] }
  0x95   :  { %842 = vmatpush.msrb.mxu2 %v4675_v48  ;;  %871 = vmatpush.msrb.mxu3 %v4707_v49  ;;  %v4783_v47 = vld [vmem:[%s10820_s1 + $0x988] sm:$0xff]  ;;  %v760_v48 = vsel %vm748_vm2, %v755_v10, %v6710_v38  ;;  %v762_v49 = vsel %vm748_vm2, %v757_v11, %v6712_v39  ;;  %v4738_v10 = vld [vmem:[%s10820_s1 + $0x820] sm:$0xff] }
  0x96   :  { %785 = vmatpush.msrb.mxu0 %v4672_v50  ;;  %814 = vmatpush.msrb.mxu1 %v4704_v51  ;;  %v4748_v50 = vld [vmem:[%s10820_s1 + $0x870] sm:$0xff]  ;;  %v4770_v11 = vld [vmem:[%s10820_s1 + $0x920] sm:$0xff] }
  0x97   :  { %843 = vmatpush.msrb.mxu2 %v4673_v58  ;;  %872 = vmatpush.msrb.mxu3 %v4705_v59  ;;  %v4780_v51 = vld [vmem:[%s10820_s1 + $0x970] sm:$0xff] }
  0x98   :  { %786 = vmatpush.msrb.mxu0 %v4670_v52  ;;  %815 = vmatpush.msrb.mxu1 %v4702_v54  ;;  %v4744_v52 = vld [vmem:[%s10820_s1 + $0x850] sm:$0xff] }
  0x99   :  { %844 = vmatpush.msrb.mxu2 %v4671_v60  ;;  %873 = vmatpush.msrb.mxu3 %v4703_v61  ;;  %v4776_v54 = vld [vmem:[%s10820_s1 + $0x950] sm:$0xff]  ;;  %v4745_v60 = vld [vmem:[%s10820_s1 + $0x858] sm:$0xff] }
  0x9a   :  { %787 = vmatmul.f32.vlgmr.msrb.gmra.mxu0 %v751_v62  ;;  %816 = vmatmul.f32.vlgmr.msrb.gmra.mxu1 %v754_v63  ;;  %v4777_v61 = vld [vmem:[%s10820_s1 + $0x958] sm:$0xff] }
  0x9b   :  { %845 = vmatmul.f32.vlgmr.msrb.gmra.mxu2 %v751_v62  ;;  %874 = vmatmul.f32.vlgmr.msrb.gmra.mxu3 %v754_v63  ;;  %v4742_v62 = vld [vmem:[%s10820_s1 + $0x840] sm:$0xff] }
  0x9c   :  { %991 = vmatpush.msra.mxu0 %v4764_v0  ;;  %1020 = vmatpush.msra.mxu1 %v4796_v1  ;;  %v4774_v63 = vld [vmem:[%s10820_s1 + $0x940] sm:$0xff] }
  0x9d   :  { %1049 = vmatpush.msra.mxu2 %v4765_v2  ;;  %1078 = vmatpush.msra.mxu3 %v4797_v3  ;;  %v4743_v2 = vld [vmem:[%s10820_s1 + $0x848] sm:$0xff] }
  0x9e   :  { %992 = vmatpush.msra.mxu0 %v4762_v4  ;;  %1021 = vmatpush.msra.mxu1 %v4794_v5  ;;  %v4775_v3 = vld [vmem:[%s10820_s1 + $0x948] sm:$0xff]  ;;  %v4740_v4 = vld [vmem:[%s10820_s1 + $0x830] sm:$0xff] }
  0x9f   :  { %1050 = vmatpush.msra.mxu2 %v4763_v6  ;;  %1079 = vmatpush.msra.mxu3 %v4795_v7  ;;  %v6654_v18 = vpop.f32.mrf.mxu0  ;;  %v6656_v19 = vpop.f32.mrf.mxu1  ;;  %v4772_v5 = vld [vmem:[%s10820_s1 + $0x930] sm:$0xff]  ;;  %v4741_v6 = vld [vmem:[%s10820_s1 + $0x838] sm:$0xff] }
  0xa0   :  { %993 = vmatpush.msra.mxu0 %v4760_v8  ;;  %1022 = vmatpush.msra.mxu1 %v4792_v9  ;;  %v4773_v7 = vld [vmem:[%s10820_s1 + $0x938] sm:$0xff]  ;;  %v895_v8 = vld [vmem:[%s10819_s0] sm:$0xf0]  ;;  %v896_v9 = vld [vmem:[%s10819_s0 + $0x8] sm:$0xf0] }
  0xa1   :  { %1051 = vmatpush.msra.mxu2 %v4761_v12  ;;  %1080 = vmatpush.msra.mxu3 %v4793_v13  ;;  %v4739_v12 = vld [vmem:[%s10820_s1 + $0x828] sm:$0xff] }
  0xa2   :  { %994 = vmatpush.msra.mxu0 %v4758_v16  ;;  %1023 = vmatpush.msra.mxu1 %v4790_v17  ;;  %v4771_v13 = vld [vmem:[%s10820_s1 + $0x928] sm:$0xff] }
  0xa3   :  { %1052 = vmatpush.msra.mxu2 %v4759_v20  ;;  %1081 = vmatpush.msra.mxu3 %v4791_v21  ;;  %v4736_v20 = vld [vmem:[%s10820_s1 + $0x810] sm:$0xff] }
  0xa4   :  { %790 = vmatmul.f32.gmra.mxu0 %v756_v22  ;;  %819 = vmatmul.f32.gmra.mxu1 %v758_v23  ;;  %v4768_v21 = vld [vmem:[%s10820_s1 + $0x910] sm:$0xff] }
  0xa5   :  { %848 = vmatmul.f32.gmra.mxu2 %v756_v22  ;;  %877 = vmatmul.f32.gmra.mxu3 %v758_v23  ;;  %v969_v22 = vrot.slane %v895_v8, 4  ;;  %v5611_v23 = vld [vmem:[%s10819_s0 + $0x10] sm:$0xff] }
  0xa6   :  { %995 = vmatpush.msra.mxu0 %v4756_v24  ;;  %1024 = vmatpush.msra.mxu1 %v4788_v25  ;;  %v6700_v34 = vpop.f32.mrf.mxu2  ;;  %v6702_v35 = vpop.f32.mrf.mxu3  ;;  %v970_v24 = vrot.slane %v5611_v23, 4  ;;  %v972_v25 = vrot.slane %v896_v9, 4 }
  0xa7   :  { %1053 = vmatpush.msra.mxu2 %v4757_v26  ;;  %1082 = vmatpush.msra.mxu3 %v4789_v27  ;;  %v5612_v26 = vld [vmem:[%s10819_s0 + $0x18] sm:$0xff] }
  0xa8   :  { %996 = vmatpush.msra.mxu0 %v4754_v30  ;;  %1025 = vmatpush.msra.mxu1 %v4786_v31  ;;  %v973_v27 = vrot.slane %v5612_v26, 4  ;;  %v4734_v30 = vld [vmem:[%s10820_s1 + $0x800] sm:$0xff]  ;;  %v1152_v26 = vld [vmem:[%s10822_s3 + $0x78] sm:$0xff] }
  0xa9   :  { %1054 = vmatpush.msra.mxu2 %v4755_v32  ;;  %1083 = vmatpush.msra.mxu3 %v4787_v33  ;;  %v6726_v44 = vpop.f32.mrf.mxu0  ;;  %v6728_v45 = vpop.f32.mrf.mxu1  ;;  %v4766_v31 = vld [vmem:[%s10820_s1 + $0x900] sm:$0xff] }
  0xaa   :  { %997 = vmatpush.msra.mxu0 %v4752_v36  ;;  %1026 = vmatpush.msra.mxu1 %v4784_v37  ;;  %v4735_v36 = vld [vmem:[%s10820_s1 + $0x808] sm:$0xff] }
  0xab   :  { %1055 = vmatpush.msra.mxu2 %v4753_v40  ;;  %1084 = vmatpush.msra.mxu3 %v4785_v41  ;;  %v4767_v37 = vld [vmem:[%s10820_s1 + $0x908] sm:$0xff]  ;;  %v5613_v40 = vld [vmem:[%s10819_s0 + $0x20] sm:$0xff] }
  0xac   :  { %998 = vmatpush.msra.mxu0 %v4750_v42  ;;  %1027 = vmatpush.msra.mxu1 %v4782_v43  ;;  %v975_v41 = vrot.slane %v5613_v40, 4  ;;  %v5614_v42 = vld [vmem:[%s10819_s0 + $0x28] sm:$0xff]  ;;  %v1149_v40 = vld [vmem:[%s10822_s3 + $0x60] sm:$0xff] }
  0xad   :  { %1056 = vmatpush.msra.mxu2 %v4751_v46  ;;  %1085 = vmatpush.msra.mxu3 %v4783_v47  ;;  %v977_v43 = vrot.slane %v5614_v42, 4  ;;  %v1148_v42 = vld [vmem:[%s10822_s3 + $0x58] sm:$0xff] }
  0xae   :  { %793 = vmatmul.f32.gmra.mxu0 %v760_v48  ;;  %822 = vmatmul.f32.gmra.mxu1 %v762_v49 }
  0xaf   :  { %851 = vmatmul.f32.gmra.mxu2 %v760_v48  ;;  %880 = vmatmul.f32.gmra.mxu3 %v762_v49  ;;  %v976_v48 = vsel %vm968_vm3, %v970_v24, %v975_v41  ;;  %v978_v49 = vsel %vm968_vm3, %v973_v27, %v977_v43 }
  0xb0   :  { %999 = vmatpush.msra.mxu0 %v4748_v50  ;;  %1028 = vmatpush.msra.mxu1 %v4780_v51  ;;  %v6768_v58 = vpop.f32.mrf.mxu2  ;;  %v6770_v59 = vpop.f32.mrf.mxu3 }
  0xb1   :  { %1057 = vmatpush.msra.mxu2 %v4749_v14  ;;  %1086 = vmatpush.msra.mxu3 %v4781_v15  ;;  %v897_v14 = vld [vmem:[%s10819_s0 + $0x30] sm:$0xff]  ;;  %v898_v15 = vld [vmem:[%s10819_s0 + $0x38] sm:$0xff] }
  0xb2   :  { %1000 = vmatpush.msra.mxu0 %v4746_v53  ;;  %1029 = vmatpush.msra.mxu1 %v4778_v55  ;;  %v979_v53 = vrot.slane %v897_v14, 4  ;;  %v981_v55 = vrot.slane %v898_v15, 4 }
  0xb3   :  { %1058 = vmatpush.msra.mxu2 %v4747_v56  ;;  %1087 = vmatpush.msra.mxu3 %v4779_v57  ;;  %v6790_v0 = vpop.f32.mrf.mxu0  ;;  %v6792_v1 = vpop.f32.mrf.mxu1 }
  0xb4   :  { %1001 = vmatpush.msra.mxu0 %v4744_v52  ;;  %1030 = vmatpush.msra.mxu1 %v4776_v54  ;;  %v980_v52 = vsel %vm968_vm3, %v975_v41, %v979_v53  ;;  %v982_v54 = vsel %vm968_vm3, %v977_v43, %v981_v55  ;;  %v4814_v41 = vld [vmem:[%s10822_s3 + $0x140] sm:$0xff]  ;;  %v4813_v43 = vld [vmem:[%s10822_s3 + $0x138] sm:$0xff] }
  0xb5   :  { %1059 = vmatpush.msra.mxu2 %v4745_v60  ;;  %1088 = vmatpush.msra.mxu3 %v4777_v61 }
  0xb6   :  { %1002 = vmatpush.msra.mxu0 %v4742_v62  ;;  %1031 = vmatpush.msra.mxu1 %v4774_v63 }
  0xb7   :  { %1060 = vmatpush.msra.mxu2 %v4743_v2  ;;  %1089 = vmatpush.msra.mxu3 %v4775_v3 }
  0xb8   :  { %796 = vmatmul.f32.gmra.mxu0 %v6710_v38  ;;  %825 = vmatmul.f32.gmra.mxu1 %v6712_v39 }
  0xb9   :  { %854 = vmatmul.f32.gmra.mxu2 %v6710_v38  ;;  %883 = vmatmul.f32.gmra.mxu3 %v6712_v39  ;;  %v971_v38 = vsel %vm968_vm3, %v969_v22, %v970_v24  ;;  %v974_v39 = vsel %vm968_vm3, %v972_v25, %v973_v27  ;;  %v4817_v27 = vld [vmem:[%s10822_s3 + $0x158] sm:$0xff] }
  0xba   :  { %1003 = vmatpush.msra.mxu0 %v4740_v4  ;;  %1032 = vmatpush.msra.mxu1 %v4772_v5  ;;  %v6834_v16 = vpop.f32.mrf.mxu2  ;;  %v6836_v17 = vpop.f32.mrf.mxu3 }
  0xbb   :  { %1061 = vmatpush.msra.mxu2 %v4741_v6  ;;  %1090 = vmatpush.msra.mxu3 %v4773_v7 }
  0xbc   :  { %1004 = vmatpush.msra.mxu0 %v4738_v10  ;;  %1033 = vmatpush.msra.mxu1 %v4770_v11 }
  0xbd   :  { %1062 = vmatpush.msra.mxu2 %v4739_v12  ;;  %1091 = vmatpush.msra.mxu3 %v4771_v13  ;;  %v6862_v32 = vpop.f32.mrf.mxu0  ;;  %v6864_v33 = vpop.f32.mrf.mxu1 }
  0xbe   :  { %1005 = vmatpush.msra.mxu0 %v4736_v20  ;;  %1034 = vmatpush.msra.mxu1 %v4768_v21 }
  0xbf   :  { %1063 = vmatpush.msra.mxu2 %v4737_v28  ;;  %1092 = vmatpush.msra.mxu3 %v4769_v29  ;;  %v1151_v28 = vld [vmem:[%s10822_s3 + $0x70] sm:$0xff] }
  0xc0   :  { %1006 = vmatpush.msra.mxu0 %v4734_v30  ;;  %1035 = vmatpush.msra.mxu1 %v4766_v31  ;;  %v4816_v29 = vld [vmem:[%s10822_s3 + $0x150] sm:$0xff] }
  0xc1   :  { %1064 = vmatpush.msra.mxu2 %v4735_v36  ;;  %1093 = vmatpush.msra.mxu3 %v4767_v37  ;;  %v1150_v36 = vld [vmem:[%s10822_s3 + $0x68] sm:$0xff] }
  0xc2   :  { %1007 = vmatmul.f32.vlgmr.msra.gmra.mxu0 %v971_v38  ;;  %1036 = vmatmul.f32.vlgmr.msra.gmra.mxu1 %v974_v39  ;;  %v4815_v37 = vld [vmem:[%s10822_s3 + $0x148] sm:$0xff] }
  0xc3   :  { %1065 = vmatmul.f32.vlgmr.msra.gmra.mxu2 %v971_v38  ;;  %1094 = vmatmul.f32.vlgmr.msra.gmra.mxu3 %v974_v39 }
  0xc4   :  { %v6880_v46 = vpop.f32.mrf.mxu2  ;;  %v6882_v47 = vpop.f32.mrf.mxu3  ;;  %1178 = vmatpush.msrb.mxu0 %v1152_v26  ;;  %1265 = vmatpush.msrb.mxu2 %v4817_v27  ;;  %v1145_v26 = vld [vmem:[%s10822_s3 + $0x40] sm:$0xff]  ;;  %v1164_v27 = vld [vmem:[%s10822_s3 + $0xd8] sm:$0xff] }
  0xc5   :  { %10835 = vst [vmem:[#allocation7_spill] sm:$0xff] %v6880_v46  ;;  %1211 = vmatpush.msrb.mxu1 %v1164_v27  ;;  %v328_v46 = vadd.f32 %v6702_v35, %v6700_v34 }
  0xc6   :  { %10836 = vst [vmem:[#allocation8_spill] sm:$0xff] %v6882_v47  ;;  %1179 = vmatpush.msrb.mxu0 %v1151_v28  ;;  %1266 = vmatpush.msrb.mxu2 %v4816_v29  ;;  %v4810_v28 = vld [vmem:[%s10822_s3 + $0x120] sm:$0xff]  ;;  %v4829_v29 = vld [vmem:[%s10822_s3 + $0x1b8] sm:$0xff] }
  0xc7   :  { %v6886_v50 = vpop.f32.mrf.mxu0  ;;  %v6888_v51 = vpop.f32.mrf.mxu1  ;;  %1298 = vmatpush.msrb.mxu3 %v4829_v29  ;;  %v4826_v29 = vld [vmem:[%s10822_s3 + $0x1a0] sm:$0xff] }
  0xc8   :  { %1180 = vmatpush.msrb.mxu0 %v1150_v36  ;;  %1267 = vmatpush.msrb.mxu2 %v4815_v37  ;;  %v1144_v36 = vld [vmem:[%s10822_s3 + $0x38] sm:$0xff]  ;;  %v1163_v37 = vld [vmem:[%s10822_s3 + $0xd0] sm:$0xff] }
  0xc9   :  { %1212 = vmatpush.msrb.mxu1 %v1163_v37  ;;  %v1160_v37 = vld [vmem:[%s10822_s3 + $0xb8] sm:$0xff] }
  0xca   :  { %1010 = vmatmul.f32.gmra.mxu0 %v976_v48  ;;  %1039 = vmatmul.f32.gmra.mxu1 %v978_v49 }
  0xcb   :  { %1068 = vmatmul.f32.gmra.mxu2 %v976_v48  ;;  %1097 = vmatmul.f32.gmra.mxu3 %v978_v49  ;;  %v1147_v48 = vld [vmem:[%s10822_s3 + $0x50] sm:$0xff] }
  0xcc   :  { %1181 = vmatpush.msrb.mxu0 %v1149_v40  ;;  %1268 = vmatpush.msrb.mxu2 %v4814_v41  ;;  %v4812_v49 = vld [vmem:[%s10822_s3 + $0x130] sm:$0xff]  ;;  %v4809_v40 = vld [vmem:[%s10822_s3 + $0x118] sm:$0xff] }
  0xcd   :  { %v4828_v41 = vld [vmem:[%s10822_s3 + $0x1b0] sm:$0xff] }
  0xce   :  { %v6896_v56 = vpop.f32.mrf.mxu2  ;;  %v6898_v57 = vpop.f32.mrf.mxu3  ;;  %1182 = vmatpush.msrb.mxu0 %v1148_v42  ;;  %1269 = vmatpush.msrb.mxu2 %v4813_v43  ;;  %v1143_v42 = vld [vmem:[%s10822_s3 + $0x30] sm:$0xff]  ;;  %v1162_v43 = vld [vmem:[%s10822_s3 + $0xc8] sm:$0xff] }
  0xcf   :  { %1299 = vmatpush.msrb.mxu3 %v4828_v41  ;;  %1213 = vmatpush.msrb.mxu1 %v1162_v43  ;;  %v4825_v41 = vld [vmem:[%s10822_s3 + $0x198] sm:$0xff] }
  0xd0   :  { %1183 = vmatpush.msrb.mxu0 %v1147_v48  ;;  %1270 = vmatpush.msrb.mxu2 %v4812_v49  ;;  %v4808_v48 = vld [vmem:[%s10822_s3 + $0x110] sm:$0xff]  ;;  %v4827_v49 = vld [vmem:[%s10822_s3 + $0x1a8] sm:$0xff] }
  0xd1   :  { %v6902_v60 = vpop.f32.mrf.mxu0  ;;  %v6904_v61 = vpop.f32.mrf.mxu1  ;;  %1300 = vmatpush.msrb.mxu3 %v4827_v49  ;;  %v1159_v49 = vld [vmem:[%s10822_s3 + $0xb0] sm:$0xff] }
  0xd2   :  { %1013 = vmatmul.f32.gmra.mxu0 %v980_v52  ;;  %1042 = vmatmul.f32.gmra.mxu1 %v982_v54 }
  0xd3   :  { %1071 = vmatmul.f32.gmra.mxu2 %v980_v52  ;;  %1100 = vmatmul.f32.gmra.mxu3 %v982_v54 }
  0xd4   :  { %1301 = vmatpush.msrb.mxu3 %v4826_v29  ;;  %v1158_v29 = vld [vmem:[%s10822_s3 + $0xa8] sm:$0xff] }
  0xd6   :  { %1302 = vmatpush.msrb.mxu3 %v4825_v41  ;;  %v1157_v41 = vld [vmem:[%s10822_s3 + $0xa0] sm:$0xff] }
  0xd8   :  { %v6906_v62 = vpop.f32.mrf.mxu2  ;;  %v6908_v63 = vpop.f32.mrf.mxu3 }
  0xda   :  { %1016 = vmatmul.f32.gmra.mxu0 %v979_v53  ;;  %1045 = vmatmul.f32.gmra.mxu1 %v981_v55 }
  0xdb   :  { %1074 = vmatmul.f32.gmra.mxu2 %v979_v53  ;;  %1103 = vmatmul.f32.gmra.mxu3 %v981_v55  ;;  %v6910_v2 = vpop.f32.mrf.mxu0  ;;  %v6912_v3 = vpop.f32.mrf.mxu1  ;;  %v1146_v53 = vld [vmem:[%s10822_s3 + $0x48] sm:$0xff] }
  0xdc   :  { %v4811_v55 = vld [vmem:[%s10822_s3 + $0x128] sm:$0xff]  ;;  %1184 = vmatpush.msrb.mxu0 %v1146_v53 }
  0xdd   :  { %1271 = vmatpush.msrb.mxu2 %v4811_v55  ;;  %v1142_v53 = vld [vmem:[%s10822_s3 + $0x28] sm:$0xff]  ;;  %v1161_v55 = vld [vmem:[%s10822_s3 + $0xc0] sm:$0xff] }
  0xde   :  { %1185 = vmatpush.msrb.mxu0 %v1145_v26  ;;  %v4807_v26 = vld [vmem:[%s10822_s3 + $0x108] sm:$0xff]  ;;  %1214 = vmatpush.msrb.mxu1 %v1161_v55  ;;  %v4824_v55 = vld [vmem:[%s10822_s3 + $0x190] sm:$0xff] }
  0xdf   :  { %1272 = vmatpush.msrb.mxu2 %v4810_v28  ;;  %1303 = vmatpush.msrb.mxu3 %v4824_v55  ;;  %v1156_v55 = vld [vmem:[%s10822_s3 + $0x98] sm:$0xff] }
  0xe0   :  { %1186 = vmatpush.msrb.mxu0 %v1144_v36  ;;  %v1141_v36 = vld [vmem:[%s10822_s3 + $0x20] sm:$0xff]  ;;  %1215 = vmatpush.msrb.mxu1 %v1160_v37  ;;  %v4823_v37 = vld [vmem:[%s10822_s3 + $0x188] sm:$0xff] }
  0xe1   :  { %1273 = vmatpush.msrb.mxu2 %v4809_v40  ;;  %v4806_v40 = vld [vmem:[%s10822_s3 + $0x100] sm:$0xff]  ;;  %1304 = vmatpush.msrb.mxu3 %v4823_v37  ;;  %v4821_v37 = vld [vmem:[%s10822_s3 + $0x178] sm:$0xff] }
  0xe2   :  { %v6914_v4 = vpop.f32.mrf.mxu2  ;;  %v6916_v5 = vpop.f32.mrf.mxu3  ;;  %1187 = vmatpush.msrb.mxu0 %v1143_v42  ;;  %1216 = vmatpush.msrb.mxu1 %v1159_v49  ;;  %v4822_v49 = vld [vmem:[%s10822_s3 + $0x180] sm:$0xff] }
  0xe3   :  { %1274 = vmatpush.msrb.mxu2 %v4808_v48  ;;  %v1140_v48 = vld [vmem:[%s10822_s3 + $0x18] sm:$0xff]  ;;  %1305 = vmatpush.msrb.mxu3 %v4822_v49 }
  0xe4   :  { %1188 = vmatpush.msrb.mxu0 %v1142_v53  ;;  %v4805_v53 = vld [vmem:[%s10822_s3 + $0xf8] sm:$0xff]  ;;  %1217 = vmatpush.msrb.mxu1 %v1158_v29 }
  0xe5   :  { %v6918_v6 = vpop.f32.mrf.mxu0  ;;  %v6920_v7 = vpop.f32.mrf.mxu1  ;;  %1275 = vmatpush.msrb.mxu2 %v4807_v26  ;;  %v1139_v26 = vld [vmem:[%s10822_s3 + $0x10] sm:$0xff]  ;;  %1306 = vmatpush.msrb.mxu3 %v4821_v37  ;;  %v4818_v37 = vld [vmem:[%s10822_s3 + $0x160] sm:$0xff] }
  0xe6   :  { %1189 = vmatpush.msrb.mxu0 %v1141_v36  ;;  %v4804_v36 = vld [vmem:[%s10822_s3 + $0xf0] sm:$0xff]  ;;  %1218 = vmatpush.msrb.mxu1 %v1157_v41 }
  0xe7   :  { %1276 = vmatpush.msrb.mxu2 %v4806_v40  ;;  %v1138_v40 = vld [vmem:[%s10822_s3 + $0x8] sm:$0xff]  ;;  %v4820_v41 = vld [vmem:[%s10822_s3 + $0x170] sm:$0xff] }
  0xe8   :  { %1190 = vmatpush.msrb.mxu0 %v1140_v48  ;;  %v4803_v48 = vld [vmem:[%s10822_s3 + $0xe8] sm:$0xff]  ;;  %1219 = vmatpush.msrb.mxu1 %v1156_v55 }
  0xe9   :  { %1277 = vmatpush.msrb.mxu2 %v4805_v53  ;;  %v1137_v53 = vld [vmem:[%s10822_s3] sm:$0xff]  ;;  %1307 = vmatpush.msrb.mxu3 %v4820_v41  ;;  %v4819_v55 = vld [vmem:[%s10822_s3 + $0x168] sm:$0xff] }
  0xea   :  { %1191 = vmatpush.msrb.mxu0 %v1139_v26  ;;  %v4802_v26 = vld [vmem:[%s10822_s3 + $0xe0] sm:$0xff] }
  0xeb   :  { %1278 = vmatpush.msrb.mxu2 %v4804_v36  ;;  %1308 = vmatpush.msrb.mxu3 %v4819_v55 }
  0xec   :  { %v6922_v8 = vpop.f32.mrf.mxu2  ;;  %v6924_v9 = vpop.f32.mrf.mxu3  ;;  %1192 = vmatpush.msrb.mxu0 %v1138_v40  ;;  %v1155_v40 = vld [vmem:[%s10822_s3 + $0x90] sm:$0xff] }
  0xed   :  { %10837 = vst [vmem:[#allocation9_spill] sm:$0xff] %v6922_v8  ;;  %1279 = vmatpush.msrb.mxu2 %v4803_v48  ;;  %1220 = vmatpush.msrb.mxu1 %v1155_v40 }
  0xee   :  { %10838 = vst [vmem:[#allocation10_spill] sm:$0xff] %v6924_v9  ;;  %1193 = vmatpush.msrb.mxu0 %v1137_v53  ;;  %v1154_v53 = vld [vmem:[%s10822_s3 + $0x88] sm:$0xff]  ;;  %1309 = vmatpush.msrb.mxu3 %v4818_v37 }
  0xef   :  { %v6926_v10 = vpop.f32.mrf.mxu0  ;;  %v6928_v11 = vpop.f32.mrf.mxu1  ;;  %1280 = vmatpush.msrb.mxu2 %v4802_v26  ;;  %1221 = vmatpush.msrb.mxu1 %v1154_v53  ;;  %v1153_v26 = vld [vmem:[%s10822_s3 + $0x80] sm:$0xff]  ;;  %v270_v53 = vadd.f32 %v6656_v19, %v6654_v18  ;;  %v273_v19 = vadd.f32 %v6728_v45, %v6726_v44 }
  0xf0   :  { %v1115_v18 = vld [vmem:[%s10821_s2] sm:$0x3] }
  0xf1   :  { %1222 = vmatpush.msrb.mxu1 %v1153_v26  ;;  %v357_v55 = vadd.f32 %v6886_v50, %v270_v53 }
  0xf3   :  { %v386_v8 = vadd.f32 %v6888_v51, %v357_v55  ;;  %v415_v51 = vadd.f32 %v6896_v56, %v328_v46  ;;  %v7175_v55 = vperm.slane %v1115_v18, 0 }
  0xf5   :  { %v444_v44 = vadd.f32 %v6898_v57, %v415_v51 }
  0xf6   :  { %v6930_v12 = vpop.f32.mrf.mxu2  ;;  %v6932_v13 = vpop.f32.mrf.mxu3 }
  0xf7   :  { %v656_v34 = vadd.f32 %v6932_v13, %v6930_v12  ;;  %v276_v13 = vadd.f32 %v6792_v1, %v6790_v0 }
  0xf9   :  { %v6934_v20 = vpop.f32.mrf.mxu0  ;;  %v6936_v21 = vpop.f32.mrf.mxu1  ;;  %v668_v12 = vadd.f32 %v656_v34, %v444_v44 }
  0xfa   :  { %v601_v35 = vadd.f32 %v6936_v21, %v6934_v20 }
 0x100   :  { %v6938_v22 = vpop.f32.mrf.mxu2  ;;  %v6940_v23 = vpop.f32.mrf.mxu3 }
 0x103   :  { %v6942_v24 = vpop.f32.mrf.mxu0  ;;  %v6944_v25 = vpop.f32.mrf.mxu1 }
 0x104   :  { %v604_v1 = vadd.f32 %v6944_v25, %v6942_v24 }
 0x10a   :  { %v6958_v30 = vpop.f32.mrf.mxu2  ;;  %v6960_v31 = vpop.f32.mrf.mxu3 }
 0x10d   :  { %v6968_v38 = vpop.f32.mrf.mxu0  ;;  %v6970_v39 = vpop.f32.mrf.mxu1 }
 0x114   :  { %v6990_v14 = vpop.f32.mrf.mxu2  ;;  %v6992_v15 = vpop.f32.mrf.mxu3 }
 0x115   :  { %10839 = vst [vmem:[#allocation11_spill] sm:$0xff] %v6990_v14  ;;  %v598_v14 = vadd.f32 %v6928_v11, %v6926_v10 }
 0x116   :  { %10840 = vst [vmem:[#allocation12_spill] sm:$0xff] %v6992_v15 }
 0x117   :  { %v7000_v52 = vpop.f32.mrf.mxu0  ;;  %v7002_v54 = vpop.f32.mrf.mxu1  ;;  %v667_v50 = vadd.f32 %v598_v14, %v386_v8  ;;  %v331_v8 = vadd.f32 %v6770_v59, %v6768_v58  ;;  %v659_v59 = vadd.f32 %v6940_v23, %v6938_v22  ;;  %v334_v23 = vadd.f32 %v6836_v17, %v6834_v16 }
 0x118   :  { %v818_v26 = vadd.f32 %v7002_v54, %v7000_v52  ;;  %v360_v52 = vadd.f32 %v6902_v60, %v273_v19 }
 0x11a   :  { %v887_v54 = vadd.f32 %v818_v26, %v667_v50  ;;  %v389_v46 = vadd.f32 %v6904_v61, %v360_v52  ;;  %v7193_v26 = vperm.slane %v1115_v18, 1 }
 0x11c   :  { %v669_v20 = vadd.f32 %v601_v35, %v389_v46 }
 0x11e   :  { %v7049_v27 = vpop.f32.mrf.mxu2  ;;  %v7051_v28 = vpop.f32.mrf.mxu3 }
 0x11f   :  { %v876_v45 = vadd.f32 %v7051_v28, %v7049_v27  ;;  %v418_v27 = vadd.f32 %v6906_v62, %v331_v8 }
 0x121   :  { %v7068_v42 = vpop.f32.mrf.mxu0  ;;  %v7070_v43 = vpop.f32.mrf.mxu1  ;;  %v888_v28 = vadd.f32 %v876_v45, %v668_v12  ;;  %v447_v50 = vadd.f32 %v6908_v63, %v418_v27  ;;  %v279_v63 = vadd.f32 %v6864_v33, %v6862_v32  ;;  %v662_v32 = vadd.f32 %v6960_v31, %v6958_v30  ;;  %v10842_v30 = vld [vmem:[#allocation7_spill] sm:$0xff]  ;;  %v10843_v31 = vld [vmem:[#allocation8_spill] sm:$0xff] }
 0x122   :  { %v821_v56 = vadd.f32 %v7070_v43, %v7068_v42  ;;  %v337_v8 = vadd.f32 %v10843_v31, %v10842_v30  ;;  %v10845_v27 = vld [vmem:[#allocation11_spill] sm:$0xff] }
 0x123   :  { %v670_v24 = vadd.f32 %v659_v59, %v447_v50  ;;  %v366_v16 = vadd.f32 %v6918_v6, %v279_v63  ;;  %v4861_v30 = vld [vmem:[%s10824_s5 + $0x198] sm:$0xff] }
 0x124   :  { %v889_v19 = vadd.f32 %v821_v56, %v669_v20 }
 0x125   :  { %v395_v6 = vadd.f32 %v6920_v7, %v366_v16  ;;  %v4871_v16 = vld [vmem:[%s10824_s5 + $0x1e8] sm:$0xff] }
 0x128   :  { %v7117_v29 = vpop.f32.mrf.mxu2  ;;  %v7119_v36 = vpop.f32.mrf.mxu3 }
 0x129   :  { %v879_v18 = vadd.f32 %v7119_v36, %v7117_v29 }
 0x12b   :  { %v7130_v48 = vpop.f32.mrf.mxu0  ;;  %v7132_v49 = vpop.f32.mrf.mxu1 }
 0x132   :  { %v7146_v40 = vpop.f32.mrf.mxu2  ;;  %v7148_v41 = vpop.f32.mrf.mxu3 }
 0x133   :  { %v882_v45 = vadd.f32 %v7148_v41, %v7146_v40 }
 0x135   :  { %v7150_v9 = vpop.f32.mrf.mxu0  ;;  %v7152_v15 = vpop.f32.mrf.mxu1 }
 0x136   :  { %v827_v56 = vadd.f32 %v7152_v15, %v7150_v9 }
 0x13c   :  { %v7162_v37 = vpop.f32.mrf.mxu2  ;;  %v7164_v47 = vpop.f32.mrf.mxu3 }
 0x13d   :  { %10841 = vst [vmem:[#allocation13_spill] sm:$0xff] %v7164_v47 }
 0x13f   :  { %v1008_v10 = vpop.f32.mrf.mxu0  ;;  %v1037_v11 = vpop.f32.mrf.mxu1 }
 0x140   :  { %v1038_v53 = vadd.f32 %v1037_v11, %v1008_v10  ;;  %v824_v10 = vadd.f32 %v7132_v49, %v7130_v48 }
 0x142   :  { %v1107_v47 = vadd.f32 %v1038_v53, %v887_v54  ;;  %v890_v54 = vadd.f32 %v879_v18, %v670_v24 }
 0x144   :  { %v1121_v60 = vadd.f32 %v7175_v55, %v1107_v47  ;;  %v363_v47 = vadd.f32 %v6910_v2, %v276_v13 }
 0x146   :  { %v1129_v21 = vmax.f32 %v1121_v60, 0.0  ;;  %v1066_v57 = vpop.f32.mrf.mxu2  ;;  %v1095_v14 = vpop.f32.mrf.mxu3  ;;  %v392_v2 = vadd.f32 %v6912_v3, %v363_v47  ;;  %v421_v3 = vadd.f32 %v6914_v4, %v334_v23  ;;  %v607_v4 = vadd.f32 %v6970_v39, %v6968_v38  ;;  %v10847_v47 = vld [vmem:[#allocation10_spill] sm:$0xff] }
 0x147   :  { %v1096_v61 = vadd.f32 %v1095_v14, %v1066_v57  ;;  %v1011_v42 = vpop.f32.mrf.mxu0  ;;  %v1040_v43 = vpop.f32.mrf.mxu1 }
 0x148   :  { %v1041_v58 = vadd.f32 %v1040_v43, %v1011_v42  ;;  %1194 = vmatmul.f32.vlgmr.msrb.gmra.mxu0 %v1129_v21  ;;  %1281 = vmatmul.f32.vlgmr.msrb.gmra.mxu2 %v1129_v21  ;;  %v671_v11 = vadd.f32 %v604_v1, %v392_v2  ;;  %v450_v44 = vadd.f32 %v6916_v5, %v421_v3  ;;  %v10844_v21 = vld [vmem:[#allocation9_spill] sm:$0xff] }
 0x149   :  { %v1108_v0 = vadd.f32 %v1096_v61, %v888_v28  ;;  %v673_v39 = vadd.f32 %v607_v4, %v395_v6  ;;  %v424_v40 = vadd.f32 %v10844_v21, %v337_v8  ;;  %v10846_v28 = vld [vmem:[#allocation12_spill] sm:$0xff]  ;;  %v4863_v6 = vld [vmem:[%s10824_s5 + $0x1a8] sm:$0xff] }
 0x14a   :  { %v1109_v62 = vadd.f32 %v1041_v58, %v889_v19  ;;  %v891_v17 = vadd.f32 %v824_v10, %v671_v11  ;;  %v672_v12 = vadd.f32 %v662_v32, %v450_v44  ;;  %v665_v61 = vadd.f32 %v10846_v28, %v10845_v27  ;;  %v10848_v58 = vld [vmem:[#allocation13_spill] sm:$0xff]  ;;  %v4869_v32 = vld [vmem:[%s10824_s5 + $0x1d8] sm:$0xff]  ;;  %v4864_v44 = vld [vmem:[%s10824_s5 + $0x1b0] sm:$0xff] }
 0x14b   :  { %v1122_v51 = vadd.f32 %v7193_v26, %v1108_v0  ;;  %v893_v15 = vadd.f32 %v827_v56, %v673_v39  ;;  %v453_v19 = vadd.f32 %v10847_v47, %v424_v40  ;;  %v885_v59 = vadd.f32 %v10848_v58, %v7162_v37  ;;  %v4866_v4 = vld [vmem:[%s10824_s5 + $0x1c0] sm:$0xff]  ;;  %v4859_v39 = vld [vmem:[%s10824_s5 + $0x188] sm:$0xff]  ;;  %v4853_v47 = vld [vmem:[%s10824_s5 + $0x158] sm:$0xff] }
 0x14c   :  { %v1123_v22 = vadd.f32 %v7175_v55, %v1109_v62  ;;  %v892_v41 = vadd.f32 %v882_v45, %v672_v12  ;;  %v4865_v45 = vld [vmem:[%s10824_s5 + $0x1b8] sm:$0xff]  ;;  %v4854_v27 = vld [vmem:[%s10824_s5 + $0x160] sm:$0xff]  ;;  %v4855_v28 = vld [vmem:[%s10824_s5 + $0x168] sm:$0xff] }
 0x14d   :  { %v1130_v25 = vmax.f32 %v1122_v51, 0.0  ;;  %v674_v62 = vadd.f32 %v665_v61, %v453_v19  ;;  %v1327_v58 = vld [vmem:[%s10823_s4] sm:$0xff] }
 0x14e   :  { %v1069_v29 = vpop.f32.mrf.mxu2  ;;  %v1098_v36 = vpop.f32.mrf.mxu3  ;;  %v1131_v52 = vmax.f32 %v1123_v22, 0.0 }
 0x14f   :  { %v1099_v53 = vadd.f32 %v1098_v36, %v1069_v29  ;;  %4798 = vmatmul.msk.f32.vlgmr.msrb.gmra.mxu1 %vm1165_vm4, %v1130_v25  ;;  %4830 = vmatmul.msk.f32.vlgmr.msrb.gmra.mxu3 %vm1165_vm4, %v1130_v25  ;;  %v1014_v48 = vpop.f32.mrf.mxu0  ;;  %v1043_v49 = vpop.f32.mrf.mxu1  ;;  %v894_v10 = vadd.f32 %v885_v59, %v674_v62  ;;  %v4837_v59 = vld [vmem:[%s10823_s4 + $0x10] sm:$0xff]  ;;  %v4850_v62 = vld [vmem:[%s10824_s5 + $0x140] sm:$0xff] }
 0x150   :  { %v1044_v34 = vadd.f32 %v1043_v49, %v1014_v48  ;;  %1197 = vmatmul.f32.gmra.mxu0 %v1131_v52  ;;  %1284 = vmatmul.f32.gmra.mxu2 %v1131_v52  ;;  %v4870_v48 = vld [vmem:[%s10824_s5 + $0x1e0] sm:$0xff] }
 0x151   :  { %v1110_v33 = vadd.f32 %v1099_v53, %v890_v54  ;;  %v4873_v53 = vld [vmem:[%s10824_s5 + $0x1f8] sm:$0xff] }
 0x152   :  { %v1111_v35 = vadd.f32 %v1044_v34, %v891_v17  ;;  %1490 = vmatpush.msra.mxu3 %v4873_v53  ;;  %v4868_v34 = vld [vmem:[%s10824_s5 + $0x1d0] sm:$0xff]  ;;  %v4842_v53 = vld [vmem:[%s10824_s5 + $0x100] sm:$0xff] }
 0x153   :  { %v1124_v46 = vadd.f32 %v7193_v26, %v1110_v33 }
 0x154   :  { %v1125_v60 = vadd.f32 %v7175_v55, %v1111_v35  ;;  %1491 = vmatpush.msra.mxu3 %v4871_v16  ;;  %v4867_v35 = vld [vmem:[%s10824_s5 + $0x1c8] sm:$0xff]  ;;  %v1419_v16 = vld [vmem:[%s10824_s5 + $0x98] sm:$0xff] }
 0x155   :  { %v1132_v38 = vmax.f32 %v1124_v46, 0.0  ;;  %v4862_v46 = vld [vmem:[%s10824_s5 + $0x1a0] sm:$0xff] }
 0x156   :  { %v1072_v13 = vpop.f32.mrf.mxu2  ;;  %v1101_v5 = vpop.f32.mrf.mxu3  ;;  %v1133_v20 = vmax.f32 %v1125_v60, 0.0  ;;  %1492 = vmatpush.msra.mxu3 %v4869_v32  ;;  %v4860_v60 = vld [vmem:[%s10824_s5 + $0x190] sm:$0xff]  ;;  %v1416_v32 = vld [vmem:[%s10824_s5 + $0x80] sm:$0xff] }
 0x157   :  { %v1102_v57 = vadd.f32 %v1101_v5, %v1072_v13  ;;  %4799 = vmatmul.msk.f32.gmra.mxu1 %vm1165_vm4, %v1132_v38  ;;  %4831 = vmatmul.msk.f32.gmra.mxu3 %vm1165_vm4, %v1132_v38  ;;  %v1017_v7 = vpop.f32.mrf.mxu0  ;;  %v1046_v9 = vpop.f32.mrf.mxu1  ;;  %v4858_v38 = vld [vmem:[%s10824_s5 + $0x180] sm:$0xff] }
 0x158   :  { %v1047_v14 = vadd.f32 %v1046_v9, %v1017_v7  ;;  %1200 = vmatmul.f32.gmra.mxu0 %v1133_v20  ;;  %1287 = vmatmul.f32.gmra.mxu2 %v1133_v20  ;;  %v4857_v7 = vld [vmem:[%s10824_s5 + $0x178] sm:$0xff] }
 0x159   :  { %v1112_v42 = vadd.f32 %v1102_v57, %v892_v41  ;;  %1493 = vmatpush.msra.mxu3 %v4867_v35  ;;  %v4856_v57 = vld [vmem:[%s10824_s5 + $0x170] sm:$0xff]  ;;  %v4903_v35 = vld [vmem:[%s10824_s5 + $0x2e8] sm:$0xff] }
 0x15a   :  { %v1113_v43 = vadd.f32 %v1047_v14, %v893_v15 }
 0x15b   :  { %v1126_v0 = vadd.f32 %v7193_v26, %v1112_v42  ;;  %1494 = vmatpush.msra.mxu3 %v4865_v45  ;;  %v1415_v45 = vld [vmem:[%s10824_s5 + $0x78] sm:$0xff] }
 0x15c   :  { %v1127_v1 = vadd.f32 %v7175_v55, %v1113_v43  ;;  %v4852_v43 = vld [vmem:[%s10824_s5 + $0x150] sm:$0xff] }
 0x15d   :  { %v1134_v50 = vmax.f32 %v1126_v0, 0.0  ;;  %1495 = vmatpush.msra.mxu3 %v4863_v6  ;;  %v1430_v0 = vld [vmem:[%s10824_s5 + $0xf0] sm:$0xff]  ;;  %v4901_v6 = vld [vmem:[%s10824_s5 + $0x2d8] sm:$0xff] }
 0x15e   :  { %v1075_v18 = vpop.f32.mrf.mxu2  ;;  %v1104_v51 = vpop.f32.mrf.mxu3  ;;  %v1135_v2 = vmax.f32 %v1127_v1, 0.0  ;;  %v1431_v1 = vld [vmem:[%s10824_s5 + $0xf8] sm:$0xff] }
 0x15f   :  { %v1105_v22 = vadd.f32 %v1104_v51, %v1075_v18  ;;  %4800 = vmatmul.msk.f32.gmra.mxu1 %vm1165_vm4, %v1134_v50  ;;  %4832 = vmatmul.msk.f32.gmra.mxu3 %vm1165_vm4, %v1134_v50  ;;  %v4851_v50 = vld [vmem:[%s10824_s5 + $0x148] sm:$0xff]  ;;  %v1428_v18 = vld [vmem:[%s10824_s5 + $0xe0] sm:$0xff] }
 0x160   :  { %1203 = vmatmul.f32.gmra.mxu0 %v1135_v2  ;;  %1290 = vmatmul.f32.gmra.mxu2 %v1135_v2  ;;  %v1429_v51 = vld [vmem:[%s10824_s5 + $0xe8] sm:$0xff]  ;;  %v4848_v2 = vld [vmem:[%s10824_s5 + $0x130] sm:$0xff] }
 0x161   :  { %v1114_v23 = vadd.f32 %v1105_v22, %v894_v10  ;;  %1496 = vmatpush.msra.mxu3 %v4861_v30  ;;  %v4849_v10 = vld [vmem:[%s10824_s5 + $0x138] sm:$0xff]  ;;  %v1426_v22 = vld [vmem:[%s10824_s5 + $0xd0] sm:$0xff]  ;;  %v4898_v30 = vld [vmem:[%s10824_s5 + $0x2c0] sm:$0xff] }
 0x163   :  { %v1128_v37 = vadd.f32 %v7193_v26, %v1114_v23  ;;  %v4872_v26 = vld [vmem:[%s10824_s5 + $0x1f0] sm:$0xff]  ;;  %1497 = vmatpush.msra.mxu3 %v4859_v39  ;;  %v1427_v23 = vld [vmem:[%s10824_s5 + $0xd8] sm:$0xff] }
 0x164   :  { %1467 = vmatpush.msra.mxu2 %v4872_v26  ;;  %v1421_v26 = vld [vmem:[%s10824_s5 + $0xa8] sm:$0xff]  ;;  %v4897_v39 = vld [vmem:[%s10824_s5 + $0x2b8] sm:$0xff] }
 0x165   :  { %v1136_v24 = vmax.f32 %v1128_v37, 0.0  ;;  %1498 = vmatpush.msra.mxu3 %v4857_v7  ;;  %v4846_v37 = vld [vmem:[%s10824_s5 + $0x120] sm:$0xff]  ;;  %v1405_v7 = vld [vmem:[%s10824_s5 + $0x28] sm:$0xff] }
 0x166   :  { %1468 = vmatpush.msra.mxu2 %v4870_v48  ;;  %v4843_v48 = vld [vmem:[%s10824_s5 + $0x108] sm:$0xff] }
 0x167   :  { %4801 = vmatmul.msk.f32.gmra.mxu1 %vm1165_vm4, %v1136_v24  ;;  %4833 = vmatmul.msk.f32.gmra.mxu3 %vm1165_vm4, %v1136_v24  ;;  %v4847_v24 = vld [vmem:[%s10824_s5 + $0x128] sm:$0xff] }
 0x168   :  { %1469 = vmatpush.msra.mxu2 %v4868_v34  ;;  %1499 = vmatpush.msra.mxu3 %v4855_v28  ;;  %v4905_v34 = vld [vmem:[%s10824_s5 + $0x2f8] sm:$0xff]  ;;  %v4936_v28 = vld [vmem:[%s10824_s5 + $0x3f0] sm:$0xff] }
 0x16a   :  { %1470 = vmatpush.msra.mxu2 %v4866_v4  ;;  %1500 = vmatpush.msra.mxu3 %v4853_v47  ;;  %v4902_v4 = vld [vmem:[%s10824_s5 + $0x2e0] sm:$0xff]  ;;  %v4932_v47 = vld [vmem:[%s10824_s5 + $0x3d0] sm:$0xff] }
 0x16c   :  { %1471 = vmatpush.msra.mxu2 %v4864_v44  ;;  %1501 = vmatpush.msra.mxu3 %v4851_v50  ;;  %v1414_v44 = vld [vmem:[%s10824_s5 + $0x70] sm:$0xff]  ;;  %v4891_v50 = vld [vmem:[%s10824_s5 + $0x288] sm:$0xff] }
 0x16e   :  { %1472 = vmatpush.msra.mxu2 %v4862_v46  ;;  %1502 = vmatpush.msra.mxu3 %v4849_v10  ;;  %v4900_v46 = vld [vmem:[%s10824_s5 + $0x2d0] sm:$0xff]  ;;  %v4889_v10 = vld [vmem:[%s10824_s5 + $0x278] sm:$0xff] }
 0x170   :  { %1473 = vmatpush.msra.mxu2 %v4860_v60  ;;  %1503 = vmatpush.msra.mxu3 %v4847_v24  ;;  %v1413_v60 = vld [vmem:[%s10824_s5 + $0x68] sm:$0xff] }
 0x171   :  { %v4887_v24 = vld [vmem:[%s10824_s5 + $0x268] sm:$0xff] }
 0x172   :  { %1474 = vmatpush.msra.mxu2 %v4858_v38  ;;  %v4896_v38 = vld [vmem:[%s10824_s5 + $0x2b0] sm:$0xff] }
 0x174   :  { %1475 = vmatpush.msra.mxu2 %v4856_v57  ;;  %v1404_v57 = vld [vmem:[%s10824_s5 + $0x20] sm:$0xff] }
 0x176   :  { %1476 = vmatpush.msra.mxu2 %v4854_v27  ;;  %v1401_v27 = vld [vmem:[%s10824_s5 + $0x8] sm:$0xff] }
 0x178   :  { %1477 = vmatpush.msra.mxu2 %v4852_v43  ;;  %v4935_v43 = vld [vmem:[%s10824_s5 + $0x3e8] sm:$0xff] }
 0x17a   :  { %1478 = vmatpush.msra.mxu2 %v4850_v62  ;;  %v4890_v62 = vld [vmem:[%s10824_s5 + $0x280] sm:$0xff] }
 0x17c   :  { %1479 = vmatpush.msra.mxu2 %v4848_v2  ;;  %v4888_v2 = vld [vmem:[%s10824_s5 + $0x270] sm:$0xff] }
 0x17e   :  { %1480 = vmatpush.msra.mxu2 %v4846_v37  ;;  %v4886_v37 = vld [vmem:[%s10824_s5 + $0x260] sm:$0xff] }
 0x1c5   :  { %v7245_v55 = vpop.f32.mrf.mxu0 }
 0x1cb   :  { %v1282_v63 = vpop.f32.mrf.mxu2 }
 0x1cc   :  { %v7247_v25 = vpop.f32.mrf.mxu1 }
 0x1cd   :  { %v1198_v36 = vpop.f32.mrf.mxu0  ;;  %v1225_v61 = vadd.f32 %v7247_v25, %v7245_v55  ;;  %v1424_v55 = vld [vmem:[%s10824_s5 + $0xc0] sm:$0xff]  ;;  %v1425_v25 = vld [vmem:[%s10824_s5 + $0xc8] sm:$0xff] }
 0x1d2   :  { %v1311_v11 = vpop.f32.mrf.mxu3 }
 0x1d3   :  { %v1285_v52 = vpop.f32.mrf.mxu2  ;;  %v1312_v9 = vadd.f32 %v1311_v11, %v1282_v63  ;;  %v1328_v63 = vld [vmem:[%s10823_s4 + $0x8] sm:$0x3f]  ;;  %v4838_v11 = vld [vmem:[%s10823_s4 + $0x18] sm:$0x3f] }
 0x1d4   :  { %v1227_v29 = vpop.f32.mrf.mxu1 }
 0x1d5   :  { %v1201_v49 = vpop.f32.mrf.mxu0  ;;  %v1228_v15 = vadd.f32 %v1227_v29, %v1198_v36  ;;  %v1323_v19 = vmax.f32 %v1225_v61, %v1312_v9  ;;  %v1422_v29 = vld [vmem:[%s10824_s5 + $0xb0] sm:$0xff]  ;;  %v1423_v36 = vld [vmem:[%s10824_s5 + $0xb8] sm:$0xff] }
 0x1d6   :  { %v1402_v9 = vld [vmem:[%s10824_s5 + $0x10] sm:$0xff]  ;;  %v4937_v61 = vld [vmem:[%s10824_s5 + $0x3f8] sm:$0xff] }
 0x1da   :  { %v1314_v3 = vpop.f32.mrf.mxu3 }
 0x1db   :  { %v1288_v17 = vpop.f32.mrf.mxu2  ;;  %v1315_v21 = vadd.f32 %v1314_v3, %v1285_v52  ;;  %v4844_v52 = vld [vmem:[%s10824_s5 + $0x110] sm:$0xff]  ;;  %v4845_v3 = vld [vmem:[%s10824_s5 + $0x118] sm:$0xff] }
 0x1dc   :  { %v1230_v54 = vpop.f32.mrf.mxu1  ;;  %1481 = vmatpush.msra.mxu2 %v4844_v52  ;;  %1504 = vmatpush.msra.mxu3 %v4845_v3  ;;  %v4882_v52 = vld [vmem:[%s10824_s5 + $0x240] sm:$0xff]  ;;  %v4883_v3 = vld [vmem:[%s10824_s5 + $0x248] sm:$0xff] }
 0x1dd   :  { %v1204_v31 = vpop.f32.mrf.mxu0  ;;  %v1231_v40 = vadd.f32 %v1230_v54, %v1201_v49  ;;  %v1324_v42 = vmax.f32 %v1228_v15, %v1315_v21  ;;  %v1420_v54 = vld [vmem:[%s10824_s5 + $0xa0] sm:$0xff]  ;;  %v1418_v49 = vld [vmem:[%s10824_s5 + $0x90] sm:$0xff]  ;;  %v4895_v21 = vld [vmem:[%s10824_s5 + $0x2a8] sm:$0xff] }
 0x1de   :  { %1482 = vmatpush.msra.mxu2 %v4842_v53  ;;  %1505 = vmatpush.msra.mxu3 %v4843_v48  ;;  %v1403_v15 = vld [vmem:[%s10824_s5 + $0x18] sm:$0xff]  ;;  %v4880_v53 = vld [vmem:[%s10824_s5 + $0x230] sm:$0xff] }
 0x1df   :  { %v4881_v48 = vld [vmem:[%s10824_s5 + $0x238] sm:$0xff] }
 0x1e0   :  { %1617 = vmatpush.msrb.mxu3 %v4905_v34  ;;  %v4879_v34 = vld [vmem:[%s10824_s5 + $0x228] sm:$0xff] }
 0x1e2   :  { %v1317_v33 = vpop.f32.mrf.mxu3  ;;  %1618 = vmatpush.msrb.mxu3 %v4903_v35  ;;  %v4877_v35 = vld [vmem:[%s10824_s5 + $0x218] sm:$0xff] }
 0x1e3   :  { %v1291_v8 = vpop.f32.mrf.mxu2  ;;  %v1318_v13 = vadd.f32 %v1317_v33, %v1288_v17  ;;  %v4904_v17 = vld [vmem:[%s10824_s5 + $0x2f0] sm:$0xff]  ;;  %v1417_v33 = vld [vmem:[%s10824_s5 + $0x88] sm:$0xff] }
 0x1e4   :  { %v1233_v56 = vpop.f32.mrf.mxu1  ;;  %1594 = vmatpush.msrb.mxu2 %v4904_v17  ;;  %1619 = vmatpush.msrb.mxu3 %v4901_v6  ;;  %v4878_v17 = vld [vmem:[%s10824_s5 + $0x220] sm:$0xff]  ;;  %v4875_v6 = vld [vmem:[%s10824_s5 + $0x208] sm:$0xff] }
 0x1e5   :  { %v1234_v5 = vadd.f32 %v1233_v56, %v1204_v31  ;;  %v1325_v14 = vmax.f32 %v1231_v40, %v1318_v13  ;;  %v1412_v56 = vld [vmem:[%s10824_s5 + $0x60] sm:$0xff]  ;;  %v4899_v31 = vld [vmem:[%s10824_s5 + $0x2c8] sm:$0xff]  ;;  %v1406_v40 = vld [vmem:[%s10824_s5 + $0x30] sm:$0xff] }
 0x1e6   :  { %1595 = vmatpush.msrb.mxu2 %v4902_v4  ;;  %v1408_v13 = vld [vmem:[%s10824_s5 + $0x40] sm:$0xff]  ;;  %1620 = vmatpush.msrb.mxu3 %v4899_v31  ;;  %v4876_v4 = vld [vmem:[%s10824_s5 + $0x210] sm:$0xff]  ;;  %v4911_v31 = vld [vmem:[%s10824_s5 + $0x328] sm:$0xff] }
 0x1e8   :  { %1596 = vmatpush.msrb.mxu2 %v4900_v46  ;;  %1621 = vmatpush.msrb.mxu3 %v4897_v39  ;;  %v4874_v46 = vld [vmem:[%s10824_s5 + $0x200] sm:$0xff]  ;;  %v4907_v39 = vld [vmem:[%s10824_s5 + $0x308] sm:$0xff] }
 0x1ea   :  { %v1320_v12 = vpop.f32.mrf.mxu3  ;;  %1597 = vmatpush.msrb.mxu2 %v4898_v30  ;;  %1622 = vmatpush.msrb.mxu3 %v4895_v21  ;;  %v4910_v30 = vld [vmem:[%s10824_s5 + $0x320] sm:$0xff] }
 0x1eb   :  { %v1321_v20 = vadd.f32 %v1320_v12, %v1291_v8  ;;  %v1410_v8 = vld [vmem:[%s10824_s5 + $0x50] sm:$0xff]  ;;  %v1411_v12 = vld [vmem:[%s10824_s5 + $0x58] sm:$0xff] }
 0x1ec   :  { %1598 = vmatpush.msrb.mxu2 %v4896_v38  ;;  %v4906_v38 = vld [vmem:[%s10824_s5 + $0x300] sm:$0xff] }
 0x1ed   :  { %v1326_v41 = vmax.f32 %v1234_v5, %v1321_v20  ;;  %v1409_v5 = vld [vmem:[%s10824_s5 + $0x48] sm:$0xff]  ;;  %v4894_v20 = vld [vmem:[%s10824_s5 + $0x2a0] sm:$0xff] }
 0x1ee   :  { %1599 = vmatpush.msrb.mxu2 %v4894_v20 }
 0x1ef   :  { %4834 = vmatpush.msk.msra.mxu0 %vm968_vm3, %v1326_v41  ;;  %4839 = vmatpush.msk.msra.mxu1 %vm968_vm3, %v1326_v41  ;;  %v1407_v41 = vld [vmem:[%s10824_s5 + $0x38] sm:$0xff] }
 0x1f1   :  { %1352 = vmatpush.msra.mxu0 %v1325_v14  ;;  %1384 = vmatpush.msra.mxu1 %v1325_v14  ;;  %v1400_v14 = vld [vmem:[%s10824_s5] sm:$0xff] }
 0x1f3   :  { %1353 = vmatpush.msra.mxu0 %v1324_v42  ;;  %1385 = vmatpush.msra.mxu1 %v1324_v42  ;;  %v4934_v42 = vld [vmem:[%s10824_s5 + $0x3e0] sm:$0xff] }
 0x1f5   :  { %1354 = vmatpush.msra.mxu0 %v1323_v19  ;;  %1386 = vmatpush.msra.mxu1 %v1323_v19  ;;  %v4933_v19 = vld [vmem:[%s10824_s5 + $0x3d8] sm:$0xff] }
 0x1f6   :  { %4835 = vmatmul.msk.f32.vlgmr.msra.gmra.mxu0 %vm1329_vm5, %v1327_v58  ;;  %4840 = vmatmul.msk.f32.vlgmr.msra.gmra.mxu1 %vm1329_vm5, %v4837_v59  ;;  %v4892_v58 = vld [vmem:[%s10824_s5 + $0x290] sm:$0xff]  ;;  %v4893_v59 = vld [vmem:[%s10824_s5 + $0x298] sm:$0xff] }
 0x1f7   :  { %1513 = vmatpush.msrb.mxu0 %v1430_v0  ;;  %1536 = vmatpush.msrb.mxu1 %v1431_v1  ;;  %v4930_v0 = vld [vmem:[%s10824_s5 + $0x3c0] sm:$0xff]  ;;  %v4931_v1 = vld [vmem:[%s10824_s5 + $0x3c8] sm:$0xff] }
 0x1f8   :  { %1600 = vmatpush.msrb.mxu2 %v4892_v58  ;;  %1623 = vmatpush.msrb.mxu3 %v4893_v59  ;;  %v4961_v58 = vld [vmem:[%s10824_s5 + $0x4b8] sm:$0xff] }
 0x1f9   :  { %1514 = vmatpush.msrb.mxu0 %v1428_v18  ;;  %1537 = vmatpush.msrb.mxu1 %v1429_v51  ;;  %v4928_v18 = vld [vmem:[%s10824_s5 + $0x3b0] sm:$0xff]  ;;  %v4929_v51 = vld [vmem:[%s10824_s5 + $0x3b8] sm:$0xff] }
 0x1fa   :  { %1601 = vmatpush.msrb.mxu2 %v4890_v62  ;;  %1624 = vmatpush.msrb.mxu3 %v4891_v50  ;;  %v4956_v62 = vld [vmem:[%s10824_s5 + $0x490] sm:$0xff]  ;;  %v4957_v50 = vld [vmem:[%s10824_s5 + $0x498] sm:$0xff] }
 0x1fb   :  { %1515 = vmatpush.msrb.mxu0 %v1426_v22  ;;  %1538 = vmatpush.msrb.mxu1 %v1427_v23  ;;  %v4926_v22 = vld [vmem:[%s10824_s5 + $0x3a0] sm:$0xff]  ;;  %v4927_v23 = vld [vmem:[%s10824_s5 + $0x3a8] sm:$0xff] }
 0x1fc   :  { %1602 = vmatpush.msrb.mxu2 %v4888_v2  ;;  %1625 = vmatpush.msrb.mxu3 %v4889_v10  ;;  %v4952_v10 = vld [vmem:[%s10824_s5 + $0x470] sm:$0xff] }
 0x1fd   :  { %1516 = vmatpush.msrb.mxu0 %v1424_v55  ;;  %1539 = vmatpush.msrb.mxu1 %v1425_v25  ;;  %v4924_v55 = vld [vmem:[%s10824_s5 + $0x390] sm:$0xff]  ;;  %v4925_v25 = vld [vmem:[%s10824_s5 + $0x398] sm:$0xff] }
 0x1fe   :  { %4836 = vmatmul.msk.f32.gmra.mxu0 %vm1329_vm5, %v1328_v63  ;;  %4841 = vmatmul.msk.f32.gmra.mxu1 %vm1329_vm5, %v4838_v11  ;;  %v4884_v63 = vld [vmem:[%s10824_s5 + $0x250] sm:$0xff]  ;;  %v4885_v11 = vld [vmem:[%s10824_s5 + $0x258] sm:$0xff] }
 0x1ff   :  { %1517 = vmatpush.msrb.mxu0 %v1422_v29  ;;  %1540 = vmatpush.msrb.mxu1 %v1423_v36  ;;  %v4922_v29 = vld [vmem:[%s10824_s5 + $0x380] sm:$0xff]  ;;  %v4923_v36 = vld [vmem:[%s10824_s5 + $0x388] sm:$0xff] }
 0x200   :  { %1603 = vmatpush.msrb.mxu2 %v4886_v37  ;;  %1626 = vmatpush.msrb.mxu3 %v4887_v24  ;;  %v4950_v37 = vld [vmem:[%s10824_s5 + $0x460] sm:$0xff]  ;;  %v4951_v24 = vld [vmem:[%s10824_s5 + $0x468] sm:$0xff] }
 0x201   :  { %1518 = vmatpush.msrb.mxu0 %v1420_v54  ;;  %1541 = vmatpush.msrb.mxu1 %v1421_v26  ;;  %v4920_v54 = vld [vmem:[%s10824_s5 + $0x370] sm:$0xff]  ;;  %v4921_v26 = vld [vmem:[%s10824_s5 + $0x378] sm:$0xff] }
 0x202   :  { %1604 = vmatpush.msrb.mxu2 %v4884_v63  ;;  %1627 = vmatpush.msrb.mxu3 %v4885_v11  ;;  %v4946_v63 = vld [vmem:[%s10824_s5 + $0x440] sm:$0xff]  ;;  %v4947_v11 = vld [vmem:[%s10824_s5 + $0x448] sm:$0xff] }
 0x203   :  { %1519 = vmatpush.msrb.mxu0 %v1418_v49  ;;  %1542 = vmatpush.msrb.mxu1 %v1419_v16  ;;  %v4918_v49 = vld [vmem:[%s10824_s5 + $0x360] sm:$0xff]  ;;  %v4919_v16 = vld [vmem:[%s10824_s5 + $0x368] sm:$0xff] }
 0x204   :  { %1605 = vmatpush.msrb.mxu2 %v4882_v52  ;;  %1628 = vmatpush.msrb.mxu3 %v4883_v3  ;;  %v4942_v3 = vld [vmem:[%s10824_s5 + $0x420] sm:$0xff] }
 0x205   :  { %1520 = vmatpush.msrb.mxu0 %v1416_v32  ;;  %1543 = vmatpush.msrb.mxu1 %v1417_v33  ;;  %v4916_v32 = vld [vmem:[%s10824_s5 + $0x350] sm:$0xff]  ;;  %v4917_v33 = vld [vmem:[%s10824_s5 + $0x358] sm:$0xff] }
 0x206   :  { %1606 = vmatpush.msrb.mxu2 %v4880_v53  ;;  %1629 = vmatpush.msrb.mxu3 %v4881_v48  ;;  %v4941_v53 = vld [vmem:[%s10824_s5 + $0x418] sm:$0xff]  ;;  %v4938_v48 = vld [vmem:[%s10824_s5 + $0x400] sm:$0xff] }
 0x207   :  { %1521 = vmatpush.msrb.mxu0 %v1414_v44  ;;  %1544 = vmatpush.msrb.mxu1 %v1415_v45  ;;  %v4914_v44 = vld [vmem:[%s10824_s5 + $0x340] sm:$0xff]  ;;  %v4915_v45 = vld [vmem:[%s10824_s5 + $0x348] sm:$0xff] }
 0x208   :  { %1607 = vmatpush.msrb.mxu2 %v4878_v17  ;;  %1630 = vmatpush.msrb.mxu3 %v4879_v34  ;;  %v1843_v34 = vld [vmem:[%s10826_s7 + $0x78] sm:$0xff] }
 0x209   :  { %1522 = vmatpush.msrb.mxu0 %v1412_v56  ;;  %1545 = vmatpush.msrb.mxu1 %v1413_v60  ;;  %v4912_v56 = vld [vmem:[%s10824_s5 + $0x330] sm:$0xff]  ;;  %v4913_v60 = vld [vmem:[%s10824_s5 + $0x338] sm:$0xff] }
 0x20a   :  { %1608 = vmatpush.msrb.mxu2 %v4876_v4  ;;  %1631 = vmatpush.msrb.mxu3 %v4877_v35  ;;  %v4986_v4 = vld [vmem:[%s10826_s7 + $0x110] sm:$0xff]  ;;  %v1841_v35 = vld [vmem:[%s10826_s7 + $0x68] sm:$0xff] }
 0x20b   :  { %1523 = vmatpush.msrb.mxu0 %v1410_v8  ;;  %1546 = vmatpush.msrb.mxu1 %v1411_v12  ;;  %v4908_v8 = vld [vmem:[%s10824_s5 + $0x310] sm:$0xff]  ;;  %v4909_v12 = vld [vmem:[%s10824_s5 + $0x318] sm:$0xff] }
 0x20c   :  { %1609 = vmatpush.msrb.mxu2 %v4874_v46  ;;  %1632 = vmatpush.msrb.mxu3 %v4875_v6  ;;  %v4984_v46 = vld [vmem:[%s10826_s7 + $0x100] sm:$0xff]  ;;  %v1839_v6 = vld [vmem:[%s10826_s7 + $0x58] sm:$0xff] }
 0x20d   :  { %1524 = vmatpush.msrb.mxu0 %v1408_v13  ;;  %1547 = vmatpush.msrb.mxu1 %v1409_v5 }
 0x20f   :  { %1525 = vmatpush.msrb.mxu0 %v1406_v40  ;;  %1548 = vmatpush.msrb.mxu1 %v1407_v41 }
 0x211   :  { %1526 = vmatpush.msrb.mxu0 %v1404_v57  ;;  %1549 = vmatpush.msrb.mxu1 %v1405_v7  ;;  %v4968_v57 = vld [vmem:[%s10824_s5 + $0x4f0] sm:$0xff] }
 0x213   :  { %1527 = vmatpush.msrb.mxu0 %v1402_v9  ;;  %1550 = vmatpush.msrb.mxu1 %v1403_v15  ;;  %v4969_v15 = vld [vmem:[%s10824_s5 + $0x4f8] sm:$0xff] }
 0x215   :  { %1528 = vmatpush.msrb.mxu0 %v1400_v14  ;;  %1551 = vmatpush.msrb.mxu1 %v1401_v27  ;;  %v4966_v14 = vld [vmem:[%s10824_s5 + $0x4e0] sm:$0xff]  ;;  %v4967_v27 = vld [vmem:[%s10824_s5 + $0x4e8] sm:$0xff] }
 0x217   :  { %1679 = vmatpush.msra.mxu0 %v4936_v28  ;;  %1702 = vmatpush.msra.mxu1 %v4937_v61  ;;  %v4964_v28 = vld [vmem:[%s10824_s5 + $0x4d0] sm:$0xff]  ;;  %v4965_v61 = vld [vmem:[%s10824_s5 + $0x4d8] sm:$0xff] }
 0x219   :  { %1680 = vmatpush.msra.mxu0 %v4934_v42  ;;  %1703 = vmatpush.msra.mxu1 %v4935_v43  ;;  %v4962_v42 = vld [vmem:[%s10824_s5 + $0x4c0] sm:$0xff]  ;;  %v4963_v43 = vld [vmem:[%s10824_s5 + $0x4c8] sm:$0xff] }
 0x21b   :  { %1681 = vmatpush.msra.mxu0 %v4932_v47  ;;  %1704 = vmatpush.msra.mxu1 %v4933_v19  ;;  %v4960_v19 = vld [vmem:[%s10824_s5 + $0x4b0] sm:$0xff] }
 0x21d   :  { %1682 = vmatpush.msra.mxu0 %v4930_v0  ;;  %1705 = vmatpush.msra.mxu1 %v4931_v1  ;;  %v4958_v0 = vld [vmem:[%s10824_s5 + $0x4a0] sm:$0xff]  ;;  %v4959_v1 = vld [vmem:[%s10824_s5 + $0x4a8] sm:$0xff] }
 0x21f   :  { %1683 = vmatpush.msra.mxu0 %v4928_v18  ;;  %1706 = vmatpush.msra.mxu1 %v4929_v51  ;;  %v4954_v18 = vld [vmem:[%s10824_s5 + $0x480] sm:$0xff]  ;;  %v4955_v51 = vld [vmem:[%s10824_s5 + $0x488] sm:$0xff] }
 0x221   :  { %1684 = vmatpush.msra.mxu0 %v4926_v22  ;;  %1707 = vmatpush.msra.mxu1 %v4927_v23  ;;  %v4953_v22 = vld [vmem:[%s10824_s5 + $0x478] sm:$0xff] }
 0x223   :  { %1685 = vmatpush.msra.mxu0 %v4924_v55  ;;  %1708 = vmatpush.msra.mxu1 %v4925_v25  ;;  %v4948_v55 = vld [vmem:[%s10824_s5 + $0x450] sm:$0xff]  ;;  %v4949_v25 = vld [vmem:[%s10824_s5 + $0x458] sm:$0xff] }
 0x225   :  { %1686 = vmatpush.msra.mxu0 %v4922_v29  ;;  %1709 = vmatpush.msra.mxu1 %v4923_v36  ;;  %v4944_v29 = vld [vmem:[%s10824_s5 + $0x430] sm:$0xff]  ;;  %v4945_v36 = vld [vmem:[%s10824_s5 + $0x438] sm:$0xff] }
 0x227   :  { %1687 = vmatpush.msra.mxu0 %v4920_v54  ;;  %1710 = vmatpush.msra.mxu1 %v4921_v26  ;;  %v4943_v54 = vld [vmem:[%s10824_s5 + $0x428] sm:$0xff]  ;;  %v4940_v26 = vld [vmem:[%s10824_s5 + $0x410] sm:$0xff] }
 0x229   :  { %1688 = vmatpush.msra.mxu0 %v4918_v49  ;;  %1711 = vmatpush.msra.mxu1 %v4919_v16  ;;  %v4939_v49 = vld [vmem:[%s10824_s5 + $0x408] sm:$0xff] }
 0x22b   :  { %1689 = vmatpush.msra.mxu0 %v4916_v32  ;;  %1712 = vmatpush.msra.mxu1 %v4917_v33  ;;  %v4987_v32 = vld [vmem:[%s10826_s7 + $0x118] sm:$0xff]  ;;  %v1842_v33 = vld [vmem:[%s10826_s7 + $0x70] sm:$0xff] }
 0x22d   :  { %1690 = vmatpush.msra.mxu0 %v4914_v44  ;;  %1713 = vmatpush.msra.mxu1 %v4915_v45  ;;  %v4985_v44 = vld [vmem:[%s10826_s7 + $0x108] sm:$0xff]  ;;  %v1840_v45 = vld [vmem:[%s10826_s7 + $0x60] sm:$0xff] }
 0x22f   :  { %1691 = vmatpush.msra.mxu0 %v4912_v56  ;;  %1714 = vmatpush.msra.mxu1 %v4913_v60  ;;  %v4983_v56 = vld [vmem:[%s10826_s7 + $0xf8] sm:$0xff]  ;;  %v1838_v60 = vld [vmem:[%s10826_s7 + $0x50] sm:$0xff] }
 0x231   :  { %1692 = vmatpush.msra.mxu0 %v4910_v30  ;;  %1715 = vmatpush.msra.mxu1 %v4911_v31  ;;  %v4982_v30 = vld [vmem:[%s10826_s7 + $0xf0] sm:$0xff]  ;;  %v1837_v31 = vld [vmem:[%s10826_s7 + $0x48] sm:$0xff] }
 0x233   :  { %1693 = vmatpush.msra.mxu0 %v4908_v8  ;;  %1716 = vmatpush.msra.mxu1 %v4909_v12  ;;  %v4981_v8 = vld [vmem:[%s10826_s7 + $0xe8] sm:$0xff]  ;;  %v1836_v12 = vld [vmem:[%s10826_s7 + $0x40] sm:$0xff] }
 0x235   :  { %1694 = vmatpush.msra.mxu0 %v4906_v38  ;;  %1717 = vmatpush.msra.mxu1 %v4907_v39  ;;  %v4980_v38 = vld [vmem:[%s10826_s7 + $0xe0] sm:$0xff]  ;;  %v1835_v39 = vld [vmem:[%s10826_s7 + $0x38] sm:$0xff] }
 0x273   :  { %v1356_v13 = vpop.f32.mrf.mxu0  ;;  %v1388_v5 = vpop.f32.mrf.mxu1 }
 0x274   :  { %v1394_v20 = vmax.f32 %v1356_v13, %v1388_v5  ;;  %v4979_v13 = vld [vmem:[%s10826_s7 + $0xd8] sm:$0xff]  ;;  %v1834_v5 = vld [vmem:[%s10826_s7 + $0x30] sm:$0xff] }
 0x276   :  { %1396 = vst [vmem:[#allocation2] sm:$0xff] %v1394_v20  ;;  %1529 = vmatmul.f32.vlgmr.msrb.gmra.mxu0 %v1394_v20  ;;  %1552 = vmatmul.f32.vlgmr.msrb.gmra.mxu1 %v1394_v20  ;;  %v4978_v20 = vld [vmem:[%s10826_s7 + $0xd0] sm:$0xff] }
 0x277   :  { %1855 = vmatpush.msrb.mxu0 %v1843_v34 }
 0x279   :  { %1856 = vmatpush.msrb.mxu0 %v1842_v33 }
 0x27b   :  { %v1359_v21 = vpop.f32.mrf.mxu0  ;;  %v1391_v40 = vpop.f32.mrf.mxu1  ;;  %1857 = vmatpush.msrb.mxu0 %v1841_v35 }
 0x27c   :  { %v1395_v41 = vmax.f32 %v1359_v21, %v1391_v40  ;;  %v1833_v21 = vld [vmem:[%s10826_s7 + $0x28] sm:$0xff] }
 0x27d   :  { %1858 = vmatpush.msrb.mxu0 %v1840_v45  ;;  %v4977_v40 = vld [vmem:[%s10826_s7 + $0xc8] sm:$0xff] }
 0x27e   :  { %1397 = vst [vmem:[#allocation2 + $0x8] sm:$0x3f] %v1395_v41  ;;  %v1832_v41 = vld [vmem:[%s10826_s7 + $0x20] sm:$0xff] }
 0x27f   :  { %1859 = vmatpush.msrb.mxu0 %v1839_v6 }
 0x281   :  { %1860 = vmatpush.msrb.mxu0 %v1838_v60 }
 0x283   :  { %1861 = vmatpush.msrb.mxu0 %v1837_v31 }
 0x285   :  { %v1432_v7 = vld [vmem:[#allocation2 + $0x1] sm:$0xff]  ;;  %v1433_v47 = vld [vmem:[#allocation2 + $0x9] sm:$0x3]  ;;  %v1645_v23 = vld [vmem:[#allocation2 + $0xb] sm:$0x3]  ;;  %1862 = vmatpush.msrb.mxu0 %v1836_v12 }
 0x286   :  { %v1399_v9 = vld [vmem:[#allocation2 + $0x8] sm:$0x3]  ;;  %1483 = vmatmul.f32.vlgmr.msra.gmra.mxu2 %v1432_v7  ;;  %1506 = vmatmul.f32.vlgmr.msra.gmra.mxu3 %v1432_v7  ;;  %v1560_v52 = vld [vmem:[#allocation2 + $0xa] sm:$0x3]  ;;  %v1730_v17 = vld [vmem:[#allocation2 + $0xc] sm:$0x3] }
 0x287   :  { %1532 = vmatmul.f32.gmra.mxu0 %v1399_v9  ;;  %1555 = vmatmul.f32.gmra.mxu1 %v1399_v9  ;;  %v1644_v59 = vld [vmem:[#allocation2 + $0x3] sm:$0xff] }
 0x288   :  { %1764 = vmatpush.msra.mxu2 %v4968_v57  ;;  %1787 = vmatpush.msra.mxu3 %v4969_v15  ;;  %v1559_v2 = vld [vmem:[#allocation2 + $0x2] sm:$0xff]  ;;  %v1831_v15 = vld [vmem:[%s10826_s7 + $0x18] sm:$0xff] }
 0x289   :  { %v1729_v16 = vld [vmem:[#allocation2 + $0x4] sm:$0xff]  ;;  %1863 = vmatpush.msrb.mxu0 %v1835_v39 }
 0x28a   :  { %1765 = vmatpush.msra.mxu2 %v4966_v14  ;;  %1788 = vmatpush.msra.mxu3 %v4967_v27  ;;  %v4976_v57 = vld [vmem:[%s10826_s7 + $0xc0] sm:$0xff]  ;;  %v1847_v14 = vld [vmem:[%s10826_s7 + $0x98] sm:$0xff] }
 0x28b   :  { %1864 = vmatpush.msrb.mxu0 %v1834_v5  ;;  %v4975_v27 = vld [vmem:[%s10826_s7 + $0xb8] sm:$0xff]  ;;  %1890 = vmatpush.msrb.mxu1 %v1847_v14 }
 0x28c   :  { %1766 = vmatpush.msra.mxu2 %v4964_v28  ;;  %1789 = vmatpush.msra.mxu3 %v4965_v61  ;;  %v4991_v28 = vld [vmem:[%s10826_s7 + $0x138] sm:$0xff]  ;;  %v1830_v61 = vld [vmem:[%s10826_s7 + $0x10] sm:$0xff] }
 0x28d   :  { %1865 = vmatpush.msrb.mxu0 %v1833_v21  ;;  %v5030_v14 = vld [vmem:[%s10828_s9 + $0x178] sm:$0xff] }
 0x28e   :  { %1767 = vmatpush.msra.mxu2 %v4962_v42  ;;  %1790 = vmatpush.msra.mxu3 %v4963_v43  ;;  %v1846_v42 = vld [vmem:[%s10826_s7 + $0x90] sm:$0xff] }
 0x28f   :  { %1486 = vmatmul.f32.gmra.mxu2 %v1433_v47  ;;  %1509 = vmatmul.f32.gmra.mxu3 %v1433_v47  ;;  %v4974_v43 = vld [vmem:[%s10826_s7 + $0xb0] sm:$0xff] }
 0x290   :  { %1695 = vmatmul.f32.vlgmr.msra.gmra.mxu0 %v1644_v59  ;;  %1718 = vmatmul.f32.vlgmr.msra.gmra.mxu1 %v1644_v59  ;;  %v4990_v47 = vld [vmem:[%s10826_s7 + $0x130] sm:$0xff]  ;;  %v4973_v59 = vld [vmem:[%s10826_s7 + $0xa8] sm:$0xff] }
 0x291   :  { %1768 = vmatpush.msra.mxu2 %v4960_v19  ;;  %1791 = vmatpush.msra.mxu3 %v4961_v58  ;;  %v1829_v19 = vld [vmem:[%s10826_s7 + $0x8] sm:$0xff] }
 0x292   :  { %1866 = vmatpush.msrb.mxu0 %v1832_v41  ;;  %1891 = vmatpush.msrb.mxu1 %v1846_v42  ;;  %v1845_v58 = vld [vmem:[%s10826_s7 + $0x88] sm:$0xff]  ;;  %v2038_v42 = vld [vmem:[%s10828_s9 + $0x50] sm:$0xff] }
 0x293   :  { %1769 = vmatpush.msra.mxu2 %v4958_v0  ;;  %1792 = vmatpush.msra.mxu3 %v4959_v1  ;;  %v4989_v0 = vld [vmem:[%s10826_s7 + $0x128] sm:$0xff]  ;;  %v1828_v1 = vld [vmem:[%s10826_s7] sm:$0xff] }
 0x294   :  { %1867 = vmatpush.msrb.mxu0 %v1831_v15  ;;  %1892 = vmatpush.msrb.mxu1 %v1845_v58  ;;  %v2040_v15 = vld [vmem:[%s10828_s9 + $0x60] sm:$0xff] }
 0x295   :  { %1770 = vmatpush.msra.mxu2 %v4956_v62  ;;  %1793 = vmatpush.msra.mxu3 %v4957_v50  ;;  %v1844_v62 = vld [vmem:[%s10826_s7 + $0x80] sm:$0xff] }
 0x296   :  { %1868 = vmatpush.msrb.mxu0 %v1830_v61  ;;  %v4972_v50 = vld [vmem:[%s10826_s7 + $0xa0] sm:$0xff]  ;;  %1893 = vmatpush.msrb.mxu1 %v1844_v62  ;;  %v5028_v61 = vld [vmem:[%s10828_s9 + $0x168] sm:$0xff]  ;;  %v2035_v62 = vld [vmem:[%s10828_s9 + $0x38] sm:$0xff] }
 0x297   :  { %1771 = vmatpush.msra.mxu2 %v4954_v18  ;;  %1794 = vmatpush.msra.mxu3 %v4955_v51 }
 0x298   :  { %1610 = vmatmul.f32.vlgmr.msrb.gmra.mxu2 %v1559_v2  ;;  %1633 = vmatmul.f32.vlgmr.msrb.gmra.mxu3 %v1559_v2  ;;  %v4988_v2 = vld [vmem:[%s10826_s7 + $0x120] sm:$0xff] }
 0x299   :  { %1698 = vmatmul.f32.gmra.mxu0 %v1645_v23  ;;  %1721 = vmatmul.f32.gmra.mxu1 %v1645_v23 }
 0x29a   :  { %1772 = vmatpush.msra.mxu2 %v4952_v10  ;;  %1795 = vmatpush.msra.mxu3 %v4953_v22 }
 0x29b   :  { %1869 = vmatpush.msrb.mxu0 %v1829_v19  ;;  %v5026_v19 = vld [vmem:[%s10828_s9 + $0x158] sm:$0xff] }
 0x29c   :  { %1773 = vmatpush.msra.mxu2 %v4950_v37  ;;  %1796 = vmatpush.msra.mxu3 %v4951_v24 }
 0x29d   :  { %1870 = vmatpush.msrb.mxu0 %v1828_v1  ;;  %v5025_v1 = vld [vmem:[%s10828_s9 + $0x150] sm:$0xff] }
 0x29e   :  { %1774 = vmatpush.msra.mxu2 %v4948_v55  ;;  %1797 = vmatpush.msra.mxu3 %v4949_v25 }
 0x2a0   :  { %1775 = vmatpush.msra.mxu2 %v4946_v63  ;;  %1798 = vmatpush.msra.mxu3 %v4947_v11 }
 0x2a1   :  { %1613 = vmatmul.f32.gmra.mxu2 %v1560_v52  ;;  %1636 = vmatmul.f32.gmra.mxu3 %v1560_v52 }
 0x2a2   :  { %1776 = vmatpush.msra.mxu2 %v4944_v29  ;;  %1799 = vmatpush.msra.mxu3 %v4945_v36 }
 0x2a4   :  { %1777 = vmatpush.msra.mxu2 %v4942_v3  ;;  %1800 = vmatpush.msra.mxu3 %v4943_v54 }
 0x2a6   :  { %1778 = vmatpush.msra.mxu2 %v4940_v26  ;;  %1801 = vmatpush.msra.mxu3 %v4941_v53  ;;  %v1814_v26 = vld [vmem:[%s10825_s6] sm:$0x3] }
 0x2a8   :  { %1779 = vmatpush.msra.mxu2 %v4938_v48  ;;  %1802 = vmatpush.msra.mxu3 %v4939_v49  ;;  %v1816_v48 = vperm.slane %v1814_v26, 0 }
 0x2a9   :  { %1780 = vmatmul.f32.vlgmr.msra.gmra.mxu2 %v1729_v16  ;;  %1803 = vmatmul.f32.vlgmr.msra.gmra.mxu3 %v1729_v16  ;;  %v1817_v16 = vperm.slane %v1814_v26, 1 }
 0x2aa   :  { %1922 = vmatpush.msrb.mxu2 %v4987_v32  ;;  %1957 = vmatpush.msrb.mxu3 %v4991_v28  ;;  %v5029_v28 = vld [vmem:[%s10828_s9 + $0x170] sm:$0xff] }
 0x2ac   :  { %1923 = vmatpush.msrb.mxu2 %v4986_v4  ;;  %1958 = vmatpush.msrb.mxu3 %v4990_v47  ;;  %v2037_v47 = vld [vmem:[%s10828_s9 + $0x48] sm:$0xff] }
 0x2ae   :  { %1924 = vmatpush.msrb.mxu2 %v4985_v44  ;;  %1959 = vmatpush.msrb.mxu3 %v4989_v0  ;;  %v2036_v0 = vld [vmem:[%s10828_s9 + $0x40] sm:$0xff] }
 0x2b0   :  { %1925 = vmatpush.msrb.mxu2 %v4984_v46  ;;  %1960 = vmatpush.msrb.mxu3 %v4988_v2  ;;  %v2034_v2 = vld [vmem:[%s10828_s9 + $0x30] sm:$0xff] }
 0x2b1   :  { %1783 = vmatmul.f32.gmra.mxu2 %v1730_v17  ;;  %1806 = vmatmul.f32.gmra.mxu3 %v1730_v17 }
 0x2b2   :  { %1926 = vmatpush.msrb.mxu2 %v4983_v56 }
 0x2b4   :  { %1927 = vmatpush.msrb.mxu2 %v4982_v30 }
 0x2b6   :  { %1928 = vmatpush.msrb.mxu2 %v4981_v8 }
 0x2b8   :  { %1929 = vmatpush.msrb.mxu2 %v4980_v38 }
 0x2ba   :  { %1930 = vmatpush.msrb.mxu2 %v4979_v13 }
 0x2bc   :  { %1931 = vmatpush.msrb.mxu2 %v4978_v20 }
 0x2be   :  { %1932 = vmatpush.msrb.mxu2 %v4977_v40 }
 0x2c0   :  { %1933 = vmatpush.msrb.mxu2 %v4976_v57  ;;  %v2043_v57 = vld [vmem:[%s10828_s9 + $0x78] sm:$0xff] }
 0x2c1   :  { %2044 = vmatpush.msra.mxu0 %v2043_v57  ;;  %v5006_v57 = vld [vmem:[%s10828_s9 + $0xb8] sm:$0xff] }
 0x2c2   :  { %1934 = vmatpush.msrb.mxu2 %v4975_v27  ;;  %v2039_v27 = vld [vmem:[%s10828_s9 + $0x58] sm:$0xff] }
 0x2c4   :  { %1935 = vmatpush.msrb.mxu2 %v4974_v43  ;;  %v5027_v43 = vld [vmem:[%s10828_s9 + $0x160] sm:$0xff] }
 0x2c6   :  { %1936 = vmatpush.msrb.mxu2 %v4973_v59 }
 0x2c8   :  { %1937 = vmatpush.msrb.mxu2 %v4972_v50  ;;  %v5024_v50 = vld [vmem:[%s10828_s9 + $0x148] sm:$0xff] }
 0x2ca   :  { %2122 = vmatpush.msra.mxu2 %v5030_v14  ;;  %v5004_v14 = vld [vmem:[%s10828_s9 + $0xa8] sm:$0xff] }
 0x2cc   :  { %2123 = vmatpush.msra.mxu2 %v5029_v28  ;;  %v5036_v28 = vld [vmem:[%s10828_s9 + $0x1a8] sm:$0xff] }
 0x2ce   :  { %2124 = vmatpush.msra.mxu2 %v5028_v61  ;;  %v5056_v61 = vld [vmem:[%s10828_s9 + $0x248] sm:$0xff] }
 0x2d0   :  { %2125 = vmatpush.msra.mxu2 %v5027_v43  ;;  %v5019_v43 = vld [vmem:[%s10828_s9 + $0x120] sm:$0xff] }
 0x2d2   :  { %2126 = vmatpush.msra.mxu2 %v5026_v19  ;;  %v5055_v19 = vld [vmem:[%s10828_s9 + $0x240] sm:$0xff] }
 0x2d4   :  { %2127 = vmatpush.msra.mxu2 %v5025_v1  ;;  %v5054_v1 = vld [vmem:[%s10828_s9 + $0x238] sm:$0xff] }
 0x2d6   :  { %2128 = vmatpush.msra.mxu2 %v5024_v50  ;;  %v5017_v50 = vld [vmem:[%s10828_s9 + $0x110] sm:$0xff] }
 0x2f3   :  { %v1530_v10 = vpop.f32.mrf.mxu0  ;;  %v1553_v22 = vpop.f32.mrf.mxu1 }
 0x304   :  { %v1533_v24 = vpop.f32.mrf.mxu0  ;;  %v1556_v55 = vpop.f32.mrf.mxu1 }
 0x309   :  { %v1484_v7 = vpop.f32.mrf.mxu2  ;;  %v1507_v9 = vpop.f32.mrf.mxu3 }
 0x30a   :  { %v1531_v11 = vadd.f32 %v1530_v10, %v1484_v7  ;;  %v1554_v29 = vadd.f32 %v1553_v22, %v1507_v9  ;;  %v2042_v7 = vld [vmem:[%s10828_s9 + $0x70] sm:$0xff]  ;;  %v2041_v9 = vld [vmem:[%s10828_s9 + $0x68] sm:$0xff]  ;;  %v5023_v10 = vld [vmem:[%s10828_s9 + $0x140] sm:$0xff] }
 0x30b   :  { %2045 = vmatpush.msra.mxu0 %v2042_v7  ;;  %v2033_v22 = vld [vmem:[%s10828_s9 + $0x28] sm:$0xff]  ;;  %2129 = vmatpush.msra.mxu2 %v5023_v10  ;;  %v5038_v7 = vld [vmem:[%s10828_s9 + $0x1b8] sm:$0xff] }
 0x30c   :  { %v5016_v10 = vld [vmem:[%s10828_s9 + $0x108] sm:$0xff] }
 0x30d   :  { %v1696_v3 = vpop.f32.mrf.mxu0  ;;  %v1719_v54 = vpop.f32.mrf.mxu1  ;;  %2046 = vmatpush.msra.mxu0 %v2041_v9  ;;  %v5005_v9 = vld [vmem:[%s10828_s9 + $0xb0] sm:$0xff] }
 0x30f   :  { %2047 = vmatpush.msra.mxu0 %v2040_v15  ;;  %v5037_v15 = vld [vmem:[%s10828_s9 + $0x1b0] sm:$0xff] }
 0x311   :  { %2048 = vmatpush.msra.mxu0 %v2039_v27  ;;  %v5020_v27 = vld [vmem:[%s10828_s9 + $0x128] sm:$0xff] }
 0x312   :  { %v1487_v18 = vpop.f32.mrf.mxu2  ;;  %v1510_v51 = vpop.f32.mrf.mxu3 }
 0x313   :  { %v1534_v32 = vadd.f32 %v1533_v24, %v1487_v18  ;;  %v1557_v33 = vadd.f32 %v1556_v55, %v1510_v51  ;;  %2049 = vmatpush.msra.mxu0 %v2038_v42  ;;  %v5021_v24 = vld [vmem:[%s10828_s9 + $0x130] sm:$0xff]  ;;  %v5003_v42 = vld [vmem:[%s10828_s9 + $0xa0] sm:$0xff] }
 0x315   :  { %2050 = vmatpush.msra.mxu0 %v2037_v47  ;;  %v5035_v47 = vld [vmem:[%s10828_s9 + $0x1a0] sm:$0xff] }
 0x316   :  { %v1699_v30 = vpop.f32.mrf.mxu0  ;;  %v1722_v31 = vpop.f32.mrf.mxu1 }
 0x317   :  { %2051 = vmatpush.msra.mxu0 %v2036_v0  ;;  %v5034_v0 = vld [vmem:[%s10828_s9 + $0x198] sm:$0xff] }
 0x319   :  { %2052 = vmatpush.msra.mxu0 %v2035_v62  ;;  %v5001_v62 = vld [vmem:[%s10828_s9 + $0x90] sm:$0xff] }
 0x31b   :  { %v1611_v23 = vpop.f32.mrf.mxu2  ;;  %v1634_v37 = vpop.f32.mrf.mxu3  ;;  %2053 = vmatpush.msra.mxu0 %v2034_v2  ;;  %v5000_v2 = vld [vmem:[%s10828_s9 + $0x88] sm:$0xff] }
 0x31c   :  { %v1640_v36 = vadd.f32 %v1611_v23, %v1531_v11  ;;  %v1641_v52 = vadd.f32 %v1634_v37, %v1554_v29  ;;  %v5022_v23 = vld [vmem:[%s10828_s9 + $0x138] sm:$0xff]  ;;  %v2032_v37 = vld [vmem:[%s10828_s9 + $0x20] sm:$0xff] }
 0x31d   :  { %2054 = vmatpush.msra.mxu0 %v2033_v22  ;;  %2130 = vmatpush.msra.mxu2 %v5022_v23  ;;  %v5032_v22 = vld [vmem:[%s10828_s9 + $0x188] sm:$0xff] }
 0x31e   :  { %v1725_v53 = vadd.f32 %v1696_v3, %v1640_v36  ;;  %v1726_v49 = vadd.f32 %v1719_v54, %v1641_v52  ;;  %v2030_v36 = vld [vmem:[%s10828_s9 + $0x10] sm:$0xff]  ;;  %v5052_v23 = vld [vmem:[%s10828_s9 + $0x228] sm:$0xff] }
 0x31f   :  { %2055 = vmatpush.msra.mxu0 %v2032_v37  ;;  %2131 = vmatpush.msra.mxu2 %v5021_v24  ;;  %v4999_v37 = vld [vmem:[%s10828_s9 + $0x80] sm:$0xff] }
 0x320   :  { %v5015_v24 = vld [vmem:[%s10828_s9 + $0x100] sm:$0xff] }
 0x321   :  { %2132 = vmatpush.msra.mxu2 %v5020_v27  ;;  %v5089_v27 = vld [vmem:[%s10820_s1 + $0x270] sm:$0xff] }
 0x323   :  { %2133 = vmatpush.msra.mxu2 %v5019_v43  ;;  %v5085_v43 = vld [vmem:[%s10820_s1 + $0x250] sm:$0xff] }
 0x324   :  { %v1614_v25 = vpop.f32.mrf.mxu2  ;;  %v1637_v63 = vpop.f32.mrf.mxu3 }
 0x325   :  { %v1642_v44 = vadd.f32 %v1614_v25, %v1534_v32  ;;  %v1643_v45 = vadd.f32 %v1637_v63, %v1557_v33  ;;  %v2031_v63 = vld [vmem:[%s10828_s9 + $0x18] sm:$0xff]  ;;  %v2028_v33 = vld [vmem:[%s10828_s9] sm:$0xff] }
 0x326   :  { %2056 = vmatpush.msra.mxu0 %v2031_v63  ;;  %v5046_v32 = vld [vmem:[%s10828_s9 + $0x1f8] sm:$0xff] }
 0x327   :  { %v1727_v8 = vadd.f32 %v1699_v30, %v1642_v44  ;;  %v1728_v12 = vadd.f32 %v1722_v31, %v1643_v45  ;;  %v5062_v44 = vld [vmem:[%s10828_s9 + $0x278] sm:$0xff]  ;;  %v5012_v45 = vld [vmem:[%s10828_s9 + $0xe8] sm:$0xff] }
 0x328   :  { %2057 = vmatpush.msra.mxu0 %v2030_v36  ;;  %v5060_v30 = vld [vmem:[%s10828_s9 + $0x268] sm:$0xff]  ;;  %v5010_v31 = vld [vmem:[%s10828_s9 + $0xd8] sm:$0xff]  ;;  %v5047_v36 = vld [vmem:[%s10828_s9 + $0x200] sm:$0xff] }
 0x329   :  { %v5050_v63 = vld [vmem:[%s10828_s9 + $0x218] sm:$0xff] }
 0x32c   :  { %v1781_v17 = vpop.f32.mrf.mxu2  ;;  %v1804_v34 = vpop.f32.mrf.mxu3 }
 0x32d   :  { %v1810_v4 = vadd.f32 %v1781_v17, %v1725_v53  ;;  %v1811_v35 = vadd.f32 %v1804_v34, %v1726_v49  ;;  %v1970_v17 = vld [vmem:[%s10827_s8] sm:$0x1f]  ;;  %v5014_v34 = vld [vmem:[%s10828_s9 + $0xf8] sm:$0xff] }
 0x32f   :  { %v1820_v46 = vadd.f32 %v1816_v48, %v1810_v4  ;;  %v1821_v6 = vadd.f32 %v1817_v16, %v1811_v35  ;;  %v5013_v4 = vld [vmem:[%s10828_s9 + $0xf0] sm:$0xff] }
 0x330   :  { %v5045_v35 = vld [vmem:[%s10828_s9 + $0x1f0] sm:$0xff] }
 0x331   :  { %v1824_v56 = vmax.f32 %v1820_v46, 0.0  ;;  %v1825_v60 = vmax.f32 %v1821_v6, 0.0  ;;  %v5044_v46 = vld [vmem:[%s10828_s9 + $0x1e8] sm:$0xff]  ;;  %v5061_v6 = vld [vmem:[%s10828_s9 + $0x270] sm:$0xff] }
 0x333   :  { %1871 = vmatmul.f32.vlgmr.msrb.gmra.mxu0 %v1824_v56  ;;  %4970 = vmatmul.msk.f32.vlgmr.msrb.gmra.mxu1 %vm1848_vm6, %v1825_v60 }
 0x334   :  { %1938 = vmatmul.f32.vlgmr.msrb.gmra.mxu2 %v1824_v56  ;;  %4992 = vmatmul.msk.f32.vlgmr.msrb.gmra.mxu3 %vm1848_vm6, %v1825_v60  ;;  %v1784_v38 = vpop.f32.mrf.mxu2  ;;  %v1807_v39 = vpop.f32.mrf.mxu3  ;;  %v5011_v56 = vld [vmem:[%s10828_s9 + $0xe0] sm:$0xff] }
 0x335   :  { %v1812_v13 = vadd.f32 %v1784_v38, %v1727_v8  ;;  %v1813_v5 = vadd.f32 %v1807_v39, %v1728_v12  ;;  %v5043_v60 = vld [vmem:[%s10828_s9 + $0x1e0] sm:$0xff]  ;;  %v5042_v8 = vld [vmem:[%s10828_s9 + $0x1d8] sm:$0xff]  ;;  %v5009_v38 = vld [vmem:[%s10828_s9 + $0xd0] sm:$0xff] }
 0x336   :  { %v5059_v12 = vld [vmem:[%s10828_s9 + $0x260] sm:$0xff]  ;;  %v5041_v39 = vld [vmem:[%s10828_s9 + $0x1d0] sm:$0xff] }
 0x337   :  { %v1822_v20 = vadd.f32 %v1816_v48, %v1812_v13  ;;  %v1823_v21 = vadd.f32 %v1817_v16, %v1813_v5  ;;  %v2029_v48 = vld [vmem:[%s10828_s9 + $0x8] sm:$0xff]  ;;  %v5058_v13 = vld [vmem:[%s10828_s9 + $0x258] sm:$0xff] }
 0x338   :  { %v4996_v16 = vld [vmem:[%s10827_s8 + $0x8] sm:$0x1f]  ;;  %2058 = vmatpush.msra.mxu0 %v2029_v48  ;;  %v2232_v48 = vld [vmem:[%s10830_s11 + $0x50] sm:$0xff] }
 0x339   :  { %v1827_v40 = vmax.f32 %v1823_v21, 0.0  ;;  %v1826_v41 = vmax.f32 %v1822_v20, 0.0  ;;  %v5008_v5 = vld [vmem:[%s10828_s9 + $0xc8] sm:$0xff]  ;;  %v5057_v21 = vld [vmem:[%s10828_s9 + $0x250] sm:$0xff] }
 0x33a   :  { %2059 = vmatpush.msra.mxu0 %v2028_v33  ;;  %v5040_v20 = vld [vmem:[%s10828_s9 + $0x1c8] sm:$0xff] }
 0x33b   :  { %1874 = vmatmul.f32.gmra.mxu0 %v1826_v41  ;;  %4971 = vmatmul.msk.f32.gmra.mxu1 %vm1848_vm6, %v1827_v40 }
 0x33c   :  { %1941 = vmatmul.f32.gmra.mxu2 %v1826_v41  ;;  %4993 = vmatmul.msk.f32.gmra.mxu3 %vm1848_vm6, %v1827_v40  ;;  %v5007_v40 = vld [vmem:[%s10828_s9 + $0xc0] sm:$0xff] }
 0x33d   :  { %2200 = vmatpush.msrb.mxu0 %v5062_v44  ;;  %v5039_v41 = vld [vmem:[%s10828_s9 + $0x1c0] sm:$0xff] }
 0x33f   :  { %2201 = vmatpush.msrb.mxu0 %v5061_v6  ;;  %v2228_v6 = vld [vmem:[%s10830_s11 + $0x30] sm:$0xff] }
 0x341   :  { %2202 = vmatpush.msrb.mxu0 %v5060_v30  ;;  %v5103_v30 = vld [vmem:[%s10820_s1 + $0x2e0] sm:$0xff] }
 0x343   :  { %2203 = vmatpush.msrb.mxu0 %v5059_v12  ;;  %v2225_v12 = vld [vmem:[%s10830_s11 + $0x18] sm:$0xff] }
 0x345   :  { %2204 = vmatpush.msrb.mxu0 %v5058_v13  ;;  %v2224_v13 = vld [vmem:[%s10830_s11 + $0x10] sm:$0xff] }
 0x347   :  { %2205 = vmatpush.msrb.mxu0 %v5057_v21  ;;  %v2223_v21 = vld [vmem:[%s10830_s11 + $0x8] sm:$0xff] }
 0x349   :  { %2206 = vmatpush.msrb.mxu0 %v5056_v61  ;;  %v5087_v61 = vld [vmem:[%s10820_s1 + $0x260] sm:$0xff] }
 0x34b   :  { %2207 = vmatpush.msrb.mxu0 %v5055_v19  ;;  %v5083_v19 = vld [vmem:[%s10820_s1 + $0x240] sm:$0xff] }
 0x34d   :  { %2208 = vmatpush.msrb.mxu0 %v5054_v1  ;;  %v5071_v1 = vld [vmem:[%s10819_s0 + $0x40] sm:$0xfe] }
 0x3b0   :  { %v1872_v58 = vpop.f32.mrf.mxu0  ;;  %v1895_v59 = vpop.f32.mrf.mxu1 }
 0x3b1   :  { %v1896_v26 = vadd.f32 %v1895_v59, %v1872_v58  ;;  %v5002_v58 = vld [vmem:[%s10828_s9 + $0x98] sm:$0xff] }
 0x3b2   :  { %v5018_v59 = vld [vmem:[%s10828_s9 + $0x118] sm:$0xff] }
 0x3b3   :  { %2134 = vmatpush.msra.mxu2 %v5018_v59  ;;  %v5081_v59 = vld [vmem:[%s10820_s1 + $0x230] sm:$0xff] }
 0x3b5   :  { %2135 = vmatpush.msra.mxu2 %v5017_v50  ;;  %v5079_v50 = vld [vmem:[%s10820_s1 + $0x220] sm:$0xff] }
 0x3b7   :  { %v1939_v18 = vpop.f32.mrf.mxu2  ;;  %v1962_v51 = vpop.f32.mrf.mxu3  ;;  %2136 = vmatpush.msra.mxu2 %v5016_v10  ;;  %v5077_v10 = vld [vmem:[%s10820_s1 + $0x210] sm:$0xff] }
 0x3b8   :  { %v1875_v55 = vpop.f32.mrf.mxu0  ;;  %v1898_v25 = vpop.f32.mrf.mxu1  ;;  %v1963_v52 = vadd.f32 %v1962_v51, %v1939_v18  ;;  %v5033_v18 = vld [vmem:[%s10828_s9 + $0x190] sm:$0xff] }
 0x3b9   :  { %v1899_v3 = vadd.f32 %v1898_v25, %v1875_v55  ;;  %v5053_v51 = vld [vmem:[%s10828_s9 + $0x230] sm:$0xff]  ;;  %v5031_v55 = vld [vmem:[%s10828_s9 + $0x180] sm:$0xff]  ;;  %2137 = vmatpush.msra.mxu2 %v5015_v24 }
 0x3ba   :  { %v1968_v49 = vmax.f32 %v1896_v26, %v1963_v52  ;;  %2209 = vmatpush.msrb.mxu0 %v5053_v51  ;;  %v5051_v25 = vld [vmem:[%s10828_s9 + $0x220] sm:$0xff]  ;;  %v2237_v52 = vld [vmem:[%s10830_s11 + $0x78] sm:$0xff]  ;;  %v2447_v51 = vrot.slane %v5071_v1, 1  ;;  %v5113_v24 = vld [vmem:[%s10820_s1 + $0x330] sm:$0xff] }
 0x3bb   :  { %v2234_v26 = vld [vmem:[%s10830_s11 + $0x60] sm:$0xff]  ;;  %v2353_v1 = vld [vmem:[%s10820_s1 + $0x170] sm:$0xff] }
 0x3bc   :  { %2210 = vmatpush.msrb.mxu0 %v5052_v23  ;;  %v2026_v23 = vld [vmem:[%s10829_s10] sm:$0x1] }
 0x3be   :  { %2211 = vmatpush.msrb.mxu0 %v5051_v25  ;;  %v8279_v25 = vld [vmem:[%s10819_s0 + $0x58] sm:$0xff] }
 0x3bf   :  { %v1942_v11 = vpop.f32.mrf.mxu2  ;;  %v1965_v29 = vpop.f32.mrf.mxu3 }
 0x3c0   :  { %v1966_v54 = vadd.f32 %v1965_v29, %v1942_v11  ;;  %v5049_v11 = vld [vmem:[%s10828_s9 + $0x210] sm:$0xff]  ;;  %2212 = vmatpush.msrb.mxu0 %v5050_v63  ;;  %v5048_v29 = vld [vmem:[%s10828_s9 + $0x208] sm:$0xff] }
 0x3c1   :  { %v5072_v63 = vld [vmem:[%s10819_s0 + $0x48] sm:$0xfe] }
 0x3c2   :  { %v1969_v53 = vmax.f32 %v1899_v3, %v1966_v54  ;;  %2213 = vmatpush.msrb.mxu0 %v5049_v11  ;;  %v2236_v3 = vld [vmem:[%s10830_s11 + $0x70] sm:$0xff]  ;;  %v2235_v54 = vld [vmem:[%s10830_s11 + $0x68] sm:$0xff] }
 0x3c4   :  { %4994 = vmatpush.msk.msra.mxu1 %vm1975_vm7, %v1969_v53  ;;  %4997 = vmatpush.msk.msra.mxu3 %vm1975_vm7, %v1969_v53  ;;  %v2233_v53 = vld [vmem:[%s10830_s11 + $0x58] sm:$0xff] }
 0x3c5   :  { %2214 = vmatpush.msrb.mxu0 %v5048_v29  ;;  %v2337_v29 = vld [vmem:[%s10820_s1 + $0xf0] sm:$0xff] }
 0x3c6   :  { %1994 = vmatpush.msra.mxu1 %v1968_v49  ;;  %2019 = vmatpush.msra.mxu3 %v1968_v49  ;;  %v2231_v49 = vld [vmem:[%s10830_s11 + $0x48] sm:$0xff] }
 0x3c7   :  { %4998 = vmatmul.msk.f32.vlgmr.msra.gmra.mxu3 %vm1971_vm8, %v4996_v16  ;;  %4995 = vmatmul.msk.f32.vlgmr.msra.gmra.mxu1 %vm1971_vm8, %v1970_v17  ;;  %v2230_v17 = vld [vmem:[%s10830_s11 + $0x40] sm:$0xff] }
 0x3c8   :  { %2083 = vmatpush.msrb.mxu1 %v5014_v34  ;;  %2161 = vmatpush.msrb.mxu3 %v5046_v32 }
 0x3c9   :  { %2215 = vmatpush.msrb.mxu0 %v5047_v36  ;;  %v8290_v36 = vld [vmem:[%s10819_s0 + $0x60] sm:$0xff] }
 0x3ca   :  { %2084 = vmatpush.msrb.mxu1 %v5013_v4  ;;  %2162 = vmatpush.msrb.mxu3 %v5045_v35 }
 0x3cc   :  { %2085 = vmatpush.msrb.mxu1 %v5012_v45  ;;  %2163 = vmatpush.msrb.mxu3 %v5044_v46  ;;  %v2229_v46 = vld [vmem:[%s10830_s11 + $0x38] sm:$0xff] }
 0x3ce   :  { %2086 = vmatpush.msrb.mxu1 %v5011_v56  ;;  %2164 = vmatpush.msrb.mxu3 %v5043_v60  ;;  %v5105_v56 = vld [vmem:[%s10820_s1 + $0x2f0] sm:$0xff]  ;;  %v2227_v60 = vld [vmem:[%s10830_s11 + $0x28] sm:$0xff] }
 0x3d0   :  { %2087 = vmatpush.msrb.mxu1 %v5010_v31  ;;  %2165 = vmatpush.msrb.mxu3 %v5042_v8  ;;  %v2226_v31 = vld [vmem:[%s10830_s11 + $0x20] sm:$0xff]  ;;  %v5101_v8 = vld [vmem:[%s10820_s1 + $0x2d0] sm:$0xff] }
 0x3d2   :  { %2088 = vmatpush.msrb.mxu1 %v5009_v38  ;;  %2166 = vmatpush.msrb.mxu3 %v5041_v39  ;;  %v5099_v38 = vld [vmem:[%s10820_s1 + $0x2c0] sm:$0xff]  ;;  %v5137_v39 = vld [vmem:[%s10820_s1 + $0x3f0] sm:$0xff] }
 0x3d4   :  { %2089 = vmatpush.msrb.mxu1 %v5008_v5  ;;  %2167 = vmatpush.msrb.mxu3 %v5040_v20  ;;  %v5097_v5 = vld [vmem:[%s10820_s1 + $0x2b0] sm:$0xff]  ;;  %v5135_v20 = vld [vmem:[%s10820_s1 + $0x3e0] sm:$0xff] }
 0x3d6   :  { %2090 = vmatpush.msrb.mxu1 %v5007_v40  ;;  %2168 = vmatpush.msrb.mxu3 %v5039_v41  ;;  %v5095_v40 = vld [vmem:[%s10820_s1 + $0x2a0] sm:$0xff]  ;;  %v5133_v41 = vld [vmem:[%s10820_s1 + $0x3d0] sm:$0xff] }
 0x3d8   :  { %2091 = vmatpush.msrb.mxu1 %v5006_v57  ;;  %2169 = vmatpush.msrb.mxu3 %v5038_v7  ;;  %v2222_v57 = vld [vmem:[%s10830_s11] sm:$0xff]  ;;  %v5093_v7 = vld [vmem:[%s10820_s1 + $0x290] sm:$0xff] }
 0x3da   :  { %2092 = vmatpush.msrb.mxu1 %v5005_v9  ;;  %2170 = vmatpush.msrb.mxu3 %v5037_v15  ;;  %v5131_v9 = vld [vmem:[%s10820_s1 + $0x3c0] sm:$0xff] }
 0x3db   :  { %v5091_v15 = vld [vmem:[%s10820_s1 + $0x280] sm:$0xff] }
 0x3dc   :  { %2093 = vmatpush.msrb.mxu1 %v5004_v14  ;;  %2171 = vmatpush.msrb.mxu3 %v5036_v28  ;;  %v5129_v14 = vld [vmem:[%s10820_s1 + $0x3b0] sm:$0xff]  ;;  %v5127_v28 = vld [vmem:[%s10820_s1 + $0x3a0] sm:$0xff] }
 0x3de   :  { %2094 = vmatpush.msrb.mxu1 %v5003_v42  ;;  %2172 = vmatpush.msrb.mxu3 %v5035_v47  ;;  %v5125_v42 = vld [vmem:[%s10820_s1 + $0x390] sm:$0xff]  ;;  %v5123_v47 = vld [vmem:[%s10820_s1 + $0x380] sm:$0xff] }
 0x3e0   :  { %2095 = vmatpush.msrb.mxu1 %v5002_v58  ;;  %2173 = vmatpush.msrb.mxu3 %v5034_v0  ;;  %v5121_v58 = vld [vmem:[%s10820_s1 + $0x370] sm:$0xff] }
 0x3e1   :  { %v8243_v0 = vld [vmem:[%s10819_s0 + $0x50] sm:$0xff] }
 0x3e2   :  { %2096 = vmatpush.msrb.mxu1 %v5001_v62  ;;  %2174 = vmatpush.msrb.mxu3 %v5033_v18  ;;  %v5119_v62 = vld [vmem:[%s10820_s1 + $0x360] sm:$0xff]  ;;  %v5117_v18 = vld [vmem:[%s10820_s1 + $0x350] sm:$0xff] }
 0x3e4   :  { %2097 = vmatpush.msrb.mxu1 %v5000_v2  ;;  %2175 = vmatpush.msrb.mxu3 %v5032_v22  ;;  %v2448_v2 = vrot.slane %v8243_v0, 1  ;;  %v5115_v22 = vld [vmem:[%s10820_s1 + $0x340] sm:$0xff] }
 0x3e6   :  { %2098 = vmatpush.msrb.mxu1 %v4999_v37  ;;  %2176 = vmatpush.msrb.mxu3 %v5031_v55  ;;  %v5075_v37 = vld [vmem:[%s10820_s1 + $0x200] sm:$0xff]  ;;  %v8274_v55 = vsel %vm200_vm0, %v2447_v51, %v2448_v2  ;;  %v2349_v51 = vld [vmem:[%s10820_s1 + $0x150] sm:$0xff] }
 0x3e8   :  { %2239 = vmatpush.msra.mxu1 %v2237_v52  ;;  %2469 = vmatpush.msra.mxu3 %v5105_v56  ;;  %v5111_v52 = vld [vmem:[%s10820_s1 + $0x320] sm:$0xff]  ;;  %v2329_v56 = vld [vmem:[%s10820_s1 + $0xb0] sm:$0xff] }
 0x3ea   :  { %2240 = vmatpush.msra.mxu1 %v2236_v3  ;;  %2470 = vmatpush.msra.mxu3 %v5103_v30 }
 0x3ec   :  { %2241 = vmatpush.msra.mxu1 %v2235_v54  ;;  %2471 = vmatpush.msra.mxu3 %v5101_v8  ;;  %v2335_v54 = vld [vmem:[%s10820_s1 + $0xe0] sm:$0xff] }
 0x3ee   :  { %2242 = vmatpush.msra.mxu1 %v2234_v26  ;;  %2472 = vmatpush.msra.mxu3 %v5099_v38  ;;  %v2450_v26 = vrot.slane %v5072_v63, 1  ;;  %v8436_v63 = vld [vmem:[%s10819_s0 + $0x40] sm:$0xff] }
 0x3f0   :  { %2243 = vmatpush.msra.mxu1 %v2233_v53  ;;  %2473 = vmatpush.msra.mxu3 %v5097_v5  ;;  %v2451_v53 = vrot.slane %v8279_v25, 1 }
 0x3f2   :  { %2244 = vmatpush.msra.mxu1 %v2232_v48  ;;  %2474 = vmatpush.msra.mxu3 %v5095_v40  ;;  %v5109_v48 = vld [vmem:[%s10820_s1 + $0x310] sm:$0xff]  ;;  %v2363_v40 = vld [vmem:[%s10820_s1 + $0x1c0] sm:$0xff] }
 0x3f4   :  { %2245 = vmatpush.msra.mxu1 %v2231_v49  ;;  %2475 = vmatpush.msra.mxu3 %v5093_v7  ;;  %v2453_v49 = vrot.slane %v8290_v36, 1  ;;  %v2323_v7 = vld [vmem:[%s10820_s1 + $0x80] sm:$0xff] }
 0x3f6   :  { %2246 = vmatpush.msra.mxu1 %v2230_v17  ;;  %2476 = vmatpush.msra.mxu3 %v5091_v15 }
 0x3f8   :  { %2247 = vmatpush.msra.mxu1 %v2229_v46  ;;  %2477 = vmatpush.msra.mxu3 %v5089_v27  ;;  %v8325_v46 = vld [vmem:[%s10819_s0 + $0x68] sm:$0xff]  ;;  %v2321_v27 = vld [vmem:[%s10820_s1 + $0x70] sm:$0xff] }
 0x3f9   :  { %v2455_v38 = vrot.slane %v8325_v46, 1 }
 0x3fa   :  { %2248 = vmatpush.msra.mxu1 %v2228_v6  ;;  %2478 = vmatpush.msra.mxu3 %v5087_v61  ;;  %v2319_v61 = vld [vmem:[%s10820_s1 + $0x60] sm:$0xff] }
 0x3fc   :  { %2249 = vmatpush.msra.mxu1 %v2227_v60  ;;  %2479 = vmatpush.msra.mxu3 %v5085_v43  ;;  %v5073_v60 = vld [vmem:[%s10819_s0 + $0x70] sm:$0x1f] }
 0x3fd   :  { %v8345_v5 = vrot.slane %v5073_v60, 1  ;;  %v2357_v43 = vld [vmem:[%s10820_s1 + $0x190] sm:$0xff]  ;;  %v5100_v60 = vld [vmem:[%s10820_s1 + $0x2c8] sm:$0xff] }
 0x3fe   :  { %2250 = vmatpush.msra.mxu1 %v2226_v31  ;;  %2480 = vmatpush.msra.mxu3 %v5083_v19  ;;  %v2367_v31 = vld [vmem:[%s10820_s1 + $0x1e0] sm:$0xff] }
 0x3ff   :  { %v8364_v15 = vsel %vm200_vm0, %v2453_v49, %v8345_v5  ;;  %v2355_v19 = vld [vmem:[%s10820_s1 + $0x180] sm:$0xff] }
 0x400   :  { %2251 = vmatpush.msra.mxu1 %v2225_v12  ;;  %2481 = vmatpush.msra.mxu3 %v5081_v59  ;;  %v2327_v12 = vld [vmem:[%s10820_s1 + $0xa0] sm:$0xff] }
 0x401   :  { %v2315_v59 = vld [vmem:[%s10820_s1 + $0x40] sm:$0xff] }
 0x402   :  { %2252 = vmatpush.msra.mxu1 %v2224_v13  ;;  %2482 = vmatpush.msra.mxu3 %v5079_v50  ;;  %v2365_v13 = vld [vmem:[%s10820_s1 + $0x1d0] sm:$0xff]  ;;  %v2351_v50 = vld [vmem:[%s10820_s1 + $0x160] sm:$0xff] }
 0x404   :  { %2253 = vmatpush.msra.mxu1 %v2223_v21  ;;  %2483 = vmatpush.msra.mxu3 %v5077_v10  ;;  %v2325_v21 = vld [vmem:[%s10820_s1 + $0x90] sm:$0xff]  ;;  %v2275_v10 = vld [vmem:[%s10832_s13 + $0x78] sm:$0xff] }
 0x405   :  { %2277 = vmatpush.msrb.mxu2 %v2275_v10  ;;  %v2264_v10 = vld [vmem:[%s10832_s13 + $0x20] sm:$0xff] }
 0x406   :  { %2254 = vmatpush.msra.mxu1 %v2222_v57  ;;  %2484 = vmatpush.msra.mxu3 %v5075_v37  ;;  %v8354_v57 = vsel %vm200_vm0, %v2451_v53, %v2455_v38  ;;  %v2274_v37 = vld [vmem:[%s10832_s13 + $0x70] sm:$0xff] }
 0x407   :  { %2278 = vmatpush.msrb.mxu2 %v2274_v37  ;;  %v5147_v37 = vld [vmem:[%s10820_s1 + $0x420] sm:$0xff] }
 0x444   :  { %v1996_v16 = vpop.f32.mrf.mxu1 }
 0x44a   :  { %v2021_v34 = vpop.f32.mrf.mxu3 }
 0x44b   :  { %v2024_v32 = vmax.f32 %v1996_v16, %v2021_v34  ;;  %v2333_v16 = vld [vmem:[%s10820_s1 + $0xd0] sm:$0xff]  ;;  %v5107_v34 = vld [vmem:[%s10820_s1 + $0x300] sm:$0xff] }
 0x44d   :  { %2025 = vst [vmem:[#allocation3] sm:$0x1f] %v2024_v32 }
 0x454   :  { %v2027_v33 = vld [vmem:[#allocation3] sm:$0x1]  ;;  %v2065_v4 = vld [vmem:[#allocation3 + $0x1] sm:$0x1]  ;;  %v2104_v35 = vld [vmem:[#allocation3 + $0x2] sm:$0x1] }
 0x455   :  { %2060 = vmatmul.f32.vlgmr.msra.gmra.mxu0 %v2027_v33  ;;  %2099 = vmatmul.f32.vlgmr.msrb.gmra.mxu1 %v2065_v4  ;;  %v2143_v44 = vld [vmem:[#allocation3 + $0x3] sm:$0x1]  ;;  %v2182_v45 = vld [vmem:[#allocation3 + $0x4] sm:$0x1]  ;;  %v8311_v33 = vsel %vm200_vm0, %v2450_v26, %v2451_v53  ;;  %v5106_v26 = vld [vmem:[%s10820_s1 + $0x2f8] sm:$0xff] }
 0x456   :  { %2138 = vmatmul.f32.vlgmr.msra.gmra.mxu2 %v2104_v35  ;;  %2177 = vmatmul.f32.vlgmr.msrb.gmra.mxu3 %v2143_v44  ;;  %v2331_v4 = vld [vmem:[%s10820_s1 + $0xc0] sm:$0xff]  ;;  %v2369_v44 = vld [vmem:[%s10820_s1 + $0x1f0] sm:$0xff] }
 0x457   :  { %2498 = vmatpush.msra.mxu0 %v5137_v39  ;;  %2585 = vmatpush.msrb.mxu3 %v2337_v29  ;;  %v2273_v29 = vld [vmem:[%s10832_s13 + $0x68] sm:$0xff]  ;;  %v2341_v53 = vld [vmem:[%s10820_s1 + $0x110] sm:$0xff] }
 0x458   :  { %2279 = vmatpush.msrb.mxu2 %v2273_v29  ;;  %2527 = vmatpush.msrb.mxu1 %v5106_v26  ;;  %v2262_v26 = vld [vmem:[%s10832_s13 + $0x10] sm:$0xff] }
 0x459   :  { %2499 = vmatpush.msra.mxu0 %v5135_v20  ;;  %2586 = vmatpush.msrb.mxu3 %v2335_v54  ;;  %v2272_v54 = vld [vmem:[%s10832_s13 + $0x60] sm:$0xff] }
 0x45a   :  { %2280 = vmatpush.msrb.mxu2 %v2272_v54  ;;  %v5145_v54 = vld [vmem:[%s10820_s1 + $0x410] sm:$0xff] }
 0x45b   :  { %2500 = vmatpush.msra.mxu0 %v5133_v41  ;;  %2587 = vmatpush.msrb.mxu3 %v2333_v16  ;;  %v5104_v16 = vld [vmem:[%s10820_s1 + $0x2e8] sm:$0xff] }
 0x45c   :  { %2528 = vmatpush.msrb.mxu1 %v5104_v16  ;;  %v5143_v16 = vld [vmem:[%s10820_s1 + $0x400] sm:$0xff] }
 0x45d   :  { %2216 = vmatmul.f32.vlgmr.msrb.gmra.mxu0 %v2182_v45  ;;  %v8320_v45 = vsel %vm200_vm0, %v2448_v2, %v2453_v49  ;;  %2588 = vmatpush.msrb.mxu3 %v2331_v4  ;;  %v2309_v2 = vld [vmem:[%s10820_s1 + $0x10] sm:$0xff]  ;;  %v2271_v49 = vld [vmem:[%s10832_s13 + $0x58] sm:$0xff] }
 0x45e   :  { %2501 = vmatpush.msra.mxu0 %v5131_v9  ;;  %2485 = vmatmul.f32.vlgmr.msra.gmra.mxu3 %v8274_v55  ;;  %v2361_v9 = vld [vmem:[%s10820_s1 + $0x1b0] sm:$0xff]  ;;  %v5102_v4 = vld [vmem:[%s10820_s1 + $0x2d8] sm:$0xff] }
 0x45f   :  { %2589 = vmatpush.msrb.mxu3 %v2329_v56  ;;  %2281 = vmatpush.msrb.mxu2 %v2271_v49  ;;  %v5203_v56 = vld [vmem:[%s10820_s1 + $0x5e0] sm:$0xff]  ;;  %v8625_v49 = vld [vmem:[%s10819_s0 + $0x78] sm:$0xf] }
 0x460   :  { %2502 = vmatpush.msra.mxu0 %v5129_v14  ;;  %v5074_v14 = vld [vmem:[%s10819_s0 + $0x78] sm:$0x1f]  ;;  %2529 = vmatpush.msrb.mxu1 %v5102_v4  ;;  %v5140_v4 = vld [vmem:[%s10819_s0 + $0x48] sm:$0xfc] }
 0x461   :  { %2590 = vmatpush.msrb.mxu3 %v2327_v12  ;;  %v5098_v12 = vld [vmem:[%s10820_s1 + $0x2b8] sm:$0xff] }
 0x462   :  { %2503 = vmatpush.msra.mxu0 %v5127_v28  ;;  %v2359_v28 = vld [vmem:[%s10820_s1 + $0x1a0] sm:$0xff]  ;;  %2530 = vmatpush.msrb.mxu1 %v5100_v60 }
 0x463   :  { %2591 = vmatpush.msrb.mxu3 %v2325_v21  ;;  %v5159_v21 = vld [vmem:[%s10820_s1 + $0x480] sm:$0xff] }
 0x464   :  { %2504 = vmatpush.msra.mxu0 %v5125_v42  ;;  %v8380_v42 = vrot.slane %v5074_v14, 1  ;;  %2531 = vmatpush.msrb.mxu1 %v5098_v12  ;;  %v5094_v14 = vld [vmem:[%s10820_s1 + $0x298] sm:$0xff]  ;;  %v5239_v60 = vld [vmem:[%s10820_s1 + $0x6e0] sm:$0xff]  ;;  %v5177_v12 = vld [vmem:[%s10820_s1 + $0x510] sm:$0xff] }
 0x465   :  { %2592 = vmatpush.msrb.mxu3 %v2323_v7  ;;  %v2267_v7 = vld [vmem:[%s10832_s13 + $0x38] sm:$0xff] }
 0x466   :  { %2505 = vmatpush.msra.mxu0 %v5123_v47  ;;  %2488 = vmatmul.f32.gmra.mxu3 %v8320_v45  ;;  %v2317_v47 = vld [vmem:[%s10820_s1 + $0x50] sm:$0xff] }
 0x467   :  { %2593 = vmatpush.msrb.mxu3 %v2321_v27  ;;  %v5155_v27 = vld [vmem:[%s10820_s1 + $0x460] sm:$0xff] }
 0x468   :  { %2506 = vmatpush.msra.mxu0 %v5121_v58  ;;  %v8393_v58 = vsel %vm200_vm0, %v2455_v38, %v8380_v42  ;;  %v5161_v38 = vld [vmem:[%s10820_s1 + $0x490] sm:$0xff] }
 0x469   :  { %2594 = vmatpush.msrb.mxu3 %v2319_v61  ;;  %v5193_v61 = vld [vmem:[%s10820_s1 + $0x590] sm:$0xff] }
 0x46a   :  { %2507 = vmatpush.msra.mxu0 %v5119_v62  ;;  %v2313_v62 = vld [vmem:[%s10820_s1 + $0x30] sm:$0xff] }
 0x46b   :  { %2595 = vmatpush.msrb.mxu3 %v2317_v47  ;;  %v5153_v47 = vld [vmem:[%s10820_s1 + $0x450] sm:$0xff] }
 0x46c   :  { %2508 = vmatpush.msra.mxu0 %v5117_v18  ;;  %v2311_v18 = vld [vmem:[%s10820_s1 + $0x20] sm:$0xff] }
 0x46d   :  { %2596 = vmatpush.msrb.mxu3 %v2315_v59  ;;  %v5191_v59 = vld [vmem:[%s10820_s1 + $0x580] sm:$0xff] }
 0x46e   :  { %2509 = vmatpush.msra.mxu0 %v5115_v22  ;;  %2491 = vmatmul.f32.gmra.mxu3 %v8364_v15  ;;  %v2347_v22 = vld [vmem:[%s10820_s1 + $0x140] sm:$0xff] }
 0x46f   :  { %2597 = vmatpush.msrb.mxu3 %v2313_v62  ;;  %v5151_v62 = vld [vmem:[%s10820_s1 + $0x440] sm:$0xff] }
 0x470   :  { %2510 = vmatpush.msra.mxu0 %v5113_v24  ;;  %v2345_v24 = vld [vmem:[%s10820_s1 + $0x130] sm:$0xff] }
 0x471   :  { %2598 = vmatpush.msrb.mxu3 %v2311_v18  ;;  %v8578_v18 = vld [vmem:[%s10819_s0 + $0x70] sm:$0xf] }
 0x472   :  { %2511 = vmatpush.msra.mxu0 %v5111_v52  ;;  %v2343_v52 = vld [vmem:[%s10820_s1 + $0x120] sm:$0xff] }
 0x473   :  { %2599 = vmatpush.msrb.mxu3 %v2309_v2  ;;  %v5139_v2 = vld [vmem:[%s10819_s0 + $0x40] sm:$0xfc] }
 0x474   :  { %2512 = vmatpush.msra.mxu0 %v5109_v48  ;;  %v5169_v48 = vld [vmem:[%s10820_s1 + $0x4d0] sm:$0xff]  ;;  %v2773_v29 = vrot.slane %v5139_v2, 2 }
 0x475   :  { %v5229_v2 = vld [vmem:[%s10820_s1 + $0x690] sm:$0xff] }
 0x476   :  { %2513 = vmatpush.msra.mxu0 %v5107_v34  ;;  %2494 = vmatmul.f32.gmra.mxu3 %v8345_v5  ;;  %v8476_v34 = vld [vmem:[%s10819_s0 + $0x48] sm:$0xff] }
 0x477   :  { %2514 = vmatmul.f32.vlgmr.msra.gmra.mxu0 %v8311_v33 }
 0x478   :  { %2614 = vmatpush.msrb.mxu0 %v2369_v44  ;;  %v5165_v44 = vld [vmem:[%s10820_s1 + $0x4b0] sm:$0xff] }
 0x47a   :  { %2615 = vmatpush.msrb.mxu0 %v2367_v31  ;;  %v2269_v31 = vld [vmem:[%s10832_s13 + $0x48] sm:$0xff] }
 0x47c   :  { %2616 = vmatpush.msrb.mxu0 %v2365_v13  ;;  %v5199_v13 = vld [vmem:[%s10820_s1 + $0x5c0] sm:$0xff] }
 0x47e   :  { %2617 = vmatpush.msrb.mxu0 %v2363_v40  ;;  %v5197_v40 = vld [vmem:[%s10820_s1 + $0x5b0] sm:$0xff] }
 0x47f   :  { %2517 = vmatmul.f32.gmra.mxu0 %v8354_v57 }
 0x480   :  { %2618 = vmatpush.msrb.mxu0 %v2361_v9  ;;  %v5195_v9 = vld [vmem:[%s10820_s1 + $0x5a0] sm:$0xff] }
 0x482   :  { %2619 = vmatpush.msrb.mxu0 %v2359_v28  ;;  %v2266_v28 = vld [vmem:[%s10832_s13 + $0x30] sm:$0xff] }
 0x484   :  { %2620 = vmatpush.msrb.mxu0 %v2357_v43  ;;  %v5092_v43 = vld [vmem:[%s10820_s1 + $0x288] sm:$0xff] }
 0x486   :  { %2621 = vmatpush.msrb.mxu0 %v2355_v19  ;;  %v2265_v19 = vld [vmem:[%s10832_s13 + $0x28] sm:$0xff] }
 0x487   :  { %2520 = vmatmul.f32.gmra.mxu0 %v8393_v58 }
 0x488   :  { %2622 = vmatpush.msrb.mxu0 %v2353_v1  ;;  %v5090_v1 = vld [vmem:[%s10820_s1 + $0x278] sm:$0xff] }
 0x48a   :  { %2623 = vmatpush.msrb.mxu0 %v2351_v50  ;;  %v5189_v50 = vld [vmem:[%s10820_s1 + $0x570] sm:$0xff] }
 0x48c   :  { %2624 = vmatpush.msrb.mxu0 %v2349_v51  ;;  %v5149_v51 = vld [vmem:[%s10820_s1 + $0x430] sm:$0xff] }
 0x48e   :  { %2625 = vmatpush.msrb.mxu0 %v2347_v22  ;;  %v5187_v22 = vld [vmem:[%s10820_s1 + $0x560] sm:$0xff] }
 0x48f   :  { %2523 = vmatmul.f32.gmra.mxu0 %v8380_v42 }
 0x490   :  { %2626 = vmatpush.msrb.mxu0 %v2345_v24  ;;  %v2263_v24 = vld [vmem:[%s10832_s13 + $0x18] sm:$0xff] }
 0x492   :  { %2627 = vmatpush.msrb.mxu0 %v2343_v52  ;;  %v2774_v52 = vrot.slane %v8243_v0, 2 }
 0x494   :  { %2628 = vmatpush.msrb.mxu0 %v2341_v53  ;;  %v5183_v53 = vld [vmem:[%s10820_s1 + $0x540] sm:$0xff] }
 0x4d2   :  { %v2061_v11 = vpop.f32.mrf.mxu0  ;;  %v2100_v17 = vpop.f32.mrf.mxu1 }
 0x4d3   :  { %v2064_v3 = vadd.f32 %v2061_v11, %v2026_v23  ;;  %v2307_v23 = vld [vmem:[%s10820_s1] sm:$0xff]  ;;  %v5173_v11 = vld [vmem:[%s10820_s1 + $0x4f0] sm:$0xff] }
 0x4d4   :  { %2600 = vmatpush.msrb.mxu3 %v2307_v23  ;;  %v5088_v23 = vld [vmem:[%s10820_s1 + $0x268] sm:$0xff] }
 0x4d5   :  { %v2103_v32 = vadd.f32 %v2100_v17, %v2064_v3  ;;  %2601 = vmatmul.f32.vlgmr.msrb.gmra.mxu3 %v8436_v63  ;;  %v5171_v3 = vld [vmem:[%s10820_s1 + $0x4e0] sm:$0xff] }
 0x4d6   :  { %2795 = vmatpush.msra.mxu3 %v5173_v11  ;;  %v2339_v17 = vld [vmem:[%s10820_s1 + $0x100] sm:$0xff]  ;;  %v5185_v11 = vld [vmem:[%s10820_s1 + $0x550] sm:$0xff] }
 0x4d7   :  { %2629 = vmatpush.msrb.mxu0 %v2339_v17  ;;  %v5181_v17 = vld [vmem:[%s10820_s1 + $0x530] sm:$0xff] }
 0x4d8   :  { %2796 = vmatpush.msra.mxu3 %v5171_v3  ;;  %2630 = vmatmul.f32.vlgmr.msrb.gmra.mxu0 %v8476_v34  ;;  %v5086_v3 = vld [vmem:[%s10820_s1 + $0x258] sm:$0xff] }
 0x4d9   :  { %v2139_v35 = vpop.f32.mrf.mxu2  ;;  %v2178_v30 = vpop.f32.mrf.mxu3 }
 0x4da   :  { %v2142_v6 = vadd.f32 %v2139_v35, %v2103_v32  ;;  %v2217_v39 = vpop.f32.mrf.mxu0  ;;  %v5167_v32 = vld [vmem:[%s10820_s1 + $0x4c0] sm:$0xff]  ;;  %2797 = vmatpush.msra.mxu3 %v5169_v48  ;;  %v5205_v35 = vld [vmem:[%s10820_s1 + $0x5f0] sm:$0xff]  ;;  %v5084_v48 = vld [vmem:[%s10820_s1 + $0x248] sm:$0xff] }
 0x4db   :  { %2824 = vmatpush.msra.mxu0 %v5205_v35  ;;  %v5241_v35 = vld [vmem:[%s10820_s1 + $0x6f0] sm:$0xff] }
 0x4dc   :  { %v2181_v8 = vadd.f32 %v2178_v30, %v2142_v6  ;;  %v2270_v6 = vld [vmem:[%s10832_s13 + $0x50] sm:$0xff]  ;;  %2798 = vmatpush.msra.mxu3 %v5167_v32  ;;  %v5163_v30 = vld [vmem:[%s10820_s1 + $0x4a0] sm:$0xff]  ;;  %v8634_v32 = vsel %vm528_vm1, %v2773_v29, %v2774_v52  ;;  %v5142_v29 = vld [vmem:[%s10819_s0 + $0x78] sm:$0x3f] }
 0x4dd   :  { %2604 = vmatmul.f32.gmra.mxu3 %v8243_v0  ;;  %2282 = vmatpush.msrb.mxu2 %v2270_v6  ;;  %v5179_v6 = vld [vmem:[%s10820_s1 + $0x520] sm:$0xff] }
 0x4de   :  { %v2220_v20 = vadd.f32 %v2217_v39, %v2181_v8  ;;  %2799 = vmatpush.msra.mxu3 %v5165_v44  ;;  %v5201_v8 = vld [vmem:[%s10820_s1 + $0x5d0] sm:$0xff]  ;;  %2825 = vmatpush.msra.mxu0 %v5203_v56  ;;  %v2268_v39 = vld [vmem:[%s10832_s13 + $0x40] sm:$0xff]  ;;  %v2261_v44 = vld [vmem:[%s10832_s13 + $0x8] sm:$0xff] }
 0x4df   :  { %2283 = vmatpush.msrb.mxu2 %v2269_v31  ;;  %v5082_v56 = vld [vmem:[%s10820_s1 + $0x238] sm:$0xff]  ;;  %v2777_v31 = vrot.slane %v8279_v25, 2 }
 0x4e0   :  { %v2221_v41 = vmax.f32 %v2220_v20, 0.0  ;;  %2800 = vmatpush.msra.mxu3 %v5163_v30  ;;  %v5096_v20 = vld [vmem:[%s10820_s1 + $0x2a8] sm:$0xff]  ;;  %2826 = vmatpush.msra.mxu0 %v5201_v8  ;;  %v2776_v30 = vrot.slane %v5140_v4, 2  ;;  %v2260_v8 = vld [vmem:[%s10832_s13] sm:$0xff]  ;;  %v5221_v4 = vld [vmem:[%s10820_s1 + $0x650] sm:$0xff] }
 0x4e1   :  { %2284 = vmatpush.msrb.mxu2 %v2268_v39  ;;  %2532 = vmatpush.msrb.mxu1 %v5096_v20  ;;  %v5138_v39 = vld [vmem:[%s10820_s1 + $0x3f8] sm:$0xff]  ;;  %v5080_v20 = vld [vmem:[%s10820_s1 + $0x228] sm:$0xff] }
 0x4e2   :  { %2255 = vmatmul.f32.vlgmr.msra.gmra.mxu1 %v2221_v41  ;;  %2801 = vmatpush.msra.mxu3 %v5161_v38  ;;  %v5157_v41 = vld [vmem:[%s10820_s1 + $0x470] sm:$0xff]  ;;  %v2779_v38 = vrot.slane %v8290_v36, 2 }
 0x4e3   :  { %2827 = vmatpush.msra.mxu0 %v5199_v13  ;;  %2285 = vmatpush.msrb.mxu2 %v2267_v7  ;;  %v5237_v13 = vld [vmem:[%s10820_s1 + $0x6d0] sm:$0xff]  ;;  %v5235_v7 = vld [vmem:[%s10820_s1 + $0x6c0] sm:$0xff] }
 0x4e4   :  { %2633 = vmatmul.f32.gmra.mxu0 %v8279_v25  ;;  %2802 = vmatpush.msra.mxu3 %v5159_v21  ;;  %v5175_v21 = vld [vmem:[%s10820_s1 + $0x500] sm:$0xff] }
 0x4e5   :  { %2828 = vmatpush.msra.mxu0 %v5197_v40  ;;  %2607 = vmatmul.f32.gmra.mxu3 %v8290_v36  ;;  %v5136_v40 = vld [vmem:[%s10820_s1 + $0x3e8] sm:$0xff] }
 0x4e6   :  { %2803 = vmatpush.msra.mxu3 %v5157_v41  ;;  %2533 = vmatpush.msrb.mxu1 %v5094_v14  ;;  %v8680_v41 = vsel %vm528_vm1, %v2776_v30, %v2777_v31  ;;  %v8689_v14 = vsel %vm528_vm1, %v2774_v52, %v2779_v38  ;;  %v5225_v52 = vld [vmem:[%s10820_s1 + $0x670] sm:$0xff] }
 0x4e7   :  { %2829 = vmatpush.msra.mxu0 %v5195_v9  ;;  %2286 = vmatpush.msrb.mxu2 %v2266_v28  ;;  %v5273_v9 = vld [vmem:[%s10820_s1 + $0x7f0] sm:$0xff] }
 0x4e8   :  { %2804 = vmatpush.msra.mxu3 %v5155_v27  ;;  %2534 = vmatpush.msrb.mxu1 %v5092_v43  ;;  %v5233_v27 = vld [vmem:[%s10820_s1 + $0x6b0] sm:$0xff]  ;;  %v5271_v43 = vld [vmem:[%s10820_s1 + $0x7e0] sm:$0xff] }
 0x4e9   :  { %2830 = vmatpush.msra.mxu0 %v5193_v61  ;;  %2287 = vmatpush.msrb.mxu2 %v2265_v19  ;;  %v5141_v28 = vld [vmem:[%s10819_s0 + $0x70] sm:$0x3f]  ;;  %v5078_v61 = vld [vmem:[%s10820_s1 + $0x218] sm:$0xff]  ;;  %v5231_v19 = vld [vmem:[%s10820_s1 + $0x6a0] sm:$0xff] }
 0x4ea   :  { %2805 = vmatpush.msra.mxu3 %v5153_v47  ;;  %2535 = vmatpush.msrb.mxu1 %v5090_v1  ;;  %v5134_v47 = vld [vmem:[%s10820_s1 + $0x3d8] sm:$0xff]  ;;  %v5076_v1 = vld [vmem:[%s10820_s1 + $0x208] sm:$0xff]  ;;  %v5257_v30 = vld [vmem:[%s10820_s1 + $0x770] sm:$0xff] }
 0x4eb   :  { %2831 = vmatpush.msra.mxu0 %v5191_v59  ;;  %2288 = vmatpush.msrb.mxu2 %v2264_v10  ;;  %v2781_v59 = vrot.slane %v8325_v46, 2  ;;  %v5267_v10 = vld [vmem:[%s10820_s1 + $0x7c0] sm:$0xff] }
 0x4ec   :  { %2636 = vmatmul.f32.gmra.mxu0 %v8325_v46  ;;  %2806 = vmatpush.msra.mxu3 %v5151_v62  ;;  %v5269_v62 = vld [vmem:[%s10820_s1 + $0x7d0] sm:$0xff] }
 0x4ed   :  { %2832 = vmatpush.msra.mxu0 %v5189_v50  ;;  %2610 = vmatmul.f32.gmra.mxu3 %v8578_v18  ;;  %v8718_v50 = vrot.slane %v5141_v28, 2  ;;  %v5211_v28 = vld [vmem:[%s10820_s1 + $0x600] sm:$0xff] }
 0x4ee   :  { %2807 = vmatpush.msra.mxu3 %v5149_v51  ;;  %2536 = vmatpush.msrb.mxu1 %v5088_v23  ;;  %v5132_v51 = vld [vmem:[%s10820_s1 + $0x3c8] sm:$0xff]  ;;  %v8733_v23 = vsel %vm528_vm1, %v2777_v31, %v2781_v59  ;;  %v5217_v31 = vld [vmem:[%s10820_s1 + $0x630] sm:$0xff] }
 0x4ef   :  { %2833 = vmatpush.msra.mxu0 %v5187_v22  ;;  %2289 = vmatpush.msrb.mxu2 %v2263_v24  ;;  %v5130_v22 = vld [vmem:[%s10820_s1 + $0x3b8] sm:$0xff]  ;;  %v5265_v24 = vld [vmem:[%s10820_s1 + $0x7b0] sm:$0xff] }
 0x4f0   :  { %2808 = vmatpush.msra.mxu3 %v5147_v37  ;;  %2537 = vmatpush.msrb.mxu1 %v5086_v3  ;;  %v5227_v37 = vld [vmem:[%s10820_s1 + $0x680] sm:$0xff]  ;;  %v2338_v3 = vld [vmem:[%s10820_s1 + $0xf8] sm:$0xff] }
 0x4f1   :  { %2834 = vmatpush.msra.mxu0 %v5185_v11  ;;  %2290 = vmatpush.msrb.mxu2 %v2262_v26  ;;  %v8743_v11 = vsel %vm528_vm1, %v2779_v38, %v8718_v50  ;;  %v5223_v26 = vld [vmem:[%s10820_s1 + $0x660] sm:$0xff] }
 0x4f2   :  { %2809 = vmatpush.msra.mxu3 %v5145_v54  ;;  %2538 = vmatpush.msrb.mxu1 %v5084_v48  ;;  %v5263_v54 = vld [vmem:[%s10820_s1 + $0x7a0] sm:$0xff]  ;;  %v2336_v48 = vld [vmem:[%s10820_s1 + $0xe8] sm:$0xff] }
 0x4f3   :  { %2835 = vmatpush.msra.mxu0 %v5183_v53  ;;  %2291 = vmatpush.msrb.mxu2 %v2261_v44  ;;  %v8766_v53 = vrot.slane %v5142_v29, 2  ;;  %v5259_v44 = vld [vmem:[%s10820_s1 + $0x780] sm:$0xff]  ;;  %v5341_v29 = vld [vmem:[%s10820_s1 + $0x9f0] sm:$0xff] }
 0x4f4   :  { %2639 = vmatmul.f32.gmra.mxu0 %v8625_v49  ;;  %2810 = vmatpush.msra.mxu3 %v5143_v16  ;;  %v5261_v16 = vld [vmem:[%s10820_s1 + $0x790] sm:$0xff]  ;;  %v5255_v38 = vld [vmem:[%s10820_s1 + $0x760] sm:$0xff] }
 0x4f5   :  { %2836 = vmatpush.msra.mxu0 %v5181_v17  ;;  %2811 = vmatmul.f32.vlgmr.msra.gmra.mxu3 %v8634_v32  ;;  %v5126_v17 = vld [vmem:[%s10820_s1 + $0x398] sm:$0xff] }
 0x4f6   :  { %3013 = vmatpush.msrb.mxu3 %v5241_v35  ;;  %2539 = vmatpush.msrb.mxu1 %v5082_v56  ;;  %v2334_v35 = vld [vmem:[%s10820_s1 + $0xd8] sm:$0xff]  ;;  %v8791_v56 = vsel %vm528_vm1, %v2781_v59, %v8766_v53  ;;  %v5307_v59 = vld [vmem:[%s10820_s1 + $0x8e0] sm:$0xff] }
 0x4f7   :  { %2837 = vmatpush.msra.mxu0 %v5179_v6  ;;  %2292 = vmatpush.msrb.mxu2 %v2260_v8  ;;  %v5124_v6 = vld [vmem:[%s10820_s1 + $0x388] sm:$0xff]  ;;  %v5207_v8 = vld [vmem:[%s10819_s0 + $0x40] sm:$0xf8] }
 0x4f8   :  { %3014 = vmatpush.msrb.mxu3 %v5239_v60  ;;  %2540 = vmatpush.msrb.mxu1 %v5080_v20  ;;  %v5219_v60 = vld [vmem:[%s10820_s1 + $0x640] sm:$0xff]  ;;  %v5253_v20 = vld [vmem:[%s10820_s1 + $0x750] sm:$0xff] }
 0x4f9   :  { %2838 = vmatpush.msra.mxu0 %v5177_v12  ;;  %2556 = vmatpush.msra.mxu2 %v5138_v39  ;;  %v2332_v12 = vld [vmem:[%s10820_s1 + $0xc8] sm:$0xff]  ;;  %v5215_v39 = vld [vmem:[%s10820_s1 + $0x620] sm:$0xff] }
 0x4fa   :  { %3015 = vmatpush.msrb.mxu3 %v5237_v13  ;;  %2541 = vmatpush.msrb.mxu1 %v5078_v61  ;;  %v5122_v13 = vld [vmem:[%s10820_s1 + $0x378] sm:$0xff]  ;;  %v5249_v61 = vld [vmem:[%s10820_s1 + $0x730] sm:$0xff] }
 0x4fb   :  { %2839 = vmatpush.msra.mxu0 %v5175_v21  ;;  %2557 = vmatpush.msra.mxu2 %v5136_v40  ;;  %v2991_v21 = vrot.slane %v5207_v8, 3  ;;  %v2992_v40 = vrot.slane %v8243_v0, 3 }
 0x4fc   :  { %2840 = vmatmul.f32.vlgmr.msra.gmra.mxu0 %v8680_v41  ;;  %3016 = vmatpush.msrb.mxu3 %v5235_v7  ;;  %v2330_v7 = vld [vmem:[%s10820_s1 + $0xb8] sm:$0xff] }
 0x4fd   :  { %3042 = vmatpush.msrb.mxu0 %v5273_v9  ;;  %2814 = vmatmul.f32.gmra.mxu3 %v8689_v14  ;;  %v5213_v9 = vld [vmem:[%s10820_s1 + $0x610] sm:$0xff] }
 0x4fe   :  { %3017 = vmatpush.msrb.mxu3 %v5233_v27  ;;  %2558 = vmatpush.msra.mxu2 %v5134_v47  ;;  %v5251_v27 = vld [vmem:[%s10820_s1 + $0x740] sm:$0xff]  ;;  %v5309_v47 = vld [vmem:[%s10820_s1 + $0x8f0] sm:$0xff] }
 0x4ff   :  { %3043 = vmatpush.msrb.mxu0 %v5271_v43  ;;  %2542 = vmatpush.msrb.mxu1 %v5076_v1  ;;  %v8840_v43 = vsel %vm748_vm2, %v2991_v21, %v2992_v40  ;;  %v5331_v21 = vld [vmem:[%s10820_s1 + $0x9a0] sm:$0xff] }
 0x500   :  { %3018 = vmatpush.msrb.mxu3 %v5231_v19  ;;  %2559 = vmatpush.msra.mxu2 %v5132_v51  ;;  %v5247_v19 = vld [vmem:[%s10820_s1 + $0x720] sm:$0xff]  ;;  %v5245_v51 = vld [vmem:[%s10820_s1 + $0x710] sm:$0xff] }
 0x501   :  { %3044 = vmatpush.msrb.mxu0 %v5269_v62  ;;  %2543 = vmatmul.f32.vlgmr.msrb.gmra.mxu1 %v8274_v55  ;;  %v5128_v55 = vld [vmem:[%s10820_s1 + $0x3a8] sm:$0xff]  ;;  %v2995_v62 = vrot.slane %v8279_v25, 3 }
 0x502   :  { %3019 = vmatpush.msrb.mxu3 %v5229_v2  ;;  %2560 = vmatpush.msra.mxu2 %v5130_v22  ;;  %v2997_v2 = vrot.slane %v8290_v36, 3  ;;  %v5243_v22 = vld [vmem:[%s10820_s1 + $0x700] sm:$0xff] }
 0x503   :  { %3045 = vmatpush.msrb.mxu0 %v5267_v10  ;;  %2643 = vmatpush.msra.mxu1 %v2338_v3  ;;  %v5305_v10 = vld [vmem:[%s10820_s1 + $0x8d0] sm:$0xff]  ;;  %v5339_v3 = vld [vmem:[%s10820_s1 + $0x9e0] sm:$0xff] }
 0x504   :  { %2843 = vmatmul.f32.gmra.mxu0 %v8733_v23  ;;  %3020 = vmatpush.msrb.mxu3 %v5227_v37 }
 0x505   :  { %3046 = vmatpush.msrb.mxu0 %v5265_v24  ;;  %2817 = vmatmul.f32.gmra.mxu3 %v8743_v11  ;;  %v5303_v24 = vld [vmem:[%s10820_s1 + $0x8c0] sm:$0xff] }
 0x506   :  { %3021 = vmatpush.msrb.mxu3 %v5225_v52  ;;  %2561 = vmatpush.msra.mxu2 %v5128_v55  ;;  %v5301_v52 = vld [vmem:[%s10820_s1 + $0x8b0] sm:$0xff]  ;;  %v2328_v55 = vld [vmem:[%s10820_s1 + $0xa8] sm:$0xff] }
 0x507   :  { %3047 = vmatpush.msrb.mxu0 %v5263_v54  ;;  %2644 = vmatpush.msra.mxu1 %v2336_v48  ;;  %v5120_v54 = vld [vmem:[%s10820_s1 + $0x368] sm:$0xff]  ;;  %v5337_v48 = vld [vmem:[%s10820_s1 + $0x9d0] sm:$0xff] }
 0x508   :  { %3022 = vmatpush.msrb.mxu3 %v5223_v26  ;;  %2562 = vmatpush.msra.mxu2 %v5126_v17  ;;  %v5299_v26 = vld [vmem:[%s10820_s1 + $0x8a0] sm:$0xff]  ;;  %v5118_v17 = vld [vmem:[%s10820_s1 + $0x358] sm:$0xff] }
 0x509   :  { %3048 = vmatpush.msrb.mxu0 %v5261_v16  ;;  %2645 = vmatpush.msra.mxu1 %v2334_v35  ;;  %v2999_v16 = vrot.slane %v8325_v46, 3  ;;  %v5335_v35 = vld [vmem:[%s10820_s1 + $0x9c0] sm:$0xff] }
 0x50a   :  { %3023 = vmatpush.msrb.mxu3 %v5221_v4  ;;  %2563 = vmatpush.msra.mxu2 %v5124_v6  ;;  %v2326_v4 = vld [vmem:[%s10820_s1 + $0x98] sm:$0xff]  ;;  %v5209_v6 = vld [vmem:[%s10819_s0 + $0x70] sm:$0x7f] }
 0x50b   :  { %3049 = vmatpush.msrb.mxu0 %v5259_v44  ;;  %2646 = vmatpush.msra.mxu1 %v2332_v12  ;;  %v8915_v44 = vsel %vm748_vm2, %v2995_v62, %v2999_v16  ;;  %v8929_v8 = vrot.slane %v5209_v6, 3  ;;  %v5333_v12 = vld [vmem:[%s10820_s1 + $0x9b0] sm:$0xff] }
 0x50c   :  { %2846 = vmatmul.f32.gmra.mxu0 %v8791_v56  ;;  %3024 = vmatpush.msrb.mxu3 %v5219_v60  ;;  %v5116_v60 = vld [vmem:[%s10820_s1 + $0x348] sm:$0xff]  ;;  %v5317_v6 = vld [vmem:[%s10820_s1 + $0x930] sm:$0xff] }
 0x50d   :  { %3050 = vmatpush.msrb.mxu0 %v5257_v30  ;;  %2820 = vmatmul.f32.gmra.mxu3 %v8718_v50  ;;  %v2324_v30 = vld [vmem:[%s10820_s1 + $0x88] sm:$0xff] }
 0x50e   :  { %3025 = vmatpush.msrb.mxu3 %v5217_v31  ;;  %2546 = vmatmul.f32.gmra.mxu1 %v8320_v45  ;;  %v5208_v45 = vld [vmem:[%s10819_s0 + $0x48] sm:$0xf8]  ;;  %v5295_v31 = vld [vmem:[%s10820_s1 + $0x880] sm:$0xff] }
 0x50f   :  { %3051 = vmatpush.msrb.mxu0 %v5255_v38  ;;  %2564 = vmatpush.msra.mxu2 %v5122_v13  ;;  %v2994_v1 = vrot.slane %v5208_v45, 3  ;;  %v8937_v38 = vsel %vm748_vm2, %v2997_v2, %v8929_v8  ;;  %v2322_v13 = vld [vmem:[%s10820_s1 + $0x78] sm:$0xff]  ;;  %v5289_v45 = vld [vmem:[%s10820_s1 + $0x850] sm:$0xff] }
 0x510   :  { %3026 = vmatpush.msrb.mxu3 %v5215_v39  ;;  %2647 = vmatpush.msra.mxu1 %v2330_v7  ;;  %v5114_v39 = vld [vmem:[%s10820_s1 + $0x338] sm:$0xff]  ;;  %v2320_v7 = vld [vmem:[%s10820_s1 + $0x68] sm:$0xff] }
 0x511   :  { %3052 = vmatpush.msrb.mxu0 %v5253_v20  ;;  %v8869_v37 = vsel %vm748_vm2, %v2994_v1, %v2995_v62  ;;  %2565 = vmatpush.msra.mxu2 %v5120_v54  ;;  %v5293_v20 = vld [vmem:[%s10820_s1 + $0x870] sm:$0xff]  ;;  %v5108_v1 = vld [vmem:[%s10820_s1 + $0x308] sm:$0xff] }
 0x512   :  { %3027 = vmatpush.msrb.mxu3 %v5213_v9  ;;  %2648 = vmatpush.msra.mxu1 %v2328_v55  ;;  %v5291_v9 = vld [vmem:[%s10820_s1 + $0x860] sm:$0xff]  ;;  %v2316_v62 = vld [vmem:[%s10820_s1 + $0x48] sm:$0xff]  ;;  %v5321_v54 = vld [vmem:[%s10820_s1 + $0x950] sm:$0xff] }
 0x513   :  { %3053 = vmatpush.msrb.mxu0 %v5251_v27  ;;  %2566 = vmatpush.msra.mxu2 %v5118_v17  ;;  %v5329_v27 = vld [vmem:[%s10820_s1 + $0x990] sm:$0xff]  ;;  %v2310_v55 = vld [vmem:[%s10820_s1 + $0x18] sm:$0xff]  ;;  %v3210_v17 = vrot.slane %v8243_v0, 4  ;;  %v5315_v0 = vld [vmem:[%s10820_s1 + $0x920] sm:$0xff] }
 0x514   :  { %2849 = vmatmul.f32.gmra.mxu0 %v8766_v53  ;;  %3028 = vmatpush.msrb.mxu3 %v5211_v28  ;;  %v5110_v28 = vld [vmem:[%s10820_s1 + $0x318] sm:$0xff] }
 0x515   :  { %3054 = vmatpush.msrb.mxu0 %v5249_v61  ;;  %3029 = vmatmul.f32.vlgmr.msrb.gmra.mxu3 %v8840_v43  ;;  %v2318_v61 = vld [vmem:[%s10820_s1 + $0x58] sm:$0xff] }
 0x516   :  { %3231 = vmatpush.msra.mxu3 %v5309_v47  ;;  %2549 = vmatmul.f32.gmra.mxu1 %v8364_v15  ;;  %v8878_v15 = vsel %vm748_vm2, %v2992_v40, %v2997_v2  ;;  %v5112_v40 = vld [vmem:[%s10820_s1 + $0x328] sm:$0xff]  ;;  %v5327_v47 = vld [vmem:[%s10820_s1 + $0x980] sm:$0xff] }
 0x517   :  { %3055 = vmatpush.msrb.mxu0 %v5247_v19  ;;  %2649 = vmatpush.msra.mxu1 %v2326_v4  ;;  %v5210_v19 = vld [vmem:[%s10819_s0 + $0x78] sm:$0x7f]  ;;  %v2308_v4 = vld [vmem:[%s10820_s1 + $0x8] sm:$0xff] }
 0x518   :  { %3232 = vmatpush.msra.mxu3 %v5307_v59  ;;  %2567 = vmatpush.msra.mxu2 %v5116_v60  ;;  %v8979_v59 = vrot.slane %v5210_v19, 3 }
 0x519   :  { %3056 = vmatpush.msrb.mxu0 %v5245_v51  ;;  %2650 = vmatpush.msra.mxu1 %v2324_v30  ;;  %v5287_v51 = vld [vmem:[%s10820_s1 + $0x840] sm:$0xff]  ;;  %v5276_v30 = vld [vmem:[%s10819_s0 + $0x48] sm:$0xf0] }
 0x51a   :  { %3233 = vmatpush.msra.mxu3 %v5305_v10  ;;  %2568 = vmatpush.msra.mxu2 %v5114_v39  ;;  %v8992_v2 = vsel %vm748_vm2, %v2999_v16, %v8979_v59  ;;  %v5325_v10 = vld [vmem:[%s10820_s1 + $0x970] sm:$0xff]  ;;  %v5275_v16 = vld [vmem:[%s10819_s0 + $0x40] sm:$0xf0] }
 0x51b   :  { %3057 = vmatpush.msrb.mxu0 %v5243_v22  ;;  %2651 = vmatpush.msra.mxu1 %v2322_v13  ;;  %v2314_v22 = vld [vmem:[%s10820_s1 + $0x38] sm:$0xff]  ;;  %v5313_v39 = vld [vmem:[%s10820_s1 + $0x910] sm:$0xff]  ;;  %v3212_v13 = vrot.slane %v5276_v30, 4 }
 0x51c   :  { %3058 = vmatmul.f32.vlgmr.msrb.gmra.mxu0 %v8869_v37  ;;  %3234 = vmatpush.msra.mxu3 %v5303_v24  ;;  %v5285_v24 = vld [vmem:[%s10820_s1 + $0x830] sm:$0xff]  ;;  %v5162_v30 = vld [vmem:[%s10820_s1 + $0x498] sm:$0xff] }
 0x51d   :  { %3260 = vmatpush.msra.mxu0 %v5341_v29  ;;  %3032 = vmatmul.f32.gmra.mxu3 %v8878_v15  ;;  %v5323_v29 = vld [vmem:[%s10820_s1 + $0x960] sm:$0xff] }
 0x51e   :  { %3235 = vmatpush.msra.mxu3 %v5301_v52  ;;  %2552 = vmatmul.f32.gmra.mxu1 %v8345_v5  ;;  %v5297_v5 = vld [vmem:[%s10820_s1 + $0x890] sm:$0xff]  ;;  %v2312_v52 = vld [vmem:[%s10820_s1 + $0x28] sm:$0xff] }
 0x51f   :  { %3261 = vmatpush.msra.mxu0 %v5339_v3  ;;  %2569 = vmatpush.msra.mxu2 %v5112_v40  ;;  %v5283_v3 = vld [vmem:[%s10820_s1 + $0x820] sm:$0xff] }
 0x520   :  { %3236 = vmatpush.msra.mxu3 %v5299_v26  ;;  %2652 = vmatpush.msra.mxu1 %v2320_v7  ;;  %v5281_v26 = vld [vmem:[%s10820_s1 + $0x810] sm:$0xff]  ;;  %v2238_v7 = vld [vmem:[%s10831_s12] sm:$0x1] }
 0x521   :  { %3262 = vmatpush.msra.mxu0 %v5337_v48  ;;  %2570 = vmatpush.msra.mxu2 %v5110_v28  ;;  %v5319_v48 = vld [vmem:[%s10820_s1 + $0x940] sm:$0xff] }
 0x522   :  { %3237 = vmatpush.msra.mxu3 %v5297_v5  ;;  %2653 = vmatpush.msra.mxu1 %v2318_v61  ;;  %v3209_v5 = vrot.slane %v5275_v16, 4  ;;  %v5615_v61 = vld [vmem:[%s10819_s0 + $0x50] sm:$0xff] }
 0x523   :  { %3263 = vmatpush.msra.mxu0 %v5335_v35  ;;  %2571 = vmatpush.msra.mxu2 %v5108_v1  ;;  %v5279_v35 = vld [vmem:[%s10820_s1 + $0x800] sm:$0xff]  ;;  %v5277_v1 = vld [vmem:[%s10819_s0 + $0x70] sm:$0xff] }
 0x524   :  { %3061 = vmatmul.f32.gmra.mxu0 %v8915_v44  ;;  %3238 = vmatpush.msra.mxu3 %v5295_v31  ;;  %v9040_v60 = vsel %vm968_vm3, %v3209_v5, %v3210_v17  ;;  %v3213_v31 = vrot.slane %v8279_v25, 4  ;;  %v3215_v25 = vrot.slane %v8290_v36, 4  ;;  %v5172_v36 = vld [vmem:[%s10820_s1 + $0x4e8] sm:$0xff] }
 0x525   :  { %3264 = vmatpush.msra.mxu0 %v5333_v12  ;;  %3035 = vmatmul.f32.gmra.mxu3 %v8937_v38  ;;  %v9052_v12 = vpop.f32.mrf.mxu3  ;;  %v5164_v5 = vld [vmem:[%s10820_s1 + $0x4a8] sm:$0xff] }
 0x526   :  { %3239 = vmatpush.msra.mxu3 %v5293_v20  ;;  %2654 = vmatpush.msra.mxu1 %v2316_v62  ;;  %v9057_v20 = vpop.f32.mrf.mxu0  ;;  %v9067_v40 = vsel %vm968_vm3, %v3210_v17, %v3215_v25  ;;  %v9091_v62 = vrot.slane %v5277_v1, 4  ;;  %v2364_v17 = vld [vmem:[%s10820_s1 + $0x1c8] sm:$0xff] }
 0x527   :  { %3265 = vmatpush.msra.mxu0 %v5331_v21  ;;  %v5311_v21 = vld [vmem:[%s10820_s1 + $0x900] sm:$0xff] }
 0x528   :  { %3240 = vmatpush.msra.mxu3 %v5291_v9  ;;  %2655 = vmatpush.msra.mxu1 %v2314_v22  ;;  %v5174_v9 = vld [vmem:[%s10820_s1 + $0x4f8] sm:$0xff]  ;;  %v2368_v22 = vld [vmem:[%s10820_s1 + $0x1e8] sm:$0xff] }
 0x529   :  { %3266 = vmatpush.msra.mxu0 %v5329_v27  ;;  %v3217_v27 = vrot.slane %v8325_v46, 4 }
 0x52a   :  { %3241 = vmatpush.msra.mxu3 %v5289_v45  ;;  %2656 = vmatpush.msra.mxu1 %v2312_v52  ;;  %v5168_v52 = vld [vmem:[%s10820_s1 + $0x4c8] sm:$0xff] }
 0x52b   :  { %3267 = vmatpush.msra.mxu0 %v5327_v47 }
 0x52c   :  { %3064 = vmatmul.f32.gmra.mxu0 %v8992_v2  ;;  %3242 = vmatpush.msra.mxu3 %v5287_v51  ;;  %v2370_v51 = vld [vmem:[%s10820_s1 + $0x1f8] sm:$0xff] }
 0x52d   :  { %3268 = vmatpush.msra.mxu0 %v5325_v10  ;;  %3038 = vmatmul.f32.gmra.mxu3 %v8929_v8  ;;  %v9084_v45 = vpop.f32.mrf.mxu3  ;;  %v9097_v10 = vsel %vm968_vm3, %v3213_v31, %v3217_v27 }
 0x52e   :  { %3243 = vmatpush.msra.mxu3 %v5285_v24  ;;  %2657 = vmatpush.msra.mxu1 %v2310_v55  ;;  %v9086_v19 = vpop.f32.mrf.mxu0  ;;  %v5170_v24 = vld [vmem:[%s10820_s1 + $0x4d8] sm:$0xff]  ;;  %v5616_v55 = vld [vmem:[%s10819_s0 + $0x60] sm:$0xff] }
 0x52f   :  { %3269 = vmatpush.msra.mxu0 %v5323_v29  ;;  %v9108_v29 = vsel %vm968_vm3, %v3215_v25, %v9091_v62 }
 0x530   :  { %3244 = vmatpush.msra.mxu3 %v5283_v3  ;;  %2658 = vmatpush.msra.mxu1 %v2308_v4  ;;  %v2366_v3 = vld [vmem:[%s10820_s1 + $0x1d8] sm:$0xff] }
 0x531   :  { %3270 = vmatpush.msra.mxu0 %v5321_v54  ;;  %2659 = vmatmul.f32.vlgmr.msra.gmra.mxu1 %v8436_v63  ;;  %v9064_v63 = vsel %vm968_vm3, %v3212_v13, %v3213_v31  ;;  %v5278_v54 = vld [vmem:[%s10819_s0 + $0x78] sm:$0xff]  ;;  %v5160_v31 = vld [vmem:[%s10820_s1 + $0x488] sm:$0xff] }
 0x532   :  { %3245 = vmatpush.msra.mxu3 %v5281_v26  ;;  %2853 = vmatpush.msrb.mxu1 %v5174_v9  ;;  %v9127_v16 = vrot.slane %v5278_v54, 4  ;;  %v5158_v13 = vld [vmem:[%s10820_s1 + $0x478] sm:$0xff]  ;;  %v2352_v9 = vld [vmem:[%s10820_s1 + $0x168] sm:$0xff] }
 0x533   :  { %3271 = vmatpush.msra.mxu0 %v5319_v48  ;;  %v5166_v48 = vld [vmem:[%s10820_s1 + $0x4b8] sm:$0xff] }
 0x534   :  { %3067 = vmatmul.f32.gmra.mxu0 %v8979_v59  ;;  %3246 = vmatpush.msra.mxu3 %v5279_v35  ;;  %v2362_v35 = vld [vmem:[%s10820_s1 + $0x1b8] sm:$0xff] }
 0x535   :  { %3272 = vmatpush.msra.mxu0 %v5317_v6  ;;  %3247 = vmatmul.f32.vlgmr.msra.gmra.mxu3 %v9040_v60  ;;  %v9122_v26 = vpop.f32.mrf.mxu3  ;;  %v9143_v6 = vsel %vm968_vm3, %v3217_v27, %v9127_v16  ;;  %v5152_v27 = vld [vmem:[%s10820_s1 + $0x448] sm:$0xff]  ;;  %v5242_v54 = vld [vmem:[%s10820_s1 + $0x6f8] sm:$0xff] }
 0x536   :  { %2854 = vmatpush.msrb.mxu1 %v5172_v36  ;;  %v9133_v4 = vpop.f32.mrf.mxu0  ;;  %v5154_v36 = vld [vmem:[%s10820_s1 + $0x458] sm:$0xff] }
 0x537   :  { %3273 = vmatpush.msra.mxu0 %v5315_v0  ;;  %v2360_v0 = vld [vmem:[%s10820_s1 + $0x1a8] sm:$0xff] }
 0x538   :  { %2855 = vmatpush.msrb.mxu1 %v5170_v24  ;;  %v5146_v24 = vld [vmem:[%s10820_s1 + $0x418] sm:$0xff] }
 0x539   :  { %3274 = vmatpush.msra.mxu0 %v5313_v39  ;;  %2662 = vmatmul.f32.gmra.mxu1 %v5615_v61  ;;  %v5150_v61 = vld [vmem:[%s10820_s1 + $0x438] sm:$0xff] }
 0x53a   :  { %2856 = vmatpush.msrb.mxu1 %v5168_v52  ;;  %v5144_v52 = vld [vmem:[%s10820_s1 + $0x408] sm:$0xff] }
 0x53b   :  { %3275 = vmatpush.msra.mxu0 %v5311_v21  ;;  %v2356_v21 = vld [vmem:[%s10820_s1 + $0x188] sm:$0xff] }
 0x53c   :  { %3276 = vmatmul.f32.vlgmr.msra.gmra.mxu0 %v9064_v63  ;;  %2857 = vmatpush.msrb.mxu1 %v5166_v48 }
 0x53d   :  { %3250 = vmatmul.f32.gmra.mxu3 %v9067_v40  ;;  %v9160_v39 = vpop.f32.mrf.mxu3 }
 0x53e   :  { %2858 = vmatpush.msrb.mxu1 %v5164_v5  ;;  %v9169_v25 = vpop.f32.mrf.mxu0  ;;  %v5206_v5 = vld [vmem:[%s10820_s1 + $0x5f8] sm:$0xff] }
 0x540   :  { %2859 = vmatpush.msrb.mxu1 %v5162_v30  ;;  %v5202_v30 = vld [vmem:[%s10820_s1 + $0x5d8] sm:$0xff] }
 0x541   :  { %2665 = vmatmul.f32.gmra.mxu1 %v5616_v55  ;;  %v2340_v55 = vld [vmem:[%s10820_s1 + $0x108] sm:$0xff] }
 0x542   :  { %2860 = vmatpush.msrb.mxu1 %v5160_v31  ;;  %v5234_v31 = vld [vmem:[%s10820_s1 + $0x6b8] sm:$0xff] }
 0x544   :  { %3279 = vmatmul.f32.gmra.mxu0 %v9097_v10  ;;  %2861 = vmatpush.msrb.mxu1 %v5158_v13 }
 0x545   :  { %3253 = vmatmul.f32.gmra.mxu3 %v9108_v29 }
 0x549   :  { %2668 = vmatmul.f32.gmra.mxu1 %v8578_v18  ;;  %v5156_v18 = vld [vmem:[%s10820_s1 + $0x468] sm:$0xff] }
 0x54a   :  { %2862 = vmatpush.msrb.mxu1 %v5156_v18  ;;  %v5198_v18 = vld [vmem:[%s10820_s1 + $0x5b8] sm:$0xff] }
 0x54c   :  { %3282 = vmatmul.f32.gmra.mxu0 %v9143_v6  ;;  %2863 = vmatpush.msrb.mxu1 %v5154_v36  ;;  %v5194_v36 = vld [vmem:[%s10820_s1 + $0x598] sm:$0xff] }
 0x54d   :  { %3256 = vmatmul.f32.gmra.mxu3 %v9091_v62 }
 0x54e   :  { %2864 = vmatpush.msrb.mxu1 %v5152_v27  ;;  %v5226_v27 = vld [vmem:[%s10820_s1 + $0x678] sm:$0xff] }
 0x550   :  { %2865 = vmatpush.msrb.mxu1 %v5150_v61 }
 0x554   :  { %3285 = vmatmul.f32.gmra.mxu0 %v9127_v16 }
 0x555   :  { %v9199_v1 = vpop.f32.mrf.mxu0 }
 0x55f   :  { %v2256_v28 = vpop.f32.mrf.mxu1 }
 0x560   :  { %v2257_v47 = vadd.f32 %v2256_v28, %v2238_v7  ;;  %v2354_v7 = vld [vmem:[%s10820_s1 + $0x178] sm:$0xff]  ;;  %v9191_v28 = vpop.f32.mrf.mxu3 }
 0x561   :  { %v9228_v48 = vpop.f32.mrf.mxu0 }
 0x562   :  { %v2259_v46 = vmax.f32 %v2257_v47, 0.0  ;;  %v2348_v47 = vld [vmem:[%s10820_s1 + $0x148] sm:$0xff] }
 0x564   :  { %2293 = vmatmul.f32.vlgmr.msrb.gmra.mxu2 %v2259_v46  ;;  %v5148_v46 = vld [vmem:[%s10820_s1 + $0x428] sm:$0xff] }
 0x565   :  { %2672 = vmatpush.msrb.mxu2 %v2370_v51  ;;  %v2346_v51 = vld [vmem:[%s10820_s1 + $0x138] sm:$0xff]  ;;  %2866 = vmatpush.msrb.mxu1 %v5148_v46 }
 0x566   :  { %v5190_v46 = vld [vmem:[%s10820_s1 + $0x578] sm:$0xff] }
 0x567   :  { %2673 = vmatpush.msrb.mxu2 %v2368_v22  ;;  %v2344_v22 = vld [vmem:[%s10820_s1 + $0x128] sm:$0xff]  ;;  %2867 = vmatpush.msrb.mxu1 %v5146_v24 }
 0x568   :  { %v5220_v24 = vld [vmem:[%s10820_s1 + $0x648] sm:$0xff] }
 0x569   :  { %2674 = vmatpush.msrb.mxu2 %v2366_v3  ;;  %v2342_v3 = vld [vmem:[%s10820_s1 + $0x118] sm:$0xff]  ;;  %2868 = vmatpush.msrb.mxu1 %v5144_v52  ;;  %v9258_v13 = vpop.f32.mrf.mxu0 }
 0x56a   :  { %2869 = vmatmul.f32.vlgmr.msrb.gmra.mxu1 %v8634_v32  ;;  %v5238_v32 = vld [vmem:[%s10820_s1 + $0x6d8] sm:$0xff] }
 0x56b   :  { %2675 = vmatpush.msrb.mxu2 %v2364_v17  ;;  %v5240_v17 = vld [vmem:[%s10820_s1 + $0x6e8] sm:$0xff]  ;;  %3071 = vmatpush.msra.mxu1 %v5242_v54  ;;  %v5186_v52 = vld [vmem:[%s10820_s1 + $0x558] sm:$0xff] }
 0x56c   :  { %2572 = vmatmul.f32.vlgmr.msra.gmra.mxu2 %v8311_v33  ;;  %v2358_v33 = vld [vmem:[%s10820_s1 + $0x198] sm:$0xff] }
 0x56d   :  { %2676 = vmatpush.msrb.mxu2 %v2362_v35  ;;  %v5204_v35 = vld [vmem:[%s10820_s1 + $0x5e8] sm:$0xff]  ;;  %3072 = vmatpush.msra.mxu1 %v5240_v17  ;;  %v5218_v54 = vld [vmem:[%s10820_s1 + $0x638] sm:$0xff] }
 0x56f   :  { %2677 = vmatpush.msrb.mxu2 %v2360_v0  ;;  %v5236_v0 = vld [vmem:[%s10820_s1 + $0x6c8] sm:$0xff]  ;;  %3073 = vmatpush.msra.mxu1 %v5238_v32 }
 0x570   :  { %v5618_v32 = vld [vmem:[%s10819_s0 + $0x68] sm:$0xff] }
 0x571   :  { %2678 = vmatpush.msrb.mxu2 %v2358_v33  ;;  %v5200_v33 = vld [vmem:[%s10820_s1 + $0x5c8] sm:$0xff]  ;;  %3074 = vmatpush.msra.mxu1 %v5236_v0  ;;  %v9288_v61 = vpop.f32.mrf.mxu0 }
 0x572   :  { %2872 = vmatmul.f32.gmra.mxu1 %v8689_v14  ;;  %v5230_v14 = vld [vmem:[%s10820_s1 + $0x698] sm:$0xff]  ;;  %v5180_v0 = vld [vmem:[%s10820_s1 + $0x528] sm:$0xff] }
 0x573   :  { %2679 = vmatpush.msrb.mxu2 %v2356_v21  ;;  %v5232_v21 = vld [vmem:[%s10820_s1 + $0x6a8] sm:$0xff]  ;;  %3075 = vmatpush.msra.mxu1 %v5234_v31  ;;  %v5178_v31 = vld [vmem:[%s10820_s1 + $0x518] sm:$0xff] }
 0x574   :  { %2575 = vmatmul.f32.gmra.mxu2 %v8354_v57  ;;  %v2350_v57 = vld [vmem:[%s10820_s1 + $0x158] sm:$0xff] }
 0x575   :  { %2680 = vmatpush.msrb.mxu2 %v2354_v7  ;;  %v5196_v7 = vld [vmem:[%s10820_s1 + $0x5a8] sm:$0xff]  ;;  %3076 = vmatpush.msra.mxu1 %v5232_v21  ;;  %v5310_v21 = vld [vmem:[%s10820_s1 + $0x8f8] sm:$0xff] }
 0x577   :  { %2681 = vmatpush.msrb.mxu2 %v2352_v9  ;;  %v5228_v9 = vld [vmem:[%s10820_s1 + $0x688] sm:$0xff]  ;;  %3077 = vmatpush.msra.mxu1 %v5230_v14 }
 0x578   :  { %v5308_v14 = vld [vmem:[%s10820_s1 + $0x8e8] sm:$0xff] }
 0x579   :  { %2682 = vmatpush.msrb.mxu2 %v2350_v57  ;;  %v5192_v57 = vld [vmem:[%s10820_s1 + $0x588] sm:$0xff]  ;;  %3078 = vmatpush.msra.mxu1 %v5228_v9  ;;  %v9320_v17 = vpop.f32.mrf.mxu0  ;;  %v5274_v9 = vld [vmem:[%s10820_s1 + $0x7f8] sm:$0xff] }
 0x57a   :  { %2875 = vmatmul.f32.gmra.mxu1 %v8743_v11  ;;  %v5222_v11 = vld [vmem:[%s10820_s1 + $0x658] sm:$0xff] }
 0x57b   :  { %2683 = vmatpush.msrb.mxu2 %v2348_v47  ;;  %v5224_v47 = vld [vmem:[%s10820_s1 + $0x668] sm:$0xff]  ;;  %3079 = vmatpush.msra.mxu1 %v5226_v27 }
 0x57c   :  { %2578 = vmatmul.f32.gmra.mxu2 %v8393_v58  ;;  %v9220_v58 = vpop.f32.mrf.mxu3  ;;  %v5304_v27 = vld [vmem:[%s10820_s1 + $0x8c8] sm:$0xff] }
 0x57d   :  { %2684 = vmatpush.msrb.mxu2 %v2346_v51  ;;  %v5617_v51 = vld [vmem:[%s10819_s0 + $0x58] sm:$0xff]  ;;  %3080 = vmatpush.msra.mxu1 %v5224_v47  ;;  %s4530_s0 = sshll.u32 %s10834_s15, 4  ;;  %s4531_s0 = int_to_ptr.hbm [resolvable:$true] %s4530_s0 }
 0x57e   :  { %v5302_v47 = vld [vmem:[%s10820_s1 + $0x8b8] sm:$0xff] }
 0x57f   :  { %2685 = vmatpush.msrb.mxu2 %v2344_v22  ;;  %v5188_v22 = vld [vmem:[%s10820_s1 + $0x568] sm:$0xff]  ;;  %3081 = vmatpush.msra.mxu1 %v5222_v11  ;;  %v5266_v11 = vld [vmem:[%s10820_s1 + $0x7b8] sm:$0xff] }
 0x581   :  { %2686 = vmatpush.msrb.mxu2 %v2342_v3  ;;  %3082 = vmatpush.msra.mxu1 %v5220_v24  ;;  %v5264_v24 = vld [vmem:[%s10820_s1 + $0x7a8] sm:$0xff] }
 0x582   :  { %2878 = vmatmul.f32.gmra.mxu1 %v8718_v50  ;;  %v5214_v50 = vld [vmem:[%s10820_s1 + $0x618] sm:$0xff] }
 0x583   :  { %2687 = vmatpush.msrb.mxu2 %v2340_v55  ;;  %v5184_v55 = vld [vmem:[%s10820_s1 + $0x548] sm:$0xff]  ;;  %3083 = vmatpush.msra.mxu1 %v5218_v54  ;;  %v5262_v54 = vld [vmem:[%s10820_s1 + $0x798] sm:$0xff] }
 0x584   :  { %2581 = vmatmul.f32.gmra.mxu2 %v8380_v42  ;;  %v9250_v42 = vpop.f32.mrf.mxu3 }
 0x585   :  { %2882 = vmatpush.msra.mxu2 %v5206_v5  ;;  %v5216_v5 = vld [vmem:[%s10820_s1 + $0x628] sm:$0xff] }
 0x586   :  { %3084 = vmatpush.msra.mxu1 %v5216_v5  ;;  %v5260_v5 = vld [vmem:[%s10820_s1 + $0x788] sm:$0xff] }
 0x587   :  { %2883 = vmatpush.msra.mxu2 %v5204_v35  ;;  %v5182_v35 = vld [vmem:[%s10820_s1 + $0x538] sm:$0xff] }
 0x588   :  { %3085 = vmatpush.msra.mxu1 %v5214_v50  ;;  %v5256_v50 = vld [vmem:[%s10820_s1 + $0x768] sm:$0xff] }
 0x589   :  { %2884 = vmatpush.msra.mxu2 %v5202_v30  ;;  %v5212_v30 = vld [vmem:[%s10820_s1 + $0x608] sm:$0xff] }
 0x58a   :  { %3086 = vmatpush.msra.mxu1 %v5212_v30  ;;  %v5288_v30 = vld [vmem:[%s10820_s1 + $0x848] sm:$0xff] }
 0x58b   :  { %2885 = vmatpush.msra.mxu2 %v5200_v33  ;;  %3087 = vmatmul.f32.vlgmr.msra.gmra.mxu1 %v8840_v43  ;;  %v5306_v43 = vld [vmem:[%s10820_s1 + $0x8d8] sm:$0xff] }
 0x58c   :  { %2688 = vmatmul.f32.vlgmr.msrb.gmra.mxu2 %v8476_v34  ;;  %v9280_v34 = vpop.f32.mrf.mxu3  ;;  %3289 = vmatpush.msrb.mxu1 %v5310_v21  ;;  %v5286_v21 = vld [vmem:[%s10820_s1 + $0x838] sm:$0xff] }
 0x58d   :  { %2886 = vmatpush.msra.mxu2 %v5198_v18  ;;  %v5176_v18 = vld [vmem:[%s10820_s1 + $0x508] sm:$0xff] }
 0x58e   :  { %3290 = vmatpush.msrb.mxu1 %v5308_v14 }
 0x58f   :  { %2887 = vmatpush.msra.mxu2 %v5196_v7  ;;  %v9352_v7 = vpop.f32.mrf.mxu0 }
 0x590   :  { %3291 = vmatpush.msrb.mxu1 %v5306_v43  ;;  %v5248_v43 = vld [vmem:[%s10820_s1 + $0x728] sm:$0xff] }
 0x591   :  { %2888 = vmatpush.msra.mxu2 %v5194_v36  ;;  %v5272_v36 = vld [vmem:[%s10820_s1 + $0x7e8] sm:$0xff] }
 0x592   :  { %3292 = vmatpush.msrb.mxu1 %v5304_v27  ;;  %v5280_v27 = vld [vmem:[%s10820_s1 + $0x808] sm:$0xff] }
 0x593   :  { %2889 = vmatpush.msra.mxu2 %v5192_v57  ;;  %v5270_v57 = vld [vmem:[%s10820_s1 + $0x7d8] sm:$0xff]  ;;  %3090 = vmatmul.f32.gmra.mxu1 %v8878_v15 }
 0x594   :  { %2691 = vmatmul.f32.gmra.mxu2 %v5617_v51  ;;  %v9312_v3 = vpop.f32.mrf.mxu3  ;;  %3293 = vmatpush.msrb.mxu1 %v5302_v47  ;;  %v5298_v15 = vld [vmem:[%s10820_s1 + $0x898] sm:$0xff]  ;;  %v3391_v47 = vld [vmem:[%s10822_s3 + $0x70] sm:$0xff] }
 0x595   :  { %2890 = vmatpush.msra.mxu2 %v5190_v46  ;;  %v5268_v46 = vld [vmem:[%s10820_s1 + $0x7c8] sm:$0xff] }
 0x597   :  { %2891 = vmatpush.msra.mxu2 %v5188_v22  ;;  %v9382_v51 = vpop.f32.mrf.mxu0  ;;  %v5300_v22 = vld [vmem:[%s10820_s1 + $0x8a8] sm:$0xff] }
 0x598   :  { %3294 = vmatpush.msrb.mxu1 %v5300_v22  ;;  %v5362_v22 = vld [vmem:[%s10822_s3 + $0x158] sm:$0xff] }
 0x599   :  { %2892 = vmatpush.msra.mxu2 %v5186_v52  ;;  %v5296_v52 = vld [vmem:[%s10820_s1 + $0x888] sm:$0xff] }
 0x59a   :  { %3295 = vmatpush.msrb.mxu1 %v5298_v15  ;;  %v5361_v15 = vld [vmem:[%s10822_s3 + $0x150] sm:$0xff] }
 0x59b   :  { %2893 = vmatpush.msra.mxu2 %v5184_v55  ;;  %v5294_v55 = vld [vmem:[%s10820_s1 + $0x878] sm:$0xff]  ;;  %3093 = vmatmul.f32.gmra.mxu1 %v8937_v38 }
 0x59c   :  { %2694 = vmatmul.f32.gmra.mxu2 %v5618_v32  ;;  %v9344_v33 = vpop.f32.mrf.mxu3  ;;  %3296 = vmatpush.msrb.mxu1 %v5296_v52  ;;  %v5292_v32 = vld [vmem:[%s10820_s1 + $0x868] sm:$0xff]  ;;  %v5290_v38 = vld [vmem:[%s10820_s1 + $0x858] sm:$0xff] }
 0x59d   :  { %2894 = vmatpush.msra.mxu2 %v5182_v35  ;;  %v5342_v52 = vld [vmem:[%s10820_s1 + $0x9f8] sm:$0xff] }
 0x59e   :  { %3297 = vmatpush.msrb.mxu1 %v5294_v55  ;;  %v5360_v55 = vld [vmem:[%s10822_s3 + $0x148] sm:$0xff] }
 0x59f   :  { %2895 = vmatpush.msra.mxu2 %v5180_v0  ;;  %v9412_v35 = vpop.f32.mrf.mxu0  ;;  %v5258_v0 = vld [vmem:[%s10820_s1 + $0x778] sm:$0xff] }
 0x5a0   :  { %3298 = vmatpush.msrb.mxu1 %v5292_v32  ;;  %v5359_v32 = vld [vmem:[%s10822_s3 + $0x140] sm:$0xff] }
 0x5a1   :  { %2896 = vmatpush.msra.mxu2 %v5178_v31  ;;  %v5254_v31 = vld [vmem:[%s10820_s1 + $0x758] sm:$0xff] }
 0x5a2   :  { %3299 = vmatpush.msrb.mxu1 %v5290_v38  ;;  %v3388_v38 = vld [vmem:[%s10822_s3 + $0x58] sm:$0xff] }
 0x5a3   :  { %2897 = vmatpush.msra.mxu2 %v5176_v18  ;;  %v5252_v18 = vld [vmem:[%s10820_s1 + $0x748] sm:$0xff]  ;;  %3096 = vmatmul.f32.gmra.mxu1 %v8929_v8  ;;  %v5282_v8 = vld [vmem:[%s10820_s1 + $0x818] sm:$0xff] }
 0x5a4   :  { %2697 = vmatmul.f32.gmra.mxu2 %v8625_v49  ;;  %v9374_v49 = vpop.f32.mrf.mxu3  ;;  %3300 = vmatpush.msrb.mxu1 %v5288_v30  ;;  %v5358_v30 = vld [vmem:[%s10822_s3 + $0x138] sm:$0xff] }
 0x5a5   :  { %3100 = vmatpush.msrb.mxu2 %v5274_v9  ;;  %v5284_v9 = vld [vmem:[%s10820_s1 + $0x828] sm:$0xff] }
 0x5a6   :  { %3301 = vmatpush.msrb.mxu1 %v5286_v21 }
 0x5a7   :  { %3101 = vmatpush.msrb.mxu2 %v5272_v36  ;;  %v9442_v14 = vpop.f32.mrf.mxu0  ;;  %v5250_v36 = vld [vmem:[%s10820_s1 + $0x738] sm:$0xff] }
 0x5a8   :  { %3302 = vmatpush.msrb.mxu1 %v5284_v9  ;;  %v3387_v9 = vld [vmem:[%s10822_s3 + $0x50] sm:$0xff] }
 0x5a9   :  { %3102 = vmatpush.msrb.mxu2 %v5270_v57  ;;  %v3392_v57 = vld [vmem:[%s10822_s3 + $0x78] sm:$0xff] }
 0x5aa   :  { %3303 = vmatpush.msrb.mxu1 %v5282_v8  ;;  %3417 = vmatpush.msrb.mxu3 %v3392_v57  ;;  %v5355_v57 = vld [vmem:[%s10822_s3 + $0x120] sm:$0xff] }
 0x5ab   :  { %3103 = vmatpush.msrb.mxu2 %v5268_v46 }
 0x5ac   :  { %2898 = vmatmul.f32.vlgmr.msra.gmra.mxu2 %v8680_v41  ;;  %v9404_v41 = vpop.f32.mrf.mxu3  ;;  %3304 = vmatpush.msrb.mxu1 %v5280_v27  ;;  %v3385_v27 = vld [vmem:[%s10822_s3 + $0x40] sm:$0xff] }
 0x5ad   :  { %3104 = vmatpush.msrb.mxu2 %v5266_v11  ;;  %v5244_v11 = vld [vmem:[%s10820_s1 + $0x708] sm:$0xff]  ;;  %3418 = vmatpush.msrb.mxu3 %v3391_v47  ;;  %v5354_v47 = vld [vmem:[%s10822_s3 + $0x118] sm:$0xff] }
 0x5ae   :  { %3305 = vmatmul.f32.vlgmr.msrb.gmra.mxu1 %v9040_v60  ;;  %v3390_v60 = vld [vmem:[%s10822_s3 + $0x68] sm:$0xff] }
 0x5af   :  { %3105 = vmatpush.msrb.mxu2 %v5264_v24  ;;  %v9478_v24 = vpop.f32.mrf.mxu0  ;;  %3503 = vmatpush.msra.mxu1 %v5362_v22  ;;  %v2519_v22 = vadd.f32 %v9086_v19, %v9084_v45  ;;  %v3383_v45 = vld [vmem:[%s10822_s3 + $0x30] sm:$0xff] }
 0x5b0   :  { %3419 = vmatpush.msrb.mxu3 %v3390_v60  ;;  %v5353_v19 = vld [vmem:[%s10822_s3 + $0x110] sm:$0xff] }
 0x5b1   :  { %3106 = vmatpush.msrb.mxu2 %v5262_v54  ;;  %v5340_v54 = vld [vmem:[%s10820_s1 + $0x9e8] sm:$0xff]  ;;  %3504 = vmatpush.msra.mxu1 %v5361_v15  ;;  %v2842_v15 = vadd.f32 %v9320_v17, %v9312_v3  ;;  %v2606_v17 = vadd.f32 %v9220_v58, %v2519_v22  ;;  %v5351_v58 = vld [vmem:[%s10822_s3 + $0x100] sm:$0xff] }
 0x5b2   :  { %v5352_v3 = vld [vmem:[%s10822_s3 + $0x108] sm:$0xff] }
 0x5b3   :  { %3107 = vmatpush.msrb.mxu2 %v5260_v5  ;;  %v5338_v5 = vld [vmem:[%s10820_s1 + $0x9d8] sm:$0xff]  ;;  %3505 = vmatpush.msra.mxu1 %v5360_v55 }
 0x5b4   :  { %2901 = vmatmul.f32.gmra.mxu2 %v8733_v23  ;;  %v9434_v23 = vpop.f32.mrf.mxu3 }
 0x5b5   :  { %3108 = vmatpush.msrb.mxu2 %v5258_v0  ;;  %v5336_v0 = vld [vmem:[%s10820_s1 + $0x9c8] sm:$0xff]  ;;  %3506 = vmatpush.msra.mxu1 %v5359_v32  ;;  %v3381_v32 = vld [vmem:[%s10822_s3 + $0x20] sm:$0xff] }
 0x5b6   :  { %3308 = vmatmul.f32.gmra.mxu1 %v9067_v40  ;;  %v3386_v40 = vld [vmem:[%s10822_s3 + $0x48] sm:$0xff] }
 0x5b7   :  { %3109 = vmatpush.msrb.mxu2 %v5256_v50  ;;  %v9519_v21 = vpop.f32.mrf.mxu0  ;;  %3507 = vmatpush.msra.mxu1 %v5358_v30  ;;  %v2635_v30 = vadd.f32 %v9228_v48, %v2606_v17  ;;  %v3379_v48 = vld [vmem:[%s10822_s3 + $0x10] sm:$0xff] }
 0x5b9   :  { %3110 = vmatpush.msrb.mxu2 %v5254_v31  ;;  %v2516_v31 = vadd.f32 %v9057_v20, %v9052_v12  ;;  %v9531_v12 = vpop.f32.mrf.mxu1  ;;  %v5332_v20 = vld [vmem:[%s10820_s1 + $0x9a8] sm:$0xff] }
 0x5bb   :  { %3111 = vmatpush.msrb.mxu2 %v5252_v18  ;;  %v5334_v18 = vld [vmem:[%s10820_s1 + $0x9b8] sm:$0xff]  ;;  %v2603_v8 = vadd.f32 %v9191_v28, %v2516_v31  ;;  %v5328_v28 = vld [vmem:[%s10820_s1 + $0x988] sm:$0xff]  ;;  %v2845_v31 = vadd.f32 %v9352_v7, %v9344_v33  ;;  %v5349_v33 = vld [vmem:[%s10822_s3 + $0xf0] sm:$0xff] }
 0x5bc   :  { %2904 = vmatmul.f32.gmra.mxu2 %v8791_v56  ;;  %v5246_v56 = vld [vmem:[%s10820_s1 + $0x718] sm:$0xff]  ;;  %v9470_v46 = vpop.f32.mrf.mxu3 }
 0x5bd   :  { %3112 = vmatpush.msrb.mxu2 %v5250_v36  ;;  %v5357_v36 = vld [vmem:[%s10822_s3 + $0x130] sm:$0xff] }
 0x5be   :  { %3508 = vmatpush.msra.mxu1 %v5357_v36  ;;  %v5318_v36 = vld [vmem:[%s10820_s1 + $0x938] sm:$0xff] }
 0x5bf   :  { %3113 = vmatpush.msrb.mxu2 %v5248_v43  ;;  %v5356_v43 = vld [vmem:[%s10822_s3 + $0x128] sm:$0xff]  ;;  %v9572_v60 = vpop.f32.mrf.mxu0  ;;  %3311 = vmatmul.f32.gmra.mxu1 %v9108_v29 }
 0x5c0   :  { %3509 = vmatpush.msra.mxu1 %v5356_v43  ;;  %v3382_v29 = vld [vmem:[%s10822_s3 + $0x28] sm:$0xff] }
 0x5c1   :  { %3114 = vmatpush.msrb.mxu2 %v5246_v56  ;;  %v3384_v56 = vld [vmem:[%s10822_s3 + $0x38] sm:$0xff]  ;;  %v5348_v43 = vld [vmem:[%s10822_s3 + $0xe8] sm:$0xff] }
 0x5c2   :  { %3510 = vmatpush.msra.mxu1 %v5355_v57  ;;  %v5314_v57 = vld [vmem:[%s10820_s1 + $0x918] sm:$0xff] }
 0x5c3   :  { %3115 = vmatpush.msrb.mxu2 %v5244_v11  ;;  %v2632_v11 = vadd.f32 %v9199_v1, %v2603_v8  ;;  %v5324_v1 = vld [vmem:[%s10820_s1 + $0x968] sm:$0xff]  ;;  %v2913_v8 = vadd.f32 %v2845_v31, %v2635_v30 }
 0x5c4   :  { %2907 = vmatmul.f32.gmra.mxu2 %v8766_v53  ;;  %v3389_v53 = vld [vmem:[%s10822_s3 + $0x60] sm:$0xff]  ;;  %v9509_v50 = vpop.f32.mrf.mxu3  ;;  %3511 = vmatpush.msra.mxu1 %v5354_v47 }
 0x5c5   :  { %3318 = vmatpush.msra.mxu2 %v5342_v52  ;;  %3420 = vmatpush.msrb.mxu3 %v3389_v53  ;;  %v2911_v55 = vadd.f32 %v2842_v15, %v2632_v11  ;;  %v5322_v53 = vld [vmem:[%s10820_s1 + $0x958] sm:$0xff]  ;;  %v2525_v11 = vadd.f32 %v9169_v25, %v9160_v39 }
 0x5c6   :  { %3512 = vmatpush.msra.mxu1 %v5353_v19 }
 0x5c7   :  { %3319 = vmatpush.msra.mxu2 %v5340_v54  ;;  %3421 = vmatpush.msrb.mxu3 %v3388_v38  ;;  %v5326_v54 = vld [vmem:[%s10820_s1 + $0x978] sm:$0xff]  ;;  %v2612_v39 = vadd.f32 %v9280_v34, %v2525_v11  ;;  %v3401_v11 = vld [vmem:[%s10822_s3 + $0xc0] sm:$0xff] }
 0x5c8   :  { %3513 = vmatpush.msra.mxu1 %v5352_v3  ;;  %v5350_v38 = vld [vmem:[%s10822_s3 + $0xf8] sm:$0xff] }
 0x5c9   :  { %3320 = vmatpush.msra.mxu2 %v5338_v5  ;;  %3422 = vmatpush.msrb.mxu3 %v3387_v9  ;;  %v3060_v5 = vadd.f32 %v9442_v14, %v9434_v23  ;;  %v5320_v23 = vld [vmem:[%s10820_s1 + $0x948] sm:$0xff]  ;;  %v9611_v14 = vld [vmem:[%s10821_s2] sm:$0x3]  ;;  %v2522_v9 = vadd.f32 %v9133_v4, %v9122_v26 }
 0x5ca   :  { %3514 = vmatpush.msra.mxu1 %v5351_v58  ;;  %v9635_v26 = vperm.slane %v9611_v14, 0  ;;  %v3378_v4 = vld [vmem:[%s10822_s3 + $0x8] sm:$0xff] }
 0x5cb   :  { %3321 = vmatpush.msra.mxu2 %v5336_v0  ;;  %3423 = vmatpush.msrb.mxu3 %v3386_v40  ;;  %v3380_v0 = vld [vmem:[%s10822_s3 + $0x18] sm:$0xff]  ;;  %v3277_v40 = vpop.f32.mrf.mxu0 }
 0x5cc   :  { %3116 = vmatmul.f32.vlgmr.msrb.gmra.mxu2 %v8869_v37  ;;  %v5330_v37 = vld [vmem:[%s10820_s1 + $0x998] sm:$0xff]  ;;  %v9567_v52 = vpop.f32.mrf.mxu3  ;;  %3314 = vmatmul.f32.gmra.mxu1 %v9091_v62  ;;  %v5316_v62 = vld [vmem:[%s10820_s1 + $0x928] sm:$0xff] }
 0x5cd   :  { %3322 = vmatpush.msra.mxu2 %v5334_v18  ;;  %3424 = vmatpush.msrb.mxu3 %v3385_v27  ;;  %v3129_v18 = vadd.f32 %v3060_v5, %v2911_v55 }
 0x5ce   :  { %3515 = vmatpush.msra.mxu1 %v5350_v38 }
 0x5cf   :  { %3323 = vmatpush.msra.mxu2 %v5332_v20  ;;  %3425 = vmatpush.msrb.mxu3 %v3384_v56  ;;  %v5347_v56 = vld [vmem:[%s10822_s3 + $0xe0] sm:$0xff] }
 0x5d0   :  { %3516 = vmatpush.msra.mxu1 %v5349_v33 }
 0x5d1   :  { %3324 = vmatpush.msra.mxu2 %v5330_v37  ;;  %3426 = vmatpush.msrb.mxu3 %v3383_v45  ;;  %v3063_v37 = vadd.f32 %v9478_v24, %v9470_v46 }
 0x5d2   :  { %3517 = vmatpush.msra.mxu1 %v5348_v43 }
 0x5d3   :  { %3325 = vmatpush.msra.mxu2 %v5328_v28  ;;  %3427 = vmatpush.msrb.mxu3 %v3382_v29  ;;  %v3377_v28 = vld [vmem:[%s10822_s3] sm:$0xff]  ;;  %v3131_v24 = vadd.f32 %v3063_v37, %v2913_v8  ;;  %v3280_v19 = vpop.f32.mrf.mxu0 }
 0x5d4   :  { %3119 = vmatmul.f32.gmra.mxu2 %v8915_v44  ;;  %v9594_v44 = vpop.f32.mrf.mxu1  ;;  %v3248_v20 = vpop.f32.mrf.mxu3  ;;  %3518 = vmatpush.msra.mxu1 %v5347_v56  ;;  %v2276_v29 = vld [vmem:[%s10833_s14] sm:$0x1] }
 0x5d5   :  { %3326 = vmatpush.msra.mxu2 %v5326_v54  ;;  %3428 = vmatpush.msrb.mxu3 %v3381_v32  ;;  %v3278_v7 = vadd.f32 %v3277_v40, %v3248_v20  ;;  %v2848_v54 = vadd.f32 %v9382_v51, %v9374_v49 }
 0x5d7   :  { %3327 = vmatpush.msra.mxu2 %v5324_v1  ;;  %3429 = vmatpush.msrb.mxu3 %v3380_v0  ;;  %v3347_v27 = vadd.f32 %v3278_v7, %v3129_v18 }
 0x5d9   :  { %3328 = vmatpush.msra.mxu2 %v5322_v53  ;;  %3430 = vmatpush.msrb.mxu3 %v3379_v48  ;;  %v3361_v46 = vadd.f32 %v9635_v26, %v3347_v27  ;;  %v2851_v53 = vadd.f32 %v9412_v35, %v9404_v41 }
 0x5db   :  { %3329 = vmatpush.msra.mxu2 %v5320_v23  ;;  %3431 = vmatpush.msrb.mxu3 %v3378_v4  ;;  %v3369_v22 = vmax.f32 %v3361_v46, 0.0  ;;  %v3283_v58 = vpop.f32.mrf.mxu0  ;;  %v3069_v23 = vadd.f32 %v9572_v60, %v9567_v52  ;;  %v3403_v46 = vld [vmem:[%s10822_s3 + $0xd0] sm:$0xff] }
 0x5dc   :  { %3122 = vmatmul.f32.gmra.mxu2 %v8992_v2  ;;  %v2609_v2 = vadd.f32 %v9250_v42, %v2522_v9  ;;  %v9659_v47 = vpop.f32.mrf.mxu1  ;;  %v5312_v42 = vld [vmem:[%s10820_s1 + $0x908] sm:$0xff]  ;;  %v3251_v45 = vpop.f32.mrf.mxu3 }
 0x5dd   :  { %3330 = vmatpush.msra.mxu2 %v5318_v36  ;;  %3432 = vmatpush.msrb.mxu3 %v3377_v28  ;;  %v3281_v1 = vadd.f32 %v3280_v19, %v3251_v45  ;;  %v5374_v28 = vld [vmem:[%s10822_s3 + $0x1b8] sm:$0xff] }
 0x5de   :  { %v2638_v15 = vadd.f32 %v9258_v13, %v2609_v2  ;;  %3433 = vmatmul.f32.vlgmr.msrb.gmra.mxu3 %v3369_v22  ;;  %3519 = vmatmul.f32.vlgmr.msra.gmra.mxu1 %v3369_v22  ;;  %v3066_v13 = vadd.f32 %v9519_v21, %v9509_v50  ;;  %v5372_v22 = vld [vmem:[%s10822_s3 + $0x1a8] sm:$0xff]  ;;  %v3400_v45 = vld [vmem:[%s10822_s3 + $0xb8] sm:$0xff] }
 0x5df   :  { %3331 = vmatpush.msra.mxu2 %v5316_v62  ;;  %v3349_v3 = vadd.f32 %v3281_v1, %v3131_v24  ;;  %v3402_v24 = vld [vmem:[%s10822_s3 + $0xc8] sm:$0xff]  ;;  %v5370_v19 = vld [vmem:[%s10822_s3 + $0x198] sm:$0xff]  ;;  %v3399_v1 = vld [vmem:[%s10822_s3 + $0xb0] sm:$0xff] }
 0x5e0   :  { %v2915_v25 = vadd.f32 %v2848_v54, %v2638_v15  ;;  %v5371_v15 = vld [vmem:[%s10822_s3 + $0x1a0] sm:$0xff] }
 0x5e1   :  { %3332 = vmatpush.msra.mxu2 %v5314_v57  ;;  %v3363_v51 = vadd.f32 %v9635_v26, %v3349_v3  ;;  %v3404_v57 = vld [vmem:[%s10822_s3 + $0xd8] sm:$0xff]  ;;  %v3398_v3 = vld [vmem:[%s10822_s3 + $0xa8] sm:$0xff] }
 0x5e2   :  { %v3133_v32 = vadd.f32 %v3066_v13, %v2915_v25  ;;  %3450 = vmatpush.msrb.mxu0 %v3404_v57  ;;  %v5368_v25 = vld [vmem:[%s10822_s3 + $0x188] sm:$0xff]  ;;  %v3397_v13 = vld [vmem:[%s10822_s3 + $0xa0] sm:$0xff] }
 0x5e3   :  { %3333 = vmatpush.msra.mxu2 %v5312_v42  ;;  %v3371_v5 = vmax.f32 %v3363_v51, 0.0  ;;  %v3286_v41 = vpop.f32.mrf.mxu0  ;;  %v5373_v42 = vld [vmem:[%s10822_s3 + $0x1b0] sm:$0xff] }
 0x5e4   :  { %3125 = vmatmul.f32.gmra.mxu2 %v8979_v59  ;;  %v9678_v55 = vpop.f32.mrf.mxu1  ;;  %v2641_v59 = vadd.f32 %v9288_v61, %v2612_v39  ;;  %v3254_v34 = vpop.f32.mrf.mxu3  ;;  %3451 = vmatpush.msrb.mxu0 %v3403_v46 }
 0x5e5   :  { %v3284_v50 = vadd.f32 %v3283_v58, %v3254_v34  ;;  %3536 = vmatpush.msrb.mxu2 %v5374_v28  ;;  %v5364_v58 = vld [vmem:[%s10822_s3 + $0x168] sm:$0xff] }
 0x5e6   :  { %3436 = vmatmul.f32.gmra.mxu3 %v3371_v5  ;;  %3522 = vmatmul.f32.gmra.mxu1 %v3371_v5  ;;  %v2917_v21 = vadd.f32 %v2851_v53, %v2641_v59  ;;  %v5366_v5 = vld [vmem:[%s10822_s3 + $0x178] sm:$0xff]  ;;  %v3395_v59 = vld [vmem:[%s10822_s3 + $0x90] sm:$0xff] }
 0x5e7   :  { %v2294_v49 = vpop.f32.mrf.mxu2  ;;  %v3351_v0 = vadd.f32 %v3284_v50, %v3133_v32  ;;  %3537 = vmatpush.msrb.mxu2 %v5373_v42  ;;  %3452 = vmatpush.msrb.mxu0 %v3402_v24  ;;  %v5365_v53 = vld [vmem:[%s10822_s3 + $0x170] sm:$0xff]  ;;  %v3394_v32 = vld [vmem:[%s10822_s3 + $0x88] sm:$0xff]  ;;  %v3393_v50 = vld [vmem:[%s10822_s3 + $0x80] sm:$0xff]  ;;  %v3358_v24 = vperm.slane %v9611_v14, 1 }
 0x5e8   :  { %v2295_v17 = vadd.f32 %v2294_v49, %v2276_v29  ;;  %v3135_v30 = vadd.f32 %v3069_v23, %v2917_v21  ;;  %v5369_v29 = vld [vmem:[%s10822_s3 + $0x190] sm:$0xff]  ;;  %v5367_v49 = vld [vmem:[%s10822_s3 + $0x180] sm:$0xff] }
 0x5e9   :  { %v3365_v61 = vadd.f32 %v9635_v26, %v3351_v0  ;;  %3538 = vmatpush.msrb.mxu2 %v5372_v22  ;;  %3453 = vmatpush.msrb.mxu0 %v3401_v11  ;;  %v5363_v21 = vld [vmem:[%s10822_s3 + $0x160] sm:$0xff] }
 0x5ea   :  { %2297 = vst [vmem:[#allocation4] sm:$0x1] %v2295_v17  ;;  %v3396_v17 = vld [vmem:[%s10822_s3 + $0x98] sm:$0xff]  ;;  %s4528_s3 = sshll.u32 %s5645_s26, 4  ;;  %s4529_s3 = int_to_ptr.vmem [resolvable:$true] %s4528_s3 }
 0x5eb   :  { %v3373_v35 = vmax.f32 %v3365_v61, 0.0  ;;  %3539 = vmatpush.msrb.mxu2 %v5371_v15  ;;  %3454 = vmatpush.msrb.mxu0 %v3400_v45 }
 0x5ec   :  { %3334 = vmatmul.f32.vlgmr.msra.gmra.mxu2 %v9064_v63  ;;  %v9689_v31 = vpop.f32.mrf.mxu1  ;;  %v3257_v18 = vpop.f32.mrf.mxu3 }
 0x5ed   :  { %v3287_v63 = vadd.f32 %v3286_v41, %v3257_v18  ;;  %3540 = vmatpush.msrb.mxu2 %v5370_v19  ;;  %3455 = vmatpush.msrb.mxu0 %v3399_v1 }
 0x5ee   :  { %3439 = vmatmul.f32.gmra.mxu3 %v3373_v35  ;;  %3525 = vmatmul.f32.gmra.mxu1 %v3373_v35 }
 0x5ef   :  { %v9686_v38 = vpop.f32.mrf.mxu2  ;;  %v3353_v9 = vadd.f32 %v3287_v63, %v3135_v30  ;;  %3541 = vmatpush.msrb.mxu2 %v5369_v29  ;;  %3456 = vmatpush.msrb.mxu0 %v3398_v3 }
 0x5f0   :  { %v2574_v30 = vadd.f32 %v9686_v38, %v9531_v12 }
 0x5f1   :  { %v3367_v52 = vadd.f32 %v9635_v26, %v3353_v9  ;;  %3542 = vmatpush.msrb.mxu2 %v5368_v25  ;;  %3457 = vmatpush.msrb.mxu0 %v3397_v13 }
 0x5f2   :  { %v2661_v18 = vadd.f32 %v9689_v31, %v2574_v30 }
 0x5f3   :  { %v3375_v60 = vmax.f32 %v3367_v52, 0.0  ;;  %3543 = vmatpush.msrb.mxu2 %v5367_v49  ;;  %3458 = vmatpush.msrb.mxu0 %v3396_v17 }
 0x5f4   :  { %3337 = vmatmul.f32.gmra.mxu2 %v9097_v10  ;;  %v9696_v20 = vpop.f32.mrf.mxu1 }
 0x5f5   :  { %3544 = vmatpush.msrb.mxu2 %v5366_v5  ;;  %3459 = vmatpush.msrb.mxu0 %v3395_v59 }
 0x5f6   :  { %3442 = vmatmul.f32.gmra.mxu3 %v3375_v60  ;;  %3528 = vmatmul.f32.gmra.mxu1 %v3375_v60 }
 0x5f7   :  { %v9692_v36 = vpop.f32.mrf.mxu2  ;;  %3545 = vmatpush.msrb.mxu2 %v5365_v53  ;;  %3460 = vmatpush.msrb.mxu0 %v3394_v32 }
 0x5f8   :  { %v2577_v60 = vadd.f32 %v9692_v36, %v9594_v44 }
 0x5f9   :  { %3546 = vmatpush.msrb.mxu2 %v5364_v58  ;;  %3461 = vmatpush.msrb.mxu0 %v3393_v50 }
 0x5fa   :  { %v2664_v12 = vadd.f32 %v9696_v20, %v2577_v60 }
 0x5fb   :  { %3547 = vmatpush.msrb.mxu2 %v5363_v21 }
 0x5fc   :  { %3340 = vmatmul.f32.gmra.mxu2 %v9143_v6  ;;  %v9701_v10 = vpop.f32.mrf.mxu1 }
 0x5ff   :  { %v9698_v40 = vpop.f32.mrf.mxu2 }
 0x600   :  { %v2580_v44 = vadd.f32 %v9698_v40, %v9659_v47 }
 0x602   :  { %v2667_v14 = vadd.f32 %v9701_v10, %v2580_v44  ;;  %v3667_v44 = vld [vmem:[%s10824_s5 + $0xf0] sm:$0xff] }
 0x603   :  { %3749 = vmatpush.msra.mxu2 %v3667_v44  ;;  %v5447_v44 = vld [vmem:[%s10824_s5 + $0x2e0] sm:$0xff] }
 0x604   :  { %3343 = vmatmul.f32.gmra.mxu2 %v9127_v16  ;;  %v9707_v7 = vpop.f32.mrf.mxu1 }
 0x607   :  { %v9703_v48 = vpop.f32.mrf.mxu2 }
 0x608   :  { %v2583_v40 = vadd.f32 %v9703_v48, %v9678_v55 }
 0x60a   :  { %v2670_v10 = vadd.f32 %v9707_v7, %v2583_v40  ;;  %v5408_v40 = vld [vmem:[%s10824_s5 + $0x1a8] sm:$0xff] }
 0x60c   :  { %v9711_v62 = vpop.f32.mrf.mxu1 }
 0x60f   :  { %v9705_v33 = vpop.f32.mrf.mxu2 }
 0x610   :  { %v2690_v9 = vadd.f32 %v9705_v33, %v2661_v18 }
 0x614   :  { %v9715_v4 = vpop.f32.mrf.mxu1 }
 0x617   :  { %v9709_v26 = vpop.f32.mrf.mxu2 }
 0x61c   :  { %v9719_v8 = vpop.f32.mrf.mxu1 }
 0x61f   :  { %v9713_v6 = vpop.f32.mrf.mxu2 }
 0x624   :  { %v9723_v37 = vpop.f32.mrf.mxu1 }
 0x627   :  { %v9717_v43 = vpop.f32.mrf.mxu2 }
 0x62c   :  { %v3088_v56 = vpop.f32.mrf.mxu1 }
 0x62f   :  { %v9721_v16 = vpop.f32.mrf.mxu2 }
 0x630   :  { %v2900_v63 = vadd.f32 %v9721_v16, %v9711_v62  ;;  %v2693_v62 = vadd.f32 %v9709_v26, %v2664_v12  ;;  %v5418_v12 = vld [vmem:[%s10824_s5 + $0x1f8] sm:$0xff] }
 0x631   :  { %3726 = vmatpush.msrb.mxu1 %v5418_v12  ;;  %v5388_v12 = vld [vmem:[%s10824_s5 + $0x108] sm:$0xff] }
 0x632   :  { %v2912_v57 = vadd.f32 %v2900_v63, %v2690_v9 }
 0x634   :  { %v3091_v39 = vpop.f32.mrf.mxu1 }
 0x637   :  { %v9725_v27 = vpop.f32.mrf.mxu2 }
 0x638   :  { %v2903_v38 = vadd.f32 %v9725_v27, %v9715_v4  ;;  %v2696_v4 = vadd.f32 %v9713_v6, %v2667_v14 }
 0x63a   :  { %v2914_v36 = vadd.f32 %v2903_v38, %v2693_v62  ;;  %v5415_v38 = vld [vmem:[%s10824_s5 + $0x1e0] sm:$0xff] }
 0x63c   :  { %v3094_v34 = vpop.f32.mrf.mxu1 }
 0x63f   :  { %v9727_v2 = vpop.f32.mrf.mxu2 }
 0x640   :  { %v2906_v20 = vadd.f32 %v9727_v2, %v9719_v8  ;;  %v2699_v2 = vadd.f32 %v9717_v43, %v2670_v10  ;;  %v3566_v10 = vld [vmem:[%s10823_s4 + $0x8] sm:$0x3f] }
 0x642   :  { %v2916_v1 = vadd.f32 %v2906_v20, %v2696_v4  ;;  %v3565_v20 = vld [vmem:[%s10823_s4] sm:$0xff]  ;;  %v5409_v4 = vld [vmem:[%s10824_s5 + $0x1b0] sm:$0xff] }
 0x644   :  { %v3097_v0 = vpop.f32.mrf.mxu1 }
 0x647   :  { %v9753_v54 = vpop.f32.mrf.mxu2 }
 0x648   :  { %v2909_v6 = vadd.f32 %v9753_v54, %v9723_v37 }
 0x64a   :  { %v2918_v55 = vadd.f32 %v2909_v6, %v2699_v2  ;;  %v5404_v6 = vld [vmem:[%s10824_s5 + $0x188] sm:$0xff]  ;;  %v5401_v2 = vld [vmem:[%s10824_s5 + $0x170] sm:$0xff] }
 0x64c   :  { %v3306_v35 = vpop.f32.mrf.mxu1 }
 0x64f   :  { %v3117_v51 = vpop.f32.mrf.mxu2 }
 0x650   :  { %v3118_v52 = vadd.f32 %v3117_v51, %v3088_v56 }
 0x652   :  { %v3130_v46 = vadd.f32 %v3118_v52, %v2912_v57 }
 0x654   :  { %v3309_v22 = vpop.f32.mrf.mxu1 }
 0x657   :  { %v3120_v23 = vpop.f32.mrf.mxu2 }
 0x658   :  { %v3121_v33 = vadd.f32 %v3120_v23, %v3091_v39 }
 0x65a   :  { %v3132_v15 = vadd.f32 %v3121_v33, %v2914_v36  ;;  %v5416_v33 = vld [vmem:[%s10824_s5 + $0x1e8] sm:$0xff] }
 0x65b   :  { %3727 = vmatpush.msrb.mxu1 %v5416_v33  ;;  %v3641_v33 = vld [vmem:[%s10824_s5 + $0x20] sm:$0xff] }
 0x65c   :  { %v3312_v47 = vpop.f32.mrf.mxu1 }
 0x65f   :  { %v3123_v61 = vpop.f32.mrf.mxu2 }
 0x660   :  { %v3124_v27 = vadd.f32 %v3123_v61, %v3094_v34 }
 0x661   :  { %v3434_v37 = vpop.f32.mrf.mxu3 }
 0x662   :  { %v3134_v39 = vadd.f32 %v3124_v27, %v2916_v1  ;;  %v5410_v27 = vld [vmem:[%s10824_s5 + $0x1b8] sm:$0xff]  ;;  %v3661_v1 = vld [vmem:[%s10824_s5 + $0xc0] sm:$0xff] }
 0x664   :  { %v3315_v51 = vpop.f32.mrf.mxu1 }
 0x667   :  { %v3126_v41 = vpop.f32.mrf.mxu2 }
 0x668   :  { %v3127_v13 = vadd.f32 %v3126_v41, %v3097_v0 }
 0x669   :  { %v3437_v21 = vpop.f32.mrf.mxu3 }
 0x66a   :  { %v3136_v5 = vadd.f32 %v3127_v13, %v2918_v55  ;;  %v5402_v13 = vld [vmem:[%s10824_s5 + $0x178] sm:$0xff]  ;;  %v3666_v55 = vld [vmem:[%s10824_s5 + $0xe8] sm:$0xff] }
 0x66c   :  { %v3520_v43 = vpop.f32.mrf.mxu1 }
 0x66f   :  { %v3335_v28 = vpop.f32.mrf.mxu2 }
 0x670   :  { %v3336_v42 = vadd.f32 %v3335_v28, %v3306_v35 }
 0x671   :  { %v3440_v30 = vpop.f32.mrf.mxu3 }
 0x672   :  { %v3348_v31 = vadd.f32 %v3336_v42, %v3130_v46 }
 0x674   :  { %v3362_v16 = vadd.f32 %v3358_v24, %v3348_v31  ;;  %v3523_v50 = vpop.f32.mrf.mxu1 }
 0x676   :  { %v3370_v56 = vmax.f32 %v3362_v16, 0.0  ;;  %v5413_v16 = vld [vmem:[%s10824_s5 + $0x1d0] sm:$0xff] }
 0x677   :  { %v3338_v11 = vpop.f32.mrf.mxu2 }
 0x678   :  { %v3339_v45 = vadd.f32 %v3338_v11, %v3309_v22  ;;  %5343 = vmatmul.msk.f32.vlgmr.msrb.gmra.mxu0 %vm1165_vm4, %v3370_v56  ;;  %5375 = vmatmul.msk.f32.vlgmr.msrb.gmra.mxu2 %vm1165_vm4, %v3370_v56  ;;  %v5414_v11 = vld [vmem:[%s10824_s5 + $0x1d8] sm:$0xff] }
 0x679   :  { %v3443_v63 = vpop.f32.mrf.mxu3  ;;  %3728 = vmatpush.msrb.mxu1 %v5414_v11  ;;  %v3640_v11 = vld [vmem:[%s10824_s5 + $0x18] sm:$0xff] }
 0x67a   :  { %v3350_v26 = vadd.f32 %v3339_v45, %v3132_v15  ;;  %v5411_v15 = vld [vmem:[%s10824_s5 + $0x1c0] sm:$0xff] }
 0x67b   :  { %v3665_v45 = vld [vmem:[%s10824_s5 + $0xe0] sm:$0xff] }
 0x67c   :  { %v3364_v19 = vadd.f32 %v3358_v24, %v3350_v26  ;;  %v3526_v61 = vpop.f32.mrf.mxu1  ;;  %v5412_v26 = vld [vmem:[%s10824_s5 + $0x1c8] sm:$0xff]  ;;  %3750 = vmatpush.msra.mxu2 %v3665_v45  ;;  %v5446_v45 = vld [vmem:[%s10824_s5 + $0x2d8] sm:$0xff] }
 0x67d   :  { %3729 = vmatpush.msrb.mxu1 %v5412_v26  ;;  %v5443_v26 = vld [vmem:[%s10824_s5 + $0x2c0] sm:$0xff] }
 0x67e   :  { %v3372_v29 = vmax.f32 %v3364_v19, 0.0  ;;  %v3663_v19 = vld [vmem:[%s10824_s5 + $0xd0] sm:$0xff] }
 0x67f   :  { %v3341_v3 = vpop.f32.mrf.mxu2  ;;  %3730 = vmatpush.msrb.mxu1 %v5410_v27  ;;  %3751 = vmatpush.msra.mxu2 %v3663_v19  ;;  %v5481_v27 = vld [vmem:[%s10824_s5 + $0x3f0] sm:$0xff]  ;;  %v5482_v19 = vld [vmem:[%s10824_s5 + $0x3f8] sm:$0xff] }
 0x680   :  { %v3342_v25 = vadd.f32 %v3341_v3, %v3312_v47  ;;  %5344 = vmatmul.msk.f32.gmra.mxu0 %vm1165_vm4, %v3372_v29  ;;  %5376 = vmatmul.msk.f32.gmra.mxu2 %vm1165_vm4, %v3372_v29  ;;  %v5407_v47 = vld [vmem:[%s10824_s5 + $0x1a0] sm:$0xff]  ;;  %v5405_v29 = vld [vmem:[%s10824_s5 + $0x190] sm:$0xff]  ;;  %v5406_v3 = vld [vmem:[%s10824_s5 + $0x198] sm:$0xff] }
 0x681   :  { %3731 = vmatpush.msrb.mxu1 %v5408_v40  ;;  %3752 = vmatpush.msra.mxu2 %v3661_v1  ;;  %v5442_v40 = vld [vmem:[%s10824_s5 + $0x2b8] sm:$0xff]  ;;  %v5479_v1 = vld [vmem:[%s10824_s5 + $0x3e0] sm:$0xff] }
 0x682   :  { %v3352_v8 = vadd.f32 %v3342_v25, %v3134_v39  ;;  %v3659_v39 = vld [vmem:[%s10824_s5 + $0xb0] sm:$0xff]  ;;  %v5403_v25 = vld [vmem:[%s10824_s5 + $0x180] sm:$0xff] }
 0x683   :  { %3732 = vmatpush.msrb.mxu1 %v5406_v3  ;;  %3753 = vmatpush.msra.mxu2 %v3659_v39  ;;  %v5439_v3 = vld [vmem:[%s10824_s5 + $0x2a0] sm:$0xff]  ;;  %v5440_v39 = vld [vmem:[%s10824_s5 + $0x2a8] sm:$0xff] }
 0x684   :  { %v3366_v49 = vadd.f32 %v3358_v24, %v3352_v8  ;;  %v3529_v18 = vpop.f32.mrf.mxu1  ;;  %v3668_v8 = vld [vmem:[%s10824_s5 + $0xf8] sm:$0xff] }
 0x685   :  { %3733 = vmatpush.msrb.mxu1 %v5404_v6  ;;  %v5437_v6 = vld [vmem:[%s10824_s5 + $0x290] sm:$0xff] }
 0x686   :  { %v3374_v48 = vmax.f32 %v3366_v49, 0.0  ;;  %v3657_v49 = vld [vmem:[%s10824_s5 + $0xa0] sm:$0xff] }
 0x687   :  { %v3344_v17 = vpop.f32.mrf.mxu2  ;;  %3734 = vmatpush.msrb.mxu1 %v5402_v13  ;;  %3754 = vmatpush.msra.mxu2 %v3657_v49  ;;  %v5476_v13 = vld [vmem:[%s10824_s5 + $0x3c8] sm:$0xff]  ;;  %v5435_v49 = vld [vmem:[%s10824_s5 + $0x280] sm:$0xff] }
 0x688   :  { %v3345_v59 = vadd.f32 %v3344_v17, %v3315_v51  ;;  %5345 = vmatmul.msk.f32.gmra.mxu0 %vm1165_vm4, %v3374_v48  ;;  %5377 = vmatmul.msk.f32.gmra.mxu2 %vm1165_vm4, %v3374_v48  ;;  %v5399_v48 = vld [vmem:[%s10824_s5 + $0x160] sm:$0xff]  ;;  %v5400_v51 = vld [vmem:[%s10824_s5 + $0x168] sm:$0xff]  ;;  %v3655_v17 = vld [vmem:[%s10824_s5 + $0x90] sm:$0xff] }
 0x689   :  { %3735 = vmatpush.msrb.mxu1 %v5400_v51  ;;  %3755 = vmatpush.msra.mxu2 %v3655_v17  ;;  %v5474_v51 = vld [vmem:[%s10824_s5 + $0x3b8] sm:$0xff]  ;;  %v5433_v17 = vld [vmem:[%s10824_s5 + $0x270] sm:$0xff] }
 0x68a   :  { %v3354_v53 = vadd.f32 %v3345_v59, %v3136_v5  ;;  %v3664_v5 = vld [vmem:[%s10824_s5 + $0xd8] sm:$0xff]  ;;  %v5397_v59 = vld [vmem:[%s10824_s5 + $0x150] sm:$0xff] }
 0x68c   :  { %v3368_v7 = vadd.f32 %v3358_v24, %v3354_v53  ;;  %v5417_v24 = vld [vmem:[%s10824_s5 + $0x1f0] sm:$0xff]  ;;  %v5398_v53 = vld [vmem:[%s10824_s5 + $0x158] sm:$0xff] }
 0x68d   :  { %3703 = vmatpush.msra.mxu0 %v5417_v24  ;;  %3736 = vmatpush.msrb.mxu1 %v5398_v53  ;;  %v5387_v24 = vld [vmem:[%s10824_s5 + $0x100] sm:$0xff]  ;;  %v5472_v53 = vld [vmem:[%s10824_s5 + $0x3a8] sm:$0xff] }
 0x68e   :  { %v3376_v32 = vmax.f32 %v3368_v7, 0.0  ;;  %v3653_v7 = vld [vmem:[%s10824_s5 + $0x80] sm:$0xff] }
 0x68f   :  { %3704 = vmatpush.msra.mxu0 %v5415_v38  ;;  %3756 = vmatpush.msra.mxu2 %v3653_v7  ;;  %v3643_v38 = vld [vmem:[%s10824_s5 + $0x30] sm:$0xff]  ;;  %v5431_v7 = vld [vmem:[%s10824_s5 + $0x260] sm:$0xff] }
 0x690   :  { %5346 = vmatmul.msk.f32.gmra.mxu0 %vm1165_vm4, %v3376_v32  ;;  %5378 = vmatmul.msk.f32.gmra.mxu2 %vm1165_vm4, %v3376_v32  ;;  %v3662_v32 = vld [vmem:[%s10824_s5 + $0xc8] sm:$0xff] }
 0x691   :  { %3705 = vmatpush.msra.mxu0 %v5413_v16  ;;  %v3642_v16 = vld [vmem:[%s10824_s5 + $0x28] sm:$0xff] }
 0x693   :  { %3706 = vmatpush.msra.mxu0 %v5411_v15  ;;  %v5445_v15 = vld [vmem:[%s10824_s5 + $0x2d0] sm:$0xff] }
 0x695   :  { %3707 = vmatpush.msra.mxu0 %v5409_v4  ;;  %v5444_v4 = vld [vmem:[%s10824_s5 + $0x2c8] sm:$0xff] }
 0x697   :  { %3708 = vmatpush.msra.mxu0 %v5407_v47  ;;  %v5441_v47 = vld [vmem:[%s10824_s5 + $0x2b0] sm:$0xff] }
 0x699   :  { %3709 = vmatpush.msra.mxu0 %v5405_v29  ;;  %v5480_v29 = vld [vmem:[%s10824_s5 + $0x3e8] sm:$0xff] }
 0x69b   :  { %3710 = vmatpush.msra.mxu0 %v5403_v25  ;;  %v5477_v25 = vld [vmem:[%s10824_s5 + $0x3d0] sm:$0xff] }
 0x69d   :  { %3711 = vmatpush.msra.mxu0 %v5401_v2  ;;  %v5475_v2 = vld [vmem:[%s10824_s5 + $0x3c0] sm:$0xff] }
 0x69f   :  { %3712 = vmatpush.msra.mxu0 %v5399_v48  ;;  %v5473_v48 = vld [vmem:[%s10824_s5 + $0x3b0] sm:$0xff] }
 0x6a1   :  { %3713 = vmatpush.msra.mxu0 %v5397_v59  ;;  %v5471_v59 = vld [vmem:[%s10824_s5 + $0x3a0] sm:$0xff] }
 0x6f5   :  { %v3463_v54 = vpop.f32.mrf.mxu0 }
 0x6f6   :  { %v3464_v36 = vadd.f32 %v3463_v54, %v3434_v37  ;;  %v5382_v37 = vld [vmem:[%s10823_s4 + $0x10] sm:$0xff]  ;;  %v5396_v54 = vld [vmem:[%s10824_s5 + $0x148] sm:$0xff] }
 0x6f7   :  { %3737 = vmatpush.msrb.mxu1 %v5396_v54  ;;  %v5429_v54 = vld [vmem:[%s10824_s5 + $0x250] sm:$0xff] }
 0x6fb   :  { %v3549_v58 = vpop.f32.mrf.mxu2 }
 0x6fc   :  { %v3550_v31 = vadd.f32 %v3549_v58, %v3520_v43  ;;  %v5395_v43 = vld [vmem:[%s10824_s5 + $0x140] sm:$0xff]  ;;  %v3660_v58 = vld [vmem:[%s10824_s5 + $0xb8] sm:$0xff] }
 0x6fd   :  { %v3466_v34 = vpop.f32.mrf.mxu0  ;;  %3714 = vmatpush.msra.mxu0 %v5395_v43  ;;  %v5469_v43 = vld [vmem:[%s10824_s5 + $0x390] sm:$0xff] }
 0x6fe   :  { %v3467_v22 = vadd.f32 %v3466_v34, %v3437_v21  ;;  %v3561_v14 = vmax.f32 %v3464_v36, %v3550_v31  ;;  %v3651_v34 = vld [vmem:[%s10824_s5 + $0x70] sm:$0xff]  ;;  %v5394_v21 = vld [vmem:[%s10824_s5 + $0x138] sm:$0xff]  ;;  %v5448_v36 = vld [vmem:[%s10824_s5 + $0x2e8] sm:$0xff] }
 0x6ff   :  { %3757 = vmatpush.msra.mxu2 %v3651_v34  ;;  %3738 = vmatpush.msrb.mxu1 %v5394_v21  ;;  %v3644_v31 = vld [vmem:[%s10824_s5 + $0x38] sm:$0xff]  ;;  %v5467_v34 = vld [vmem:[%s10824_s5 + $0x380] sm:$0xff] }
 0x700   :  { %v5427_v21 = vld [vmem:[%s10824_s5 + $0x240] sm:$0xff] }
 0x703   :  { %v3552_v23 = vpop.f32.mrf.mxu2 }
 0x704   :  { %v3553_v28 = vadd.f32 %v3552_v23, %v3523_v50  ;;  %v5393_v50 = vld [vmem:[%s10824_s5 + $0x130] sm:$0xff]  ;;  %v3658_v23 = vld [vmem:[%s10824_s5 + $0xa8] sm:$0xff] }
 0x705   :  { %v3469_v0 = vpop.f32.mrf.mxu0  ;;  %3715 = vmatpush.msra.mxu0 %v5393_v50  ;;  %v5468_v50 = vld [vmem:[%s10824_s5 + $0x388] sm:$0xff] }
 0x706   :  { %v3470_v46 = vadd.f32 %v3469_v0, %v3440_v30  ;;  %v3562_v56 = vmax.f32 %v3467_v22, %v3553_v28  ;;  %v3649_v0 = vld [vmem:[%s10824_s5 + $0x60] sm:$0xff]  ;;  %v3654_v30 = vld [vmem:[%s10824_s5 + $0x88] sm:$0xff]  ;;  %v5390_v28 = vld [vmem:[%s10824_s5 + $0x118] sm:$0xff] }
 0x707   :  { %3758 = vmatpush.msra.mxu2 %v3649_v0  ;;  %v5449_v22 = vld [vmem:[%s10824_s5 + $0x2f0] sm:$0xff] }
 0x708   :  { %v5465_v0 = vld [vmem:[%s10824_s5 + $0x370] sm:$0xff] }
 0x70b   :  { %v3555_v41 = vpop.f32.mrf.mxu2 }
 0x70c   :  { %v3556_v52 = vadd.f32 %v3555_v41, %v3526_v61  ;;  %v3656_v61 = vld [vmem:[%s10824_s5 + $0x98] sm:$0xff] }
 0x70d   :  { %v3472_v35 = vpop.f32.mrf.mxu0  ;;  %v5383_v41 = vld [vmem:[%s10823_s4 + $0x18] sm:$0x3f] }
 0x70e   :  { %v3473_v60 = vadd.f32 %v3472_v35, %v3443_v63  ;;  %v3563_v62 = vmax.f32 %v3470_v46, %v3556_v52  ;;  %v3652_v35 = vld [vmem:[%s10824_s5 + $0x78] sm:$0xff]  ;;  %v5391_v63 = vld [vmem:[%s10824_s5 + $0x120] sm:$0xff]  ;;  %v3647_v52 = vld [vmem:[%s10824_s5 + $0x50] sm:$0xff] }
 0x70f   :  { %3716 = vmatpush.msra.mxu0 %v5391_v63  ;;  %3759 = vmatpush.msra.mxu2 %v3647_v52  ;;  %v3645_v46 = vld [vmem:[%s10824_s5 + $0x40] sm:$0xff]  ;;  %v5461_v52 = vld [vmem:[%s10824_s5 + $0x350] sm:$0xff] }
 0x710   :  { %v5423_v63 = vld [vmem:[%s10824_s5 + $0x220] sm:$0xff] }
 0x711   :  { %3760 = vmatpush.msra.mxu2 %v3645_v46  ;;  %v5422_v46 = vld [vmem:[%s10824_s5 + $0x218] sm:$0xff] }
 0x713   :  { %v3558_v9 = vpop.f32.mrf.mxu2  ;;  %3761 = vmatpush.msra.mxu2 %v3643_v38  ;;  %v5420_v38 = vld [vmem:[%s10824_s5 + $0x208] sm:$0xff] }
 0x714   :  { %v3559_v57 = vadd.f32 %v3558_v9, %v3529_v18  ;;  %v3650_v18 = vld [vmem:[%s10824_s5 + $0x68] sm:$0xff] }
 0x715   :  { %v5392_v9 = vld [vmem:[%s10824_s5 + $0x128] sm:$0xff]  ;;  %3762 = vmatpush.msra.mxu2 %v3641_v33 }
 0x716   :  { %v3564_v42 = vmax.f32 %v3473_v60, %v3559_v57  ;;  %3739 = vmatpush.msrb.mxu1 %v5392_v9  ;;  %v3648_v60 = vld [vmem:[%s10824_s5 + $0x58] sm:$0xff]  ;;  %v5389_v57 = vld [vmem:[%s10824_s5 + $0x110] sm:$0xff]  ;;  %v5424_v9 = vld [vmem:[%s10824_s5 + $0x228] sm:$0xff] }
 0x717   :  { %3717 = vmatpush.msra.mxu0 %v5389_v57  ;;  %v5456_v33 = vld [vmem:[%s10824_s5 + $0x328] sm:$0xff] }
 0x718   :  { %5379 = vmatpush.msk.msra.mxu3 %vm968_vm3, %v3564_v42  ;;  %3740 = vmatpush.msrb.mxu1 %v5390_v28  ;;  %v5421_v28 = vld [vmem:[%s10824_s5 + $0x210] sm:$0xff] }
 0x719   :  { %3718 = vmatpush.msra.mxu0 %v5387_v24  ;;  %v5460_v24 = vld [vmem:[%s10824_s5 + $0x348] sm:$0xff] }
 0x71a   :  { %3589 = vmatpush.msra.mxu3 %v3563_v62  ;;  %3741 = vmatpush.msrb.mxu1 %v5388_v12  ;;  %v5419_v12 = vld [vmem:[%s10824_s5 + $0x200] sm:$0xff] }
 0x71b   :  { %3829 = vmatpush.msrb.mxu0 %v5449_v22  ;;  %v5458_v22 = vld [vmem:[%s10824_s5 + $0x338] sm:$0xff] }
 0x71c   :  { %3590 = vmatpush.msra.mxu3 %v3562_v56 }
 0x71d   :  { %3830 = vmatpush.msrb.mxu0 %v5447_v44  ;;  %v5454_v44 = vld [vmem:[%s10824_s5 + $0x318] sm:$0xff] }
 0x71e   :  { %3591 = vmatpush.msra.mxu3 %v3561_v14 }
 0x71f   :  { %5380 = vmatmul.msk.f32.vlgmr.msra.gmra.mxu3 %vm1329_vm5, %v3565_v20  ;;  %v3638_v20 = vld [vmem:[%s10824_s5 + $0x8] sm:$0xff]  ;;  %3831 = vmatpush.msrb.mxu0 %v5445_v15 }
 0x720   :  { %5384 = vmatpush.msk.msrb.mxu3 %vm968_vm3, %v3564_v42  ;;  %v3646_v42 = vld [vmem:[%s10824_s5 + $0x48] sm:$0xff] }
 0x721   :  { %3832 = vmatpush.msrb.mxu0 %v5443_v26  ;;  %v5513_v26 = vld [vmem:[%s10824_s5 + $0x4f0] sm:$0xff] }
 0x722   :  { %3620 = vmatpush.msrb.mxu3 %v3563_v62  ;;  %v5450_v62 = vld [vmem:[%s10824_s5 + $0x2f8] sm:$0xff] }
 0x723   :  { %3852 = vmatpush.msra.mxu1 %v5450_v62  ;;  %3833 = vmatpush.msrb.mxu0 %v5441_v47  ;;  %v5455_v62 = vld [vmem:[%s10824_s5 + $0x320] sm:$0xff] }
 0x724   :  { %3621 = vmatpush.msrb.mxu3 %v3562_v56  ;;  %v3639_v56 = vld [vmem:[%s10824_s5 + $0x10] sm:$0xff]  ;;  %v5511_v47 = vld [vmem:[%s10824_s5 + $0x4e0] sm:$0xff] }
 0x725   :  { %3853 = vmatpush.msra.mxu1 %v5448_v36  ;;  %3763 = vmatpush.msra.mxu2 %v3639_v56  ;;  %v5451_v56 = vld [vmem:[%s10824_s5 + $0x300] sm:$0xff] }
 0x726   :  { %3622 = vmatpush.msrb.mxu3 %v3561_v14  ;;  %v3637_v14 = vld [vmem:[%s10824_s5] sm:$0xff]  ;;  %3834 = vmatpush.msrb.mxu0 %v5439_v3 }
 0x727   :  { %5381 = vmatmul.msk.f32.gmra.mxu3 %vm1329_vm5, %v3566_v10  ;;  %3854 = vmatpush.msra.mxu1 %v5446_v45  ;;  %v5478_v10 = vld [vmem:[%s10824_s5 + $0x3d8] sm:$0xff]  ;;  %v5507_v3 = vld [vmem:[%s10824_s5 + $0x4c0] sm:$0xff] }
 0x728   :  { %3772 = vmatpush.msra.mxu3 %v3668_v8  ;;  %3764 = vmatpush.msra.mxu2 %v3637_v14  ;;  %v5438_v8 = vld [vmem:[%s10824_s5 + $0x298] sm:$0xff] }
 0x729   :  { %3855 = vmatpush.msra.mxu1 %v5444_v4  ;;  %3835 = vmatpush.msrb.mxu0 %v5437_v6  ;;  %v5506_v6 = vld [vmem:[%s10824_s5 + $0x4b8] sm:$0xff] }
 0x72a   :  { %3773 = vmatpush.msra.mxu3 %v3666_v55  ;;  %3913 = vmatpush.msrb.mxu2 %v5481_v27  ;;  %v5436_v55 = vld [vmem:[%s10824_s5 + $0x288] sm:$0xff] }
 0x72b   :  { %3856 = vmatpush.msra.mxu1 %v5442_v40  ;;  %3836 = vmatpush.msrb.mxu0 %v5435_v49  ;;  %v5512_v40 = vld [vmem:[%s10824_s5 + $0x4e8] sm:$0xff]  ;;  %v5501_v49 = vld [vmem:[%s10824_s5 + $0x490] sm:$0xff] }
 0x72c   :  { %3774 = vmatpush.msra.mxu3 %v3664_v5  ;;  %3914 = vmatpush.msrb.mxu2 %v5479_v1  ;;  %v5434_v5 = vld [vmem:[%s10824_s5 + $0x278] sm:$0xff]  ;;  %v5509_v1 = vld [vmem:[%s10824_s5 + $0x4d0] sm:$0xff] }
 0x72d   :  { %3857 = vmatpush.msra.mxu1 %v5440_v39  ;;  %3837 = vmatpush.msrb.mxu0 %v5433_v17  ;;  %v5508_v39 = vld [vmem:[%s10824_s5 + $0x4c8] sm:$0xff] }
 0x72e   :  { %3775 = vmatpush.msra.mxu3 %v3662_v32  ;;  %3915 = vmatpush.msrb.mxu2 %v5477_v25  ;;  %v5432_v32 = vld [vmem:[%s10824_s5 + $0x268] sm:$0xff] }
 0x72f   :  { %5385 = vmatmul.msk.f32.vlgmr.msrb.gmra.mxu3 %vm1329_vm5, %v5382_v37  ;;  %3858 = vmatpush.msra.mxu1 %v5438_v8  ;;  %v5470_v37 = vld [vmem:[%s10824_s5 + $0x398] sm:$0xff] }
 0x730   :  { %3776 = vmatpush.msra.mxu3 %v3660_v58  ;;  %3916 = vmatpush.msrb.mxu2 %v5475_v2  ;;  %v5430_v58 = vld [vmem:[%s10824_s5 + $0x258] sm:$0xff]  ;;  %v5503_v2 = vld [vmem:[%s10824_s5 + $0x4a0] sm:$0xff] }
 0x731   :  { %3859 = vmatpush.msra.mxu1 %v5436_v55  ;;  %3838 = vmatpush.msrb.mxu0 %v5431_v7  ;;  %v5502_v55 = vld [vmem:[%s10824_s5 + $0x498] sm:$0xff]  ;;  %v5495_v7 = vld [vmem:[%s10824_s5 + $0x460] sm:$0xff] }
 0x732   :  { %3777 = vmatpush.msra.mxu3 %v3658_v23  ;;  %3917 = vmatpush.msrb.mxu2 %v5473_v48  ;;  %v5428_v23 = vld [vmem:[%s10824_s5 + $0x248] sm:$0xff]  ;;  %v5499_v48 = vld [vmem:[%s10824_s5 + $0x480] sm:$0xff] }
 0x733   :  { %3860 = vmatpush.msra.mxu1 %v5434_v5  ;;  %3839 = vmatpush.msrb.mxu0 %v5429_v54  ;;  %v5497_v5 = vld [vmem:[%s10824_s5 + $0x470] sm:$0xff]  ;;  %v5491_v54 = vld [vmem:[%s10824_s5 + $0x440] sm:$0xff] }
 0x734   :  { %3778 = vmatpush.msra.mxu3 %v3656_v61  ;;  %3918 = vmatpush.msrb.mxu2 %v5471_v59  ;;  %v5466_v61 = vld [vmem:[%s10824_s5 + $0x378] sm:$0xff] }
 0x735   :  { %3861 = vmatpush.msra.mxu1 %v5432_v32  ;;  %3840 = vmatpush.msrb.mxu0 %v5427_v21  ;;  %v5498_v59 = vld [vmem:[%s10824_s5 + $0x478] sm:$0xff]  ;;  %v5496_v32 = vld [vmem:[%s10824_s5 + $0x468] sm:$0xff] }
 0x736   :  { %3779 = vmatpush.msra.mxu3 %v3654_v30  ;;  %3919 = vmatpush.msrb.mxu2 %v5469_v43  ;;  %v5425_v30 = vld [vmem:[%s10824_s5 + $0x230] sm:$0xff] }
 0x737   :  { %5386 = vmatmul.msk.f32.gmra.mxu3 %vm1329_vm5, %v5383_v41  ;;  %3862 = vmatpush.msra.mxu1 %v5430_v58  ;;  %v5426_v41 = vld [vmem:[%s10824_s5 + $0x238] sm:$0xff]  ;;  %v5493_v43 = vld [vmem:[%s10824_s5 + $0x450] sm:$0xff]  ;;  %v5492_v58 = vld [vmem:[%s10824_s5 + $0x448] sm:$0xff] }
 0x738   :  { %3780 = vmatpush.msra.mxu3 %v3652_v35  ;;  %3920 = vmatpush.msrb.mxu2 %v5467_v34  ;;  %v5463_v35 = vld [vmem:[%s10824_s5 + $0x360] sm:$0xff]  ;;  %v5489_v34 = vld [vmem:[%s10824_s5 + $0x430] sm:$0xff] }
 0x739   :  { %3863 = vmatpush.msra.mxu1 %v5428_v23  ;;  %3841 = vmatpush.msrb.mxu0 %v5425_v30  ;;  %v5487_v23 = vld [vmem:[%s10824_s5 + $0x420] sm:$0xff]  ;;  %v5486_v30 = vld [vmem:[%s10824_s5 + $0x418] sm:$0xff] }
 0x73a   :  { %3781 = vmatpush.msra.mxu3 %v3650_v18  ;;  %v5464_v18 = vld [vmem:[%s10824_s5 + $0x368] sm:$0xff]  ;;  %3921 = vmatpush.msrb.mxu2 %v5465_v0 }
 0x73b   :  { %3864 = vmatpush.msra.mxu1 %v5426_v41  ;;  %3842 = vmatpush.msrb.mxu0 %v5423_v63  ;;  %v5488_v0 = vld [vmem:[%s10824_s5 + $0x428] sm:$0xff]  ;;  %v5483_v41 = vld [vmem:[%s10824_s5 + $0x400] sm:$0xff] }
 0x73c   :  { %3782 = vmatpush.msra.mxu3 %v3648_v60  ;;  %v5462_v60 = vld [vmem:[%s10824_s5 + $0x358] sm:$0xff]  ;;  %3922 = vmatpush.msrb.mxu2 %v5463_v35  ;;  %v5484_v35 = vld [vmem:[%s10824_s5 + $0x408] sm:$0xff] }
 0x73d   :  { %3865 = vmatpush.msra.mxu1 %v5424_v9  ;;  %3843 = vmatpush.msrb.mxu0 %v5421_v28  ;;  %v4076_v9 = vld [vmem:[%s10826_s7 + $0x78] sm:$0xff]  ;;  %v4074_v28 = vld [vmem:[%s10826_s7 + $0x68] sm:$0xff] }
 0x73e   :  { %3783 = vmatpush.msra.mxu3 %v3646_v42  ;;  %v5459_v42 = vld [vmem:[%s10824_s5 + $0x340] sm:$0xff]  ;;  %3923 = vmatpush.msrb.mxu2 %v5461_v52  ;;  %v5532_v52 = vld [vmem:[%s10826_s7 + $0x118] sm:$0xff] }
 0x73f   :  { %3866 = vmatpush.msra.mxu1 %v5422_v46  ;;  %3844 = vmatpush.msrb.mxu0 %v5419_v12  ;;  %v5530_v46 = vld [vmem:[%s10826_s7 + $0x108] sm:$0xff]  ;;  %v4072_v12 = vld [vmem:[%s10826_s7 + $0x58] sm:$0xff] }
 0x740   :  { %3784 = vmatpush.msra.mxu3 %v3644_v31  ;;  %3924 = vmatpush.msrb.mxu2 %v5459_v42  ;;  %v5457_v31 = vld [vmem:[%s10824_s5 + $0x330] sm:$0xff]  ;;  %v4073_v42 = vld [vmem:[%s10826_s7 + $0x60] sm:$0xff] }
 0x741   :  { %3867 = vmatpush.msra.mxu1 %v5420_v38  ;;  %v5528_v38 = vld [vmem:[%s10826_s7 + $0xf8] sm:$0xff] }
 0x742   :  { %3785 = vmatpush.msra.mxu3 %v3642_v16  ;;  %3925 = vmatpush.msrb.mxu2 %v5457_v31  ;;  %v5453_v16 = vld [vmem:[%s10824_s5 + $0x310] sm:$0xff] }
 0x743   :  { %v4071_v31 = vld [vmem:[%s10826_s7 + $0x50] sm:$0xff] }
 0x744   :  { %3786 = vmatpush.msra.mxu3 %v3640_v11  ;;  %3926 = vmatpush.msrb.mxu2 %v5455_v62  ;;  %v5452_v11 = vld [vmem:[%s10824_s5 + $0x308] sm:$0xff] }
 0x745   :  { %v4070_v62 = vld [vmem:[%s10826_s7 + $0x48] sm:$0xff] }
 0x746   :  { %3787 = vmatpush.msra.mxu3 %v3638_v20  ;;  %3927 = vmatpush.msrb.mxu2 %v5453_v16  ;;  %v4069_v16 = vld [vmem:[%s10826_s7 + $0x40] sm:$0xff] }
 0x748   :  { %3936 = vmatpush.msrb.mxu3 %v5482_v19  ;;  %3928 = vmatpush.msrb.mxu2 %v5451_v56  ;;  %v5514_v19 = vld [vmem:[%s10824_s5 + $0x4f8] sm:$0xff] }
 0x749   :  { %v5524_v56 = vld [vmem:[%s10826_s7 + $0xd8] sm:$0xff] }
 0x74a   :  { %3937 = vmatpush.msrb.mxu3 %v5480_v29  ;;  %v5510_v29 = vld [vmem:[%s10824_s5 + $0x4d8] sm:$0xff] }
 0x74c   :  { %3938 = vmatpush.msrb.mxu3 %v5478_v10  ;;  %v5505_v10 = vld [vmem:[%s10824_s5 + $0x4b0] sm:$0xff] }
 0x74e   :  { %3939 = vmatpush.msrb.mxu3 %v5476_v13  ;;  %v5504_v13 = vld [vmem:[%s10824_s5 + $0x4a8] sm:$0xff] }
 0x750   :  { %3940 = vmatpush.msrb.mxu3 %v5474_v51  ;;  %v5500_v51 = vld [vmem:[%s10824_s5 + $0x488] sm:$0xff] }
 0x752   :  { %3941 = vmatpush.msrb.mxu3 %v5472_v53 }
 0x754   :  { %3942 = vmatpush.msrb.mxu3 %v5470_v37  ;;  %v5494_v37 = vld [vmem:[%s10824_s5 + $0x458] sm:$0xff] }
 0x756   :  { %3943 = vmatpush.msrb.mxu3 %v5468_v50  ;;  %v5490_v50 = vld [vmem:[%s10824_s5 + $0x438] sm:$0xff] }
 0x758   :  { %3944 = vmatpush.msrb.mxu3 %v5466_v61  ;;  %v5485_v61 = vld [vmem:[%s10824_s5 + $0x410] sm:$0xff] }
 0x75a   :  { %3945 = vmatpush.msrb.mxu3 %v5464_v18 }
 0x75c   :  { %3946 = vmatpush.msrb.mxu3 %v5462_v60  ;;  %v4075_v60 = vld [vmem:[%s10826_s7 + $0x70] sm:$0xff] }
 0x75e   :  { %3947 = vmatpush.msrb.mxu3 %v5460_v24  ;;  %v5529_v24 = vld [vmem:[%s10826_s7 + $0x100] sm:$0xff] }
 0x760   :  { %3948 = vmatpush.msrb.mxu3 %v5458_v22  ;;  %v5527_v22 = vld [vmem:[%s10826_s7 + $0xf0] sm:$0xff] }
 0x762   :  { %3949 = vmatpush.msrb.mxu3 %v5456_v33  ;;  %v5526_v33 = vld [vmem:[%s10826_s7 + $0xe8] sm:$0xff] }
 0x764   :  { %3950 = vmatpush.msrb.mxu3 %v5454_v44  ;;  %v5525_v44 = vld [vmem:[%s10826_s7 + $0xe0] sm:$0xff] }
 0x766   :  { %3951 = vmatpush.msrb.mxu3 %v5452_v11  ;;  %v4067_v11 = vld [vmem:[%s10826_s7 + $0x30] sm:$0xff] }
 0x7a2   :  { %v3593_v57 = vpop.f32.mrf.mxu3 }
 0x7aa   :  { %v3596_v36 = vpop.f32.mrf.mxu3 }
 0x7b2   :  { %v3624_v15 = vpop.f32.mrf.mxu3 }
 0x7b3   :  { %v3630_v45 = vmax.f32 %v3593_v57, %v3624_v15  ;;  %v5531_v57 = vld [vmem:[%s10826_s7 + $0x110] sm:$0xff] }
 0x7b4   :  { %v5523_v15 = vld [vmem:[%s10826_s7 + $0xd0] sm:$0xff] }
 0x7b5   :  { %3633 = vst [vmem:[#allocation2 + $0x10] sm:$0xff] %v3630_v45  ;;  %3765 = vmatmul.f32.vlgmr.msra.gmra.mxu2 %v3630_v45  ;;  %3788 = vmatmul.f32.vlgmr.msra.gmra.mxu3 %v3630_v45  ;;  %v4066_v45 = vld [vmem:[%s10826_s7 + $0x28] sm:$0xff] }
 0x7b6   :  { %4087 = vmatpush.msra.mxu2 %v4076_v9 }
 0x7b8   :  { %4088 = vmatpush.msra.mxu2 %v4075_v60 }
 0x7ba   :  { %v3627_v14 = vpop.f32.mrf.mxu3  ;;  %4089 = vmatpush.msra.mxu2 %v4074_v28 }
 0x7bb   :  { %v3631_v20 = vmax.f32 %v3596_v36, %v3627_v14  ;;  %v4068_v36 = vld [vmem:[%s10826_s7 + $0x38] sm:$0xff]  ;;  %v5522_v14 = vld [vmem:[%s10826_s7 + $0xc8] sm:$0xff] }
 0x7bc   :  { %4090 = vmatpush.msra.mxu2 %v4073_v42 }
 0x7bd   :  { %3634 = vst [vmem:[#allocation2 + $0x18] sm:$0x3f] %v3631_v20  ;;  %v4065_v20 = vld [vmem:[%s10826_s7 + $0x20] sm:$0xff] }
 0x7be   :  { %4091 = vmatpush.msra.mxu2 %v4072_v12 }
 0x7c0   :  { %4092 = vmatpush.msra.mxu2 %v4071_v31 }
 0x7c2   :  { %4093 = vmatpush.msra.mxu2 %v4070_v62 }
 0x7c4   :  { %v3669_v4 = vld [vmem:[#allocation2 + $0x11] sm:$0xff]  ;;  %v3670_v25 = vld [vmem:[#allocation2 + $0x19] sm:$0x3]  ;;  %v3880_v53 = vld [vmem:[#allocation2 + $0x1b] sm:$0x3]  ;;  %4094 = vmatpush.msra.mxu2 %v4069_v16 }
 0x7c5   :  { %v3636_v27 = vld [vmem:[#allocation2 + $0x18] sm:$0x3]  ;;  %3719 = vmatmul.f32.vlgmr.msra.gmra.mxu0 %v3669_v4  ;;  %3742 = vmatmul.f32.vlgmr.msrb.gmra.mxu1 %v3669_v4  ;;  %v3796_v21 = vld [vmem:[#allocation2 + $0x1a] sm:$0x3]  ;;  %v3964_v63 = vld [vmem:[#allocation2 + $0x1c] sm:$0x3] }
 0x7c6   :  { %3768 = vmatmul.f32.gmra.mxu2 %v3636_v27  ;;  %3791 = vmatmul.f32.gmra.mxu3 %v3636_v27  ;;  %v3879_v8 = vld [vmem:[#allocation2 + $0x13] sm:$0xff] }
 0x7c7   :  { %3997 = vmatpush.msra.mxu0 %v5513_v26  ;;  %4020 = vmatpush.msrb.mxu1 %v5514_v19  ;;  %v3795_v17 = vld [vmem:[#allocation2 + $0x12] sm:$0xff]  ;;  %v5521_v26 = vld [vmem:[%s10826_s7 + $0xc0] sm:$0xff] }
 0x7c8   :  { %v3963_v18 = vld [vmem:[#allocation2 + $0x14] sm:$0xff]  ;;  %4095 = vmatpush.msra.mxu2 %v4068_v36 }
 0x7c9   :  { %3998 = vmatpush.msra.mxu0 %v5511_v47  ;;  %4021 = vmatpush.msrb.mxu1 %v5512_v40  ;;  %v4064_v19 = vld [vmem:[%s10826_s7 + $0x18] sm:$0xff] }
 0x7ca   :  { %4096 = vmatpush.msra.mxu2 %v4067_v11  ;;  %v4080_v47 = vld [vmem:[%s10826_s7 + $0x98] sm:$0xff] }
 0x7cb   :  { %3999 = vmatpush.msra.mxu0 %v5509_v1  ;;  %4022 = vmatpush.msrb.mxu1 %v5510_v29  ;;  %v5520_v40 = vld [vmem:[%s10826_s7 + $0xb8] sm:$0xff]  ;;  %v4063_v29 = vld [vmem:[%s10826_s7 + $0x10] sm:$0xff] }
 0x7cc   :  { %4097 = vmatpush.msra.mxu2 %v4066_v45  ;;  %4122 = vmatpush.msra.mxu3 %v4080_v47  ;;  %v5536_v1 = vld [vmem:[%s10826_s7 + $0x138] sm:$0xff] }
 0x7cd   :  { %4000 = vmatpush.msra.mxu0 %v5507_v3  ;;  %4023 = vmatpush.msrb.mxu1 %v5508_v39  ;;  %v4079_v3 = vld [vmem:[%s10826_s7 + $0x90] sm:$0xff]  ;;  %v4268_v47 = vld [vmem:[%s10828_s9 + $0x58] sm:$0xff] }
 0x7ce   :  { %3722 = vmatmul.f32.gmra.mxu0 %v3670_v25  ;;  %3745 = vmatmul.f32.gmra.mxu1 %v3670_v25  ;;  %v5519_v39 = vld [vmem:[%s10826_s7 + $0xb0] sm:$0xff] }
 0x7cf   :  { %3929 = vmatmul.f32.vlgmr.msrb.gmra.mxu2 %v3879_v8  ;;  %3952 = vmatmul.f32.vlgmr.msrb.gmra.mxu3 %v3879_v8  ;;  %v5535_v25 = vld [vmem:[%s10826_s7 + $0x130] sm:$0xff]  ;;  %v5518_v8 = vld [vmem:[%s10826_s7 + $0xa8] sm:$0xff] }
 0x7d0   :  { %4001 = vmatpush.msra.mxu0 %v5505_v10  ;;  %4024 = vmatpush.msrb.mxu1 %v5506_v6  ;;  %v4062_v10 = vld [vmem:[%s10826_s7 + $0x8] sm:$0xff] }
 0x7d1   :  { %4098 = vmatpush.msra.mxu2 %v4065_v20  ;;  %4123 = vmatpush.msra.mxu3 %v4079_v3  ;;  %v4078_v6 = vld [vmem:[%s10826_s7 + $0x88] sm:$0xff] }
 0x7d2   :  { %4002 = vmatpush.msra.mxu0 %v5503_v2  ;;  %4025 = vmatpush.msrb.mxu1 %v5504_v13  ;;  %v5534_v2 = vld [vmem:[%s10826_s7 + $0x128] sm:$0xff]  ;;  %v4061_v13 = vld [vmem:[%s10826_s7] sm:$0xff] }
 0x7d3   :  { %4099 = vmatpush.msra.mxu2 %v4064_v19  ;;  %4124 = vmatpush.msra.mxu3 %v4078_v6  ;;  %v4269_v19 = vld [vmem:[%s10828_s9 + $0x60] sm:$0xff]  ;;  %v4264_v6 = vld [vmem:[%s10828_s9 + $0x38] sm:$0xff] }
 0x7d4   :  { %4003 = vmatpush.msra.mxu0 %v5501_v49  ;;  %4026 = vmatpush.msrb.mxu1 %v5502_v55  ;;  %v4077_v49 = vld [vmem:[%s10826_s7 + $0x80] sm:$0xff] }
 0x7d5   :  { %4100 = vmatpush.msra.mxu2 %v4063_v29  ;;  %v5517_v55 = vld [vmem:[%s10826_s7 + $0xa0] sm:$0xff]  ;;  %4125 = vmatpush.msra.mxu3 %v4077_v49  ;;  %v5591_v29 = vld [vmem:[%s10828_s9 + $0x1f8] sm:$0xff]  ;;  %v4263_v49 = vld [vmem:[%s10828_s9 + $0x30] sm:$0xff] }
 0x7d6   :  { %4004 = vmatpush.msra.mxu0 %v5499_v48  ;;  %4027 = vmatpush.msrb.mxu1 %v5500_v51 }
 0x7d7   :  { %3845 = vmatmul.f32.vlgmr.msrb.gmra.mxu0 %v3795_v17  ;;  %3868 = vmatmul.f32.vlgmr.msra.gmra.mxu1 %v3795_v17  ;;  %v5533_v17 = vld [vmem:[%s10826_s7 + $0x120] sm:$0xff] }
 0x7d8   :  { %3932 = vmatmul.f32.gmra.mxu2 %v3880_v53  ;;  %3955 = vmatmul.f32.gmra.mxu3 %v3880_v53 }
 0x7d9   :  { %4005 = vmatpush.msra.mxu0 %v5497_v5  ;;  %4028 = vmatpush.msrb.mxu1 %v5498_v59 }
 0x7da   :  { %4101 = vmatpush.msra.mxu2 %v4062_v10  ;;  %v5590_v10 = vld [vmem:[%s10828_s9 + $0x1f0] sm:$0xff] }
 0x7db   :  { %4006 = vmatpush.msra.mxu0 %v5495_v7  ;;  %4029 = vmatpush.msrb.mxu1 %v5496_v32 }
 0x7dc   :  { %4102 = vmatpush.msra.mxu2 %v4061_v13 }
 0x7dd   :  { %4007 = vmatpush.msra.mxu0 %v5493_v43  ;;  %4030 = vmatpush.msrb.mxu1 %v5494_v37 }
 0x7df   :  { %4008 = vmatpush.msra.mxu0 %v5491_v54  ;;  %4031 = vmatpush.msrb.mxu1 %v5492_v58 }
 0x7e0   :  { %3848 = vmatmul.f32.gmra.mxu0 %v3796_v21  ;;  %3871 = vmatmul.f32.gmra.mxu1 %v3796_v21 }
 0x7e1   :  { %4009 = vmatpush.msra.mxu0 %v5489_v34  ;;  %4032 = vmatpush.msrb.mxu1 %v5490_v50 }
 0x7e3   :  { %4010 = vmatpush.msra.mxu0 %v5487_v23  ;;  %4033 = vmatpush.msrb.mxu1 %v5488_v0 }
 0x7e5   :  { %4011 = vmatpush.msra.mxu0 %v5485_v61  ;;  %4034 = vmatpush.msrb.mxu1 %v5486_v30  ;;  %v4047_v61 = vld [vmem:[%s10825_s6] sm:$0x3] }
 0x7e7   :  { %4012 = vmatpush.msra.mxu0 %v5483_v41  ;;  %4035 = vmatpush.msrb.mxu1 %v5484_v35  ;;  %v4049_v41 = vperm.slane %v4047_v61, 0 }
 0x7e8   :  { %4013 = vmatmul.f32.vlgmr.msra.gmra.mxu0 %v3963_v18  ;;  %4036 = vmatmul.f32.vlgmr.msrb.gmra.mxu1 %v3963_v18  ;;  %v4050_v18 = vperm.slane %v4047_v61, 1  ;;  %v5541_v61 = vld [vmem:[%s10827_s8 + $0x8] sm:$0x1f] }
 0x7e9   :  { %4153 = vmatpush.msrb.mxu0 %v5532_v52  ;;  %4188 = vmatpush.msra.mxu1 %v5536_v1  ;;  %v4266_v1 = vld [vmem:[%s10828_s9 + $0x48] sm:$0xff] }
 0x7eb   :  { %4154 = vmatpush.msrb.mxu0 %v5531_v57  ;;  %4189 = vmatpush.msra.mxu1 %v5535_v25  ;;  %v4265_v25 = vld [vmem:[%s10828_s9 + $0x40] sm:$0xff] }
 0x7ed   :  { %4155 = vmatpush.msrb.mxu0 %v5530_v46  ;;  %4190 = vmatpush.msra.mxu1 %v5534_v2 }
 0x7ef   :  { %4156 = vmatpush.msrb.mxu0 %v5529_v24  ;;  %4191 = vmatpush.msra.mxu1 %v5533_v17  ;;  %v4261_v17 = vld [vmem:[%s10828_s9 + $0x20] sm:$0xff] }
 0x7f0   :  { %4016 = vmatmul.f32.gmra.mxu0 %v3964_v63  ;;  %4039 = vmatmul.f32.gmra.mxu1 %v3964_v63 }
 0x7f1   :  { %4157 = vmatpush.msrb.mxu0 %v5528_v38 }
 0x7f3   :  { %4158 = vmatpush.msrb.mxu0 %v5527_v22 }
 0x7f5   :  { %4159 = vmatpush.msrb.mxu0 %v5526_v33 }
 0x7f7   :  { %4160 = vmatpush.msrb.mxu0 %v5525_v44 }
 0x7f9   :  { %4161 = vmatpush.msrb.mxu0 %v5524_v56 }
 0x7fb   :  { %4162 = vmatpush.msrb.mxu0 %v5523_v15 }
 0x7fd   :  { %4163 = vmatpush.msrb.mxu0 %v5522_v14 }
 0x7ff   :  { %4164 = vmatpush.msrb.mxu0 %v5521_v26  ;;  %v4272_v26 = vld [vmem:[%s10828_s9 + $0x78] sm:$0xff] }
 0x800   :  { %4273 = vmatpush.msrb.mxu1 %v4272_v26  ;;  %v5583_v26 = vld [vmem:[%s10828_s9 + $0x1b8] sm:$0xff] }
 0x801   :  { %4165 = vmatpush.msrb.mxu0 %v5520_v40  ;;  %v4267_v40 = vld [vmem:[%s10828_s9 + $0x50] sm:$0xff] }
 0x803   :  { %4166 = vmatpush.msrb.mxu0 %v5519_v39 }
 0x805   :  { %4167 = vmatpush.msrb.mxu0 %v5518_v8  ;;  %v5589_v8 = vld [vmem:[%s10828_s9 + $0x1e8] sm:$0xff] }
 0x807   :  { %4168 = vmatpush.msrb.mxu0 %v5517_v55  ;;  %v5588_v55 = vld [vmem:[%s10828_s9 + $0x1e0] sm:$0xff] }
 0x809   :  { %4387 = vmatpush.msra.mxu0 %v5591_v29  ;;  %v5581_v29 = vld [vmem:[%s10828_s9 + $0x1a8] sm:$0xff] }
 0x80b   :  { %4388 = vmatpush.msra.mxu0 %v5590_v10  ;;  %v5547_v10 = vld [vmem:[%s10828_s9 + $0x98] sm:$0xff] }
 0x80d   :  { %4389 = vmatpush.msra.mxu0 %v5589_v8  ;;  %v5546_v8 = vld [vmem:[%s10828_s9 + $0x90] sm:$0xff] }
 0x80f   :  { %4390 = vmatpush.msra.mxu0 %v5588_v55  ;;  %v5545_v55 = vld [vmem:[%s10828_s9 + $0x88] sm:$0xff] }
 0x838   :  { %v3766_v5 = vpop.f32.mrf.mxu2  ;;  %v3789_v59 = vpop.f32.mrf.mxu3 }
 0x842   :  { %v3720_v4 = vpop.f32.mrf.mxu0  ;;  %v3743_v27 = vpop.f32.mrf.mxu1 }
 0x843   :  { %v3767_v58 = vadd.f32 %v3766_v5, %v3720_v4  ;;  %v3790_v34 = vadd.f32 %v3789_v59, %v3743_v27  ;;  %v4271_v4 = vld [vmem:[%s10828_s9 + $0x70] sm:$0xff]  ;;  %v4270_v27 = vld [vmem:[%s10828_s9 + $0x68] sm:$0xff] }
 0x844   :  { %4274 = vmatpush.msrb.mxu1 %v4271_v4  ;;  %v5566_v4 = vld [vmem:[%s10828_s9 + $0x130] sm:$0xff] }
 0x846   :  { %4275 = vmatpush.msrb.mxu1 %v4270_v27  ;;  %v5602_v27 = vld [vmem:[%s10828_s9 + $0x250] sm:$0xff] }
 0x848   :  { %4276 = vmatpush.msrb.mxu1 %v4269_v19  ;;  %v5582_v19 = vld [vmem:[%s10828_s9 + $0x1b0] sm:$0xff] }
 0x849   :  { %v3769_v32 = vpop.f32.mrf.mxu2  ;;  %v3792_v43 = vpop.f32.mrf.mxu3 }
 0x84a   :  { %4277 = vmatpush.msrb.mxu1 %v4268_v47  ;;  %v5549_v47 = vld [vmem:[%s10828_s9 + $0xa8] sm:$0xff] }
 0x84b   :  { %v3723_v48 = vpop.f32.mrf.mxu0  ;;  %v3746_v51 = vpop.f32.mrf.mxu1 }
 0x84c   :  { %v3770_v52 = vadd.f32 %v3769_v32, %v3723_v48  ;;  %v3793_v60 = vadd.f32 %v3792_v43, %v3746_v51  ;;  %4278 = vmatpush.msrb.mxu1 %v4267_v40  ;;  %v4262_v48 = vld [vmem:[%s10828_s9 + $0x28] sm:$0xff]  ;;  %v5587_v51 = vld [vmem:[%s10828_s9 + $0x1d8] sm:$0xff]  ;;  %v4259_v43 = vld [vmem:[%s10828_s9 + $0x10] sm:$0xff] }
 0x84d   :  { %4391 = vmatpush.msra.mxu0 %v5587_v51  ;;  %v5565_v40 = vld [vmem:[%s10828_s9 + $0x128] sm:$0xff]  ;;  %v5580_v51 = vld [vmem:[%s10828_s9 + $0x1a0] sm:$0xff] }
 0x84e   :  { %4279 = vmatpush.msrb.mxu1 %v4266_v1  ;;  %v5601_v1 = vld [vmem:[%s10828_s9 + $0x248] sm:$0xff] }
 0x850   :  { %4280 = vmatpush.msrb.mxu1 %v4265_v25  ;;  %v5600_v25 = vld [vmem:[%s10828_s9 + $0x240] sm:$0xff] }
 0x852   :  { %v3930_v23 = vpop.f32.mrf.mxu2  ;;  %v3953_v0 = vpop.f32.mrf.mxu3  ;;  %4281 = vmatpush.msrb.mxu1 %v4264_v6  ;;  %v5563_v6 = vld [vmem:[%s10828_s9 + $0x118] sm:$0xff] }
 0x854   :  { %v3846_v53 = vpop.f32.mrf.mxu0  ;;  %v3869_v7 = vpop.f32.mrf.mxu1  ;;  %4282 = vmatpush.msrb.mxu1 %v4263_v49  ;;  %v5598_v49 = vld [vmem:[%s10828_s9 + $0x230] sm:$0xff] }
 0x855   :  { %v3875_v50 = vadd.f32 %v3846_v53, %v3767_v58  ;;  %v3876_v21 = vadd.f32 %v3869_v7, %v3790_v34  ;;  %v4260_v53 = vld [vmem:[%s10828_s9 + $0x18] sm:$0xff] }
 0x856   :  { %4283 = vmatpush.msrb.mxu1 %v4262_v48  ;;  %v5561_v48 = vld [vmem:[%s10828_s9 + $0x108] sm:$0xff] }
 0x857   :  { %v3959_v30 = vadd.f32 %v3930_v23, %v3875_v50  ;;  %v3960_v35 = vadd.f32 %v3953_v0, %v3876_v21  ;;  %v4258_v21 = vld [vmem:[%s10828_s9 + $0x8] sm:$0xff]  ;;  %v4201_v0 = vld [vmem:[%s10827_s8] sm:$0x1f] }
 0x858   :  { %4284 = vmatpush.msrb.mxu1 %v4261_v17  ;;  %v5579_v17 = vld [vmem:[%s10828_s9 + $0x198] sm:$0xff] }
 0x85a   :  { %4285 = vmatpush.msrb.mxu1 %v4260_v53  ;;  %v5578_v53 = vld [vmem:[%s10828_s9 + $0x190] sm:$0xff] }
 0x85b   :  { %v3933_v22 = vpop.f32.mrf.mxu2  ;;  %v3956_v62 = vpop.f32.mrf.mxu3 }
 0x85c   :  { %4286 = vmatpush.msrb.mxu1 %v4259_v43  ;;  %v5577_v43 = vld [vmem:[%s10828_s9 + $0x188] sm:$0xff] }
 0x85d   :  { %v3849_v37 = vpop.f32.mrf.mxu0  ;;  %v3872_v54 = vpop.f32.mrf.mxu1 }
 0x85e   :  { %v3877_v46 = vadd.f32 %v3849_v37, %v3770_v52  ;;  %v3878_v42 = vadd.f32 %v3872_v54, %v3793_v60  ;;  %4287 = vmatpush.msrb.mxu1 %v4258_v21  ;;  %v5557_v52 = vld [vmem:[%s10828_s9 + $0xe8] sm:$0xff]  ;;  %v4462_v21 = vld [vmem:[%s10830_s11 + $0x78] sm:$0xff] }
 0x85f   :  { %v5573_v60 = vld [vmem:[%s10828_s9 + $0x168] sm:$0xff] }
 0x860   :  { %v3961_v33 = vadd.f32 %v3933_v22, %v3877_v46  ;;  %v3962_v16 = vadd.f32 %v3956_v62, %v3878_v42  ;;  %v5572_v46 = vld [vmem:[%s10828_s9 + $0x160] sm:$0xff]  ;;  %v5605_v42 = vld [vmem:[%s10828_s9 + $0x268] sm:$0xff]  ;;  %v5570_v22 = vld [vmem:[%s10828_s9 + $0x150] sm:$0xff] }
 0x861   :  { %v5553_v62 = vld [vmem:[%s10828_s9 + $0xc8] sm:$0xff] }
 0x865   :  { %v4014_v63 = vpop.f32.mrf.mxu0  ;;  %v4037_v9 = vpop.f32.mrf.mxu1 }
 0x866   :  { %v4043_v57 = vadd.f32 %v4014_v63, %v3959_v30  ;;  %v4044_v28 = vadd.f32 %v4037_v9, %v3960_v35  ;;  %v5559_v30 = vld [vmem:[%s10828_s9 + $0xf8] sm:$0xff]  ;;  %v4257_v35 = vld [vmem:[%s10828_s9] sm:$0xff]  ;;  %v5574_v63 = vld [vmem:[%s10828_s9 + $0x170] sm:$0xff] }
 0x867   :  { %v5607_v9 = vld [vmem:[%s10828_s9 + $0x278] sm:$0xff]  ;;  %4288 = vmatpush.msrb.mxu1 %v4257_v35  ;;  %v4456_v35 = vld [vmem:[%s10830_s11 + $0x48] sm:$0xff] }
 0x868   :  { %v4053_v24 = vadd.f32 %v4049_v41, %v4043_v57  ;;  %v4054_v12 = vadd.f32 %v4050_v18, %v4044_v28  ;;  %v5606_v57 = vld [vmem:[%s10828_s9 + $0x270] sm:$0xff]  ;;  %v5556_v28 = vld [vmem:[%s10828_s9 + $0xe0] sm:$0xff] }
 0x86a   :  { %v4057_v38 = vmax.f32 %v4053_v24, 0.0  ;;  %v4058_v31 = vmax.f32 %v4054_v12, 0.0  ;;  %v5555_v24 = vld [vmem:[%s10828_s9 + $0xd8] sm:$0xff] }
 0x86b   :  { %v5571_v12 = vld [vmem:[%s10828_s9 + $0x158] sm:$0xff] }
 0x86c   :  { %4103 = vmatmul.f32.vlgmr.msra.gmra.mxu2 %v4057_v38  ;;  %5515 = vmatmul.msk.f32.vlgmr.msra.gmra.mxu3 %vm1848_vm6, %v4058_v31 }
 0x86d   :  { %4169 = vmatmul.f32.vlgmr.msrb.gmra.mxu0 %v4057_v38  ;;  %5537 = vmatmul.msk.f32.vlgmr.msra.gmra.mxu1 %vm1848_vm6, %v4058_v31  ;;  %v4017_v44 = vpop.f32.mrf.mxu0  ;;  %v4040_v36 = vpop.f32.mrf.mxu1  ;;  %v5604_v38 = vld [vmem:[%s10828_s9 + $0x260] sm:$0xff]  ;;  %v5554_v31 = vld [vmem:[%s10828_s9 + $0xd0] sm:$0xff] }
 0x86e   :  { %v4045_v56 = vadd.f32 %v4017_v44, %v3961_v33  ;;  %v4046_v11 = vadd.f32 %v4040_v36, %v3962_v16  ;;  %4425 = vmatpush.msra.mxu1 %v5607_v9  ;;  %v5569_v33 = vld [vmem:[%s10828_s9 + $0x148] sm:$0xff]  ;;  %v5552_v16 = vld [vmem:[%s10828_s9 + $0xc0] sm:$0xff]  ;;  %v5551_v36 = vld [vmem:[%s10828_s9 + $0xb8] sm:$0xff] }
 0x86f   :  { %v5568_v44 = vld [vmem:[%s10828_s9 + $0x140] sm:$0xff] }
 0x870   :  { %v4055_v15 = vadd.f32 %v4049_v41, %v4045_v56  ;;  %v4056_v45 = vadd.f32 %v4050_v18, %v4046_v11  ;;  %v5575_v41 = vld [vmem:[%s10828_s9 + $0x178] sm:$0xff]  ;;  %v5558_v18 = vld [vmem:[%s10828_s9 + $0xf0] sm:$0xff]  ;;  %4426 = vmatpush.msra.mxu1 %v5606_v57  ;;  %v4455_v9 = vld [vmem:[%s10830_s11 + $0x40] sm:$0xff] }
 0x871   :  { %v5567_v56 = vld [vmem:[%s10828_s9 + $0x138] sm:$0xff]  ;;  %v5550_v11 = vld [vmem:[%s10828_s9 + $0xb0] sm:$0xff] }
 0x872   :  { %v4059_v14 = vmax.f32 %v4055_v15, 0.0  ;;  %v4060_v20 = vmax.f32 %v4056_v45, 0.0  ;;  %4427 = vmatpush.msra.mxu1 %v5605_v42  ;;  %v5586_v15 = vld [vmem:[%s10828_s9 + $0x1d0] sm:$0xff]  ;;  %v5585_v45 = vld [vmem:[%s10828_s9 + $0x1c8] sm:$0xff] }
 0x873   :  { %4392 = vmatpush.msra.mxu0 %v5586_v15  ;;  %v4496_v15 = vld [vmem:[%s10832_s13 + $0x58] sm:$0xff] }
 0x874   :  { %4106 = vmatmul.f32.gmra.mxu2 %v4059_v14  ;;  %5516 = vmatmul.msk.f32.gmra.mxu3 %vm1848_vm6, %v4060_v20 }
 0x875   :  { %4172 = vmatmul.f32.gmra.mxu0 %v4059_v14  ;;  %5538 = vmatmul.msk.f32.gmra.mxu1 %vm1848_vm6, %v4060_v20  ;;  %v5584_v14 = vld [vmem:[%s10828_s9 + $0x1c0] sm:$0xff]  ;;  %v5603_v20 = vld [vmem:[%s10828_s9 + $0x258] sm:$0xff] }
 0x876   :  { %4428 = vmatpush.msra.mxu1 %v5604_v38  ;;  %4393 = vmatpush.msra.mxu0 %v5585_v45  ;;  %v4452_v38 = vld [vmem:[%s10830_s11 + $0x28] sm:$0xff]  ;;  %v4495_v45 = vld [vmem:[%s10832_s13 + $0x50] sm:$0xff] }
 0x878   :  { %4394 = vmatpush.msra.mxu0 %v5584_v14  ;;  %4429 = vmatpush.msra.mxu1 %v5603_v20  ;;  %v4494_v14 = vld [vmem:[%s10832_s13 + $0x48] sm:$0xff]  ;;  %v4493_v20 = vld [vmem:[%s10832_s13 + $0x40] sm:$0xff] }
 0x87a   :  { %4395 = vmatpush.msra.mxu0 %v5583_v26  ;;  %4430 = vmatpush.msra.mxu1 %v5602_v27  ;;  %v4492_v26 = vld [vmem:[%s10832_s13 + $0x38] sm:$0xff]  ;;  %v4255_v27 = vld [vmem:[%s10829_s10] sm:$0x1] }
 0x87c   :  { %4396 = vmatpush.msra.mxu0 %v5582_v19  ;;  %4431 = vmatpush.msra.mxu1 %v5601_v1  ;;  %v4489_v1 = vld [vmem:[%s10832_s13 + $0x20] sm:$0xff] }
 0x87e   :  { %4397 = vmatpush.msra.mxu0 %v5581_v29  ;;  %4432 = vmatpush.msra.mxu1 %v5600_v25 }
 0x880   :  { %4398 = vmatpush.msra.mxu0 %v5580_v51  ;;  %v4485_v51 = vld [vmem:[%s10832_s13] sm:$0xff] }
 0x882   :  { %4399 = vmatpush.msra.mxu0 %v5579_v17  ;;  %v4463_v17 = vld [vmem:[%s10831_s12] sm:$0x1]  ;;  %s5646_s12 = smov 16  }
 0x884   :  { %4400 = vmatpush.msra.mxu0 %v5578_v53 }
 0x886   :  { %4401 = vmatpush.msra.mxu0 %v5577_v43 }
 0x8ea   :  { %v4170_v3 = vpop.f32.mrf.mxu0  ;;  %v4193_v39 = vpop.f32.mrf.mxu1 }
 0x8eb   :  { %v4194_v34 = vadd.f32 %v4193_v39, %v4170_v3  ;;  %v5548_v3 = vld [vmem:[%s10828_s9 + $0xa0] sm:$0xff] }
 0x8ec   :  { %v5564_v39 = vld [vmem:[%s10828_s9 + $0x120] sm:$0xff] }
 0x8ef   :  { %v4104_v2 = vpop.f32.mrf.mxu2  ;;  %v4127_v13 = vpop.f32.mrf.mxu3 }
 0x8f0   :  { %v4128_v37 = vadd.f32 %v4127_v13, %v4104_v2  ;;  %v5562_v2 = vld [vmem:[%s10828_s9 + $0x110] sm:$0xff]  ;;  %v5599_v13 = vld [vmem:[%s10828_s9 + $0x238] sm:$0xff] }
 0x8f1   :  { %4433 = vmatpush.msra.mxu1 %v5599_v13 }
 0x8f2   :  { %v4173_v5 = vpop.f32.mrf.mxu0  ;;  %v4196_v59 = vpop.f32.mrf.mxu1  ;;  %v4199_v23 = vmax.f32 %v4128_v37, %v4194_v34  ;;  %v5595_v37 = vld [vmem:[%s10828_s9 + $0x218] sm:$0xff]  ;;  %v5593_v34 = vld [vmem:[%s10828_s9 + $0x208] sm:$0xff] }
 0x8f3   :  { %v4197_v54 = vadd.f32 %v4196_v59, %v4173_v5  ;;  %v5544_v5 = vld [vmem:[%s10828_s9 + $0x80] sm:$0xff]  ;;  %4434 = vmatpush.msra.mxu1 %v5598_v49  ;;  %v5597_v59 = vld [vmem:[%s10828_s9 + $0x228] sm:$0xff] }
 0x8f5   :  { %4435 = vmatpush.msra.mxu1 %v5597_v59 }
 0x8f7   :  { %v4107_v7 = vpop.f32.mrf.mxu2  ;;  %v4130_v32 = vpop.f32.mrf.mxu3 }
 0x8f8   :  { %v4131_v58 = vadd.f32 %v4130_v32, %v4107_v7  ;;  %v5560_v7 = vld [vmem:[%s10828_s9 + $0x100] sm:$0xff] }
 0x8f9   :  { %v5596_v32 = vld [vmem:[%s10828_s9 + $0x220] sm:$0xff] }
 0x8fa   :  { %v4200_v50 = vmax.f32 %v4131_v58, %v4197_v54  ;;  %4436 = vmatpush.msra.mxu1 %v5596_v32  ;;  %v5594_v54 = vld [vmem:[%s10828_s9 + $0x210] sm:$0xff]  ;;  %v5576_v58 = vld [vmem:[%s10828_s9 + $0x180] sm:$0xff] }
 0x8fb   :  { %4402 = vmatpush.msra.mxu0 %v5576_v58 }
 0x8fc   :  { %5539 = vmatpush.msk.msrb.mxu2 %vm1975_vm7, %v4200_v50  ;;  %5542 = vmatpush.msk.msrb.mxu3 %vm1975_vm7, %v4200_v50  ;;  %v5592_v50 = vld [vmem:[%s10828_s9 + $0x200] sm:$0xff] }
 0x8fd   :  { %4437 = vmatpush.msra.mxu1 %v5595_v37 }
 0x8fe   :  { %4223 = vmatpush.msrb.mxu2 %v4199_v23  ;;  %4247 = vmatpush.msrb.mxu3 %v4199_v23  ;;  %v4461_v23 = vld [vmem:[%s10830_s11 + $0x70] sm:$0xff] }
 0x8ff   :  { %5540 = vmatmul.msk.f32.vlgmr.msrb.gmra.mxu2 %vm1971_vm8, %v4201_v0  ;;  %5543 = vmatmul.msk.f32.vlgmr.msrb.gmra.mxu3 %vm1971_vm8, %v5541_v61  ;;  %v4460_v0 = vld [vmem:[%s10830_s11 + $0x68] sm:$0xff]  ;;  %v4459_v61 = vld [vmem:[%s10830_s11 + $0x60] sm:$0xff] }
 0x900   :  { %4311 = vmatpush.msra.mxu2 %v5559_v30  ;;  %4349 = vmatpush.msra.mxu3 %v5575_v41  ;;  %v4458_v30 = vld [vmem:[%s10830_s11 + $0x58] sm:$0xff]  ;;  %v4457_v41 = vld [vmem:[%s10830_s11 + $0x50] sm:$0xff] }
 0x901   :  { %4438 = vmatpush.msra.mxu1 %v5594_v54 }
 0x902   :  { %4312 = vmatpush.msra.mxu2 %v5558_v18  ;;  %4350 = vmatpush.msra.mxu3 %v5574_v63 }
 0x903   :  { %4439 = vmatpush.msra.mxu1 %v5593_v34 }
 0x904   :  { %4313 = vmatpush.msra.mxu2 %v5557_v52  ;;  %4351 = vmatpush.msra.mxu3 %v5573_v60  ;;  %v4454_v60 = vld [vmem:[%s10830_s11 + $0x38] sm:$0xff] }
 0x905   :  { %4440 = vmatpush.msra.mxu1 %v5592_v50 }
 0x906   :  { %4314 = vmatpush.msra.mxu2 %v5556_v28  ;;  %4352 = vmatpush.msra.mxu3 %v5572_v46 }
 0x908   :  { %4315 = vmatpush.msra.mxu2 %v5555_v24  ;;  %4353 = vmatpush.msra.mxu3 %v5571_v12  ;;  %v4453_v12 = vld [vmem:[%s10830_s11 + $0x30] sm:$0xff] }
 0x90a   :  { %4316 = vmatpush.msra.mxu2 %v5554_v31  ;;  %4354 = vmatpush.msra.mxu3 %v5570_v22  ;;  %v4451_v31 = vld [vmem:[%s10830_s11 + $0x20] sm:$0xff]  ;;  %v4450_v22 = vld [vmem:[%s10830_s11 + $0x18] sm:$0xff] }
 0x90c   :  { %4317 = vmatpush.msra.mxu2 %v5553_v62  ;;  %4355 = vmatpush.msra.mxu3 %v5569_v33  ;;  %v4449_v62 = vld [vmem:[%s10830_s11 + $0x10] sm:$0xff]  ;;  %v4448_v33 = vld [vmem:[%s10830_s11 + $0x8] sm:$0xff] }
 0x90e   :  { %4318 = vmatpush.msra.mxu2 %v5552_v16  ;;  %4356 = vmatpush.msra.mxu3 %v5568_v44  ;;  %v4447_v16 = vld [vmem:[%s10830_s11] sm:$0xff]  ;;  %v4500_v44 = vld [vmem:[%s10832_s13 + $0x78] sm:$0xff] }
 0x910   :  { %4319 = vmatpush.msra.mxu2 %v5551_v36  ;;  %4357 = vmatpush.msra.mxu3 %v5567_v56  ;;  %v4499_v36 = vld [vmem:[%s10832_s13 + $0x70] sm:$0xff]  ;;  %v4498_v56 = vld [vmem:[%s10832_s13 + $0x68] sm:$0xff] }
 0x912   :  { %4320 = vmatpush.msra.mxu2 %v5550_v11  ;;  %4358 = vmatpush.msra.mxu3 %v5566_v4  ;;  %v4497_v11 = vld [vmem:[%s10832_s13 + $0x60] sm:$0xff]  ;;  %v4491_v4 = vld [vmem:[%s10832_s13 + $0x30] sm:$0xff] }
 0x914   :  { %4321 = vmatpush.msra.mxu2 %v5549_v47  ;;  %4359 = vmatpush.msra.mxu3 %v5565_v40  ;;  %v4490_v47 = vld [vmem:[%s10832_s13 + $0x28] sm:$0xff] }
 0x916   :  { %4322 = vmatpush.msra.mxu2 %v5548_v3  ;;  %4360 = vmatpush.msra.mxu3 %v5564_v39  ;;  %v4488_v39 = vld [vmem:[%s10832_s13 + $0x18] sm:$0xff] }
 0x918   :  { %4323 = vmatpush.msra.mxu2 %v5547_v10  ;;  %4361 = vmatpush.msra.mxu3 %v5563_v6 }
 0x91a   :  { %4324 = vmatpush.msra.mxu2 %v5546_v8  ;;  %4362 = vmatpush.msra.mxu3 %v5562_v2 }
 0x91c   :  { %4325 = vmatpush.msra.mxu2 %v5545_v55  ;;  %4363 = vmatpush.msra.mxu3 %v5561_v48  ;;  %v4487_v55 = vld [vmem:[%s10832_s13 + $0x10] sm:$0xff]  ;;  %v4486_v48 = vld [vmem:[%s10832_s13 + $0x8] sm:$0xff]  ;;  %s5647_s13 = smov 1  }
 0x91e   :  { %4326 = vmatpush.msra.mxu2 %v5544_v5  ;;  %4364 = vmatpush.msra.mxu3 %v5560_v7  ;;  %v4501_v7 = vld [vmem:[%s10833_s14] sm:$0x1] }
 0x920   :  { %4464 = vmatpush.msrb.mxu2 %v4462_v21  ;;  %4502 = vmatpush.msrb.mxu3 %v4500_v44 }
 0x922   :  { %4465 = vmatpush.msrb.mxu2 %v4461_v23  ;;  %4503 = vmatpush.msrb.mxu3 %v4499_v36 }
 0x924   :  { %4466 = vmatpush.msrb.mxu2 %v4460_v0  ;;  %4504 = vmatpush.msrb.mxu3 %v4498_v56 }
 0x926   :  { %4467 = vmatpush.msrb.mxu2 %v4459_v61  ;;  %4505 = vmatpush.msrb.mxu3 %v4497_v11 }
 0x928   :  { %4468 = vmatpush.msrb.mxu2 %v4458_v30  ;;  %4506 = vmatpush.msrb.mxu3 %v4496_v15 }
 0x92a   :  { %4469 = vmatpush.msrb.mxu2 %v4457_v41  ;;  %4507 = vmatpush.msrb.mxu3 %v4495_v45 }
 0x92c   :  { %4470 = vmatpush.msrb.mxu2 %v4456_v35  ;;  %4508 = vmatpush.msrb.mxu3 %v4494_v14 }
 0x92e   :  { %4471 = vmatpush.msrb.mxu2 %v4455_v9  ;;  %4509 = vmatpush.msrb.mxu3 %v4493_v20 }
 0x930   :  { %4472 = vmatpush.msrb.mxu2 %v4454_v60  ;;  %4510 = vmatpush.msrb.mxu3 %v4492_v26 }
 0x932   :  { %4473 = vmatpush.msrb.mxu2 %v4453_v12  ;;  %4511 = vmatpush.msrb.mxu3 %v4491_v4 }
 0x934   :  { %4474 = vmatpush.msrb.mxu2 %v4452_v38  ;;  %4512 = vmatpush.msrb.mxu3 %v4490_v47 }
 0x936   :  { %4475 = vmatpush.msrb.mxu2 %v4451_v31  ;;  %4513 = vmatpush.msrb.mxu3 %v4489_v1 }
 0x938   :  { %4476 = vmatpush.msrb.mxu2 %v4450_v22  ;;  %4514 = vmatpush.msrb.mxu3 %v4488_v39 }
 0x93a   :  { %4477 = vmatpush.msrb.mxu2 %v4449_v62  ;;  %4515 = vmatpush.msrb.mxu3 %v4487_v55 }
 0x93c   :  { %4478 = vmatpush.msrb.mxu2 %v4448_v33  ;;  %4516 = vmatpush.msrb.mxu3 %v4486_v48 }
 0x93e   :  { %4479 = vmatpush.msrb.mxu2 %v4447_v16  ;;  %4517 = vmatpush.msrb.mxu3 %v4485_v51 }
 0x982   :  { %v4225_v18 = vpop.f32.mrf.mxu2  ;;  %v4249_v63 = vpop.f32.mrf.mxu3 }
 0x983   :  { %v4252_v52 = vmax.f32 %v4225_v18, %v4249_v63 }
 0x985   :  { %4254 = vst [vmem:[#allocation3 + $0x8] sm:$0x1f] %v4252_v52 }
 0x98c   :  { %v4294_v57 = vld [vmem:[#allocation3 + $0x9] sm:$0x1]  ;;  %v4332_v28 = vld [vmem:[#allocation3 + $0xa] sm:$0x1]  ;;  %v4256_v46 = vld [vmem:[#allocation3 + $0x8] sm:$0x1] }
 0x98d   :  { %4327 = vmatmul.f32.vlgmr.msra.gmra.mxu2 %v4294_v57  ;;  %4365 = vmatmul.f32.vlgmr.msra.gmra.mxu3 %v4332_v28  ;;  %v4370_v42 = vld [vmem:[#allocation3 + $0xb] sm:$0x1]  ;;  %v4408_v24 = vld [vmem:[#allocation3 + $0xc] sm:$0x1] }
 0x98e   :  { %4289 = vmatmul.f32.vlgmr.msrb.gmra.mxu1 %v4256_v46  ;;  %4403 = vmatmul.f32.vlgmr.msra.gmra.mxu0 %v4370_v42 }
 0x996   :  { %4441 = vmatmul.f32.vlgmr.msra.gmra.mxu1 %v4408_v24 }
 0xa0b   :  { %v4290_v19 = vpop.f32.mrf.mxu1  ;;  %v4404_v6 = vpop.f32.mrf.mxu0 }
 0xa0c   :  { %v4293_v40 = vadd.f32 %v4290_v19, %v4255_v27 }
 0xa10   :  { %v4328_v29 = vpop.f32.mrf.mxu2  ;;  %v4366_v25 = vpop.f32.mrf.mxu3 }
 0xa11   :  { %v4331_v3 = vadd.f32 %v4328_v29, %v4293_v40 }
 0xa13   :  { %v4369_v10 = vadd.f32 %v4366_v25, %v4331_v3  ;;  %v4442_v2 = vpop.f32.mrf.mxu1 }
 0xa15   :  { %v4407_v8 = vadd.f32 %v4404_v6, %v4369_v10 }
 0xa17   :  { %v4445_v13 = vadd.f32 %v4442_v2, %v4407_v8 }
 0xa19   :  { %v4446_v49 = vmax.f32 %v4445_v13, 0.0 }
 0xa1b   :  { %4480 = vmatmul.f32.vlgmr.msrb.gmra.mxu2 %v4446_v49 }
 0xa9e   :  { %v4481_v5 = vpop.f32.mrf.mxu2 }
 0xa9f   :  { %v4482_v59 = vadd.f32 %v4481_v5, %v4463_v17 }
 0xaa1   :  { %v4484_v53 = vmax.f32 %v4482_v59, 0.0 }
 0xaa3   :  { %4518 = vmatmul.f32.vlgmr.msrb.gmra.mxu3 %v4484_v53 }
 0xb26   :  { %v4519_v32 = vpop.f32.mrf.mxu3 }
 0xb27   :  { %v4520_v43 = vadd.f32 %v4519_v32, %v4501_v7 }
 0xb29   :  { %4523 = vst [vmem:[#allocation4 + $0x1] sm:$0x1] %v4520_v43 }
 0xb2a   :  { %4536 = dma.vmem_to_hbm [thread:$0]  %s4529_s3, 32, %s4531_s0, [#allocation5], %s5646_s12, %s5646_s12, %s5647_s13  }
 0xb2b   :  { %5643 = dma.done.wait [#allocation5], 32  }
 0xb2c   :  { %5644 = vsyncadd [#allocation5], 4294967264 }
 0xb2d   :  { %4541 = vsyncpa [#allocation5], 1 }

</bundles_post_ra>
